<compile_context>
chip_gen: v7x
topology: tpu7x:2x2x1
jax: 0.10.0
libtpu: 0.0.40
codegen_flags: <defaults>
</compile_context>

<pallas_src>
import functools

import jax
import jax.numpy as jnp
from jax.experimental import pallas as pl
from jax.experimental.pallas import tpu as pltpu

_MXU = jnp.bfloat16  # MXU operand dtype; accumulation stays f32.


# --------------------------------------------------------------------------- #
# In-kernel helpers.  Weight arguments are REFS, loaded at point of use.
# --------------------------------------------------------------------------- #
def _ln(x, gamma, beta, eps=1e-5):
    mu = jnp.mean(x, axis=-1, keepdims=True)
    var = jnp.mean(jnp.square(x - mu), axis=-1, keepdims=True)
    return (x - mu) * jax.lax.rsqrt(var + eps) * gamma + beta


def _softmax(s):
    s = s - jnp.max(s, axis=-1, keepdims=True)
    p = jnp.exp(s)
    return p * pl.reciprocal(jnp.sum(p, axis=-1, keepdims=True), approx=True)


def _mlp2d(z2d, w1_ref, b1_ref, w2_ref, b2_ref):
    """(M, din) -> (M, dout); weights are bf16 refs, biases f32 refs."""
    h = jnp.dot(z2d.astype(_MXU), w1_ref[...],
                preferred_element_type=jnp.float32) + b1_ref[...]
    h = jnp.maximum(h, 0.0)
    return jnp.dot(h.astype(_MXU), w2_ref[...],
                   preferred_element_type=jnp.float32) + b2_ref[...]


def _mha(q, k, v, wo_ref, num_heads):
    """q,k,v: (bb, N*, D) bf16 (scale already folded into q projection).

    Per-head outputs are accumulated into one f32 (bb*Nq, D) value via row
    slices of wo (no lane-axis head concat)."""
    bb, nq, d = q.shape
    hd = d // num_heads
    out = jnp.zeros((bb * nq, d), jnp.float32)
    for h in range(num_heads):                       # static unroll over heads
        sl = slice(h * hd, (h + 1) * hd)
        s = jnp.einsum('bqd,bkd->bqk', q[..., sl], k[..., sl],
                       preferred_element_type=jnp.float32)
        p = _softmax(s).astype(_MXU)
        oh = jnp.einsum('bqk,bkd->bqd', p, v[..., sl],
                        preferred_element_type=jnp.float32)
        out = out + jnp.dot(oh.reshape(bb * nq, hd).astype(_MXU),
                            wo_ref[sl, :],           # bf16 (hd, D) row slice
                            preferred_element_type=jnp.float32)
    return out.reshape(bb, nq, d)


def _self_attn_block(z, wqkv_ref, wo_ref, g_ref, b_ref, num_heads):
    """Pre-LN MHSA with residual; fused (D,3D) qkv projection (batch folded)."""
    bb, n, d = z.shape
    zn = _ln(z, g_ref[...], b_ref[...])
    qkv = jnp.dot(zn.reshape(bb * n, d).astype(_MXU), wqkv_ref[...],
                  preferred_element_type=jnp.float32)
    qkv = qkv.reshape(bb, n, 3 * d).astype(_MXU)     # single cast, then slice
    q, k, v = qkv[..., :d], qkv[..., d:2 * d], qkv[..., 2 * d:]
    return z + _mha(q, k, v, wo_ref, num_heads)


def _cross_attn_block(zq, zkv, wq_ref, wkv_ref, wo_ref,
                      gq_ref, bq_ref, gk_ref, bk_ref, num_heads):
    """Pre-LN MHCA with residual; fused (D,2D) kv projection (batch folded)."""
    bb, nq, d = zq.shape
    nk = zkv.shape[1]
    qn = _ln(zq, gq_ref[...], bq_ref[...])
    kn = _ln(zkv, gk_ref[...], bk_ref[...])
    q = jnp.dot(qn.reshape(bb * nq, d).astype(_MXU), wq_ref[...],
                preferred_element_type=jnp.float32).reshape(bb, nq, d)
    kv = jnp.dot(kn.reshape(bb * nk, d).astype(_MXU), wkv_ref[...],
                 preferred_element_type=jnp.float32).reshape(bb, nk, 2 * d)
    q = q.astype(_MXU)
    kv = kv.astype(_MXU)
    k, v = kv[..., :d], kv[..., d:]
    return zq + _mha(q, k, v, wo_ref, num_heads)


def _ff_block(z, g_ref, b_ref, w1_ref, b1_ref, w2_ref, b2_ref):
    """Pre-LN feed-forward with residual (batch folded into M)."""
    bb, n, d = z.shape
    zn = _ln(z, g_ref[...], b_ref[...]).reshape(bb * n, d)
    return z + _mlp2d(zn, w1_ref, b1_ref, w2_ref, b2_ref).reshape(bb, n, d)


# --------------------------------------------------------------------------- #
# Fused encoder kernel: one grid step == a block of batch elements, all in VMEM.
# --------------------------------------------------------------------------- #
def encoder_kernel(*refs, nc, dx, num_heads, lengthscale, n_params):
    zct_ref, zg_ref = refs[0], refs[1]
    p = refs[2:2 + n_params]                          # weight/bias REFS
    out_ref = refs[2 + n_params]

    (w1, b1, w2, b2,                                  # xy_encoder
     gw1, gb1, gw2, gb2,                              # xy_grid_encoder
     s_g, s_b, s_wqkv, s_wo,                          # grid MHSA
     fg_g, fg_b, fg_w1, fg_b1, fg_w2, fg_b2,          # grid FF
     c_gq, c_bq, c_gk, c_bk, c_wq, c_wkv, c_wo,       # target MHCA
     ft_g, ft_b, ft_w1, ft_b1, ft_w2, ft_b2) = p      # target FF

    bb, s, din = zct_ref.shape
    g = zg_ref.shape[1]

    zct = zct_ref[...]                                # (bb, nc+nt, din) f32
    zg = zg_ref[...]                                  # (bb, g, dgin)    f32

    # xy_encoder on concatenated [context; target] tokens (batch folded into M).
    zct_e = _mlp2d(zct.reshape(bb * s, din), w1, b1, w2, b2).reshape(bb, s, -1)
    zc = zct_e[:, :nc]                                # (bb, nc, D)
    zt = zct_e[:, nc:]                                # (bb, nt, D)

    # xy_grid_encoder on flattened on-the-grid tokens.
    zc_grid = _mlp2d(zg.reshape(bb * g, zg.shape[-1]),
                     gw1, gb1, gw2, gb2).reshape(bb, g, -1)

    # grid_encoder (OOTGSetConv): f32 VPU pairwise sq-distances (unrolled over
    # dx), RBF weights, additive merge of off-grid context tokens onto the grid.
    xc = zct[:, :nc, :dx]                             # first dx lanes == xc
    xg = zg[:, :, :dx]                                # first dx lanes == xc_grid
    d2 = jnp.zeros((bb, g, nc), jnp.float32)
    for ax in range(dx):                              # static unroll, f32 VPU
        diff = xg[:, :, ax:ax + 1] - xc[:, :, ax][:, None, :]
        d2 = d2 + diff * diff
    w_rbf = jnp.exp(d2 * (-0.5 / (lengthscale * lengthscale)))
    zc_grid = zc_grid + jnp.einsum('bgn,bnd->bgd',
                                   w_rbf.astype(_MXU), zc.astype(_MXU),
                                   preferred_element_type=jnp.float32)

    # transformer_encoder: grid MHSA + FF, then target MHCA to grid + FF.
    zc_grid = _self_attn_block(zc_grid, s_wqkv, s_wo, s_g, s_b, num_heads)
    zc_grid = _ff_block(zc_grid, fg_g, fg_b, fg_w1, fg_b1, fg_w2, fg_b2)
    zt = _cross_attn_block(zt, zc_grid, c_wq, c_wkv, c_wo,
                           c_gq, c_bq, c_gk, c_bk, num_heads)
    zt = _ff_block(zt, ft_g, ft_b, ft_w1, ft_b1, ft_w2, ft_b2)

    out_ref[...] = zt                                 # (bb, nt, D) lane-dense


# --------------------------------------------------------------------------- #
# pallas_call wrapper + plain-JAX glue
# --------------------------------------------------------------------------- #
def _batched_spec(bb, n, d):
    return pl.BlockSpec((bb, n, d), lambda b: (b, 0, 0))


def _w_spec(shape):
    zero = (0,) * len(shape)
    return pl.BlockSpec(tuple(shape), lambda b, _z=zero: _z)


def preprocess_observations(xt, yc):
    yt = jnp.zeros(xt.shape[:-1] + (yc.shape[-1],), yc.dtype)
    yc = jnp.concatenate([yc, jnp.zeros(yc.shape[:-1] + (1,), yc.dtype)], axis=-1)
    yt = jnp.concatenate([yt, jnp.ones(yt.shape[:-1] + (1,), yt.dtype)], axis=-1)
    return yc, yt


def ootg_gridded_tnp_encoder_forward(xc, yc, xc_grid, yc_grid, xt, params,
                                     batch_block=None):
    m, nc, dx = xc.shape
    nt = xt.shape[1]

    # Flatten the grid (transformer / grid encoder operate on flattened tokens).
    xg = xc_grid.reshape(m, -1, dx)
    yg = yc_grid.reshape(m, xg.shape[1], -1)
    g = xg.shape[1]

    # preprocess_observations + Identity x/y/y_grid encoders + concats (glue).
    yc_p, yt_p = preprocess_observations(xt, yc)
    zc_in = jnp.concatenate([xc, yc_p], axis=-1)              # (m, nc, dx+dy+1)
    zt_in = jnp.concatenate([xt, yt_p], axis=-1)              # (m, nt, dx+dy+1)
    zct_in = jnp.concatenate([zc_in, zt_in], axis=1)          # (m, nc+nt, din)
    zg_in = jnp.concatenate([xg, yg], axis=-1)                # (m, g, dx+dy_grid)

    flat = params["flat"]
    d_model = params["embed_dim"]
    f_dim = params["ff_dim"]
    num_heads = params["num_heads"]
    din = zct_in.shape[-1]
    dgin = zg_in.shape[-1]

    # Block the batch axis and fold it into the matmul M dimension per step.
    if batch_block is None:
        bb = 1
        for cand in (8, 4, 2, 1):
            if m % cand == 0:
                bb = cand
                break
    else:
        bb = batch_block
    assert m % bb == 0, (m, bb)

    kernel = functools.partial(
        encoder_kernel,
        nc=nc,
        dx=dx,
        num_heads=num_heads,
        lengthscale=float(params["lengthscale"]),
        n_params=len(flat),
    )

    in_specs = ([_batched_spec(bb, nc + nt, din),
                 _batched_spec(bb, g, dgin)]
                + [_w_spec(p.shape) for p in flat])

    # Advisory cost estimate for XLA scheduling around the custom call.
    flops = 2 * m * (
        (nc + nt) * (din * f_dim + f_dim * d_model)
        + g * (dgin * f_dim + f_dim * d_model)
        + g * nc * (dx + d_model)
        + g * d_model * 3 * d_model + 2 * g * g * d_model + g * d_model * d_model
        + 2 * g * d_model * f_dim
        + 2 * nt * d_model * d_model + 2 * g * d_model * d_model
        + 2 * nt * g * d_model
        + 2 * nt * d_model * f_dim
    )
    transcendentals = m * (g * nc + num_heads * (g * g + nt * g))
    bytes_accessed = (4 * (zct_in.size + zg_in.size + m * nt * d_model)
                      + sum(int(p.size * p.dtype.itemsize) for p in flat))

    return pl.pallas_call(
        kernel,
        out_shape=jax.ShapeDtypeStruct((m, nt, d_model), jnp.float32),
        grid=(m // bb,),
        in_specs=in_specs,
        out_specs=_batched_spec(bb, nt, d_model),
        compiler_params=pltpu.CompilerParams(
            dimension_semantics=("parallel",)),
        cost_estimate=pl.CostEstimate(
            flops=int(flops),
            transcendentals=int(transcendentals),
            bytes_accessed=int(bytes_accessed)),
    )(zct_in, zg_in, *flat)


# --------------------------------------------------------------------------- #
# Deterministic parameter construction (matmul weights bf16, rest f32).
# --------------------------------------------------------------------------- #
def init_params(key, dx, dy, dy_grid, embed_dim, ff_dim, num_heads):
    din = dx + dy + 1                                 # +1 density flag
    dgin = dx + dy_grid
    keys = jax.random.split(key, 13)

    def w_init(k, a, b_):
        return jax.random.normal(k, (a, b_), jnp.float32) / jnp.sqrt(a)

    def bias(b_):
        return jnp.zeros((1, b_), jnp.float32)

    w1, b1 = w_init(keys[0], din, ff_dim), bias(ff_dim)        # xy_encoder
    w2, b2 = w_init(keys[1], ff_dim, embed_dim), bias(embed_dim)
    gw1, gb1 = w_init(keys[2], dgin, ff_dim), bias(ff_dim)     # xy_grid_encoder
    gw2, gb2 = w_init(keys[3], ff_dim, embed_dim), bias(embed_dim)

    ones = jnp.ones((1, embed_dim), jnp.float32)
    zeros = jnp.zeros((1, embed_dim), jnp.float32)

    # Fold the 1/sqrt(head_dim) attention scale into the q-projection columns
    # (mathematically equivalent to scaling scores pre-softmax).
    hd = embed_dim // num_heads
    scale = 1.0 / (hd ** 0.5)

    s_wqkv = w_init(keys[4], embed_dim, 3 * embed_dim)          # grid MHSA
    s_wqkv = s_wqkv.at[:, :embed_dim].multiply(scale)
    s_wo = w_init(keys[5], embed_dim, embed_dim)

    fg_w1, fg_b1 = w_init(keys[6], embed_dim, ff_dim), bias(ff_dim)   # grid FF
    fg_w2, fg_b2 = w_init(keys[7], ff_dim, embed_dim), bias(embed_dim)

    c_wq = w_init(keys[8], embed_dim, embed_dim) * scale        # target MHCA
    c_wkv = w_init(keys[9], embed_dim, 2 * embed_dim)
    c_wo = w_init(keys[10], embed_dim, embed_dim)

    ft_w1, ft_b1 = w_init(keys[11], embed_dim, ff_dim), bias(ff_dim)  # target FF
    ft_w2, ft_b2 = w_init(keys[12], ff_dim, embed_dim), bias(embed_dim)

    bf = lambda w: w.astype(jnp.bfloat16)   # matmul weights ship as bf16

    flat = [
        bf(w1), b1, bf(w2), b2,
        bf(gw1), gb1, bf(gw2), gb2,
        ones, zeros, bf(s_wqkv), bf(s_wo),
        ones, zeros, bf(fg_w1), fg_b1, bf(fg_w2), fg_b2,
        ones, zeros, ones, zeros, bf(c_wq), bf(c_wkv), bf(c_wo),
        ones, zeros, bf(ft_w1), ft_b1, bf(ft_w2), ft_b2,
    ]
    return {
        "flat": flat,
        "embed_dim": embed_dim,
        "ff_dim": ff_dim,
        "num_heads": num_heads,
        "lengthscale": 0.5,
    }


# --------------------------------------------------------------------------- #
if __name__ == "__main__":
    m, nc, nt, dx, dy, dy_grid = 2, 8, 8, 2, 1, 1
    grid_pts = 8                                       # 8x8 grid -> 64 grid tokens
    embed_dim, ff_dim, num_heads = 128, 128, 4         # lane-dense feature axes

    key = jax.random.PRNGKey(0)
    k_xc, k_yc, k_xt, k_yg, k_par = jax.random.split(key, 5)
    xc = jax.random.uniform(k_xc, (m, nc, dx), jnp.float32, minval=-1.0, maxval=1.0)
    yc = jax.random.normal(k_yc, (m, nc, dy), jnp.float32)
    xt = jax.random.uniform(k_xt, (m, nt, dx), jnp.float32, minval=-1.0, maxval=1.0)

    lin = jnp.linspace(-1.0, 1.0, grid_pts)
    gx, gy = jnp.meshgrid(lin, lin, indexing="ij")
    xc_grid = jnp.broadcast_to(
        jnp.stack([gx, gy], axis=-1)[None], (m, grid_pts, grid_pts, dx)
    ).astype(jnp.float32)
    yc_grid = jax.random.normal(k_yg, (m, grid_pts, grid_pts, dy_grid), jnp.float32)

    params = init_params(k_par, dx, dy, dy_grid, embed_dim, ff_dim, num_heads)

    @jax.jit
    def run(xc_, yc_, xc_grid_, yc_grid_, xt_):
        return ootg_gridded_tnp_encoder_forward(xc_, yc_, xc_grid_, yc_grid_, xt_, params)

    zt = run(xc, yc, xc_grid, yc_grid, xt)
    zt = jax.block_until_ready(zt)

    assert zt.shape == (m, nt, embed_dim), zt.shape
    assert bool(jnp.all(jnp.isfinite(zt)))
    print("KERNEL_OK")
</pallas_src>

<mosaic_0001>
module attributes {stable_mosaic.version = 11 : i64} {
  func.func @encoder_kernel(%arg0: i32, %arg1: memref<2x16x4xf32, #tpu.memory_space<vmem>>, %arg2: memref<2x64x3xf32, #tpu.memory_space<vmem>>, %arg3: memref<4x128xbf16, #tpu.memory_space<vmem>>, %arg4: memref<1x128xf32, #tpu.memory_space<vmem>>, %arg5: memref<128x128xbf16, #tpu.memory_space<vmem>>, %arg6: memref<1x128xf32, #tpu.memory_space<vmem>>, %arg7: memref<3x128xbf16, #tpu.memory_space<vmem>>, %arg8: memref<1x128xf32, #tpu.memory_space<vmem>>, %arg9: memref<128x128xbf16, #tpu.memory_space<vmem>>, %arg10: memref<1x128xf32, #tpu.memory_space<vmem>>, %arg11: memref<1x128xf32, #tpu.memory_space<vmem>>, %arg12: memref<1x128xf32, #tpu.memory_space<vmem>>, %arg13: memref<128x384xbf16, #tpu.memory_space<vmem>>, %arg14: memref<128x128xbf16, #tpu.memory_space<vmem>>, %arg15: memref<1x128xf32, #tpu.memory_space<vmem>>, %arg16: memref<1x128xf32, #tpu.memory_space<vmem>>, %arg17: memref<128x128xbf16, #tpu.memory_space<vmem>>, %arg18: memref<1x128xf32, #tpu.memory_space<vmem>>, %arg19: memref<128x128xbf16, #tpu.memory_space<vmem>>, %arg20: memref<1x128xf32, #tpu.memory_space<vmem>>, %arg21: memref<1x128xf32, #tpu.memory_space<vmem>>, %arg22: memref<1x128xf32, #tpu.memory_space<vmem>>, %arg23: memref<1x128xf32, #tpu.memory_space<vmem>>, %arg24: memref<1x128xf32, #tpu.memory_space<vmem>>, %arg25: memref<128x128xbf16, #tpu.memory_space<vmem>>, %arg26: memref<128x256xbf16, #tpu.memory_space<vmem>>, %arg27: memref<128x128xbf16, #tpu.memory_space<vmem>>, %arg28: memref<1x128xf32, #tpu.memory_space<vmem>>, %arg29: memref<1x128xf32, #tpu.memory_space<vmem>>, %arg30: memref<128x128xbf16, #tpu.memory_space<vmem>>, %arg31: memref<1x128xf32, #tpu.memory_space<vmem>>, %arg32: memref<128x128xbf16, #tpu.memory_space<vmem>>, %arg33: memref<1x128xf32, #tpu.memory_space<vmem>>, %arg34: memref<2x8x128xf32, #tpu.memory_space<vmem>>) attributes {dimension_semantics = [#tpu.dimension_semantics<parallel>], iteration_bounds = array<i64: 1>, scalar_prefetch = 0 : i64, scratch_operands = 0 : i64, tpu.core_type = #tpu.core_type<tc>, window_params = [{transform_indices = @transform_0, window_bounds = array<i64: 2, 16, 4>}, {transform_indices = @transform_1, window_bounds = array<i64: 2, 64, 3>}, {pipeline_mode = #tpu.pipeline_mode<synchronous>, transform_indices = @transform_2, window_bounds = array<i64: 4, 128>}, {pipeline_mode = #tpu.pipeline_mode<synchronous>, transform_indices = @transform_3, window_bounds = array<i64: 1, 128>}, {pipeline_mode = #tpu.pipeline_mode<synchronous>, transform_indices = @transform_4, window_bounds = array<i64: 128, 128>}, {pipeline_mode = #tpu.pipeline_mode<synchronous>, transform_indices = @transform_5, window_bounds = array<i64: 1, 128>}, {pipeline_mode = #tpu.pipeline_mode<synchronous>, transform_indices = @transform_6, window_bounds = array<i64: 3, 128>}, {pipeline_mode = #tpu.pipeline_mode<synchronous>, transform_indices = @transform_7, window_bounds = array<i64: 1, 128>}, {pipeline_mode = #tpu.pipeline_mode<synchronous>, transform_indices = @transform_8, window_bounds = array<i64: 128, 128>}, {pipeline_mode = #tpu.pipeline_mode<synchronous>, transform_indices = @transform_9, window_bounds = array<i64: 1, 128>}, {pipeline_mode = #tpu.pipeline_mode<synchronous>, transform_indices = @transform_10, window_bounds = array<i64: 1, 128>}, {pipeline_mode = #tpu.pipeline_mode<synchronous>, transform_indices = @transform_11, window_bounds = array<i64: 1, 128>}, {pipeline_mode = #tpu.pipeline_mode<synchronous>, transform_indices = @transform_12, window_bounds = array<i64: 128, 384>}, {pipeline_mode = #tpu.pipeline_mode<synchronous>, transform_indices = @transform_13, window_bounds = array<i64: 128, 128>}, {pipeline_mode = #tpu.pipeline_mode<synchronous>, transform_indices = @transform_14, window_bounds = array<i64: 1, 128>}, {pipeline_mode = #tpu.pipeline_mode<synchronous>, transform_indices = @transform_15, window_bounds = array<i64: 1, 128>}, {pipeline_mode = #tpu.pipeline_mode<synchronous>, transform_indices = @transform_16, window_bounds = array<i64: 128, 128>}, {pipeline_mode = #tpu.pipeline_mode<synchronous>, transform_indices = @transform_17, window_bounds = array<i64: 1, 128>}, {pipeline_mode = #tpu.pipeline_mode<synchronous>, transform_indices = @transform_18, window_bounds = array<i64: 128, 128>}, {pipeline_mode = #tpu.pipeline_mode<synchronous>, transform_indices = @transform_19, window_bounds = array<i64: 1, 128>}, {pipeline_mode = #tpu.pipeline_mode<synchronous>, transform_indices = @transform_20, window_bounds = array<i64: 1, 128>}, {pipeline_mode = #tpu.pipeline_mode<synchronous>, transform_indices = @transform_21, window_bounds = array<i64: 1, 128>}, {pipeline_mode = #tpu.pipeline_mode<synchronous>, transform_indices = @transform_22, window_bounds = array<i64: 1, 128>}, {pipeline_mode = #tpu.pipeline_mode<synchronous>, transform_indices = @transform_23, window_bounds = array<i64: 1, 128>}, {pipeline_mode = #tpu.pipeline_mode<synchronous>, transform_indices = @transform_24, window_bounds = array<i64: 128, 128>}, {pipeline_mode = #tpu.pipeline_mode<synchronous>, transform_indices = @transform_25, window_bounds = array<i64: 128, 256>}, {pipeline_mode = #tpu.pipeline_mode<synchronous>, transform_indices = @transform_26, window_bounds = array<i64: 128, 128>}, {pipeline_mode = #tpu.pipeline_mode<synchronous>, transform_indices = @transform_27, window_bounds = array<i64: 1, 128>}, {pipeline_mode = #tpu.pipeline_mode<synchronous>, transform_indices = @transform_28, window_bounds = array<i64: 1, 128>}, {pipeline_mode = #tpu.pipeline_mode<synchronous>, transform_indices = @transform_29, window_bounds = array<i64: 128, 128>}, {pipeline_mode = #tpu.pipeline_mode<synchronous>, transform_indices = @transform_30, window_bounds = array<i64: 1, 128>}, {pipeline_mode = #tpu.pipeline_mode<synchronous>, transform_indices = @transform_31, window_bounds = array<i64: 128, 128>}, {pipeline_mode = #tpu.pipeline_mode<synchronous>, transform_indices = @transform_32, window_bounds = array<i64: 1, 128>}, {transform_indices = @transform_33, window_bounds = array<i64: 2, 8, 128>}]} {
    %c0 = arith.constant 0 : index
    %c0_0 = arith.constant 0 : index
    %c0_1 = arith.constant 0 : index
    %0 = vector.load %arg1[%c0, %c0_0, %c0_1] : memref<2x16x4xf32, #tpu.memory_space<vmem>>, vector<2x16x4xf32>
    %c0_2 = arith.constant 0 : index
    %c0_3 = arith.constant 0 : index
    %c0_4 = arith.constant 0 : index
    %1 = vector.load %arg2[%c0_2, %c0_3, %c0_4] : memref<2x64x3xf32, #tpu.memory_space<vmem>>, vector<2x64x3xf32>
    %2 = vector.shape_cast %0 : vector<2x16x4xf32> to vector<32x4xf32>
    %3 = arith.truncf %2 : vector<32x4xf32> to vector<32x4xbf16>
    %c0_5 = arith.constant 0 : index
    %c0_6 = arith.constant 0 : index
    %4 = vector.load %arg3[%c0_5, %c0_6] : memref<4x128xbf16, #tpu.memory_space<vmem>>, vector<4x128xbf16>
    %cst = arith.constant dense<0.000000e+00> : vector<32x128xf32>
    %5 = tpu.matmul %3, %4, %cst {dimension_numbers = #tpu.dot_dimension_numbers<[1], [0], [0], [1], [0, 0, 1, 1], [], []>} : vector<32x4xbf16>, vector<4x128xbf16>, vector<32x128xf32> -> vector<32x128xf32>
    %c0_7 = arith.constant 0 : index
    %c0_8 = arith.constant 0 : index
    %6 = vector.load %arg4[%c0_7, %c0_8] : memref<1x128xf32, #tpu.memory_space<vmem>>, vector<1x128xf32>
    %7 = vector.broadcast %6 : vector<1x128xf32> to vector<32x128xf32>
    %8 = arith.addf %5, %7 : vector<32x128xf32>
    %cst_9 = arith.constant 0.000000e+00 : f32
    %9 = vector.broadcast %cst_9 : f32 to vector<32x128xf32>
    %10 = arith.maximumf %8, %9 : vector<32x128xf32>
    %11 = arith.truncf %10 : vector<32x128xf32> to vector<32x128xbf16>
    %c0_10 = arith.constant 0 : index
    %c0_11 = arith.constant 0 : index
    %12 = vector.load %arg5[%c0_10, %c0_11] : memref<128x128xbf16, #tpu.memory_space<vmem>>, vector<128x128xbf16>
    %cst_12 = arith.constant dense<0.000000e+00> : vector<32x128xf32>
    %13 = tpu.matmul %11, %12, %cst_12 {dimension_numbers = #tpu.dot_dimension_numbers<[1], [0], [0], [1], [0, 0, 1, 1], [], []>} : vector<32x128xbf16>, vector<128x128xbf16>, vector<32x128xf32> -> vector<32x128xf32>
    %c0_13 = arith.constant 0 : index
    %c0_14 = arith.constant 0 : index
    %14 = vector.load %arg6[%c0_13, %c0_14] : memref<1x128xf32, #tpu.memory_space<vmem>>, vector<1x128xf32>
    %15 = vector.broadcast %14 : vector<1x128xf32> to vector<32x128xf32>
    %16 = arith.addf %13, %15 : vector<32x128xf32>
    %17 = vector.shape_cast %16 : vector<32x128xf32> to vector<2x16x128xf32>
    %18 = vector.extract_strided_slice %17 {offsets = [0, 0, 0], sizes = [2, 8, 128], strides = [1, 1, 1]} : vector<2x16x128xf32> to vector<2x8x128xf32>
    %19 = vector.extract_strided_slice %17 {offsets = [0, 8, 0], sizes = [2, 8, 128], strides = [1, 1, 1]} : vector<2x16x128xf32> to vector<2x8x128xf32>
    %20 = vector.shape_cast %1 : vector<2x64x3xf32> to vector<128x3xf32>
    %21 = arith.truncf %20 : vector<128x3xf32> to vector<128x3xbf16>
    %c0_15 = arith.constant 0 : index
    %c0_16 = arith.constant 0 : index
    %22 = vector.load %arg7[%c0_15, %c0_16] : memref<3x128xbf16, #tpu.memory_space<vmem>>, vector<3x128xbf16>
    %cst_17 = arith.constant dense<0.000000e+00> : vector<128x128xf32>
    %23 = tpu.matmul %21, %22, %cst_17 {dimension_numbers = #tpu.dot_dimension_numbers<[1], [0], [0], [1], [0, 0, 1, 1], [], []>} : vector<128x3xbf16>, vector<3x128xbf16>, vector<128x128xf32> -> vector<128x128xf32>
    %c0_18 = arith.constant 0 : index
    %c0_19 = arith.constant 0 : index
    %24 = vector.load %arg8[%c0_18, %c0_19] : memref<1x128xf32, #tpu.memory_space<vmem>>, vector<1x128xf32>
    %25 = vector.broadcast %24 : vector<1x128xf32> to vector<128x128xf32>
    %26 = arith.addf %23, %25 : vector<128x128xf32>
    %cst_20 = arith.constant 0.000000e+00 : f32
    %27 = vector.broadcast %cst_20 : f32 to vector<128x128xf32>
    %28 = arith.maximumf %26, %27 : vector<128x128xf32>
    %29 = arith.truncf %28 : vector<128x128xf32> to vector<128x128xbf16>
    %c0_21 = arith.constant 0 : index
    %c0_22 = arith.constant 0 : index
    %30 = vector.load %arg9[%c0_21, %c0_22] : memref<128x128xbf16, #tpu.memory_space<vmem>>, vector<128x128xbf16>
    %cst_23 = arith.constant dense<0.000000e+00> : vector<128x128xf32>
    %31 = tpu.matmul %29, %30, %cst_23 {dimension_numbers = #tpu.dot_dimension_numbers<[1], [0], [0], [1], [0, 0, 1, 1], [], []>} : vector<128x128xbf16>, vector<128x128xbf16>, vector<128x128xf32> -> vector<128x128xf32>
    %c0_24 = arith.constant 0 : index
    %c0_25 = arith.constant 0 : index
    %32 = vector.load %arg10[%c0_24, %c0_25] : memref<1x128xf32, #tpu.memory_space<vmem>>, vector<1x128xf32>
    %33 = vector.broadcast %32 : vector<1x128xf32> to vector<128x128xf32>
    %34 = arith.addf %31, %33 : vector<128x128xf32>
    %35 = vector.shape_cast %34 : vector<128x128xf32> to vector<2x64x128xf32>
    %36 = vector.extract_strided_slice %0 {offsets = [0, 0, 0], sizes = [2, 8, 2], strides = [1, 1, 1]} : vector<2x16x4xf32> to vector<2x8x2xf32>
    %37 = vector.extract_strided_slice %1 {offsets = [0, 0, 0], sizes = [2, 64, 2], strides = [1, 1, 1]} : vector<2x64x3xf32> to vector<2x64x2xf32>
    %cst_26 = arith.constant 0.000000e+00 : f32
    %38 = vector.broadcast %cst_26 : f32 to vector<2x64x8xf32>
    %39 = vector.extract_strided_slice %37 {offsets = [0, 0, 0], sizes = [2, 64, 1], strides = [1, 1, 1]} : vector<2x64x2xf32> to vector<2x64x1xf32>
    %40 = vector.extract_strided_slice %36 {offsets = [0, 0, 0], sizes = [2, 8, 1], strides = [1, 1, 1]} : vector<2x8x2xf32> to vector<2x8x1xf32>
    %41 = vector.shape_cast %40 : vector<2x8x1xf32> to vector<2x8xf32>
    %42 = vector.shape_cast %41 : vector<2x8xf32> to vector<2x1x8xf32>
    %43 = vector.broadcast %39 : vector<2x64x1xf32> to vector<2x64x8xf32>
    %44 = vector.broadcast %42 : vector<2x1x8xf32> to vector<2x64x8xf32>
    %45 = arith.subf %43, %44 : vector<2x64x8xf32>
    %46 = arith.mulf %45, %45 : vector<2x64x8xf32>
    %47 = arith.addf %38, %46 : vector<2x64x8xf32>
    %48 = vector.extract_strided_slice %37 {offsets = [0, 0, 1], sizes = [2, 64, 1], strides = [1, 1, 1]} : vector<2x64x2xf32> to vector<2x64x1xf32>
    %49 = vector.extract_strided_slice %36 {offsets = [0, 0, 1], sizes = [2, 8, 1], strides = [1, 1, 1]} : vector<2x8x2xf32> to vector<2x8x1xf32>
    %50 = vector.shape_cast %49 : vector<2x8x1xf32> to vector<2x8xf32>
    %51 = vector.shape_cast %50 : vector<2x8xf32> to vector<2x1x8xf32>
    %52 = vector.broadcast %48 : vector<2x64x1xf32> to vector<2x64x8xf32>
    %53 = vector.broadcast %51 : vector<2x1x8xf32> to vector<2x64x8xf32>
    %54 = arith.subf %52, %53 : vector<2x64x8xf32>
    %55 = arith.mulf %54, %54 : vector<2x64x8xf32>
    %56 = arith.addf %47, %55 : vector<2x64x8xf32>
    %cst_27 = arith.constant -2.000000e+00 : f32
    %57 = vector.broadcast %cst_27 : f32 to vector<2x64x8xf32>
    %58 = arith.mulf %56, %57 : vector<2x64x8xf32>
    %59 = math.exp %58 : vector<2x64x8xf32>
    %60 = arith.truncf %59 : vector<2x64x8xf32> to vector<2x64x8xbf16>
    %61 = arith.truncf %18 : vector<2x8x128xf32> to vector<2x8x128xbf16>
    "tpu.trace_start"() <{level = 10 : i32, message = "bgn,bnd->bgd"}> : () -> ()
    %cst_28 = arith.constant dense<0.000000e+00> : vector<2x64x128xf32>
    %62 = tpu.matmul %60, %61, %cst_28 {dimension_numbers = #tpu.dot_dimension_numbers<[2], [1], [1], [2], [0, 0, 0, 1, 1, 2], [0], [0]>} : vector<2x64x8xbf16>, vector<2x8x128xbf16>, vector<2x64x128xf32> -> vector<2x64x128xf32>
    "tpu.trace_stop"() : () -> ()
    %63 = arith.addf %35, %62 : vector<2x64x128xf32>
    %c0_29 = arith.constant 0 : index
    %c0_30 = arith.constant 0 : index
    %64 = vector.load %arg11[%c0_29, %c0_30] : memref<1x128xf32, #tpu.memory_space<vmem>>, vector<1x128xf32>
    %c0_31 = arith.constant 0 : index
    %c0_32 = arith.constant 0 : index
    %65 = vector.load %arg12[%c0_31, %c0_32] : memref<1x128xf32, #tpu.memory_space<vmem>>, vector<1x128xf32>
    %cst_33 = arith.constant dense<0.000000e+00> : vector<2x64xf32>
    %66 = vector.multi_reduction <add>, %63, %cst_33 [2] : vector<2x64x128xf32> to vector<2x64xf32>
    %67 = vector.shape_cast %66 : vector<2x64xf32> to vector<2x64x1xf32>
    %cst_34 = arith.constant 1.280000e+02 : f32
    %68 = vector.broadcast %cst_34 : f32 to vector<2x64x1xf32>
    %69 = arith.divf %67, %68 : vector<2x64x1xf32>
    %70 = vector.broadcast %69 : vector<2x64x1xf32> to vector<2x64x128xf32>
    %71 = arith.subf %63, %70 : vector<2x64x128xf32>
    %72 = arith.mulf %71, %71 : vector<2x64x128xf32>
    %cst_35 = arith.constant dense<0.000000e+00> : vector<2x64xf32>
    %73 = vector.multi_reduction <add>, %72, %cst_35 [2] : vector<2x64x128xf32> to vector<2x64xf32>
    %74 = vector.shape_cast %73 : vector<2x64xf32> to vector<2x64x1xf32>
    %cst_36 = arith.constant 1.280000e+02 : f32
    %75 = vector.broadcast %cst_36 : f32 to vector<2x64x1xf32>
    %76 = arith.divf %74, %75 : vector<2x64x1xf32>
    %77 = vector.broadcast %69 : vector<2x64x1xf32> to vector<2x64x128xf32>
    %78 = arith.subf %63, %77 : vector<2x64x128xf32>
    %cst_37 = arith.constant 9.99999974E-6 : f32
    %79 = vector.broadcast %cst_37 : f32 to vector<2x64x1xf32>
    %80 = arith.addf %76, %79 : vector<2x64x1xf32>
    %81 = math.rsqrt %80 : vector<2x64x1xf32>
    %82 = vector.broadcast %81 : vector<2x64x1xf32> to vector<2x64x128xf32>
    %83 = arith.mulf %78, %82 : vector<2x64x128xf32>
    %84 = vector.shape_cast %64 : vector<1x128xf32> to vector<1x1x128xf32>
    %85 = vector.broadcast %84 : vector<1x1x128xf32> to vector<2x64x128xf32>
    %86 = arith.mulf %83, %85 : vector<2x64x128xf32>
    %87 = vector.shape_cast %65 : vector<1x128xf32> to vector<1x1x128xf32>
    %88 = vector.broadcast %87 : vector<1x1x128xf32> to vector<2x64x128xf32>
    %89 = arith.addf %86, %88 : vector<2x64x128xf32>
    %90 = vector.shape_cast %89 : vector<2x64x128xf32> to vector<128x128xf32>
    %91 = arith.truncf %90 : vector<128x128xf32> to vector<128x128xbf16>
    %c0_38 = arith.constant 0 : index
    %c0_39 = arith.constant 0 : index
    %92 = vector.load %arg13[%c0_38, %c0_39] : memref<128x384xbf16, #tpu.memory_space<vmem>>, vector<128x384xbf16>
    %cst_40 = arith.constant dense<0.000000e+00> : vector<128x384xf32>
    %93 = tpu.matmul %91, %92, %cst_40 {dimension_numbers = #tpu.dot_dimension_numbers<[1], [0], [0], [1], [0, 0, 1, 1], [], []>} : vector<128x128xbf16>, vector<128x384xbf16>, vector<128x384xf32> -> vector<128x384xf32>
    %94 = vector.shape_cast %93 : vector<128x384xf32> to vector<2x64x384xf32>
    %95 = arith.truncf %94 : vector<2x64x384xf32> to vector<2x64x384xbf16>
    %96 = vector.extract_strided_slice %95 {offsets = [0, 0, 0], sizes = [2, 64, 128], strides = [1, 1, 1]} : vector<2x64x384xbf16> to vector<2x64x128xbf16>
    %97 = vector.extract_strided_slice %95 {offsets = [0, 0, 128], sizes = [2, 64, 128], strides = [1, 1, 1]} : vector<2x64x384xbf16> to vector<2x64x128xbf16>
    %98 = vector.extract_strided_slice %95 {offsets = [0, 0, 256], sizes = [2, 64, 128], strides = [1, 1, 1]} : vector<2x64x384xbf16> to vector<2x64x128xbf16>
    %cst_41 = arith.constant 0.000000e+00 : f32
    %99 = vector.broadcast %cst_41 : f32 to vector<128x128xf32>
    %100 = vector.extract_strided_slice %96 {offsets = [0, 0, 0], sizes = [2, 64, 32], strides = [1, 1, 1]} : vector<2x64x128xbf16> to vector<2x64x32xbf16>
    %101 = vector.extract_strided_slice %97 {offsets = [0, 0, 0], sizes = [2, 64, 32], strides = [1, 1, 1]} : vector<2x64x128xbf16> to vector<2x64x32xbf16>
    "tpu.trace_start"() <{level = 10 : i32, message = "bqd,bkd->bqk"}> : () -> ()
    %cst_42 = arith.constant dense<0.000000e+00> : vector<2x64x64xf32>
    %102 = tpu.matmul %100, %101, %cst_42 {dimension_numbers = #tpu.dot_dimension_numbers<[2], [2], [1], [1], [0, 0, 0, 1, 1, 1], [0], [0]>} : vector<2x64x32xbf16>, vector<2x64x32xbf16>, vector<2x64x64xf32> -> vector<2x64x64xf32>
    "tpu.trace_stop"() : () -> ()
    %cst_43 = arith.constant dense<0xFF800000> : vector<2x64xf32>
    %103 = vector.multi_reduction <maximumf>, %102, %cst_43 [2] : vector<2x64x64xf32> to vector<2x64xf32>
    %104 = vector.shape_cast %103 : vector<2x64xf32> to vector<2x64x1xf32>
    %105 = vector.broadcast %104 : vector<2x64x1xf32> to vector<2x64x64xf32>
    %106 = arith.subf %102, %105 : vector<2x64x64xf32>
    %107 = math.exp %106 : vector<2x64x64xf32>
    %cst_44 = arith.constant dense<0.000000e+00> : vector<2x64xf32>
    %108 = vector.multi_reduction <add>, %107, %cst_44 [2] : vector<2x64x64xf32> to vector<2x64xf32>
    %109 = vector.shape_cast %108 : vector<2x64xf32> to vector<2x64x1xf32>
    %110 = tpu.reciprocal %109 {approx = true} : vector<2x64x1xf32> -> vector<2x64x1xf32>
    %111 = vector.broadcast %110 : vector<2x64x1xf32> to vector<2x64x64xf32>
    %112 = arith.mulf %107, %111 : vector<2x64x64xf32>
    %113 = arith.truncf %112 : vector<2x64x64xf32> to vector<2x64x64xbf16>
    %114 = vector.extract_strided_slice %98 {offsets = [0, 0, 0], sizes = [2, 64, 32], strides = [1, 1, 1]} : vector<2x64x128xbf16> to vector<2x64x32xbf16>
    "tpu.trace_start"() <{level = 10 : i32, message = "bqk,bkd->bqd"}> : () -> ()
    %cst_45 = arith.constant dense<0.000000e+00> : vector<2x64x32xf32>
    %115 = tpu.matmul %113, %114, %cst_45 {dimension_numbers = #tpu.dot_dimension_numbers<[2], [1], [1], [2], [0, 0, 0, 1, 1, 2], [0], [0]>} : vector<2x64x64xbf16>, vector<2x64x32xbf16>, vector<2x64x32xf32> -> vector<2x64x32xf32>
    "tpu.trace_stop"() : () -> ()
    %116 = vector.shape_cast %115 : vector<2x64x32xf32> to vector<128x32xf32>
    %117 = arith.truncf %116 : vector<128x32xf32> to vector<128x32xbf16>
    %c0_46 = arith.constant 0 : index
    %c0_47 = arith.constant 0 : index
    %118 = vector.load %arg14[%c0_46, %c0_47] : memref<128x128xbf16, #tpu.memory_space<vmem>>, vector<32x128xbf16>
    %cst_48 = arith.constant dense<0.000000e+00> : vector<128x128xf32>
    %119 = tpu.matmul %117, %118, %cst_48 {dimension_numbers = #tpu.dot_dimension_numbers<[1], [0], [0], [1], [0, 0, 1, 1], [], []>} : vector<128x32xbf16>, vector<32x128xbf16>, vector<128x128xf32> -> vector<128x128xf32>
    %120 = arith.addf %99, %119 : vector<128x128xf32>
    %121 = vector.extract_strided_slice %96 {offsets = [0, 0, 32], sizes = [2, 64, 32], strides = [1, 1, 1]} : vector<2x64x128xbf16> to vector<2x64x32xbf16>
    %122 = vector.extract_strided_slice %97 {offsets = [0, 0, 32], sizes = [2, 64, 32], strides = [1, 1, 1]} : vector<2x64x128xbf16> to vector<2x64x32xbf16>
    "tpu.trace_start"() <{level = 10 : i32, message = "bqd,bkd->bqk"}> : () -> ()
    %cst_49 = arith.constant dense<0.000000e+00> : vector<2x64x64xf32>
    %123 = tpu.matmul %121, %122, %cst_49 {dimension_numbers = #tpu.dot_dimension_numbers<[2], [2], [1], [1], [0, 0, 0, 1, 1, 1], [0], [0]>} : vector<2x64x32xbf16>, vector<2x64x32xbf16>, vector<2x64x64xf32> -> vector<2x64x64xf32>
    "tpu.trace_stop"() : () -> ()
    %cst_50 = arith.constant dense<0xFF800000> : vector<2x64xf32>
    %124 = vector.multi_reduction <maximumf>, %123, %cst_50 [2] : vector<2x64x64xf32> to vector<2x64xf32>
    %125 = vector.shape_cast %124 : vector<2x64xf32> to vector<2x64x1xf32>
    %126 = vector.broadcast %125 : vector<2x64x1xf32> to vector<2x64x64xf32>
    %127 = arith.subf %123, %126 : vector<2x64x64xf32>
    %128 = math.exp %127 : vector<2x64x64xf32>
    %cst_51 = arith.constant dense<0.000000e+00> : vector<2x64xf32>
    %129 = vector.multi_reduction <add>, %128, %cst_51 [2] : vector<2x64x64xf32> to vector<2x64xf32>
    %130 = vector.shape_cast %129 : vector<2x64xf32> to vector<2x64x1xf32>
    %131 = tpu.reciprocal %130 {approx = true} : vector<2x64x1xf32> -> vector<2x64x1xf32>
    %132 = vector.broadcast %131 : vector<2x64x1xf32> to vector<2x64x64xf32>
    %133 = arith.mulf %128, %132 : vector<2x64x64xf32>
    %134 = arith.truncf %133 : vector<2x64x64xf32> to vector<2x64x64xbf16>
    %135 = vector.extract_strided_slice %98 {offsets = [0, 0, 32], sizes = [2, 64, 32], strides = [1, 1, 1]} : vector<2x64x128xbf16> to vector<2x64x32xbf16>
    "tpu.trace_start"() <{level = 10 : i32, message = "bqk,bkd->bqd"}> : () -> ()
    %cst_52 = arith.constant dense<0.000000e+00> : vector<2x64x32xf32>
    %136 = tpu.matmul %134, %135, %cst_52 {dimension_numbers = #tpu.dot_dimension_numbers<[2], [1], [1], [2], [0, 0, 0, 1, 1, 2], [0], [0]>} : vector<2x64x64xbf16>, vector<2x64x32xbf16>, vector<2x64x32xf32> -> vector<2x64x32xf32>
    "tpu.trace_stop"() : () -> ()
    %137 = vector.shape_cast %136 : vector<2x64x32xf32> to vector<128x32xf32>
    %138 = arith.truncf %137 : vector<128x32xf32> to vector<128x32xbf16>
    %c32 = arith.constant 32 : index
    %c0_53 = arith.constant 0 : index
    %139 = vector.load %arg14[%c32, %c0_53] : memref<128x128xbf16, #tpu.memory_space<vmem>>, vector<32x128xbf16>
    %cst_54 = arith.constant dense<0.000000e+00> : vector<128x128xf32>
    %140 = tpu.matmul %138, %139, %cst_54 {dimension_numbers = #tpu.dot_dimension_numbers<[1], [0], [0], [1], [0, 0, 1, 1], [], []>} : vector<128x32xbf16>, vector<32x128xbf16>, vector<128x128xf32> -> vector<128x128xf32>
    %141 = arith.addf %120, %140 : vector<128x128xf32>
    %142 = vector.extract_strided_slice %96 {offsets = [0, 0, 64], sizes = [2, 64, 32], strides = [1, 1, 1]} : vector<2x64x128xbf16> to vector<2x64x32xbf16>
    %143 = vector.extract_strided_slice %97 {offsets = [0, 0, 64], sizes = [2, 64, 32], strides = [1, 1, 1]} : vector<2x64x128xbf16> to vector<2x64x32xbf16>
    "tpu.trace_start"() <{level = 10 : i32, message = "bqd,bkd->bqk"}> : () -> ()
    %cst_55 = arith.constant dense<0.000000e+00> : vector<2x64x64xf32>
    %144 = tpu.matmul %142, %143, %cst_55 {dimension_numbers = #tpu.dot_dimension_numbers<[2], [2], [1], [1], [0, 0, 0, 1, 1, 1], [0], [0]>} : vector<2x64x32xbf16>, vector<2x64x32xbf16>, vector<2x64x64xf32> -> vector<2x64x64xf32>
    "tpu.trace_stop"() : () -> ()
    %cst_56 = arith.constant dense<0xFF800000> : vector<2x64xf32>
    %145 = vector.multi_reduction <maximumf>, %144, %cst_56 [2] : vector<2x64x64xf32> to vector<2x64xf32>
    %146 = vector.shape_cast %145 : vector<2x64xf32> to vector<2x64x1xf32>
    %147 = vector.broadcast %146 : vector<2x64x1xf32> to vector<2x64x64xf32>
    %148 = arith.subf %144, %147 : vector<2x64x64xf32>
    %149 = math.exp %148 : vector<2x64x64xf32>
    %cst_57 = arith.constant dense<0.000000e+00> : vector<2x64xf32>
    %150 = vector.multi_reduction <add>, %149, %cst_57 [2] : vector<2x64x64xf32> to vector<2x64xf32>
    %151 = vector.shape_cast %150 : vector<2x64xf32> to vector<2x64x1xf32>
    %152 = tpu.reciprocal %151 {approx = true} : vector<2x64x1xf32> -> vector<2x64x1xf32>
    %153 = vector.broadcast %152 : vector<2x64x1xf32> to vector<2x64x64xf32>
    %154 = arith.mulf %149, %153 : vector<2x64x64xf32>
    %155 = arith.truncf %154 : vector<2x64x64xf32> to vector<2x64x64xbf16>
    %156 = vector.extract_strided_slice %98 {offsets = [0, 0, 64], sizes = [2, 64, 32], strides = [1, 1, 1]} : vector<2x64x128xbf16> to vector<2x64x32xbf16>
    "tpu.trace_start"() <{level = 10 : i32, message = "bqk,bkd->bqd"}> : () -> ()
    %cst_58 = arith.constant dense<0.000000e+00> : vector<2x64x32xf32>
    %157 = tpu.matmul %155, %156, %cst_58 {dimension_numbers = #tpu.dot_dimension_numbers<[2], [1], [1], [2], [0, 0, 0, 1, 1, 2], [0], [0]>} : vector<2x64x64xbf16>, vector<2x64x32xbf16>, vector<2x64x32xf32> -> vector<2x64x32xf32>
    "tpu.trace_stop"() : () -> ()
    %158 = vector.shape_cast %157 : vector<2x64x32xf32> to vector<128x32xf32>
    %159 = arith.truncf %158 : vector<128x32xf32> to vector<128x32xbf16>
    %c64 = arith.constant 64 : index
    %c0_59 = arith.constant 0 : index
    %160 = vector.load %arg14[%c64, %c0_59] : memref<128x128xbf16, #tpu.memory_space<vmem>>, vector<32x128xbf16>
    %cst_60 = arith.constant dense<0.000000e+00> : vector<128x128xf32>
    %161 = tpu.matmul %159, %160, %cst_60 {dimension_numbers = #tpu.dot_dimension_numbers<[1], [0], [0], [1], [0, 0, 1, 1], [], []>} : vector<128x32xbf16>, vector<32x128xbf16>, vector<128x128xf32> -> vector<128x128xf32>
    %162 = arith.addf %141, %161 : vector<128x128xf32>
    %163 = vector.extract_strided_slice %96 {offsets = [0, 0, 96], sizes = [2, 64, 32], strides = [1, 1, 1]} : vector<2x64x128xbf16> to vector<2x64x32xbf16>
    %164 = vector.extract_strided_slice %97 {offsets = [0, 0, 96], sizes = [2, 64, 32], strides = [1, 1, 1]} : vector<2x64x128xbf16> to vector<2x64x32xbf16>
    "tpu.trace_start"() <{level = 10 : i32, message = "bqd,bkd->bqk"}> : () -> ()
    %cst_61 = arith.constant dense<0.000000e+00> : vector<2x64x64xf32>
    %165 = tpu.matmul %163, %164, %cst_61 {dimension_numbers = #tpu.dot_dimension_numbers<[2], [2], [1], [1], [0, 0, 0, 1, 1, 1], [0], [0]>} : vector<2x64x32xbf16>, vector<2x64x32xbf16>, vector<2x64x64xf32> -> vector<2x64x64xf32>
    "tpu.trace_stop"() : () -> ()
    %cst_62 = arith.constant dense<0xFF800000> : vector<2x64xf32>
    %166 = vector.multi_reduction <maximumf>, %165, %cst_62 [2] : vector<2x64x64xf32> to vector<2x64xf32>
    %167 = vector.shape_cast %166 : vector<2x64xf32> to vector<2x64x1xf32>
    %168 = vector.broadcast %167 : vector<2x64x1xf32> to vector<2x64x64xf32>
    %169 = arith.subf %165, %168 : vector<2x64x64xf32>
    %170 = math.exp %169 : vector<2x64x64xf32>
    %cst_63 = arith.constant dense<0.000000e+00> : vector<2x64xf32>
    %171 = vector.multi_reduction <add>, %170, %cst_63 [2] : vector<2x64x64xf32> to vector<2x64xf32>
    %172 = vector.shape_cast %171 : vector<2x64xf32> to vector<2x64x1xf32>
    %173 = tpu.reciprocal %172 {approx = true} : vector<2x64x1xf32> -> vector<2x64x1xf32>
    %174 = vector.broadcast %173 : vector<2x64x1xf32> to vector<2x64x64xf32>
    %175 = arith.mulf %170, %174 : vector<2x64x64xf32>
    %176 = arith.truncf %175 : vector<2x64x64xf32> to vector<2x64x64xbf16>
    %177 = vector.extract_strided_slice %98 {offsets = [0, 0, 96], sizes = [2, 64, 32], strides = [1, 1, 1]} : vector<2x64x128xbf16> to vector<2x64x32xbf16>
    "tpu.trace_start"() <{level = 10 : i32, message = "bqk,bkd->bqd"}> : () -> ()
    %cst_64 = arith.constant dense<0.000000e+00> : vector<2x64x32xf32>
    %178 = tpu.matmul %176, %177, %cst_64 {dimension_numbers = #tpu.dot_dimension_numbers<[2], [1], [1], [2], [0, 0, 0, 1, 1, 2], [0], [0]>} : vector<2x64x64xbf16>, vector<2x64x32xbf16>, vector<2x64x32xf32> -> vector<2x64x32xf32>
    "tpu.trace_stop"() : () -> ()
    %179 = vector.shape_cast %178 : vector<2x64x32xf32> to vector<128x32xf32>
    %180 = arith.truncf %179 : vector<128x32xf32> to vector<128x32xbf16>
    %c96 = arith.constant 96 : index
    %c0_65 = arith.constant 0 : index
    %181 = vector.load %arg14[%c96, %c0_65] : memref<128x128xbf16, #tpu.memory_space<vmem>>, vector<32x128xbf16>
    %cst_66 = arith.constant dense<0.000000e+00> : vector<128x128xf32>
    %182 = tpu.matmul %180, %181, %cst_66 {dimension_numbers = #tpu.dot_dimension_numbers<[1], [0], [0], [1], [0, 0, 1, 1], [], []>} : vector<128x32xbf16>, vector<32x128xbf16>, vector<128x128xf32> -> vector<128x128xf32>
    %183 = arith.addf %162, %182 : vector<128x128xf32>
    %184 = vector.shape_cast %183 : vector<128x128xf32> to vector<2x64x128xf32>
    %185 = arith.addf %63, %184 : vector<2x64x128xf32>
    %c0_67 = arith.constant 0 : index
    %c0_68 = arith.constant 0 : index
    %186 = vector.load %arg15[%c0_67, %c0_68] : memref<1x128xf32, #tpu.memory_space<vmem>>, vector<1x128xf32>
    %c0_69 = arith.constant 0 : index
    %c0_70 = arith.constant 0 : index
    %187 = vector.load %arg16[%c0_69, %c0_70] : memref<1x128xf32, #tpu.memory_space<vmem>>, vector<1x128xf32>
    %cst_71 = arith.constant dense<0.000000e+00> : vector<2x64xf32>
    %188 = vector.multi_reduction <add>, %185, %cst_71 [2] : vector<2x64x128xf32> to vector<2x64xf32>
    %189 = vector.shape_cast %188 : vector<2x64xf32> to vector<2x64x1xf32>
    %cst_72 = arith.constant 1.280000e+02 : f32
    %190 = vector.broadcast %cst_72 : f32 to vector<2x64x1xf32>
    %191 = arith.divf %189, %190 : vector<2x64x1xf32>
    %192 = vector.broadcast %191 : vector<2x64x1xf32> to vector<2x64x128xf32>
    %193 = arith.subf %185, %192 : vector<2x64x128xf32>
    %194 = arith.mulf %193, %193 : vector<2x64x128xf32>
    %cst_73 = arith.constant dense<0.000000e+00> : vector<2x64xf32>
    %195 = vector.multi_reduction <add>, %194, %cst_73 [2] : vector<2x64x128xf32> to vector<2x64xf32>
    %196 = vector.shape_cast %195 : vector<2x64xf32> to vector<2x64x1xf32>
    %cst_74 = arith.constant 1.280000e+02 : f32
    %197 = vector.broadcast %cst_74 : f32 to vector<2x64x1xf32>
    %198 = arith.divf %196, %197 : vector<2x64x1xf32>
    %199 = vector.broadcast %191 : vector<2x64x1xf32> to vector<2x64x128xf32>
    %200 = arith.subf %185, %199 : vector<2x64x128xf32>
    %cst_75 = arith.constant 9.99999974E-6 : f32
    %201 = vector.broadcast %cst_75 : f32 to vector<2x64x1xf32>
    %202 = arith.addf %198, %201 : vector<2x64x1xf32>
    %203 = math.rsqrt %202 : vector<2x64x1xf32>
    %204 = vector.broadcast %203 : vector<2x64x1xf32> to vector<2x64x128xf32>
    %205 = arith.mulf %200, %204 : vector<2x64x128xf32>
    %206 = vector.shape_cast %186 : vector<1x128xf32> to vector<1x1x128xf32>
    %207 = vector.broadcast %206 : vector<1x1x128xf32> to vector<2x64x128xf32>
    %208 = arith.mulf %205, %207 : vector<2x64x128xf32>
    %209 = vector.shape_cast %187 : vector<1x128xf32> to vector<1x1x128xf32>
    %210 = vector.broadcast %209 : vector<1x1x128xf32> to vector<2x64x128xf32>
    %211 = arith.addf %208, %210 : vector<2x64x128xf32>
    %212 = vector.shape_cast %211 : vector<2x64x128xf32> to vector<128x128xf32>
    %213 = arith.truncf %212 : vector<128x128xf32> to vector<128x128xbf16>
    %c0_76 = arith.constant 0 : index
    %c0_77 = arith.constant 0 : index
    %214 = vector.load %arg17[%c0_76, %c0_77] : memref<128x128xbf16, #tpu.memory_space<vmem>>, vector<128x128xbf16>
    %cst_78 = arith.constant dense<0.000000e+00> : vector<128x128xf32>
    %215 = tpu.matmul %213, %214, %cst_78 {dimension_numbers = #tpu.dot_dimension_numbers<[1], [0], [0], [1], [0, 0, 1, 1], [], []>} : vector<128x128xbf16>, vector<128x128xbf16>, vector<128x128xf32> -> vector<128x128xf32>
    %c0_79 = arith.constant 0 : index
    %c0_80 = arith.constant 0 : index
    %216 = vector.load %arg18[%c0_79, %c0_80] : memref<1x128xf32, #tpu.memory_space<vmem>>, vector<1x128xf32>
    %217 = vector.broadcast %216 : vector<1x128xf32> to vector<128x128xf32>
    %218 = arith.addf %215, %217 : vector<128x128xf32>
    %cst_81 = arith.constant 0.000000e+00 : f32
    %219 = vector.broadcast %cst_81 : f32 to vector<128x128xf32>
    %220 = arith.maximumf %218, %219 : vector<128x128xf32>
    %221 = arith.truncf %220 : vector<128x128xf32> to vector<128x128xbf16>
    %c0_82 = arith.constant 0 : index
    %c0_83 = arith.constant 0 : index
    %222 = vector.load %arg19[%c0_82, %c0_83] : memref<128x128xbf16, #tpu.memory_space<vmem>>, vector<128x128xbf16>
    %cst_84 = arith.constant dense<0.000000e+00> : vector<128x128xf32>
    %223 = tpu.matmul %221, %222, %cst_84 {dimension_numbers = #tpu.dot_dimension_numbers<[1], [0], [0], [1], [0, 0, 1, 1], [], []>} : vector<128x128xbf16>, vector<128x128xbf16>, vector<128x128xf32> -> vector<128x128xf32>
    %c0_85 = arith.constant 0 : index
    %c0_86 = arith.constant 0 : index
    %224 = vector.load %arg20[%c0_85, %c0_86] : memref<1x128xf32, #tpu.memory_space<vmem>>, vector<1x128xf32>
    %225 = vector.broadcast %224 : vector<1x128xf32> to vector<128x128xf32>
    %226 = arith.addf %223, %225 : vector<128x128xf32>
    %227 = vector.shape_cast %226 : vector<128x128xf32> to vector<2x64x128xf32>
    %228 = arith.addf %185, %227 : vector<2x64x128xf32>
    %c0_87 = arith.constant 0 : index
    %c0_88 = arith.constant 0 : index
    %229 = vector.load %arg21[%c0_87, %c0_88] : memref<1x128xf32, #tpu.memory_space<vmem>>, vector<1x128xf32>
    %c0_89 = arith.constant 0 : index
    %c0_90 = arith.constant 0 : index
    %230 = vector.load %arg22[%c0_89, %c0_90] : memref<1x128xf32, #tpu.memory_space<vmem>>, vector<1x128xf32>
    %cst_91 = arith.constant dense<0.000000e+00> : vector<2x8xf32>
    %231 = vector.multi_reduction <add>, %19, %cst_91 [2] : vector<2x8x128xf32> to vector<2x8xf32>
    %232 = vector.shape_cast %231 : vector<2x8xf32> to vector<2x8x1xf32>
    %cst_92 = arith.constant 1.280000e+02 : f32
    %233 = vector.broadcast %cst_92 : f32 to vector<2x8x1xf32>
    %234 = arith.divf %232, %233 : vector<2x8x1xf32>
    %235 = vector.broadcast %234 : vector<2x8x1xf32> to vector<2x8x128xf32>
    %236 = arith.subf %19, %235 : vector<2x8x128xf32>
    %237 = arith.mulf %236, %236 : vector<2x8x128xf32>
    %cst_93 = arith.constant dense<0.000000e+00> : vector<2x8xf32>
    %238 = vector.multi_reduction <add>, %237, %cst_93 [2] : vector<2x8x128xf32> to vector<2x8xf32>
    %239 = vector.shape_cast %238 : vector<2x8xf32> to vector<2x8x1xf32>
    %cst_94 = arith.constant 1.280000e+02 : f32
    %240 = vector.broadcast %cst_94 : f32 to vector<2x8x1xf32>
    %241 = arith.divf %239, %240 : vector<2x8x1xf32>
    %242 = vector.broadcast %234 : vector<2x8x1xf32> to vector<2x8x128xf32>
    %243 = arith.subf %19, %242 : vector<2x8x128xf32>
    %cst_95 = arith.constant 9.99999974E-6 : f32
    %244 = vector.broadcast %cst_95 : f32 to vector<2x8x1xf32>
    %245 = arith.addf %241, %244 : vector<2x8x1xf32>
    %246 = math.rsqrt %245 : vector<2x8x1xf32>
    %247 = vector.broadcast %246 : vector<2x8x1xf32> to vector<2x8x128xf32>
    %248 = arith.mulf %243, %247 : vector<2x8x128xf32>
    %249 = vector.shape_cast %229 : vector<1x128xf32> to vector<1x1x128xf32>
    %250 = vector.broadcast %249 : vector<1x1x128xf32> to vector<2x8x128xf32>
    %251 = arith.mulf %248, %250 : vector<2x8x128xf32>
    %252 = vector.shape_cast %230 : vector<1x128xf32> to vector<1x1x128xf32>
    %253 = vector.broadcast %252 : vector<1x1x128xf32> to vector<2x8x128xf32>
    %254 = arith.addf %251, %253 : vector<2x8x128xf32>
    %c0_96 = arith.constant 0 : index
    %c0_97 = arith.constant 0 : index
    %255 = vector.load %arg23[%c0_96, %c0_97] : memref<1x128xf32, #tpu.memory_space<vmem>>, vector<1x128xf32>
    %c0_98 = arith.constant 0 : index
    %c0_99 = arith.constant 0 : index
    %256 = vector.load %arg24[%c0_98, %c0_99] : memref<1x128xf32, #tpu.memory_space<vmem>>, vector<1x128xf32>
    %cst_100 = arith.constant dense<0.000000e+00> : vector<2x64xf32>
    %257 = vector.multi_reduction <add>, %228, %cst_100 [2] : vector<2x64x128xf32> to vector<2x64xf32>
    %258 = vector.shape_cast %257 : vector<2x64xf32> to vector<2x64x1xf32>
    %cst_101 = arith.constant 1.280000e+02 : f32
    %259 = vector.broadcast %cst_101 : f32 to vector<2x64x1xf32>
    %260 = arith.divf %258, %259 : vector<2x64x1xf32>
    %261 = vector.broadcast %260 : vector<2x64x1xf32> to vector<2x64x128xf32>
    %262 = arith.subf %228, %261 : vector<2x64x128xf32>
    %263 = arith.mulf %262, %262 : vector<2x64x128xf32>
    %cst_102 = arith.constant dense<0.000000e+00> : vector<2x64xf32>
    %264 = vector.multi_reduction <add>, %263, %cst_102 [2] : vector<2x64x128xf32> to vector<2x64xf32>
    %265 = vector.shape_cast %264 : vector<2x64xf32> to vector<2x64x1xf32>
    %cst_103 = arith.constant 1.280000e+02 : f32
    %266 = vector.broadcast %cst_103 : f32 to vector<2x64x1xf32>
    %267 = arith.divf %265, %266 : vector<2x64x1xf32>
    %268 = vector.broadcast %260 : vector<2x64x1xf32> to vector<2x64x128xf32>
    %269 = arith.subf %228, %268 : vector<2x64x128xf32>
    %cst_104 = arith.constant 9.99999974E-6 : f32
    %270 = vector.broadcast %cst_104 : f32 to vector<2x64x1xf32>
    %271 = arith.addf %267, %270 : vector<2x64x1xf32>
    %272 = math.rsqrt %271 : vector<2x64x1xf32>
    %273 = vector.broadcast %272 : vector<2x64x1xf32> to vector<2x64x128xf32>
    %274 = arith.mulf %269, %273 : vector<2x64x128xf32>
    %275 = vector.shape_cast %255 : vector<1x128xf32> to vector<1x1x128xf32>
    %276 = vector.broadcast %275 : vector<1x1x128xf32> to vector<2x64x128xf32>
    %277 = arith.mulf %274, %276 : vector<2x64x128xf32>
    %278 = vector.shape_cast %256 : vector<1x128xf32> to vector<1x1x128xf32>
    %279 = vector.broadcast %278 : vector<1x1x128xf32> to vector<2x64x128xf32>
    %280 = arith.addf %277, %279 : vector<2x64x128xf32>
    %281 = vector.shape_cast %254 : vector<2x8x128xf32> to vector<16x128xf32>
    %282 = arith.truncf %281 : vector<16x128xf32> to vector<16x128xbf16>
    %c0_105 = arith.constant 0 : index
    %c0_106 = arith.constant 0 : index
    %283 = vector.load %arg25[%c0_105, %c0_106] : memref<128x128xbf16, #tpu.memory_space<vmem>>, vector<128x128xbf16>
    %cst_107 = arith.constant dense<0.000000e+00> : vector<16x128xf32>
    %284 = tpu.matmul %282, %283, %cst_107 {dimension_numbers = #tpu.dot_dimension_numbers<[1], [0], [0], [1], [0, 0, 1, 1], [], []>} : vector<16x128xbf16>, vector<128x128xbf16>, vector<16x128xf32> -> vector<16x128xf32>
    %285 = vector.shape_cast %284 : vector<16x128xf32> to vector<2x8x128xf32>
    %286 = vector.shape_cast %280 : vector<2x64x128xf32> to vector<128x128xf32>
    %287 = arith.truncf %286 : vector<128x128xf32> to vector<128x128xbf16>
    %c0_108 = arith.constant 0 : index
    %c0_109 = arith.constant 0 : index
    %288 = vector.load %arg26[%c0_108, %c0_109] : memref<128x256xbf16, #tpu.memory_space<vmem>>, vector<128x256xbf16>
    %cst_110 = arith.constant dense<0.000000e+00> : vector<128x256xf32>
    %289 = tpu.matmul %287, %288, %cst_110 {dimension_numbers = #tpu.dot_dimension_numbers<[1], [0], [0], [1], [0, 0, 1, 1], [], []>} : vector<128x128xbf16>, vector<128x256xbf16>, vector<128x256xf32> -> vector<128x256xf32>
    %290 = vector.shape_cast %289 : vector<128x256xf32> to vector<2x64x256xf32>
    %291 = arith.truncf %285 : vector<2x8x128xf32> to vector<2x8x128xbf16>
    %292 = arith.truncf %290 : vector<2x64x256xf32> to vector<2x64x256xbf16>
    %293 = vector.extract_strided_slice %292 {offsets = [0, 0, 0], sizes = [2, 64, 128], strides = [1, 1, 1]} : vector<2x64x256xbf16> to vector<2x64x128xbf16>
    %294 = vector.extract_strided_slice %292 {offsets = [0, 0, 128], sizes = [2, 64, 128], strides = [1, 1, 1]} : vector<2x64x256xbf16> to vector<2x64x128xbf16>
    %cst_111 = arith.constant 0.000000e+00 : f32
    %295 = vector.broadcast %cst_111 : f32 to vector<16x128xf32>
    %296 = vector.extract_strided_slice %291 {offsets = [0, 0, 0], sizes = [2, 8, 32], strides = [1, 1, 1]} : vector<2x8x128xbf16> to vector<2x8x32xbf16>
    %297 = vector.extract_strided_slice %293 {offsets = [0, 0, 0], sizes = [2, 64, 32], strides = [1, 1, 1]} : vector<2x64x128xbf16> to vector<2x64x32xbf16>
    "tpu.trace_start"() <{level = 10 : i32, message = "bqd,bkd->bqk"}> : () -> ()
    %cst_112 = arith.constant dense<0.000000e+00> : vector<2x8x64xf32>
    %298 = tpu.matmul %296, %297, %cst_112 {dimension_numbers = #tpu.dot_dimension_numbers<[2], [2], [1], [1], [0, 0, 0, 1, 1, 1], [0], [0]>} : vector<2x8x32xbf16>, vector<2x64x32xbf16>, vector<2x8x64xf32> -> vector<2x8x64xf32>
    "tpu.trace_stop"() : () -> ()
    %cst_113 = arith.constant dense<0xFF800000> : vector<2x8xf32>
    %299 = vector.multi_reduction <maximumf>, %298, %cst_113 [2] : vector<2x8x64xf32> to vector<2x8xf32>
    %300 = vector.shape_cast %299 : vector<2x8xf32> to vector<2x8x1xf32>
    %301 = vector.broadcast %300 : vector<2x8x1xf32> to vector<2x8x64xf32>
    %302 = arith.subf %298, %301 : vector<2x8x64xf32>
    %303 = math.exp %302 : vector<2x8x64xf32>
    %cst_114 = arith.constant dense<0.000000e+00> : vector<2x8xf32>
    %304 = vector.multi_reduction <add>, %303, %cst_114 [2] : vector<2x8x64xf32> to vector<2x8xf32>
    %305 = vector.shape_cast %304 : vector<2x8xf32> to vector<2x8x1xf32>
    %306 = tpu.reciprocal %305 {approx = true} : vector<2x8x1xf32> -> vector<2x8x1xf32>
    %307 = vector.broadcast %306 : vector<2x8x1xf32> to vector<2x8x64xf32>
    %308 = arith.mulf %303, %307 : vector<2x8x64xf32>
    %309 = arith.truncf %308 : vector<2x8x64xf32> to vector<2x8x64xbf16>
    %310 = vector.extract_strided_slice %294 {offsets = [0, 0, 0], sizes = [2, 64, 32], strides = [1, 1, 1]} : vector<2x64x128xbf16> to vector<2x64x32xbf16>
    "tpu.trace_start"() <{level = 10 : i32, message = "bqk,bkd->bqd"}> : () -> ()
    %cst_115 = arith.constant dense<0.000000e+00> : vector<2x8x32xf32>
    %311 = tpu.matmul %309, %310, %cst_115 {dimension_numbers = #tpu.dot_dimension_numbers<[2], [1], [1], [2], [0, 0, 0, 1, 1, 2], [0], [0]>} : vector<2x8x64xbf16>, vector<2x64x32xbf16>, vector<2x8x32xf32> -> vector<2x8x32xf32>
    "tpu.trace_stop"() : () -> ()
    %312 = vector.shape_cast %311 : vector<2x8x32xf32> to vector<16x32xf32>
    %313 = arith.truncf %312 : vector<16x32xf32> to vector<16x32xbf16>
    %c0_116 = arith.constant 0 : index
    %c0_117 = arith.constant 0 : index
    %314 = vector.load %arg27[%c0_116, %c0_117] : memref<128x128xbf16, #tpu.memory_space<vmem>>, vector<32x128xbf16>
    %cst_118 = arith.constant dense<0.000000e+00> : vector<16x128xf32>
    %315 = tpu.matmul %313, %314, %cst_118 {dimension_numbers = #tpu.dot_dimension_numbers<[1], [0], [0], [1], [0, 0, 1, 1], [], []>} : vector<16x32xbf16>, vector<32x128xbf16>, vector<16x128xf32> -> vector<16x128xf32>
    %316 = arith.addf %295, %315 : vector<16x128xf32>
    %317 = vector.extract_strided_slice %291 {offsets = [0, 0, 32], sizes = [2, 8, 32], strides = [1, 1, 1]} : vector<2x8x128xbf16> to vector<2x8x32xbf16>
    %318 = vector.extract_strided_slice %293 {offsets = [0, 0, 32], sizes = [2, 64, 32], strides = [1, 1, 1]} : vector<2x64x128xbf16> to vector<2x64x32xbf16>
    "tpu.trace_start"() <{level = 10 : i32, message = "bqd,bkd->bqk"}> : () -> ()
    %cst_119 = arith.constant dense<0.000000e+00> : vector<2x8x64xf32>
    %319 = tpu.matmul %317, %318, %cst_119 {dimension_numbers = #tpu.dot_dimension_numbers<[2], [2], [1], [1], [0, 0, 0, 1, 1, 1], [0], [0]>} : vector<2x8x32xbf16>, vector<2x64x32xbf16>, vector<2x8x64xf32> -> vector<2x8x64xf32>
    "tpu.trace_stop"() : () -> ()
    %cst_120 = arith.constant dense<0xFF800000> : vector<2x8xf32>
    %320 = vector.multi_reduction <maximumf>, %319, %cst_120 [2] : vector<2x8x64xf32> to vector<2x8xf32>
    %321 = vector.shape_cast %320 : vector<2x8xf32> to vector<2x8x1xf32>
    %322 = vector.broadcast %321 : vector<2x8x1xf32> to vector<2x8x64xf32>
    %323 = arith.subf %319, %322 : vector<2x8x64xf32>
    %324 = math.exp %323 : vector<2x8x64xf32>
    %cst_121 = arith.constant dense<0.000000e+00> : vector<2x8xf32>
    %325 = vector.multi_reduction <add>, %324, %cst_121 [2] : vector<2x8x64xf32> to vector<2x8xf32>
    %326 = vector.shape_cast %325 : vector<2x8xf32> to vector<2x8x1xf32>
    %327 = tpu.reciprocal %326 {approx = true} : vector<2x8x1xf32> -> vector<2x8x1xf32>
    %328 = vector.broadcast %327 : vector<2x8x1xf32> to vector<2x8x64xf32>
    %329 = arith.mulf %324, %328 : vector<2x8x64xf32>
    %330 = arith.truncf %329 : vector<2x8x64xf32> to vector<2x8x64xbf16>
    %331 = vector.extract_strided_slice %294 {offsets = [0, 0, 32], sizes = [2, 64, 32], strides = [1, 1, 1]} : vector<2x64x128xbf16> to vector<2x64x32xbf16>
    "tpu.trace_start"() <{level = 10 : i32, message = "bqk,bkd->bqd"}> : () -> ()
    %cst_122 = arith.constant dense<0.000000e+00> : vector<2x8x32xf32>
    %332 = tpu.matmul %330, %331, %cst_122 {dimension_numbers = #tpu.dot_dimension_numbers<[2], [1], [1], [2], [0, 0, 0, 1, 1, 2], [0], [0]>} : vector<2x8x64xbf16>, vector<2x64x32xbf16>, vector<2x8x32xf32> -> vector<2x8x32xf32>
    "tpu.trace_stop"() : () -> ()
    %333 = vector.shape_cast %332 : vector<2x8x32xf32> to vector<16x32xf32>
    %334 = arith.truncf %333 : vector<16x32xf32> to vector<16x32xbf16>
    %c32_123 = arith.constant 32 : index
    %c0_124 = arith.constant 0 : index
    %335 = vector.load %arg27[%c32_123, %c0_124] : memref<128x128xbf16, #tpu.memory_space<vmem>>, vector<32x128xbf16>
    %cst_125 = arith.constant dense<0.000000e+00> : vector<16x128xf32>
    %336 = tpu.matmul %334, %335, %cst_125 {dimension_numbers = #tpu.dot_dimension_numbers<[1], [0], [0], [1], [0, 0, 1, 1], [], []>} : vector<16x32xbf16>, vector<32x128xbf16>, vector<16x128xf32> -> vector<16x128xf32>
    %337 = arith.addf %316, %336 : vector<16x128xf32>
    %338 = vector.extract_strided_slice %291 {offsets = [0, 0, 64], sizes = [2, 8, 32], strides = [1, 1, 1]} : vector<2x8x128xbf16> to vector<2x8x32xbf16>
    %339 = vector.extract_strided_slice %293 {offsets = [0, 0, 64], sizes = [2, 64, 32], strides = [1, 1, 1]} : vector<2x64x128xbf16> to vector<2x64x32xbf16>
    "tpu.trace_start"() <{level = 10 : i32, message = "bqd,bkd->bqk"}> : () -> ()
    %cst_126 = arith.constant dense<0.000000e+00> : vector<2x8x64xf32>
    %340 = tpu.matmul %338, %339, %cst_126 {dimension_numbers = #tpu.dot_dimension_numbers<[2], [2], [1], [1], [0, 0, 0, 1, 1, 1], [0], [0]>} : vector<2x8x32xbf16>, vector<2x64x32xbf16>, vector<2x8x64xf32> -> vector<2x8x64xf32>
    "tpu.trace_stop"() : () -> ()
    %cst_127 = arith.constant dense<0xFF800000> : vector<2x8xf32>
    %341 = vector.multi_reduction <maximumf>, %340, %cst_127 [2] : vector<2x8x64xf32> to vector<2x8xf32>
    %342 = vector.shape_cast %341 : vector<2x8xf32> to vector<2x8x1xf32>
    %343 = vector.broadcast %342 : vector<2x8x1xf32> to vector<2x8x64xf32>
    %344 = arith.subf %340, %343 : vector<2x8x64xf32>
    %345 = math.exp %344 : vector<2x8x64xf32>
    %cst_128 = arith.constant dense<0.000000e+00> : vector<2x8xf32>
    %346 = vector.multi_reduction <add>, %345, %cst_128 [2] : vector<2x8x64xf32> to vector<2x8xf32>
    %347 = vector.shape_cast %346 : vector<2x8xf32> to vector<2x8x1xf32>
    %348 = tpu.reciprocal %347 {approx = true} : vector<2x8x1xf32> -> vector<2x8x1xf32>
    %349 = vector.broadcast %348 : vector<2x8x1xf32> to vector<2x8x64xf32>
    %350 = arith.mulf %345, %349 : vector<2x8x64xf32>
    %351 = arith.truncf %350 : vector<2x8x64xf32> to vector<2x8x64xbf16>
    %352 = vector.extract_strided_slice %294 {offsets = [0, 0, 64], sizes = [2, 64, 32], strides = [1, 1, 1]} : vector<2x64x128xbf16> to vector<2x64x32xbf16>
    "tpu.trace_start"() <{level = 10 : i32, message = "bqk,bkd->bqd"}> : () -> ()
    %cst_129 = arith.constant dense<0.000000e+00> : vector<2x8x32xf32>
    %353 = tpu.matmul %351, %352, %cst_129 {dimension_numbers = #tpu.dot_dimension_numbers<[2], [1], [1], [2], [0, 0, 0, 1, 1, 2], [0], [0]>} : vector<2x8x64xbf16>, vector<2x64x32xbf16>, vector<2x8x32xf32> -> vector<2x8x32xf32>
    "tpu.trace_stop"() : () -> ()
    %354 = vector.shape_cast %353 : vector<2x8x32xf32> to vector<16x32xf32>
    %355 = arith.truncf %354 : vector<16x32xf32> to vector<16x32xbf16>
    %c64_130 = arith.constant 64 : index
    %c0_131 = arith.constant 0 : index
    %356 = vector.load %arg27[%c64_130, %c0_131] : memref<128x128xbf16, #tpu.memory_space<vmem>>, vector<32x128xbf16>
    %cst_132 = arith.constant dense<0.000000e+00> : vector<16x128xf32>
    %357 = tpu.matmul %355, %356, %cst_132 {dimension_numbers = #tpu.dot_dimension_numbers<[1], [0], [0], [1], [0, 0, 1, 1], [], []>} : vector<16x32xbf16>, vector<32x128xbf16>, vector<16x128xf32> -> vector<16x128xf32>
    %358 = arith.addf %337, %357 : vector<16x128xf32>
    %359 = vector.extract_strided_slice %291 {offsets = [0, 0, 96], sizes = [2, 8, 32], strides = [1, 1, 1]} : vector<2x8x128xbf16> to vector<2x8x32xbf16>
    %360 = vector.extract_strided_slice %293 {offsets = [0, 0, 96], sizes = [2, 64, 32], strides = [1, 1, 1]} : vector<2x64x128xbf16> to vector<2x64x32xbf16>
    "tpu.trace_start"() <{level = 10 : i32, message = "bqd,bkd->bqk"}> : () -> ()
    %cst_133 = arith.constant dense<0.000000e+00> : vector<2x8x64xf32>
    %361 = tpu.matmul %359, %360, %cst_133 {dimension_numbers = #tpu.dot_dimension_numbers<[2], [2], [1], [1], [0, 0, 0, 1, 1, 1], [0], [0]>} : vector<2x8x32xbf16>, vector<2x64x32xbf16>, vector<2x8x64xf32> -> vector<2x8x64xf32>
    "tpu.trace_stop"() : () -> ()
    %cst_134 = arith.constant dense<0xFF800000> : vector<2x8xf32>
    %362 = vector.multi_reduction <maximumf>, %361, %cst_134 [2] : vector<2x8x64xf32> to vector<2x8xf32>
    %363 = vector.shape_cast %362 : vector<2x8xf32> to vector<2x8x1xf32>
    %364 = vector.broadcast %363 : vector<2x8x1xf32> to vector<2x8x64xf32>
    %365 = arith.subf %361, %364 : vector<2x8x64xf32>
    %366 = math.exp %365 : vector<2x8x64xf32>
    %cst_135 = arith.constant dense<0.000000e+00> : vector<2x8xf32>
    %367 = vector.multi_reduction <add>, %366, %cst_135 [2] : vector<2x8x64xf32> to vector<2x8xf32>
    %368 = vector.shape_cast %367 : vector<2x8xf32> to vector<2x8x1xf32>
    %369 = tpu.reciprocal %368 {approx = true} : vector<2x8x1xf32> -> vector<2x8x1xf32>
    %370 = vector.broadcast %369 : vector<2x8x1xf32> to vector<2x8x64xf32>
    %371 = arith.mulf %366, %370 : vector<2x8x64xf32>
    %372 = arith.truncf %371 : vector<2x8x64xf32> to vector<2x8x64xbf16>
    %373 = vector.extract_strided_slice %294 {offsets = [0, 0, 96], sizes = [2, 64, 32], strides = [1, 1, 1]} : vector<2x64x128xbf16> to vector<2x64x32xbf16>
    "tpu.trace_start"() <{level = 10 : i32, message = "bqk,bkd->bqd"}> : () -> ()
    %cst_136 = arith.constant dense<0.000000e+00> : vector<2x8x32xf32>
    %374 = tpu.matmul %372, %373, %cst_136 {dimension_numbers = #tpu.dot_dimension_numbers<[2], [1], [1], [2], [0, 0, 0, 1, 1, 2], [0], [0]>} : vector<2x8x64xbf16>, vector<2x64x32xbf16>, vector<2x8x32xf32> -> vector<2x8x32xf32>
    "tpu.trace_stop"() : () -> ()
    %375 = vector.shape_cast %374 : vector<2x8x32xf32> to vector<16x32xf32>
    %376 = arith.truncf %375 : vector<16x32xf32> to vector<16x32xbf16>
    %c96_137 = arith.constant 96 : index
    %c0_138 = arith.constant 0 : index
    %377 = vector.load %arg27[%c96_137, %c0_138] : memref<128x128xbf16, #tpu.memory_space<vmem>>, vector<32x128xbf16>
    %cst_139 = arith.constant dense<0.000000e+00> : vector<16x128xf32>
    %378 = tpu.matmul %376, %377, %cst_139 {dimension_numbers = #tpu.dot_dimension_numbers<[1], [0], [0], [1], [0, 0, 1, 1], [], []>} : vector<16x32xbf16>, vector<32x128xbf16>, vector<16x128xf32> -> vector<16x128xf32>
    %379 = arith.addf %358, %378 : vector<16x128xf32>
    %380 = vector.shape_cast %379 : vector<16x128xf32> to vector<2x8x128xf32>
    %381 = arith.addf %19, %380 : vector<2x8x128xf32>
    %c0_140 = arith.constant 0 : index
    %c0_141 = arith.constant 0 : index
    %382 = vector.load %arg28[%c0_140, %c0_141] : memref<1x128xf32, #tpu.memory_space<vmem>>, vector<1x128xf32>
    %c0_142 = arith.constant 0 : index
    %c0_143 = arith.constant 0 : index
    %383 = vector.load %arg29[%c0_142, %c0_143] : memref<1x128xf32, #tpu.memory_space<vmem>>, vector<1x128xf32>
    %cst_144 = arith.constant dense<0.000000e+00> : vector<2x8xf32>
    %384 = vector.multi_reduction <add>, %381, %cst_144 [2] : vector<2x8x128xf32> to vector<2x8xf32>
    %385 = vector.shape_cast %384 : vector<2x8xf32> to vector<2x8x1xf32>
    %cst_145 = arith.constant 1.280000e+02 : f32
    %386 = vector.broadcast %cst_145 : f32 to vector<2x8x1xf32>
    %387 = arith.divf %385, %386 : vector<2x8x1xf32>
    %388 = vector.broadcast %387 : vector<2x8x1xf32> to vector<2x8x128xf32>
    %389 = arith.subf %381, %388 : vector<2x8x128xf32>
    %390 = arith.mulf %389, %389 : vector<2x8x128xf32>
    %cst_146 = arith.constant dense<0.000000e+00> : vector<2x8xf32>
    %391 = vector.multi_reduction <add>, %390, %cst_146 [2] : vector<2x8x128xf32> to vector<2x8xf32>
    %392 = vector.shape_cast %391 : vector<2x8xf32> to vector<2x8x1xf32>
    %cst_147 = arith.constant 1.280000e+02 : f32
    %393 = vector.broadcast %cst_147 : f32 to vector<2x8x1xf32>
    %394 = arith.divf %392, %393 : vector<2x8x1xf32>
    %395 = vector.broadcast %387 : vector<2x8x1xf32> to vector<2x8x128xf32>
    %396 = arith.subf %381, %395 : vector<2x8x128xf32>
    %cst_148 = arith.constant 9.99999974E-6 : f32
    %397 = vector.broadcast %cst_148 : f32 to vector<2x8x1xf32>
    %398 = arith.addf %394, %397 : vector<2x8x1xf32>
    %399 = math.rsqrt %398 : vector<2x8x1xf32>
    %400 = vector.broadcast %399 : vector<2x8x1xf32> to vector<2x8x128xf32>
    %401 = arith.mulf %396, %400 : vector<2x8x128xf32>
    %402 = vector.shape_cast %382 : vector<1x128xf32> to vector<1x1x128xf32>
    %403 = vector.broadcast %402 : vector<1x1x128xf32> to vector<2x8x128xf32>
    %404 = arith.mulf %401, %403 : vector<2x8x128xf32>
    %405 = vector.shape_cast %383 : vector<1x128xf32> to vector<1x1x128xf32>
    %406 = vector.broadcast %405 : vector<1x1x128xf32> to vector<2x8x128xf32>
    %407 = arith.addf %404, %406 : vector<2x8x128xf32>
    %408 = vector.shape_cast %407 : vector<2x8x128xf32> to vector<16x128xf32>
    %409 = arith.truncf %408 : vector<16x128xf32> to vector<16x128xbf16>
    %c0_149 = arith.constant 0 : index
    %c0_150 = arith.constant 0 : index
    %410 = vector.load %arg30[%c0_149, %c0_150] : memref<128x128xbf16, #tpu.memory_space<vmem>>, vector<128x128xbf16>
    %cst_151 = arith.constant dense<0.000000e+00> : vector<16x128xf32>
    %411 = tpu.matmul %409, %410, %cst_151 {dimension_numbers = #tpu.dot_dimension_numbers<[1], [0], [0], [1], [0, 0, 1, 1], [], []>} : vector<16x128xbf16>, vector<128x128xbf16>, vector<16x128xf32> -> vector<16x128xf32>
    %c0_152 = arith.constant 0 : index
    %c0_153 = arith.constant 0 : index
    %412 = vector.load %arg31[%c0_152, %c0_153] : memref<1x128xf32, #tpu.memory_space<vmem>>, vector<1x128xf32>
    %413 = vector.broadcast %412 : vector<1x128xf32> to vector<16x128xf32>
    %414 = arith.addf %411, %413 : vector<16x128xf32>
    %cst_154 = arith.constant 0.000000e+00 : f32
    %415 = vector.broadcast %cst_154 : f32 to vector<16x128xf32>
    %416 = arith.maximumf %414, %415 : vector<16x128xf32>
    %417 = arith.truncf %416 : vector<16x128xf32> to vector<16x128xbf16>
    %c0_155 = arith.constant 0 : index
    %c0_156 = arith.constant 0 : index
    %418 = vector.load %arg32[%c0_155, %c0_156] : memref<128x128xbf16, #tpu.memory_space<vmem>>, vector<128x128xbf16>
    %cst_157 = arith.constant dense<0.000000e+00> : vector<16x128xf32>
    %419 = tpu.matmul %417, %418, %cst_157 {dimension_numbers = #tpu.dot_dimension_numbers<[1], [0], [0], [1], [0, 0, 1, 1], [], []>} : vector<16x128xbf16>, vector<128x128xbf16>, vector<16x128xf32> -> vector<16x128xf32>
    %c0_158 = arith.constant 0 : index
    %c0_159 = arith.constant 0 : index
    %420 = vector.load %arg33[%c0_158, %c0_159] : memref<1x128xf32, #tpu.memory_space<vmem>>, vector<1x128xf32>
    %421 = vector.broadcast %420 : vector<1x128xf32> to vector<16x128xf32>
    %422 = arith.addf %419, %421 : vector<16x128xf32>
    %423 = vector.shape_cast %422 : vector<16x128xf32> to vector<2x8x128xf32>
    %424 = arith.addf %381, %423 : vector<2x8x128xf32>
    %c0_160 = arith.constant 0 : index
    %c0_161 = arith.constant 0 : index
    %c0_162 = arith.constant 0 : index
    %425 = vector.load %arg34[%c0_160, %c0_161, %c0_162] : memref<2x8x128xf32, #tpu.memory_space<vmem>>, vector<2x8x128xf32>
    tpu.vector_store %arg34[%c0_160, %c0_161, %c0_162], %424 {strides = array<i32>} : memref<2x8x128xf32, #tpu.memory_space<vmem>>, vector<2x8x128xf32>,
    return
  }
  func.func @transform_0(%arg0: i32) -> (i32, i32, i32) {
    %c0_i32 = arith.constant 0 : i32
    %c0_i32_0 = arith.constant 0 : i32
    %c0_i32_1 = arith.constant 0 : i32
    return %arg0, %c0_i32, %c0_i32_0 : i32, i32, i32
  }
  func.func @transform_1(%arg0: i32) -> (i32, i32, i32) {
    %c0_i32 = arith.constant 0 : i32
    %c0_i32_0 = arith.constant 0 : i32
    %c0_i32_1 = arith.constant 0 : i32
    return %arg0, %c0_i32, %c0_i32_0 : i32, i32, i32
  }
  func.func @transform_2(%arg0: i32) -> (i32, i32) {
    %c0_i32 = arith.constant 0 : i32
    %c0_i32_0 = arith.constant 0 : i32
    %c0_i32_1 = arith.constant 0 : i32
    return %c0_i32, %c0_i32_0 : i32, i32
  }
  func.func @transform_3(%arg0: i32) -> (i32, i32) {
    %c0_i32 = arith.constant 0 : i32
    %c0_i32_0 = arith.constant 0 : i32
    %c0_i32_1 = arith.constant 0 : i32
    return %c0_i32, %c0_i32_0 : i32, i32
  }
  func.func @transform_4(%arg0: i32) -> (i32, i32) {
    %c0_i32 = arith.constant 0 : i32
    %c0_i32_0 = arith.constant 0 : i32
    %c0_i32_1 = arith.constant 0 : i32
    return %c0_i32, %c0_i32_0 : i32, i32
  }
  func.func @transform_5(%arg0: i32) -> (i32, i32) {
    %c0_i32 = arith.constant 0 : i32
    %c0_i32_0 = arith.constant 0 : i32
    %c0_i32_1 = arith.constant 0 : i32
    return %c0_i32, %c0_i32_0 : i32, i32
  }
  func.func @transform_6(%arg0: i32) -> (i32, i32) {
    %c0_i32 = arith.constant 0 : i32
    %c0_i32_0 = arith.constant 0 : i32
    %c0_i32_1 = arith.constant 0 : i32
    return %c0_i32, %c0_i32_0 : i32, i32
  }
  func.func @transform_7(%arg0: i32) -> (i32, i32) {
    %c0_i32 = arith.constant 0 : i32
    %c0_i32_0 = arith.constant 0 : i32
    %c0_i32_1 = arith.constant 0 : i32
    return %c0_i32, %c0_i32_0 : i32, i32
  }
  func.func @transform_8(%arg0: i32) -> (i32, i32) {
    %c0_i32 = arith.constant 0 : i32
    %c0_i32_0 = arith.constant 0 : i32
    %c0_i32_1 = arith.constant 0 : i32
    return %c0_i32, %c0_i32_0 : i32, i32
  }
  func.func @transform_9(%arg0: i32) -> (i32, i32) {
    %c0_i32 = arith.constant 0 : i32
    %c0_i32_0 = arith.constant 0 : i32
    %c0_i32_1 = arith.constant 0 : i32
    return %c0_i32, %c0_i32_0 : i32, i32
  }
  func.func @transform_10(%arg0: i32) -> (i32, i32) {
    %c0_i32 = arith.constant 0 : i32
    %c0_i32_0 = arith.constant 0 : i32
    %c0_i32_1 = arith.constant 0 : i32
    return %c0_i32, %c0_i32_0 : i32, i32
  }
  func.func @transform_11(%arg0: i32) -> (i32, i32) {
    %c0_i32 = arith.constant 0 : i32
    %c0_i32_0 = arith.constant 0 : i32
    %c0_i32_1 = arith.constant 0 : i32
    return %c0_i32, %c0_i32_0 : i32, i32
  }
  func.func @transform_12(%arg0: i32) -> (i32, i32) {
    %c0_i32 = arith.constant 0 : i32
    %c0_i32_0 = arith.constant 0 : i32
    %c0_i32_1 = arith.constant 0 : i32
    return %c0_i32, %c0_i32_0 : i32, i32
  }
  func.func @transform_13(%arg0: i32) -> (i32, i32) {
    %c0_i32 = arith.constant 0 : i32
    %c0_i32_0 = arith.constant 0 : i32
    %c0_i32_1 = arith.constant 0 : i32
    return %c0_i32, %c0_i32_0 : i32, i32
  }
  func.func @transform_14(%arg0: i32) -> (i32, i32) {
    %c0_i32 = arith.constant 0 : i32
    %c0_i32_0 = arith.constant 0 : i32
    %c0_i32_1 = arith.constant 0 : i32
    return %c0_i32, %c0_i32_0 : i32, i32
  }
  func.func @transform_15(%arg0: i32) -> (i32, i32) {
    %c0_i32 = arith.constant 0 : i32
    %c0_i32_0 = arith.constant 0 : i32
    %c0_i32_1 = arith.constant 0 : i32
    return %c0_i32, %c0_i32_0 : i32, i32
  }
  func.func @transform_16(%arg0: i32) -> (i32, i32) {
    %c0_i32 = arith.constant 0 : i32
    %c0_i32_0 = arith.constant 0 : i32
    %c0_i32_1 = arith.constant 0 : i32
    return %c0_i32, %c0_i32_0 : i32, i32
  }
  func.func @transform_17(%arg0: i32) -> (i32, i32) {
    %c0_i32 = arith.constant 0 : i32
    %c0_i32_0 = arith.constant 0 : i32
    %c0_i32_1 = arith.constant 0 : i32
    return %c0_i32, %c0_i32_0 : i32, i32
  }
  func.func @transform_18(%arg0: i32) -> (i32, i32) {
    %c0_i32 = arith.constant 0 : i32
    %c0_i32_0 = arith.constant 0 : i32
    %c0_i32_1 = arith.constant 0 : i32
    return %c0_i32, %c0_i32_0 : i32, i32
  }
  func.func @transform_19(%arg0: i32) -> (i32, i32) {
    %c0_i32 = arith.constant 0 : i32
    %c0_i32_0 = arith.constant 0 : i32
    %c0_i32_1 = arith.constant 0 : i32
    return %c0_i32, %c0_i32_0 : i32, i32
  }
  func.func @transform_20(%arg0: i32) -> (i32, i32) {
    %c0_i32 = arith.constant 0 : i32
    %c0_i32_0 = arith.constant 0 : i32
    %c0_i32_1 = arith.constant 0 : i32
    return %c0_i32, %c0_i32_0 : i32, i32
  }
  func.func @transform_21(%arg0: i32) -> (i32, i32) {
    %c0_i32 = arith.constant 0 : i32
    %c0_i32_0 = arith.constant 0 : i32
    %c0_i32_1 = arith.constant 0 : i32
    return %c0_i32, %c0_i32_0 : i32, i32
  }
  func.func @transform_22(%arg0: i32) -> (i32, i32) {
    %c0_i32 = arith.constant 0 : i32
    %c0_i32_0 = arith.constant 0 : i32
    %c0_i32_1 = arith.constant 0 : i32
    return %c0_i32, %c0_i32_0 : i32, i32
  }
  func.func @transform_23(%arg0: i32) -> (i32, i32) {
    %c0_i32 = arith.constant 0 : i32
    %c0_i32_0 = arith.constant 0 : i32
    %c0_i32_1 = arith.constant 0 : i32
    return %c0_i32, %c0_i32_0 : i32, i32
  }
  func.func @transform_24(%arg0: i32) -> (i32, i32) {
    %c0_i32 = arith.constant 0 : i32
    %c0_i32_0 = arith.constant 0 : i32
    %c0_i32_1 = arith.constant 0 : i32
    return %c0_i32, %c0_i32_0 : i32, i32
  }
  func.func @transform_25(%arg0: i32) -> (i32, i32) {
    %c0_i32 = arith.constant 0 : i32
    %c0_i32_0 = arith.constant 0 : i32
    %c0_i32_1 = arith.constant 0 : i32
    return %c0_i32, %c0_i32_0 : i32, i32
  }
  func.func @transform_26(%arg0: i32) -> (i32, i32) {
    %c0_i32 = arith.constant 0 : i32
    %c0_i32_0 = arith.constant 0 : i32
    %c0_i32_1 = arith.constant 0 : i32
    return %c0_i32, %c0_i32_0 : i32, i32
  }
  func.func @transform_27(%arg0: i32) -> (i32, i32) {
    %c0_i32 = arith.constant 0 : i32
    %c0_i32_0 = arith.constant 0 : i32
    %c0_i32_1 = arith.constant 0 : i32
    return %c0_i32, %c0_i32_0 : i32, i32
  }
  func.func @transform_28(%arg0: i32) -> (i32, i32) {
    %c0_i32 = arith.constant 0 : i32
    %c0_i32_0 = arith.constant 0 : i32
    %c0_i32_1 = arith.constant 0 : i32
    return %c0_i32, %c0_i32_0 : i32, i32
  }
  func.func @transform_29(%arg0: i32) -> (i32, i32) {
    %c0_i32 = arith.constant 0 : i32
    %c0_i32_0 = arith.constant 0 : i32
    %c0_i32_1 = arith.constant 0 : i32
    return %c0_i32, %c0_i32_0 : i32, i32
  }
  func.func @transform_30(%arg0: i32) -> (i32, i32) {
    %c0_i32 = arith.constant 0 : i32
    %c0_i32_0 = arith.constant 0 : i32
    %c0_i32_1 = arith.constant 0 : i32
    return %c0_i32, %c0_i32_0 : i32, i32
  }
  func.func @transform_31(%arg0: i32) -> (i32, i32) {
    %c0_i32 = arith.constant 0 : i32
    %c0_i32_0 = arith.constant 0 : i32
    %c0_i32_1 = arith.constant 0 : i32
    return %c0_i32, %c0_i32_0 : i32, i32
  }
  func.func @transform_32(%arg0: i32) -> (i32, i32) {
    %c0_i32 = arith.constant 0 : i32
    %c0_i32_0 = arith.constant 0 : i32
    %c0_i32_1 = arith.constant 0 : i32
    return %c0_i32, %c0_i32_0 : i32, i32
  }
  func.func @transform_33(%arg0: i32) -> (i32, i32, i32) {
    %c0_i32 = arith.constant 0 : i32
    %c0_i32_0 = arith.constant 0 : i32
    %c0_i32_1 = arith.constant 0 : i32
    return %arg0, %c0_i32, %c0_i32_0 : i32, i32, i32
  }
}

</mosaic_0001>

<bundles_post_ra>
// kernel: run.1
= control target key start
LH: loop header
LB: loop body
LE: loop exit
PB: predicated region body
PF: predicated region fallthrough
CT: control target
= control target key end

     0   :  { %s9771_s6 = smov 1   ;;  %s9772_s10 = smov 2   ;;  %s12414_s0 = inlined_call_operand.smem [shape: u32[34], index: -1, kind: input, shape index: {}] }
   0x1   :  { %s9823_s5 = sld [smem:[%s12414_s0]]   ;;  %s9773_s14 = smov 3  }
   0x2   :  { %s9828_s9 = sld [smem:[%s12414_s0 + %s9771_s6]]   ;;  %s9774_s18 = smov 4  }
   0x3   :  { %s9833_s13 = sld [smem:[%s12414_s0 + %s9772_s10]]   ;;  %s9775_s22 = smov 5  }
   0x4   :  { %s9838_s17 = sld [smem:[%s12414_s0 + %s9773_s14]]   ;;  %s9776_s26 = smov 6  }
   0x5   :  { %s9843_s21 = sld [smem:[%s12414_s0 + %s9774_s18]]   ;;  %s9777_s30 = smov 7  }
   0x6   :  { %s9848_s25 = sld [smem:[%s12414_s0 + %s9775_s22]]   ;;  %s9778_s4 = smov 8  }
   0x7   :  { %s9853_s29 = sld [smem:[%s12414_s0 + %s9776_s26]]   ;;  %s9779_s10 = smov 9  }
   0x8   :  { %s9858_s3 = sld [smem:[%s12414_s0 + %s9777_s30]]   ;;  %s9780_s15 = smov 10  }
   0x9   :  { %s9863_s8 = sld [smem:[%s12414_s0 + %s9778_s4]]   ;;  %s9781_s20 = smov 11  }
   0xa   :  { %s9868_s14 = sld [smem:[%s12414_s0 + %s9779_s10]]   ;;  %s9782_s26 = smov 12  }
   0xb   :  { %s9873_s19 = sld [smem:[%s12414_s0 + %s9780_s15]]   ;;  %s9783_s1 = smov 13  }
   0xc   :  { %s9878_s24 = sld [smem:[%s12414_s0 + %s9781_s20]]   ;;  %s9784_s7 = smov 14  }
   0xd   :  { %s9883_s30 = sld [smem:[%s12414_s0 + %s9782_s26]]   ;;  %s9785_s15 = smov 15  }
   0xe   :  { %s9888_s6 = sld [smem:[%s12414_s0 + %s9783_s1]]   ;;  %s9786_s22 = smov 16  }
   0xf   :  { %s9893_s12 = sld [smem:[%s12414_s0 + %s9784_s7]]   ;;  %s9787_s28 = smov 17  }
  0x10   :  { %s9898_s20 = sld [smem:[%s12414_s0 + %s9785_s15]]   ;;  %s9788_s7 = smov 18  }
  0x11   :  { %s9903_s27 = sld [smem:[%s12414_s0 + %s9786_s22]]   ;;  %s9789_s15 = smov 19  }
  0x12   :  { %s9908_s4 = sld [smem:[%s12414_s0 + %s9787_s28]]   ;;  %s9790_s22 = smov 20  }
  0x13   :  { %s9791_s28 = smov 21  }
  0x15   :  { %12458 = sst [smem:[#allocation5_spill]] %s9893_s12 }
  0x16   :  { %12459 = sst [smem:[#allocation6_spill]] %s9898_s20 }
  0x17   :  { %12460 = sst [smem:[#allocation7_spill]] %s9903_s27 }
  0x18   :  { %12461 = sst [smem:[#allocation8_spill]] %s9908_s4 }
  0x19   :  { %s9913_s12 = sld [smem:[%s12414_s0 + %s9788_s7]]   ;;  %s9792_s7 = smov 22  }
  0x1a   :  { %s9918_s20 = sld [smem:[%s12414_s0 + %s9789_s15]]   ;;  %s9793_s15 = smov 23  }
  0x1b   :  { %s9923_s27 = sld [smem:[%s12414_s0 + %s9790_s22]]   ;;  %s9794_s22 = smov 24  }
  0x1c   :  { %s9928_s4 = sld [smem:[%s12414_s0 + %s9791_s28]]   ;;  %s9795_s28 = smov 25  }
  0x1f   :  { %12462 = sst [smem:[#allocation9_spill]] %s9913_s12 }
  0x20   :  { %12463 = sst [smem:[#allocation10_spill]] %s9918_s20 }
  0x21   :  { %12464 = sst [smem:[#allocation11_spill]] %s9923_s27 }
  0x22   :  { %12465 = sst [smem:[#allocation12_spill]] %s9928_s4 }
  0x23   :  { %s9933_s12 = sld [smem:[%s12414_s0 + %s9792_s7]]   ;;  %s9796_s7 = smov 26  }
  0x24   :  { %s9938_s20 = sld [smem:[%s12414_s0 + %s9793_s15]]   ;;  %s9797_s15 = smov 27  }
  0x25   :  { %s9943_s27 = sld [smem:[%s12414_s0 + %s9794_s22]]   ;;  %s9798_s22 = smov 28  }
  0x26   :  { %s9948_s4 = sld [smem:[%s12414_s0 + %s9795_s28]]   ;;  %s9799_s28 = smov 29  }
  0x29   :  { %12466 = sst [smem:[#allocation13_spill]] %s9933_s12 }
  0x2a   :  { %12467 = sst [smem:[#allocation14_spill]] %s9938_s20 }
  0x2b   :  { %12468 = sst [smem:[#allocation15_spill]] %s9943_s27 }
  0x2c   :  { %12469 = sst [smem:[#allocation16_spill]] %s9948_s4 }
  0x2d   :  { %s9953_s12 = sld [smem:[%s12414_s0 + %s9796_s7]]   ;;  %s9800_s7 = smov 30  }
  0x2e   :  { %s9958_s20 = sld [smem:[%s12414_s0 + %s9797_s15]]   ;;  %s9801_s15 = smov 31  }
  0x2f   :  { %s9963_s27 = sld [smem:[%s12414_s0 + %s9798_s22]]   ;;  %s9802_s22 = smov 32  }
  0x30   :  { %s9968_s4 = sld [smem:[%s12414_s0 + %s9799_s28]]   ;;  %s9803_s28 = smov 33  }
  0x33   :  { %12470 = sst [smem:[#allocation17_spill]] %s9953_s12 }
  0x34   :  { %12471 = sst [smem:[#allocation18_spill]] %s9958_s20 }
  0x35   :  { %12472 = sst [smem:[#allocation19_spill]] %s9963_s27 }
  0x36   :  { %12473 = sst [smem:[#allocation20_spill]] %s9968_s4 }
  0x37   :  { %s9973_s12 = sld [smem:[%s12414_s0 + %s9800_s7]]  }
  0x38   :  { %s9978_s20 = sld [smem:[%s12414_s0 + %s9801_s15]]  }
  0x39   :  { %s9983_s27 = sld [smem:[%s12414_s0 + %s9802_s22]]  }
  0x3a   :  { %s9988_s4 = sld [smem:[%s12414_s0 + %s9803_s28]]  }
  0x3b   :  { %v162_v0 = vld [vmem:[%s9833_s13] sm:$0x3]  ;;  %vm177_vm0 = vcmask 1041408   ;;  %vm397_vm1 = vcmask 1040384   ;;  %v9804_v2 = vmov 65535   ;;  %v141_v5 = vld [vmem:[%s9823_s5 + $0x8] sm:$0xff] }
  0x3c   :  { %v9992_v1 = vld [vmem:[%s9823_s5] sm:$0xff]  ;;  %9094 = vmatprep.subr.msk.bf16.mxu0 %vm177_vm0, %v162_v0  ;;  %v398_v3 = vsel %vm397_vm1, 4294967295, %v9804_v2  ;;  %v179_v4 = vsel %vm177_vm0, %v162_v0, 0  ;;  %vm170_vm2 = vcmask 31744   ;;  %v9996_v6 = vld [vmem:[%s9823_s5 + $0x10] sm:$0xff]  ;;  %v143_v7 = vld [vmem:[%s9823_s5 + $0x18] sm:$0xff] }
  0x3d   :  { %v399_v8 = vsel %vm177_vm0, %v398_v3, 0  ;;  %8203 = vmatpush3.bf16.msra.mxu0 %v179_v4  ;;  %v160_v9 = vpack.c.bf16 %v141_v5, %v9992_v1  ;;  %v161_v10 = vpack.c.bf16 %v143_v7, %v9996_v6  ;;  %v364_v11 = vld [vmem:[%s9853_s29] sm:$0x3]  ;;  %v10006_v13 = vld [vmem:[%s9828_s9 + $0x8] sm:$0xff]  ;;  %vm372_vm3 = vcmask 23552   ;;  %v10011_v16 = vld [vmem:[%s9828_s9 + $0x10] sm:$0xff] }
  0x3e   :  { %v10003_v12 = vld [vmem:[%s9828_s9] sm:$0xff]  ;;  %v401_v14 = vand.u32 %v399_v8, %v364_v11  ;;  %v10014_v17 = vld [vmem:[%s9828_s9 + $0x18] sm:$0xff]  ;;  %v10021_v19 = vld [vmem:[%s9828_s9 + $0x28] sm:$0xff]  ;;  %v12421_v43 = vmov 0   ;;  %v9806_v44 = vmov 1  }
  0x3f   :  { %v356_v15 = vpack.c.bf16 %v10006_v13, %v10003_v12  ;;  %8204 = vmatprep.mubr.msk.bf16.mxu0 %vm170_vm2, %v160_v9  ;;  %v10017_v18 = vld [vmem:[%s9828_s9 + $0x20] sm:$0xff]  ;;  %v9196_v21 = vld [vmem:[%s9843_s21 + $0x8] sm:$0xff]   ;;  %v357_v22 = vpack.c.bf16 %v10014_v17, %v10011_v16  ;;  %v9197_v24 = vld [vmem:[%s9843_s21 + $0x10] sm:$0xff]   ;;  %9174 = vset.pattern.permute.xlu1 %v12421_v43 }
  0x40   :  { %8205 = vmatmul.mubr.msk.bf16.vlgmr.msra.gmra.mrb[0].mxu0 %vm170_vm2, %v161_v10  ;;  %8228 = vmatprep.subr.bf16.mxu0 %v401_v14  ;;  %v9195_v20 = vld [vmem:[%s9843_s21] sm:$0xff]   ;;  %v358_v23 = vpack.c.bf16 %v10021_v19, %v10017_v18  ;;  %v10031_v25 = vld [vmem:[%s9828_s9 + $0x30] sm:$0xff]  ;;  %v10034_v26 = vld [vmem:[%s9828_s9 + $0x38] sm:$0xff] }
  0x41   :  { %8229 = vmatpush3.bf16.msra.mxu0 %v401_v14  ;;  %8230 = vmatprep.mubr.msk.bf16.mxu0 %vm372_vm3, %v356_v15  ;;  %v10038_v27 = vld [vmem:[%s9828_s9 + $0x40] sm:$0xff]  ;;  %v10041_v28 = vld [vmem:[%s9828_s9 + $0x48] sm:$0xff]  ;;  %v9198_v29 = vld [vmem:[%s9843_s21 + $0x18] sm:$0xff]   ;;  %v359_v30 = vpack.c.bf16 %v10034_v26, %v10031_v25 }
  0x42   :  { %8208 = vmatprep.subr.bf16.mxu1 %v9195_v20  ;;  %v9199_v31 = vld [vmem:[%s9843_s21 + $0x20] sm:$0xff]   ;;  %v360_v32 = vpack.c.bf16 %v10041_v28, %v10038_v27  ;;  %v10051_v33 = vld [vmem:[%s9828_s9 + $0x50] sm:$0xff]  ;;  %v10054_v34 = vld [vmem:[%s9828_s9 + $0x58] sm:$0xff]  ;;  %9173 = vset.pattern.permute.xlu0 %v12421_v43 }
  0x43   :  { %8209 = vmatpush3.bf16.msra.mxu1 %v9195_v20  ;;  %v10058_v35 = vld [vmem:[%s9828_s9 + $0x60] sm:$0xff]  ;;  %v10061_v36 = vld [vmem:[%s9828_s9 + $0x68] sm:$0xff]  ;;  %v361_v38 = vpack.c.bf16 %v10054_v34, %v10051_v33  ;;  %v10070_v40 = vld [vmem:[%s9828_s9 + $0x70] sm:$0xff]  ;;  %694 = vperm.xlu1 %9174, %v10003_v12  }
  0x44   :  { %8210 = vmatprep.subr.bf16.mxu1 %v9196_v21  ;;  %v9200_v37 = vld [vmem:[%s9843_s21 + $0x28] sm:$0xff]   ;;  %v362_v39 = vpack.c.bf16 %v10061_v36, %v10058_v35  ;;  %v10073_v41 = vld [vmem:[%s9828_s9 + $0x78] sm:$0xff]  ;;  %775 = vperm.xlu0 %9173, %v9992_v1  }
  0x45   :  { %v363_v42 = vpack.c.bf16 %v10073_v41, %v10070_v40 }
  0x47   :  { %8211 = vmatpush3.bf16.msra.mxu1 %v9196_v21  ;;  %699 = vperm.xlu1 %9174, %v10006_v13  }
  0x48   :  { %8231 = vmatmul.mubr.msk.bf16.vlgmr.msra.gmra.mrb[4].mxu0 %vm372_vm3, %v357_v22  ;;  %8212 = vmatprep.subr.bf16.mxu1 %v9197_v24 }
  0x49   :  { %8234 = vmatprep.mubr.msk.bf16.mxu0 %vm372_vm3, %v358_v23  ;;  %709 = vperm.xlu0 %9173, %v10014_v17  }
  0x4b   :  { %8213 = vmatpush3.bf16.msra.mxu1 %v9197_v24  ;;  %9175 = vset.pattern.permute.xlu1 %v9806_v44 }
  0x4c   :  { %8214 = vmatprep.subr.bf16.mxu1 %v9198_v29  ;;  %859 = vperm.xlu1 %9175, %v10003_v12  }
  0x4d   :  { %9177 = vset.pattern.permute.xlu0 %v9806_v44 }
  0x4e   :  { %923 = vperm.xlu0 %9177, %v9992_v1  }
  0x4f   :  { %8215 = vmatpush3.bf16.msra.mxu1 %v9198_v29 }
  0x50   :  { %8235 = vmatmul.mubr.msk.bf16.gmra.mrb[8].mxu0 %vm372_vm3, %v359_v30  ;;  %8216 = vmatprep.subr.bf16.mxu1 %v9199_v31 }
  0x51   :  { %8238 = vmatprep.mubr.msk.bf16.mxu0 %vm372_vm3, %v360_v32 }
  0x53   :  { %8217 = vmatpush3.bf16.msra.mxu1 %v9199_v31 }
  0x54   :  { %8218 = vmatprep.subr.bf16.mxu1 %v9200_v37 }
  0x57   :  { %8219 = vmatpush3.bf16.msra.mxu1 %v9200_v37 }
  0x58   :  { %8239 = vmatmul.mubr.msk.bf16.gmra.mrb[12].mxu0 %vm372_vm3, %v361_v38 }
  0x59   :  { %8242 = vmatprep.mubr.msk.bf16.mxu0 %vm372_vm3, %v362_v39 }
  0x60   :  { %8243 = vmatmul.mubr.msk.bf16.gmra.mrb[16].mxu0 %vm372_vm3, %v363_v42 }
  0x61   :  { %72 = vsyncpa [#allocation3], 0  ;;  %9176 = vset.pattern.permute.xlu1 %v12421_v43  ;;  %863 = vperm.xlu0 %9177, %v10006_v13   ;;  %v9201_v45 = vld [vmem:[%s9843_s21 + $0x30] sm:$0xff]   ;;  %v9202_v46 = vld [vmem:[%s9843_s21 + $0x38] sm:$0xff]   ;;  %v780_v56 = vlaneseq  ;;  %vm1056_vm4 = vcmask 64512   ;;  %vm1069_vm5 = vcmask 1043456  }
  0x62   :  { %704 = vperm.xlu1 %9176, %v10011_v16   ;;  %8220 = vmatprep.subr.bf16.mxu1 %v9201_v45  ;;  %v9203_v47 = vld [vmem:[%s9863_s8] sm:$0xff]   ;;  %v9204_v48 = vld [vmem:[%s9863_s8 + $0x8] sm:$0xff]   ;;  %v9205_v49 = vld [vmem:[%s9863_s8 + $0x10] sm:$0xff]   ;;  %vm1859_vm6 = vcmask 261120   ;;  %vm2038_vm7 = vcmask 523264   ;;  %s9807_s0 = smov 96  }
  0x63   :  { %8221 = vmatpush3.bf16.msra.mxu1 %v9201_v45  ;;  %8246 = vmatprep.subr.bf16.mxu0 %v9203_v47  ;;  %v9206_v50 = vld [vmem:[%s9863_s8 + $0x18] sm:$0xff]   ;;  %v9207_v51 = vld [vmem:[%s9863_s8 + $0x20] sm:$0xff]   ;;  %v9208_v52 = vld [vmem:[%s9863_s8 + $0x28] sm:$0xff]   ;;  %v781_v59 = vand.u32 127, %v780_v56  ;;  %v783_v60 = vshrl.u32 %v780_v56, 7  ;;  %s9808_s5 = smov 64  }
  0x64   :  { %8222 = vmatprep.subr.bf16.mxu1 %v9202_v46  ;;  %8247 = vmatpush3.bf16.msra.mxu0 %v9203_v47  ;;  %v9209_v53 = vld [vmem:[%s9863_s8 + $0x30] sm:$0xff]   ;;  %v9210_v54 = vld [vmem:[%s9863_s8 + $0x38] sm:$0xff]   ;;  %v7555_v61 = vld [vmem:[%s9838_s17] ss:$0 sm:$0xff]  ;;  %s9809_s9 = smov 32   ;;  %s12554_s13 = sld [smem:[#allocation7_spill]] }
  0x65   :  { %875 = vperm.xlu0 %9177, %v10017_v18   ;;  %8248 = vmatprep.subr.bf16.mxu0 %v9204_v48  ;;  %v10151_v62 = vsub.s32 %v781_v59, %v783_v60  ;;  %s12555_s17 = sld [smem:[#allocation5_spill]]  ;;  %s12556_s21 = sld [smem:[#allocation6_spill]]  ;;  %vm9811_vm8 = vmmov 0  }
  0x66   :  { %9178 = vset.pattern.permute.xlu1 %v9806_v44  ;;  %s12558_s29 = sld [smem:[#allocation8_spill]]  ;;  %s12569_s7 = sld [smem:[#allocation17_spill]] }
  0x67   :  { %867 = vperm.xlu1 %9178, %v10011_v16   ;;  %8223 = vmatpush3.bf16.msra.mxu1 %v9202_v46  ;;  %s12563_s8 = sld [smem:[#allocation16_spill]]  ;;  %s12570_s10 = sld [smem:[#allocation20_spill]] }
  0x68   :  { %8249 = vmatpush3.bf16.msra.mxu0 %v9204_v48  ;;  %s12571_s11 = sld [smem:[#allocation18_spill]]  ;;  %s12572_s15 = sld [smem:[#allocation19_spill]] }
  0x69   :  { %891 = vperm.xlu0 %9177, %v10038_v27   ;;  %8250 = vmatprep.subr.bf16.mxu0 %v9205_v49  ;;  %s9812_s16 = smov [#allocation2]  }
  0x6a   :  { %s7511_s18 = sshll.u32 %s9812_s16, 4  ;;  %s7512_s18 = int_to_ptr.vmem [resolvable:$true] %s7511_s18 }
  0x6b   :  { %871 = vperm.xlu1 %9178, %v10014_v17   ;;  %v10160_v17 = vld [vmem:[%s9858_s3] ss:$0 sm:$0xff]  ;;  %s12559_s3 = sld [smem:[#allocation10_spill]]  ;;  %p9752_p1 = scmp.lt.s32.totalorder %s7512_s18, %s7512_s18 }
  0x6c   :  { %8251 = vmatpush3.bf16.msra.mxu0 %v9205_v49 }
  0x6d   :  { %9184 = vset.pattern.permute.xlu0 %v12421_v43  ;;  %8252 = vmatprep.subr.bf16.mxu0 %v9206_v50 }
  0x6e   :  { %714 = vperm.xlu0 %9184, %v10017_v18  }
  0x6f   :  { %9179 = vset.pattern.permute.xlu1 %v12421_v43 }
  0x70   :  { %719 = vperm.xlu1 %9179, %v10021_v19   ;;  %8253 = vmatpush3.bf16.msra.mxu0 %v9206_v50 }
  0x71   :  { %8254 = vmatprep.subr.bf16.mxu0 %v9207_v51 }
  0x72   :  { %729 = vperm.xlu0 %9184, %v10034_v26  }
  0x74   :  { %9180 = vset.pattern.permute.xlu1 %v9806_v44  ;;  %8255 = vmatpush3.bf16.msra.mxu0 %v9207_v51 }
  0x75   :  { %879 = vperm.xlu1 %9180, %v10021_v19   ;;  %8256 = vmatprep.subr.bf16.mxu0 %v9208_v52 }
  0x76   :  { %778 = vperm.xlu0 %9184, %v9996_v6  }
  0x78   :  { %8257 = vmatpush3.bf16.msra.mxu0 %v9208_v52 }
  0x79   :  { %9181 = vset.pattern.permute.xlu1 %v12421_v43  ;;  %8258 = vmatprep.subr.bf16.mxu0 %v9209_v53 }
  0x7a   :  { %724 = vperm.xlu1 %9181, %v10031_v25   ;;  %734 = vperm.xlu0 %9184, %v10038_v27  }
  0x7c   :  { %8259 = vmatpush3.bf16.msra.mxu0 %v9209_v53 }
  0x7d   :  { %8260 = vmatprep.subr.bf16.mxu0 %v9210_v54 }
  0x7e   :  { %9182 = vset.pattern.permute.xlu1 %v9806_v44  ;;  %749 = vperm.xlu0 %9184, %v10054_v34  }
  0x7f   :  { %883 = vperm.xlu1 %9182, %v10031_v25  }
  0x80   :  { %8261 = vmatpush3.bf16.msra.mxu0 %v9210_v54 }
  0x82   :  { %9189 = vset.pattern.permute.xlu0 %v9806_v44 }
  0x83   :  { %887 = vperm.xlu1 %9182, %v10034_v26   ;;  %907 = vperm.xlu0 %9189, %v10058_v35  }
  0x87   :  { %926 = vperm.xlu1 %9182, %v9996_v6   ;;  %9190 = vset.pattern.permute.xlu0 %v12421_v43 }
  0x88   :  { %754 = vperm.xlu0 %9190, %v10058_v35  }
  0x8b   :  { %9183 = vset.pattern.permute.xlu1 %v12421_v43 }
  0x8c   :  { %739 = vperm.xlu1 %9183, %v10041_v28   ;;  %769 = vperm.xlu0 %9190, %v10073_v41  }
  0x90   :  { %9185 = vset.pattern.permute.xlu1 %v9806_v44  ;;  %9194 = vset.pattern.permute.xlu0 %v9806_v44 }
  0x91   :  { %895 = vperm.xlu1 %9185, %v10041_v28  }
  0x95   :  { %9186 = vset.pattern.permute.xlu1 %v12421_v43 }
  0x96   :  { %744 = vperm.xlu1 %9186, %v10051_v33  }
  0x9a   :  { %9187 = vset.pattern.permute.xlu1 %v9806_v44 }
  0x9b   :  { %899 = vperm.xlu1 %9187, %v10051_v33  }
  0x9f   :  { %903 = vperm.xlu1 %9187, %v10054_v34  }
  0xa3   :  { %9188 = vset.pattern.permute.xlu1 %v12421_v43 }
  0xa4   :  { %759 = vperm.xlu1 %9188, %v10061_v36  }
  0xa8   :  { %9191 = vset.pattern.permute.xlu1 %v9806_v44 }
  0xa9   :  { %911 = vperm.xlu1 %9191, %v10061_v36  }
  0xad   :  { %9192 = vset.pattern.permute.xlu1 %v12421_v43 }
  0xae   :  { %764 = vperm.xlu1 %9192, %v10070_v40  }
  0xb2   :  { %9193 = vset.pattern.permute.xlu1 %v9806_v44 }
  0xb3   :  { %915 = vperm.xlu1 %9193, %v10070_v40  }
  0xb7   :  { %919 = vperm.xlu1 %9193, %v10073_v41  }
  0xc2   :  { %v695_v58 = vpop.permute.xlu1 %694 }
  0xc3   :  { %v776_v55 = vpop.permute.xlu0 %775 }
  0xc4   :  { %v10154_v6 = vrot.slane %v776_v55, %v10151_v62 }
  0xc6   :  { %v700_v0 = vpop.permute.xlu1 %699  ;;  %v810_v18 = vsub.f32 %v695_v58, %v10154_v6 }
  0xc7   :  { %v811_v21 = vsub.f32 %v700_v0, %v10154_v6 }
  0xc8   :  { %v10148_v57 = vpop.permute.xlu0 %709  ;;  %v826_v29 = vmul.f32 %v810_v18, %v810_v18 }
  0xc9   :  { %v827_v34 = vmul.f32 %v811_v21, %v811_v21 }
  0xcb   :  { %v860_v14 = vpop.permute.xlu1 %859 }
  0xcd   :  { %v924_v63 = vpop.permute.xlu0 %923 }
  0xce   :  { %v10157_v7 = vrot.slane %v924_v63, %v10151_v62 }
  0xd0   :  { %v950_v19 = vsub.f32 %v860_v14, %v10157_v7 }
  0xd2   :  { %v966_v30 = vmul.f32 %v950_v19, %v950_v19 }
  0xd4   :  { %v982_v40 = vadd.f32 %v966_v30, %v826_v29 }
  0xd6   :  { %v998_v50 = vmul.f32 -2.0, %v982_v40 }
  0xd8   :  { %v1014_v60 = vmul.f32 1.442695, %v998_v50 }
  0xda   :  { %9323 = vpow2.f32 %v1014_v60 }
  0xe0   :  { %v864_v11 = vpop.permute.xlu0 %863 }
  0xe1   :  { %v951_v22 = vsub.f32 %v864_v11, %v10157_v7 }
  0xe3   :  { %v967_v35 = vmul.f32 %v951_v22, %v951_v22 }
  0xe5   :  { %v983_v42 = vadd.f32 %v967_v35, %v827_v34  ;;  %v705_v35 = vpop.permute.xlu1 %704 }
  0xe7   :  { %v999_v54 = vmul.f32 -2.0, %v983_v42 }
  0xe9   :  { %v1016_v63 = vmul.f32 1.442695, %v999_v54 }
  0xeb   :  { %9325 = vpow2.f32 %v1016_v63  ;;  %v812_v63 = vsub.f32 %v705_v35, %v10154_v6 }
 0x113   :  { %v8206_v1 = vpop.f32.mrb[0].mxu0 }
 0x114   :  { %v224_v2 = vadd.f32 %v8206_v1, %v7555_v61  ;;  %v215_v3 = vpop.f32.mrb[1].mxu0 }
 0x115   :  { %v216_v4 = vadd.f32 %v7555_v61, %v215_v3  ;;  %v8207_v5 = vpop.f32.mrb[2].mxu0 }
 0x116   :  { %v227_v8 = vadd.f32 %v8207_v5, %v7555_v61  ;;  %v218_v9 = vpop.f32.mrb[3].mxu0  ;;  %v232_v12 = vmax.f32 %v224_v2, 0.0 }
 0x117   :  { %v219_v10 = vadd.f32 %v7555_v61, %v218_v9  ;;  %v230_v15 = vmax.f32 %v216_v4, 0.0 }
 0x118   :  { %v233_v13 = vmax.f32 %v227_v8, 0.0 }
 0x119   :  { %v231_v16 = vmax.f32 %v219_v10, 0.0 }
 0x11a   :  { %v235_v20 = vpack.c.bf16 %v233_v13, %v232_v12 }
 0x11b   :  { %v234_v23 = vpack.c.bf16 %v231_v16, %v230_v15  ;;  %v8232_v24 = vpop.f32.mrb[4].mxu0 }
 0x11c   :  { %v446_v25 = vadd.f32 %v8232_v24, %v10160_v17  ;;  %v437_v26 = vpop.f32.mrb[5].mxu0 }
 0x11d   :  { %8224 = vmatprep.mubr.bf16.mxu1 %v234_v23  ;;  %v438_v27 = vadd.f32 %v10160_v17, %v437_v26  ;;  %v8233_v28 = vpop.f32.mrb[6].mxu0  ;;  %v9324_v26 = vpop.eup %9323 }
 0x11e   :  { %8225 = vmatmul.mubr.bf16.vlgmr.msra.gmra.mrb[0].mxu1 %v235_v20  ;;  %v502_v31 = vmax.f32 %v446_v25, 0.0  ;;  %v449_v32 = vadd.f32 %v8233_v28, %v10160_v17  ;;  %v440_v33 = vpop.f32.mrb[7].mxu0  ;;  %v9326_v29 = vpop.eup %9325 }
 0x11f   :  { %v500_v36 = vmax.f32 %v438_v27, 0.0  ;;  %v441_v37 = vadd.f32 %v10160_v17, %v440_v33  ;;  %1657 = vmatprep.mubr.bf16.mxu1 %v12421_v43  ;;  %v1046_v34 = vpack.c.bf16 %v9326_v29, %v9324_v26 }
 0x120   :  { %v503_v38 = vmax.f32 %v449_v32, 0.0 }
 0x121   :  { %v501_v39 = vmax.f32 %v441_v37, 0.0 }
 0x122   :  { %v517_v41 = vpack.c.bf16 %v503_v38, %v502_v31 }
 0x123   :  { %v516_v44 = vpack.c.bf16 %v501_v39, %v500_v36  ;;  %v8236_v45 = vpop.f32.mrb[8].mxu0  ;;  %v868_v36 = vpop.permute.xlu1 %867 }
 0x124   :  { %v462_v46 = vadd.f32 %v8236_v45, %v10160_v17  ;;  %v453_v47 = vpop.f32.mrb[9].mxu0  ;;  %v876_v45 = vpop.permute.xlu0 %875 }
 0x125   :  { %v454_v48 = vadd.f32 %v10160_v17, %v453_v47  ;;  %v8237_v49 = vpop.f32.mrb[10].mxu0  ;;  %8262 = vmatprep.mubr.bf16.mxu0 %v516_v44  ;;  %v954_v54 = vsub.f32 %v876_v45, %v10157_v7 }
 0x126   :  { %v506_v51 = vmax.f32 %v462_v46, 0.0  ;;  %v465_v52 = vadd.f32 %v8237_v49, %v10160_v17  ;;  %v456_v53 = vpop.f32.mrb[11].mxu0  ;;  %8263 = vmatmul.mubr.bf16.vlgmr.msra.gmra.mrb[20].mxu0 %v517_v41 }
 0x127   :  { %v504_v55 = vmax.f32 %v454_v48, 0.0  ;;  %v457_v56 = vadd.f32 %v10160_v17, %v456_v53  ;;  %v872_v37 = vpop.permute.xlu1 %871  ;;  %v970_v60 = vmul.f32 %v954_v54, %v954_v54 }
 0x128   :  { %v507_v58 = vmax.f32 %v465_v52, 0.0  ;;  %v892_v47 = vpop.permute.xlu0 %891 }
 0x129   :  { %v505_v59 = vmax.f32 %v457_v56, 0.0 }
 0x12a   :  { %v519_v61 = vpack.c.bf16 %v507_v58, %v506_v51 }
 0x12b   :  { %v518_v0 = vpack.c.bf16 %v505_v59, %v504_v55  ;;  %v8240_v1 = vpop.f32.mrb[12].mxu0  ;;  %v720_v38 = vpop.permute.xlu1 %719  ;;  %v813_v59 = vsub.f32 %v10148_v57, %v10154_v6 }
 0x12c   :  { %v478_v2 = vadd.f32 %v8240_v1, %v10160_v17  ;;  %v469_v3 = vpop.f32.mrb[13].mxu0  ;;  %v715_v49 = vpop.permute.xlu0 %714 }
 0x12d   :  { %v470_v4 = vadd.f32 %v10160_v17, %v469_v3  ;;  %v8241_v5 = vpop.f32.mrb[14].mxu0  ;;  %8266 = vmatprep.mubr.bf16.mxu0 %v518_v0  ;;  %v814_v55 = vsub.f32 %v715_v49, %v10154_v6  ;;  %v952_v0 = vsub.f32 %v868_v36, %v10157_v7  ;;  %v953_v3 = vsub.f32 %v872_v37, %v10157_v7 }
 0x12e   :  { %v510_v8 = vmax.f32 %v478_v2, 0.0  ;;  %v481_v9 = vadd.f32 %v8241_v5, %v10160_v17  ;;  %v472_v10 = vpop.f32.mrb[15].mxu0  ;;  %8267 = vmatmul.mubr.bf16.gmra.mrb[24].mxu0 %v519_v61 }
 0x12f   :  { %v508_v11 = vmax.f32 %v470_v4, 0.0  ;;  %v473_v12 = vadd.f32 %v10160_v17, %v472_v10  ;;  %v880_v39 = vpop.permute.xlu1 %879  ;;  %v830_v61 = vmul.f32 %v814_v55, %v814_v55  ;;  %v815_v4 = vsub.f32 %v720_v38, %v10154_v6 }
 0x130   :  { %v511_v13 = vmax.f32 %v481_v9, 0.0  ;;  %v730_v51 = vpop.permute.xlu0 %729  ;;  %v955_v5 = vsub.f32 %v880_v39, %v10157_v7 }
 0x131   :  { %v509_v14 = vmax.f32 %v473_v12, 0.0  ;;  %v986_v57 = vadd.f32 %v970_v60, %v830_v61  ;;  %v817_v9 = vsub.f32 %v730_v51, %v10154_v6 }
 0x132   :  { %v521_v15 = vpack.c.bf16 %v511_v13, %v510_v8  ;;  %v829_v8 = vmul.f32 %v813_v59, %v813_v59 }
 0x133   :  { %v520_v16 = vpack.c.bf16 %v509_v14, %v508_v11  ;;  %v8244_v18 = vpop.f32.mrb[16].mxu0  ;;  %v725_v40 = vpop.permute.xlu1 %724  ;;  %v828_v14 = vmul.f32 %v812_v63, %v812_v63 }
 0x134   :  { %v494_v19 = vadd.f32 %v8244_v18, %v10160_v17  ;;  %v485_v20 = vpop.f32.mrb[17].mxu0  ;;  %v779_v53 = vpop.permute.xlu0 %778  ;;  %v816_v10 = vsub.f32 %v725_v40, %v10154_v6 }
 0x135   :  { %v486_v21 = vadd.f32 %v10160_v17, %v485_v20  ;;  %v8245_v22 = vpop.f32.mrb[18].mxu0  ;;  %8270 = vmatprep.mubr.bf16.mxu0 %v520_v16  ;;  %v10194_v2 = vrot.slane %v779_v53, %v10151_v62  ;;  %v831_v20 = vmul.f32 %v815_v4, %v815_v4 }
 0x136   :  { %v514_v23 = vmax.f32 %v494_v19, 0.0  ;;  %v497_v24 = vadd.f32 %v8245_v22, %v10160_v17  ;;  %v488_v25 = vpop.f32.mrb[19].mxu0  ;;  %8271 = vmatmul.mubr.bf16.gmra.mrb[28].mxu0 %v521_v15  ;;  %v968_v15 = vmul.f32 %v952_v0, %v952_v0  ;;  %v969_v19 = vmul.f32 %v953_v3, %v953_v3 }
 0x137   :  { %v512_v27 = vmax.f32 %v486_v21, 0.0  ;;  %v489_v28 = vadd.f32 %v10160_v17, %v488_v25  ;;  %v884_v41 = vpop.permute.xlu1 %883  ;;  %v971_v21 = vmul.f32 %v955_v5, %v955_v5  ;;  %v1002_v22 = vmul.f32 -2.0, %v986_v57 }
 0x138   :  { %v515_v30 = vmax.f32 %v497_v24, 0.0  ;;  %v735_v58 = vpop.permute.xlu0 %734  ;;  %v956_v11 = vsub.f32 %v884_v41, %v10157_v7  ;;  %v833_v25 = vmul.f32 %v817_v9, %v817_v9  ;;  %v984_v6 = vadd.f32 %v968_v15, %v828_v14 }
 0x139   :  { %v513_v31 = vmax.f32 %v489_v28, 0.0  ;;  %v818_v18 = vsub.f32 %v735_v58, %v10194_v2  ;;  %v985_v29 = vadd.f32 %v969_v19, %v829_v8  ;;  %v1022_v35 = vmul.f32 1.442695, %v1002_v22 }
 0x13a   :  { %v523_v32 = vpack.c.bf16 %v515_v30, %v514_v23  ;;  %v832_v23 = vmul.f32 %v816_v10, %v816_v10  ;;  %v972_v24 = vmul.f32 %v956_v11, %v956_v11  ;;  %v1000_v37 = vmul.f32 -2.0, %v984_v6 }
 0x13b   :  { %v522_v33 = vpack.c.bf16 %v513_v31, %v512_v27  ;;  %v888_v42 = vpop.permute.xlu1 %887  ;;  %v834_v28 = vmul.f32 %v818_v18, %v818_v18  ;;  %v1001_v40 = vmul.f32 -2.0, %v985_v29  ;;  %9327 = vpow2.f32 %v1022_v35 }
 0x13c   :  { %v750_v13 = vpop.permute.xlu0 %749  ;;  %v1018_v58 = vmul.f32 1.442695, %v1000_v37 }
 0x13d   :  { %8274 = vmatprep.mubr.bf16.mxu0 %v522_v33  ;;  %v821_v36 = vsub.f32 %v750_v13, %v10194_v2  ;;  %v1020_v61 = vmul.f32 1.442695, %v1001_v40 }
 0x13e   :  { %8275 = vmatmul.mubr.bf16.gmra.mrb[32].mxu0 %v523_v32  ;;  %v987_v32 = vadd.f32 %v971_v21, %v831_v20  ;;  %9329 = vpow2.f32 %v1018_v58  ;;  %v7558_v20 = vld [vmem:[%s9848_s25] ss:$0 sm:$0xff]  ;;  %s12557_s25 = sld [smem:[#allocation9_spill]] }
 0x13f   :  { %8280 = vmatprep.mubr.msk.bf16.mxu0 %vm1056_vm4, %v1046_v34  ;;  %v927_v17 = vpop.permute.xlu1 %926  ;;  %v988_v34 = vadd.f32 %v972_v24, %v832_v23  ;;  %v837_v53 = vmul.f32 %v821_v36, %v821_v36  ;;  %9331 = vpow2.f32 %v1020_v61 }
 0x140   :  { %v10191_v1 = vrot.slane %v927_v17, %v10151_v62  ;;  %v957_v62 = vsub.f32 %v888_v42, %v10157_v7  ;;  %v908_v7 = vpop.permute.xlu0 %907  ;;  %v1003_v17 = vmul.f32 -2.0, %v987_v32 }
 0x141   :  { %v1004_v51 = vmul.f32 -2.0, %v988_v34 }
 0x142   :  { %v958_v16 = vsub.f32 %v892_v47, %v10191_v1  ;;  %v973_v26 = vmul.f32 %v957_v62, %v957_v62  ;;  %v1024_v0 = vmul.f32 1.442695, %v1003_v17 }
 0x143   :  { %v740_v44 = vpop.permute.xlu1 %739  ;;  %v1026_v8 = vmul.f32 1.442695, %v1004_v51 }
 0x144   :  { %v974_v27 = vmul.f32 %v958_v16, %v958_v16  ;;  %v819_v33 = vsub.f32 %v740_v44, %v10194_v2  ;;  %v989_v38 = vadd.f32 %v973_v26, %v833_v25  ;;  %v755_v55 = vpop.permute.xlu0 %754  ;;  %9333 = vpow2.f32 %v1024_v0 }
 0x145   :  { %9335 = vpow2.f32 %v1026_v8  ;;  %v9328_v23 = vpop.eup %9327 }
 0x146   :  { %v990_v39 = vadd.f32 %v974_v27, %v834_v28  ;;  %v835_v45 = vmul.f32 %v819_v33, %v819_v33  ;;  %v1005_v59 = vmul.f32 -2.0, %v989_v38 }
 0x147   :  { %v896_v46 = vpop.permute.xlu1 %895 }
 0x148   :  { %v959_v30 = vsub.f32 %v896_v46, %v10191_v1  ;;  %v1006_v60 = vmul.f32 -2.0, %v990_v39  ;;  %v1028_v9 = vmul.f32 1.442695, %v1005_v59  ;;  %v9330_v36 = vpop.eup %9329 }
 0x149   :  { %v9332_v40 = vpop.eup %9331 }
 0x14a   :  { %v975_v41 = vmul.f32 %v959_v30, %v959_v30  ;;  %v1030_v14 = vmul.f32 1.442695, %v1006_v60  ;;  %9337 = vpow2.f32 %v1028_v9 }
 0x14b   :  { %v745_v48 = vpop.permute.xlu1 %744 }
 0x14c   :  { %v820_v42 = vsub.f32 %v745_v48, %v10194_v2  ;;  %v962_v48 = vsub.f32 %v908_v7, %v10191_v1  ;;  %9339 = vpow2.f32 %v1030_v14 }
 0x14e   :  { %v836_v63 = vmul.f32 %v820_v42, %v820_v42  ;;  %v978_v57 = vmul.f32 %v962_v48, %v962_v48  ;;  %v9334_v42 = vpop.eup %9333 }
 0x14f   :  { %v900_v50 = vpop.permute.xlu1 %899 }
 0x150   :  { %v960_v46 = vsub.f32 %v900_v50, %v10191_v1  ;;  %v822_v50 = vsub.f32 %v755_v55, %v10194_v2  ;;  %v1048_v55 = vpack.c.bf16 %v9334_v42, %v9328_v23 }
 0x152   :  { %v976_v3 = vmul.f32 %v960_v46, %v960_v46  ;;  %v838_v10 = vmul.f32 %v822_v50, %v822_v50 }
 0x153   :  { %v904_v52 = vpop.permute.xlu1 %903 }
 0x154   :  { %v961_v47 = vsub.f32 %v904_v52, %v10191_v1  ;;  %v991_v52 = vadd.f32 %v975_v41, %v835_v45  ;;  %v992_v62 = vadd.f32 %v976_v3, %v836_v63  ;;  %v994_v25 = vadd.f32 %v978_v57, %v838_v10 }
 0x156   :  { %v1007_v13 = vmul.f32 -2.0, %v991_v52  ;;  %v1008_v27 = vmul.f32 -2.0, %v992_v62  ;;  %v1010_v39 = vmul.f32 -2.0, %v994_v25 }
 0x157   :  { %v760_v56 = vpop.permute.xlu1 %759 }
 0x158   :  { %v823_v49 = vsub.f32 %v760_v56, %v10194_v2  ;;  %v977_v56 = vmul.f32 %v961_v47, %v961_v47  ;;  %v1032_v6 = vmul.f32 1.442695, %v1007_v13  ;;  %v1034_v41 = vmul.f32 1.442695, %v1008_v27  ;;  %v7576_v13 = vld [vmem:[%s9868_s14] ss:$0 sm:$0xff] }
 0x159   :  { %v1038_v51 = vmul.f32 1.442695, %v1010_v39  ;;  %s12564_s14 = sld [smem:[#allocation15_spill]] }
 0x15a   :  { %v839_v4 = vmul.f32 %v823_v49, %v823_v49  ;;  %v993_v16 = vadd.f32 %v977_v56, %v837_v53  ;;  %9341 = vpow2.f32 %v1032_v6  ;;  %v1047_v53 = vpack.c.bf16 %v9332_v40, %v9330_v36 }
 0x15b   :  { %v912_v12 = vpop.permute.xlu1 %911  ;;  %9343 = vpow2.f32 %v1034_v41 }
 0x15c   :  { %v963_v44 = vsub.f32 %v912_v12, %v10191_v1  ;;  %v770_v12 = vpop.permute.xlu0 %769  ;;  %v1009_v28 = vmul.f32 -2.0, %v993_v16 }
 0x15d   :  { %v825_v22 = vsub.f32 %v770_v12, %v10194_v2 }
 0x15e   :  { %v979_v5 = vmul.f32 %v963_v44, %v963_v44  ;;  %v1036_v17 = vmul.f32 1.442695, %v1009_v28 }
 0x15f   :  { %v765_v31 = vpop.permute.xlu1 %764  ;;  %v841_v35 = vmul.f32 %v825_v22, %v825_v22 }
 0x160   :  { %v995_v15 = vadd.f32 %v979_v5, %v839_v4  ;;  %v824_v18 = vsub.f32 %v765_v31, %v10194_v2  ;;  %9345 = vpow2.f32 %v1036_v17 }
 0x162   :  { %v1011_v26 = vmul.f32 -2.0, %v995_v15  ;;  %v840_v30 = vmul.f32 %v824_v18, %v824_v18 }
 0x163   :  { %v916_v54 = vpop.permute.xlu1 %915 }
 0x164   :  { %v964_v19 = vsub.f32 %v916_v54, %v10191_v1  ;;  %v1040_v49 = vmul.f32 1.442695, %v1011_v26  ;;  %v9336_v54 = vpop.eup %9335 }
 0x165   :  { %v9338_v58 = vpop.eup %9337 }
 0x166   :  { %v980_v33 = vmul.f32 %v964_v19, %v964_v19  ;;  %v9340_v48 = vpop.eup %9339  ;;  %9347 = vpow2.f32 %v1040_v49  ;;  %v1049_v52 = vpack.c.bf16 %v9338_v58, %v9336_v54  ;;  %v9217_v49 = vld [vmem:[%s9883_s30 + $0x8] ss:$12 sps:$4 sm:$0xff]  }
 0x167   :  { %v920_v11 = vpop.permute.xlu1 %919  ;;  %9349 = vpow2.f32 %v1038_v51  ;;  %v9342_v63 = vpop.eup %9341 }
 0x168   :  { %v965_v21 = vsub.f32 %v920_v11, %v10191_v1  ;;  %v996_v47 = vadd.f32 %v980_v33, %v840_v30  ;;  %v1050_v3 = vpack.c.bf16 %v9342_v63, %v9340_v48  ;;  %v9344_v56 = vpop.eup %9343 }
 0x16a   :  { %v981_v2 = vmul.f32 %v965_v21, %v965_v21  ;;  %v1012_v60 = vmul.f32 -2.0, %v996_v47  ;;  %v9346_v4 = vpop.eup %9345  ;;  %v9216_v47 = vld [vmem:[%s9883_s30 + $0x1c] ss:$12 sps:$4 sm:$0xff]  }
 0x16b   :  { %v1051_v57 = vpack.c.bf16 %v9346_v4, %v9344_v56 }
 0x16c   :  { %v997_v44 = vadd.f32 %v981_v2, %v841_v35  ;;  %v1042_v50 = vmul.f32 1.442695, %v1012_v60 }
 0x16e   :  { %v1013_v61 = vmul.f32 -2.0, %v997_v44  ;;  %9351 = vpow2.f32 %v1042_v50  ;;  %v9214_v44 = vld [vmem:[%s9883_s30 + $0x18] ss:$12 sps:$4 sm:$0xff]  }
 0x170   :  { %v1044_v0 = vmul.f32 1.442695, %v1013_v61  ;;  %v9348_v5 = vpop.eup %9347 }
 0x171   :  { %v9350_v8 = vpop.eup %9349 }
 0x172   :  { %9353 = vpow2.f32 %v1044_v0  ;;  %v1052_v9 = vpack.c.bf16 %v9348_v5, %v9350_v8 }
 0x178   :  { %v9352_v10 = vpop.eup %9351 }
 0x17c   :  { %v9354_v11 = vpop.eup %9353 }
 0x17d   :  { %v1053_v12 = vpack.c.bf16 %v9354_v11, %v9352_v10 }
 0x1f1   :  { %v8226_v24 = vpop.f32.mrb[0].mxu1 }
 0x1f2   :  { %v341_v29 = vpop.f32.mrb[1].mxu1  ;;  %v350_v31 = vadd.f32 %v8226_v24, %v7558_v20 }
 0x1f3   :  { %v342_v7 = vadd.f32 %v7558_v20, %v341_v29  ;;  %v8227_v32 = vpop.f32.mrb[2].mxu1 }
 0x1f4   :  { %v10220_v34 = vadd.f32 %v8227_v32, %v7558_v20  ;;  %v344_v1 = vpop.f32.mrb[3].mxu1  ;;  %v1055_v45 = vpack.c.bf16 %v350_v31, %v350_v31 }
 0x1f5   :  { %v1054_v37 = vpack.c.bf16 %v342_v7, %v342_v7  ;;  %v10222_v38 = vadd.f32 %v7558_v20, %v344_v1 }
 0x1f6   :  { %12474 = vst [vmem:[#allocation21_spill] sm:$0xff] %v10220_v34  ;;  %v1151_v59 = vsel %vm1069_vm5, %v1055_v45, 0 }
 0x1f7   :  { %12475 = vst [vmem:[#allocation22_spill] sm:$0xff] %v10222_v38  ;;  %v1071_v46 = vsel %vm1069_vm5, %v1054_v37, 0  ;;  %9095 = vmatprep.subr.msk.bf16.mxu0 %vm1069_vm5, %v1054_v37 }
 0x1f8   :  { %8279 = vmatpush3.bf16.msra.mxu0 %v1071_v46  ;;  %v9213_v46 = vld [vmem:[%s9883_s30 + $0x4] ss:$12 sps:$4 sm:$0xff]  }
 0x1f9   :  { %9096 = vmatprep.subr.msk.bf16.mxu0 %vm1069_vm5, %v1055_v45  ;;  %v9211_v45 = vld [vmem:[%s9883_s30] ss:$12 sps:$4 sm:$0xff]   ;;  %1625 = vmatprep.subr.bf16.mxu1 %v9213_v46  ;;  %v9218_v46 = vld [vmem:[%s9883_s30 + $0x30] ss:$12 sps:$4 sm:$0xff]  }
 0x1fa   :  { %1626 = vmatpush1.bf16.msra.mxu1 %v9211_v45 }
 0x1fb   :  { %8281 = vmatmul.mubr.msk.bf16.vlgmr.msra.gmra.mrb[20].mxu0 %vm1056_vm4, %v1047_v53  ;;  %1627 = vmatprep.subr.bf16.mxu1 %v9216_v47  ;;  %v9221_v47 = vld [vmem:[%s9883_s30 + $0x20] ss:$12 sps:$4 sm:$0xff]  }
 0x1fc   :  { %8284 = vmatprep.mubr.msk.bf16.mxu0 %vm1056_vm4, %v1048_v55  ;;  %8289 = vmatpush3.bf16.msra.mxu0 %v1151_v59 }
 0x1fd   :  { %8298 = vmatprep.subr.bf16.mxu0 %v9217_v49 }
 0x1fe   :  { %1628 = vmatpush1.bf16.msra.mxu1 %v9214_v44 }
 0x203   :  { %8285 = vmatmul.mubr.msk.bf16.gmra.mrb[24].mxu0 %vm1056_vm4, %v1049_v52 }
 0x204   :  { %8290 = vmatprep.mubr.msk.bf16.mxu0 %vm1056_vm4, %v1050_v3 }
 0x20b   :  { %8291 = vmatmul.mubr.msk.bf16.vlgmr.msra.gmra.mrb[28].mxu0 %vm1056_vm4, %v1051_v57 }
 0x20c   :  { %8294 = vmatprep.mubr.msk.bf16.mxu0 %vm1056_vm4, %v1052_v9  ;;  %8299 = vmatpush3.bf16.msra.mxu0 %v9217_v49 }
 0x20d   :  { %8300 = vmatprep.subr.bf16.mxu0 %v9221_v47 }
 0x210   :  { %8301 = vmatpush3.bf16.msra.mxu0 %v9221_v47  ;;  %v9237_v47 = vld [vmem:[%s9883_s30 + $0x80] ss:$12 sps:$4 sm:$0xff]  }
 0x213   :  { %8295 = vmatmul.mubr.msk.bf16.gmra.mrb[32].mxu0 %vm1056_vm4, %v1053_v12 }
 0x2ce   :  { %v8282_v14 = vpop.f32.mrb[20].mxu0 }
 0x2cf   :  { %v1107_v15 = vpop.f32.mrb[21].mxu0  ;;  %v10241_v20 = vadd.f32 %v8282_v14, %v7576_v13 }
 0x2d0   :  { %v10236_v62 = vadd.f32 %v7576_v13, %v1107_v15  ;;  %v8283_v16 = vpop.f32.mrb[22].mxu0 }
 0x2d1   :  { %v1110_v18 = vpop.f32.mrb[23].mxu0  ;;  %12478 = vst [vmem:[#allocation25_spill] sm:$0xff] %v10241_v20  ;;  %v10245_v23 = vadd.f32 %v8283_v16, %v7576_v13 }
 0x2d2   :  { %12476 = vst [vmem:[#allocation23_spill] sm:$0xff] %v10236_v62  ;;  %v10238_v19 = vadd.f32 %v7576_v13, %v1110_v18  ;;  %1236 = vadd.xlane.f32.xlu0 %v10236_v62 }
 0x2d3   :  { %12479 = vst [vmem:[#allocation26_spill] sm:$0xff] %v10245_v23 }
 0x2d4   :  { %12477 = vst [vmem:[#allocation24_spill] sm:$0xff] %v10238_v19  ;;  %1238 = vadd.xlane.f32.xlu1 %v10238_v19 }
 0x2d6   :  { %1240 = vadd.xlane.f32.xlu0 %v10241_v20  ;;  %v8286_v21 = vpop.f32.mrb[24].mxu0 }
 0x2d7   :  { %v1123_v22 = vpop.f32.mrb[25].mxu0  ;;  %v10251_v26 = vadd.f32 %v8286_v21, %v7576_v13 }
 0x2d8   :  { %v10247_v24 = vadd.f32 %v7576_v13, %v1123_v22  ;;  %v8287_v25 = vpop.f32.mrb[26].mxu0 }
 0x2d9   :  { %v1126_v6 = vpop.f32.mrb[27].mxu0  ;;  %12481 = vst [vmem:[#allocation28_spill] sm:$0xff] %v10251_v26  ;;  %v10257_v30 = vadd.f32 %v8287_v25, %v7576_v13 }
 0x2da   :  { %12480 = vst [vmem:[#allocation27_spill] sm:$0xff] %v10247_v24  ;;  %1242 = vadd.xlane.f32.xlu0 %v10245_v23  ;;  %1244 = vadd.xlane.f32.xlu1 %v10247_v24  ;;  %v10253_v27 = vadd.f32 %v7576_v13, %v1126_v6 }
 0x2db   :  { %12483 = vst [vmem:[#allocation30_spill] sm:$0xff] %v10257_v30 }
 0x2dc   :  { %12482 = vst [vmem:[#allocation29_spill] sm:$0xff] %v10253_v27 }
 0x2de   :  { %1248 = vadd.xlane.f32.xlu1 %v10251_v26  ;;  %1246 = vadd.xlane.f32.xlu0 %v10253_v27  ;;  %v8292_v28 = vpop.f32.mrb[28].mxu0 }
 0x2df   :  { %v1187_v29 = vpop.f32.mrb[29].mxu0  ;;  %v10263_v33 = vadd.f32 %v8292_v28, %v7576_v13 }
 0x2e0   :  { %v10259_v31 = vadd.f32 %v7576_v13, %v1187_v29  ;;  %v8293_v7 = vpop.f32.mrb[30].mxu0 }
 0x2e1   :  { %v1190_v32 = vpop.f32.mrb[31].mxu0  ;;  %12485 = vst [vmem:[#allocation32_spill] sm:$0xff] %v10263_v33  ;;  %v10269_v36 = vadd.f32 %v8293_v7, %v7576_v13 }
 0x2e2   :  { %12484 = vst [vmem:[#allocation31_spill] sm:$0xff] %v10259_v31  ;;  %1250 = vadd.xlane.f32.xlu0 %v10257_v30  ;;  %1252 = vadd.xlane.f32.xlu1 %v10259_v31  ;;  %v10265_v1 = vadd.f32 %v7576_v13, %v1190_v32 }
 0x2e3   :  { %12487 = vst [vmem:[#allocation34_spill] sm:$0xff] %v10269_v36 }
 0x2e4   :  { %12486 = vst [vmem:[#allocation33_spill] sm:$0xff] %v10265_v1 }
 0x2e6   :  { %1256 = vadd.xlane.f32.xlu1 %v10263_v33  ;;  %1254 = vadd.xlane.f32.xlu0 %v10265_v1  ;;  %v8296_v2 = vpop.f32.mrb[32].mxu0 }
 0x2e7   :  { %v1203_v35 = vpop.f32.mrb[33].mxu0  ;;  %v10275_v41 = vadd.f32 %v8296_v2, %v7576_v13  ;;  %v9220_v2 = vld [vmem:[%s9883_s30 + $0x34] ss:$12 sps:$4 sm:$0xff]  }
 0x2e8   :  { %v10271_v37 = vadd.f32 %v7576_v13, %v1203_v35  ;;  %v8297_v39 = vpop.f32.mrb[34].mxu0  ;;  %1629 = vmatprep.subr.bf16.mxu1 %v9220_v2  ;;  %v9230_v2 = vld [vmem:[%s9883_s30 + $0x78] ss:$12 sps:$4 sm:$0xff]  }
 0x2e9   :  { %v1206_v40 = vpop.f32.mrb[35].mxu0  ;;  %12489 = vst [vmem:[#allocation36_spill] sm:$0xff] %v10275_v41  ;;  %v10281_v17 = vadd.f32 %v8297_v39, %v7576_v13  ;;  %1630 = vmatpush1.bf16.msra.mxu1 %v9218_v46  ;;  %v9234_v46 = vld [vmem:[%s9883_s30 + $0x90] ss:$12 sps:$4 sm:$0xff]  }
 0x2ea   :  { %12488 = vst [vmem:[#allocation35_spill] sm:$0xff] %v10271_v37  ;;  %1258 = vadd.xlane.f32.xlu0 %v10269_v36  ;;  %1260 = vadd.xlane.f32.xlu1 %v10271_v37  ;;  %v10277_v42 = vadd.f32 %v7576_v13, %v1206_v40 }
 0x2eb   :  { %12491 = vst [vmem:[#allocation38_spill] sm:$0xff] %v10281_v17 }
 0x2ec   :  { %12490 = vst [vmem:[#allocation37_spill] sm:$0xff] %v10277_v42 }
 0x2ee   :  { %1264 = vadd.xlane.f32.xlu1 %v10275_v41  ;;  %1262 = vadd.xlane.f32.xlu0 %v10277_v42 }
 0x2f2   :  { %1266 = vadd.xlane.f32.xlu0 %v10281_v17 }
 0x35f   :  { %v1237_v51 = vpop.xlane.xlu0 %1236 }
 0x360   :  { %v1269_v53 = vmul.f32 0.0078125, %v1237_v51 }
 0x361   :  { %v1239_v54 = vpop.xlane.xlu1 %1238 }
 0x362   :  { %v1270_v55 = vmul.f32 0.0078125, %v1239_v54  ;;  %v10290_v58 = vsub.f32 %v10236_v62, %v1269_v53  ;;  %v9224_v54 = vld [vmem:[%s9883_s30 + $0x4c] ss:$12 sps:$4 sm:$0xff]  }
 0x363   :  { %v1241_v59 = vpop.xlane.xlu0 %1240  ;;  %1631 = vmatprep.subr.bf16.mxu1 %v9224_v54  ;;  %v9241_v54 = vld [vmem:[%s9883_s30 + $0x98] ss:$12 sps:$4 sm:$0xff]  }
 0x364   :  { %v1271_v60 = vmul.f32 0.0078125, %v1241_v59  ;;  %v1301_v48 = vmul.f32 %v10290_v58, %v10290_v58  ;;  %v10295_v61 = vsub.f32 %v10238_v19, %v1270_v55 }
 0x366   :  { %1317 = vadd.xlane.f32.xlu1 %v1301_v48  ;;  %v1302_v63 = vmul.f32 %v10295_v61, %v10295_v61  ;;  %v10300_v50 = vsub.f32 %v10241_v20, %v1271_v60 }
 0x367   :  { %v1243_v0 = vpop.xlane.xlu0 %1242  ;;  %v1245_v52 = vpop.xlane.xlu1 %1244 }
 0x368   :  { %v1272_v3 = vmul.f32 0.0078125, %v1243_v0  ;;  %v1273_v56 = vmul.f32 0.0078125, %v1245_v52  ;;  %1319 = vadd.xlane.f32.xlu0 %v1302_v63  ;;  %v1303_v4 = vmul.f32 %v10300_v50, %v10300_v50  ;;  %v9222_v63 = vld [vmem:[%s9883_s30 + $0x48] ss:$12 sps:$4 sm:$0xff]   ;;  %v9225_v0 = vld [vmem:[%s9883_s30 + $0x38] ss:$12 sps:$4 sm:$0xff]  }
 0x369   :  { %1632 = vmatpush1.bf16.msra.mxu1 %v9222_v63  ;;  %8302 = vmatprep.subr.bf16.mxu0 %v9225_v0 }
 0x36a   :  { %1321 = vadd.xlane.f32.xlu1 %v1303_v4  ;;  %v10305_v5 = vsub.f32 %v10247_v24, %v1273_v56  ;;  %v10308_v8 = vsub.f32 %v10245_v23, %v1272_v3  ;;  %8303 = vmatpush3.bf16.msra.mxu0 %v9225_v0 }
 0x36b   :  { %v1249_v57 = vpop.xlane.xlu1 %1248  ;;  %v1247_v9 = vpop.xlane.xlu0 %1246 }
 0x36c   :  { %v1275_v10 = vmul.f32 0.0078125, %v1249_v57  ;;  %v1274_v11 = vmul.f32 0.0078125, %v1247_v9  ;;  %v1305_v12 = vmul.f32 %v10305_v5, %v10305_v5  ;;  %v1304_v13 = vmul.f32 %v10308_v8, %v10308_v8 }
 0x36e   :  { %1325 = vadd.xlane.f32.xlu1 %v1305_v12  ;;  %1323 = vadd.xlane.f32.xlu0 %v1304_v13  ;;  %v10315_v14 = vsub.f32 %v10251_v26, %v1275_v10  ;;  %v10318_v15 = vsub.f32 %v10253_v27, %v1274_v11  ;;  %v9228_v12 = vld [vmem:[%s9883_s30 + $0x64] ss:$12 sps:$4 sm:$0xff]   ;;  %v9226_v13 = vld [vmem:[%s9883_s30 + $0x60] ss:$12 sps:$4 sm:$0xff]  }
 0x36f   :  { %v1251_v16 = vpop.xlane.xlu0 %1250  ;;  %v1253_v18 = vpop.xlane.xlu1 %1252  ;;  %1633 = vmatprep.subr.bf16.mxu1 %v9228_v12 }
 0x370   :  { %v1276_v21 = vmul.f32 0.0078125, %v1251_v16  ;;  %v1277_v22 = vmul.f32 0.0078125, %v1253_v18  ;;  %v1307_v25 = vmul.f32 %v10315_v14, %v10315_v14  ;;  %v1306_v6 = vmul.f32 %v10318_v15, %v10318_v15  ;;  %1634 = vmatpush1.bf16.msra.mxu1 %v9226_v13 }
 0x372   :  { %1329 = vadd.xlane.f32.xlu1 %v1307_v25  ;;  %1327 = vadd.xlane.f32.xlu0 %v1306_v6  ;;  %v10325_v28 = vsub.f32 %v10259_v31, %v1277_v22  ;;  %v10328_v29 = vsub.f32 %v10257_v30, %v1276_v21  ;;  %v9229_v21 = vld [vmem:[%s9883_s30 + $0x50] ss:$12 sps:$4 sm:$0xff]  }
 0x373   :  { %v1257_v7 = vpop.xlane.xlu1 %1256  ;;  %v1255_v32 = vpop.xlane.xlu0 %1254  ;;  %8304 = vmatprep.subr.bf16.mxu0 %v9229_v21 }
 0x374   :  { %v1279_v35 = vmul.f32 0.0078125, %v1257_v7  ;;  %v1278_v39 = vmul.f32 0.0078125, %v1255_v32  ;;  %v1309_v40 = vmul.f32 %v10325_v28, %v10325_v28  ;;  %v1308_v45 = vmul.f32 %v10328_v29, %v10328_v29  ;;  %v9232_v32 = vld [vmem:[%s9883_s30 + $0x7c] ss:$12 sps:$4 sm:$0xff]   ;;  %8305 = vmatpush3.bf16.msra.mxu0 %v9229_v21 }
 0x375   :  { %1635 = vmatprep.subr.bf16.mxu1 %v9232_v32 }
 0x376   :  { %1333 = vadd.xlane.f32.xlu1 %v1309_v40  ;;  %1331 = vadd.xlane.f32.xlu0 %v1308_v45  ;;  %v10338_v49 = vsub.f32 %v10263_v33, %v1279_v35  ;;  %v10341_v44 = vsub.f32 %v10265_v1, %v1278_v39  ;;  %v9233_v39 = vld [vmem:[%s9883_s30 + $0x68] ss:$12 sps:$4 sm:$0xff]  }
 0x377   :  { %v1259_v51 = vpop.xlane.xlu0 %1258  ;;  %v1261_v53 = vpop.xlane.xlu1 %1260  ;;  %1636 = vmatpush1.bf16.msra.mxu1 %v9230_v2  ;;  %8306 = vmatprep.subr.bf16.mxu0 %v9233_v39  ;;  %v9236_v45 = vld [vmem:[%s9883_s30 + $0x94] ss:$12 sps:$4 sm:$0xff]  }
 0x378   :  { %v1280_v55 = vmul.f32 0.0078125, %v1259_v51  ;;  %v1281_v59 = vmul.f32 0.0078125, %v1261_v53  ;;  %v1311_v60 = vmul.f32 %v10338_v49, %v10338_v49  ;;  %v1310_v48 = vmul.f32 %v10341_v44, %v10341_v44  ;;  %8307 = vmatpush3.bf16.msra.mxu0 %v9233_v39  ;;  %1637 = vmatprep.subr.bf16.mxu1 %v9236_v45  ;;  %v9240_v51 = vld [vmem:[%s9883_s30 + $0xac] ss:$12 sps:$4 sm:$0xff]   ;;  %v9238_v53 = vld [vmem:[%s9883_s30 + $0xa8] ss:$12 sps:$4 sm:$0xff]  }
 0x379   :  { %8308 = vmatprep.subr.bf16.mxu0 %v9237_v47  ;;  %v10389_v39 = vld [vmem:[%s9873_s19] ss:$0 sm:$0xff]  ;;  %s12565_s19 = sld [smem:[#allocation13_spill]] }
 0x37a   :  { %1337 = vadd.xlane.f32.xlu1 %v1311_v60  ;;  %1335 = vadd.xlane.f32.xlu0 %v1310_v48  ;;  %v10351_v52 = vsub.f32 %v10271_v37, %v1281_v59  ;;  %v10354_v3 = vsub.f32 %v10269_v36, %v1280_v55  ;;  %v9242_v55 = vld [vmem:[%s9883_s30 + $0xb0] ss:$12 sps:$4 sm:$0xff]   ;;  %s12567_s30 = sld [smem:[#allocation11_spill]] }
 0x37b   :  { %v1265_v56 = vpop.xlane.xlu1 %1264  ;;  %v1263_v4 = vpop.xlane.xlu0 %1262  ;;  %1638 = vmatpush1.bf16.msra.mxu1 %v9234_v46 }
 0x37c   :  { %v1283_v57 = vmul.f32 0.0078125, %v1265_v56  ;;  %v1282_v9 = vmul.f32 0.0078125, %v1263_v4  ;;  %v1313_v10 = vmul.f32 %v10351_v52, %v10351_v52  ;;  %v1312_v11 = vmul.f32 %v10354_v3, %v10354_v3  ;;  %8309 = vmatpush3.bf16.msra.mxu0 %v9237_v47  ;;  %1639 = vmatprep.subr.bf16.mxu1 %v9240_v51 }
 0x37d   :  { %8310 = vmatprep.subr.bf16.mxu0 %v9241_v54 }
 0x37e   :  { %1341 = vadd.xlane.f32.xlu1 %v1313_v10  ;;  %1339 = vadd.xlane.f32.xlu0 %v1312_v11  ;;  %v10363_v16 = vsub.f32 %v10275_v41, %v1283_v57  ;;  %v10366_v18 = vsub.f32 %v10277_v42, %v1282_v9 }
 0x37f   :  { %v1267_v22 = vpop.xlane.xlu0 %1266  ;;  %1640 = vmatpush1.bf16.msra.mxu1 %v9238_v53 }
 0x380   :  { %v1284_v25 = vmul.f32 0.0078125, %v1267_v22  ;;  %v1315_v6 = vmul.f32 %v10363_v16, %v10363_v16  ;;  %v1314_v7 = vmul.f32 %v10366_v18, %v10366_v18  ;;  %8311 = vmatpush3.bf16.msra.mxu0 %v9241_v54 }
 0x381   :  { %8312 = vmatprep.subr.bf16.mxu0 %v9242_v55 }
 0x382   :  { %1345 = vadd.xlane.f32.xlu1 %v1315_v6  ;;  %1343 = vadd.xlane.f32.xlu0 %v1314_v7  ;;  %v10376_v35 = vsub.f32 %v10281_v17, %v1284_v25 }
 0x384   :  { %v1316_v40 = vmul.f32 %v10376_v35, %v10376_v35  ;;  %8313 = vmatpush3.bf16.msra.mxu0 %v9242_v55 }
 0x386   :  { %1347 = vadd.xlane.f32.xlu0 %v1316_v40 }
 0x3f3   :  { %v1318_v59 = vpop.xlane.xlu1 %1317 }
 0x3f4   :  { %v1349_v60 = vmul.f32 0.0078125, %v1318_v59 }
 0x3f5   :  { %v1320_v48 = vpop.xlane.xlu0 %1319 }
 0x3f6   :  { %v1365_v63 = vadd.f32 1e-05, %v1349_v60  ;;  %v1350_v0 = vmul.f32 0.0078125, %v1320_v48 }
 0x3f7   :  { %v1322_v56 = vpop.xlane.xlu1 %1321 }
 0x3f8   :  { %9355 = vrsqrt.f32 %v1365_v63  ;;  %v1366_v4 = vadd.f32 1e-05, %v1350_v0  ;;  %v1351_v57 = vmul.f32 0.0078125, %v1322_v56  ;;  %v10395_v56 = vld [vmem:[%s9878_s24] ss:$0 sm:$0xff]  ;;  %s12566_s24 = sld [smem:[#allocation14_spill]] }
 0x3fa   :  { %9357 = vrsqrt.f32 %v1366_v4  ;;  %v1367_v9 = vadd.f32 1e-05, %v1351_v57 }
 0x3fb   :  { %v1326_v10 = vpop.xlane.xlu1 %1325  ;;  %v1324_v11 = vpop.xlane.xlu0 %1323 }
 0x3fc   :  { %9359 = vrsqrt.f32 %v1367_v9  ;;  %v1353_v12 = vmul.f32 0.0078125, %v1326_v10  ;;  %v1352_v13 = vmul.f32 0.0078125, %v1324_v11 }
 0x3fe   :  { %v1369_v21 = vadd.f32 1e-05, %v1353_v12  ;;  %v1368_v22 = vadd.f32 1e-05, %v1352_v13 }
 0x3ff   :  { %v1330_v25 = vpop.xlane.xlu1 %1329  ;;  %v1328_v6 = vpop.xlane.xlu0 %1327 }
 0x400   :  { %9361 = vrsqrt.f32 %v1369_v21  ;;  %v1355_v7 = vmul.f32 0.0078125, %v1330_v25  ;;  %v1354_v32 = vmul.f32 0.0078125, %v1328_v6 }
 0x401   :  { %9363 = vrsqrt.f32 %v1368_v22 }
 0x402   :  { %v9356_v2 = vpop.eup %9355  ;;  %v1371_v40 = vadd.f32 1e-05, %v1355_v7  ;;  %v1370_v45 = vadd.f32 1e-05, %v1354_v32 }
 0x403   :  { %v1334_v46 = vpop.xlane.xlu1 %1333  ;;  %v1332_v47 = vpop.xlane.xlu0 %1331  ;;  %v1397_v51 = vmul.f32 %v9356_v2, %v10290_v58 }
 0x404   :  { %v9358_v53 = vpop.eup %9357  ;;  %9365 = vrsqrt.f32 %v1371_v40  ;;  %v1357_v54 = vmul.f32 0.0078125, %v1334_v46  ;;  %v1356_v55 = vmul.f32 0.0078125, %v1332_v47 }
 0x405   :  { %9367 = vrsqrt.f32 %v1370_v45  ;;  %v1398_v59 = vmul.f32 %v9358_v53, %v10295_v61  ;;  %v1419_v60 = vmul.f32 %v10389_v39, %v1397_v51 }
 0x406   :  { %v9360_v48 = vpop.eup %9359  ;;  %v1373_v63 = vadd.f32 1e-05, %v1357_v54  ;;  %v1372_v0 = vadd.f32 1e-05, %v1356_v55 }
 0x407   :  { %v1399_v4 = vmul.f32 %v9360_v48, %v10300_v50  ;;  %v1338_v57 = vpop.xlane.xlu1 %1337  ;;  %v1336_v9 = vpop.xlane.xlu0 %1335  ;;  %v1420_v58 = vmul.f32 %v10389_v39, %v1398_v59  ;;  %v1441_v12 = vadd.f32 %v10395_v56, %v1419_v60 }
 0x408   :  { %9369 = vrsqrt.f32 %v1373_v63  ;;  %v1359_v10 = vmul.f32 0.0078125, %v1338_v57  ;;  %v1358_v11 = vmul.f32 0.0078125, %v1336_v9 }
 0x409   :  { %9371 = vrsqrt.f32 %v1372_v0  ;;  %v1442_v61 = vadd.f32 %v10395_v56, %v1420_v58  ;;  %v1421_v6 = vmul.f32 %v10389_v39, %v1399_v4 }
 0x40a   :  { %v9362_v13 = vpop.eup %9361  ;;  %v1375_v21 = vadd.f32 1e-05, %v1359_v10  ;;  %v1374_v22 = vadd.f32 1e-05, %v1358_v11 }
 0x40b   :  { %v9364_v25 = vpop.eup %9363  ;;  %v1342_v7 = vpop.xlane.xlu1 %1341  ;;  %v1457_v32 = vpack.c.bf16 %v1442_v61, %v1441_v12  ;;  %v1401_v46 = vmul.f32 %v9362_v13, %v10305_v5 }
 0x40c   :  { %v1340_v50 = vpop.xlane.xlu0 %1339  ;;  %v1400_v2 = vmul.f32 %v9364_v25, %v10308_v8  ;;  %9373 = vrsqrt.f32 %v1375_v21  ;;  %v1361_v40 = vmul.f32 0.0078125, %v1342_v7  ;;  %v1443_v8 = vadd.f32 %v10395_v56, %v1421_v6 }
 0x40d   :  { %v1360_v45 = vmul.f32 0.0078125, %v1340_v50  ;;  %9375 = vrsqrt.f32 %v1374_v22  ;;  %1658 = vmatmul.mubr.bf16.vlgmr.msra.gmra.mrb[4].mxu1 %v1457_v32  ;;  %8314 = vmatprep.mubr.bf16.mxu0 %v1457_v32  ;;  %v1423_v57 = vmul.f32 %v10389_v39, %v1401_v46 }
 0x40e   :  { %v9366_v47 = vpop.eup %9365  ;;  %v1422_v51 = vmul.f32 %v10389_v39, %v1400_v2  ;;  %v1377_v53 = vadd.f32 1e-05, %v1361_v40  ;;  %1667 = vmatprep.mubr.bf16.mxu1 %v12421_v43 }
 0x40f   :  { %v1376_v54 = vadd.f32 1e-05, %v1360_v45  ;;  %v9368_v55 = vpop.eup %9367  ;;  %v1346_v59 = vpop.xlane.xlu1 %1345  ;;  %v1403_v48 = vmul.f32 %v9366_v47, %v10315_v14 }
 0x410   :  { %v1344_v60 = vpop.xlane.xlu0 %1343  ;;  %9377 = vrsqrt.f32 %v1377_v53  ;;  %v1363_v63 = vmul.f32 0.0078125, %v1346_v59  ;;  %v1444_v4 = vadd.f32 %v10395_v56, %v1422_v51  ;;  %v1402_v5 = vmul.f32 %v9368_v55, %v10318_v15 }
 0x411   :  { %v1362_v0 = vmul.f32 0.0078125, %v1344_v60  ;;  %9379 = vrsqrt.f32 %v1376_v54  ;;  %v1425_v14 = vmul.f32 %v10389_v39, %v1403_v48  ;;  %v1445_v15 = vadd.f32 %v10395_v56, %v1423_v57 }
 0x412   :  { %v9370_v9 = vpop.eup %9369  ;;  %v1379_v58 = vadd.f32 1e-05, %v1363_v63  ;;  %v1458_v11 = vpack.c.bf16 %v1444_v4, %v1443_v8  ;;  %v1424_v13 = vmul.f32 %v10389_v39, %v1402_v5 }
 0x413   :  { %v1378_v10 = vadd.f32 1e-05, %v1362_v0  ;;  %v9372_v12 = vpop.eup %9371  ;;  %v1405_v21 = vmul.f32 %v9370_v9, %v10325_v28  ;;  %v1447_v28 = vadd.f32 %v10395_v56, %v1425_v14 }
 0x414   :  { %v1348_v61 = vpop.xlane.xlu0 %1347  ;;  %9381 = vrsqrt.f32 %v1379_v58  ;;  %8315 = vmatmul.mubr.bf16.vlgmr.msra.gmra.mrb[36].mxu0 %v1458_v11  ;;  %v1404_v25 = vmul.f32 %v9372_v12, %v10328_v29  ;;  %v1446_v6 = vadd.f32 %v10395_v56, %v1424_v13 }
 0x415   :  { %v1364_v22 = vmul.f32 0.0078125, %v1348_v61  ;;  %9383 = vrsqrt.f32 %v1378_v10  ;;  %1668 = vmatmul.mubr.bf16.gmra.mrb[8].mxu1 %v1458_v11  ;;  %v1427_v45 = vmul.f32 %v10389_v39, %v1405_v21 }
 0x416   :  { %v9374_v7 = vpop.eup %9373  ;;  %v1426_v32 = vmul.f32 %v10389_v39, %v1404_v25  ;;  %1677 = vmatprep.mubr.bf16.mxu1 %v12421_v43  ;;  %v1459_v40 = vpack.c.bf16 %v1446_v6, %v1445_v15 }
 0x417   :  { %v1380_v50 = vadd.f32 1e-05, %v1364_v22  ;;  %v9376_v2 = vpop.eup %9375  ;;  %v1407_v47 = vmul.f32 %v9374_v7, %v10338_v49  ;;  %v1449_v59 = vadd.f32 %v10395_v56, %v1427_v45 }
 0x418   :  { %v1448_v29 = vadd.f32 %v10395_v56, %v1426_v32  ;;  %v1406_v46 = vmul.f32 %v9376_v2, %v10341_v44  ;;  %8318 = vmatprep.mubr.bf16.mxu0 %v1459_v40 }
 0x419   :  { %9385 = vrsqrt.f32 %v1380_v50  ;;  %v1429_v48 = vmul.f32 %v10389_v39, %v1407_v47 }
 0x41a   :  { %v9378_v51 = vpop.eup %9377  ;;  %v1460_v53 = vpack.c.bf16 %v1448_v29, %v1447_v28  ;;  %v1428_v54 = vmul.f32 %v10389_v39, %v1406_v46 }
 0x41b   :  { %v9380_v55 = vpop.eup %9379  ;;  %v1409_v63 = vmul.f32 %v9378_v51, %v10351_v52  ;;  %v1451_v57 = vadd.f32 %v10395_v56, %v1429_v48 }
 0x41c   :  { %8319 = vmatmul.mubr.bf16.gmra.mrb[40].mxu0 %v1460_v53  ;;  %v1450_v60 = vadd.f32 %v10395_v56, %v1428_v54  ;;  %v1408_v8 = vmul.f32 %v9380_v55, %v10354_v3 }
 0x41d   :  { %1678 = vmatmul.mubr.bf16.gmra.mrb[12].mxu1 %v1459_v40  ;;  %v1431_v58 = vmul.f32 %v10389_v39, %v1409_v63 }
 0x41e   :  { %v9382_v44 = vpop.eup %9381  ;;  %v1461_v49 = vpack.c.bf16 %v1450_v60, %v1449_v59  ;;  %v1430_v0 = vmul.f32 %v10389_v39, %v1408_v8  ;;  %1687 = vmatprep.mubr.bf16.mxu1 %v12421_v43 }
 0x41f   :  { %v9384_v4 = vpop.eup %9383  ;;  %v1411_v5 = vmul.f32 %v9382_v44, %v10363_v16  ;;  %v1453_v16 = vadd.f32 %v10395_v56, %v1431_v58 }
 0x420   :  { %8322 = vmatprep.mubr.bf16.mxu0 %v1461_v49  ;;  %v1452_v9 = vadd.f32 %v10395_v56, %v1430_v0  ;;  %v1410_v3 = vmul.f32 %v9384_v4, %v10366_v18 }
 0x421   :  { %v1433_v61 = vmul.f32 %v10389_v39, %v1411_v5 }
 0x422   :  { %v1462_v10 = vpack.c.bf16 %v1452_v9, %v1451_v57  ;;  %v1432_v11 = vmul.f32 %v10389_v39, %v1410_v3 }
 0x423   :  { %v9386_v52 = vpop.eup %9385  ;;  %v1455_v18 = vadd.f32 %v10395_v56, %v1433_v61 }
 0x424   :  { %v1412_v12 = vmul.f32 %v9386_v52, %v10376_v35  ;;  %8323 = vmatmul.mubr.bf16.gmra.mrb[44].mxu0 %v1462_v10  ;;  %v1454_v13 = vadd.f32 %v10395_v56, %v1432_v11 }
 0x425   :  { %1688 = vmatmul.mubr.bf16.gmra.mrb[16].mxu1 %v1460_v53 }
 0x426   :  { %v1434_v14 = vmul.f32 %v10389_v39, %v1412_v12  ;;  %v1463_v21 = vpack.c.bf16 %v1454_v13, %v1453_v16  ;;  %1697 = vmatprep.mubr.bf16.mxu1 %v12421_v43 }
 0x428   :  { %v1456_v22 = vadd.f32 %v10395_v56, %v1434_v14  ;;  %8326 = vmatprep.mubr.bf16.mxu0 %v1463_v21 }
 0x42a   :  { %v1464_v25 = vpack.c.bf16 %v1456_v22, %v1455_v18 }
 0x42c   :  { %8327 = vmatmul.mubr.bf16.gmra.mrb[48].mxu0 %v1464_v25 }
 0x42d   :  { %1698 = vmatmul.mubr.bf16.gmra.mrb[20].mxu1 %v1461_v49 }
 0x42e   :  { %1707 = vmatprep.mubr.bf16.mxu1 %v12421_v43 }
 0x435   :  { %1708 = vmatmul.mubr.bf16.gmra.mrb[24].mxu1 %v1462_v10 }
 0x436   :  { %1717 = vmatprep.mubr.bf16.mxu1 %v12421_v43 }
 0x43d   :  { %1718 = vmatmul.mubr.bf16.gmra.mrb[28].mxu1 %v1463_v21 }
 0x43e   :  { %1727 = vmatprep.mubr.bf16.mxu1 %v12421_v43 }
 0x445   :  { %1728 = vmatmul.mubr.bf16.gmra.mrb[32].mxu1 %v1464_v25 }
 0x4e0   :  { %v1659_v35 = vpop.f32.mrb[4].mxu1 }
 0x4e1   :  { %v1661_v39 = vpop.f32.mrb[5].mxu1 }
 0x4e2   :  { %v1663_v15 = vpop.f32.mrb[6].mxu1 }
 0x4e3   :  { %v10449_v6 = vpack.c.bf16 %v1663_v15, %v1659_v35  ;;  %v1665_v56 = vpop.f32.mrb[7].mxu1 }
 0x4e4   :  { %v10451_v7 = vpack.c.bf16 %v1665_v56, %v1661_v39 }
 0x4e5   :  { %12492 = vst [vmem:[#allocation39_spill] sm:$0xff] %v10449_v6  ;;  %8338 = vmatprep.mubr.msk.bf16.mxu1 %vm1859_vm6, %v10449_v6 }
 0x4e6   :  { %9097 = vmatprep.subr.msk.bf16.mxu1 %vm1859_vm6, %v10451_v7  ;;  %v1873_v50 = vsel %vm1859_vm6, %v10451_v7, 0 }
 0x4e7   :  { %v8316_v32 = vpop.f32.mrb[36].mxu0  ;;  %8331 = vmatpush3.bf16.xpose.msra.mxu1 %v1873_v50 }
 0x4e8   :  { %v1772_v2 = vpop.f32.mrb[37].mxu0  ;;  %v1669_v40 = vpop.f32.mrb[8].mxu1 }
 0x4e9   :  { %v8317_v28 = vpop.f32.mrb[38].mxu0  ;;  %v1671_v45 = vpop.f32.mrb[9].mxu1 }
 0x4ea   :  { %v10459_v29 = vpack.c.bf16 %v8317_v28, %v8316_v32  ;;  %v1775_v46 = vpop.f32.mrb[39].mxu0  ;;  %v1673_v47 = vpop.f32.mrb[10].mxu1 }
 0x4eb   :  { %v10461_v51 = vpack.c.bf16 %v1775_v46, %v1772_v2  ;;  %v10463_v53 = vpack.c.bf16 %v1673_v47, %v1669_v40  ;;  %v1675_v54 = vpop.f32.mrb[11].mxu1 }
 0x4ec   :  { %v10465_v55 = vpack.c.bf16 %v1675_v54, %v1671_v45 }
 0x4ed   :  { %12493 = vst [vmem:[#allocation40_spill] sm:$0xff] %v10463_v53 }
 0x4ee   :  { %9098 = vmatprep.subr.msk.bf16.mxu1 %vm1859_vm6, %v10465_v55  ;;  %v1876_v59 = vsel %vm1859_vm6, %v10465_v55, 0 }
 0x4ef   :  { %v8320_v60 = vpop.f32.mrb[40].mxu0  ;;  %8333 = vmatpush3.bf16.xpose.msra.mxu1 %v1876_v59 }
 0x4f0   :  { %v1788_v8 = vpop.f32.mrb[41].mxu0  ;;  %v1679_v48 = vpop.f32.mrb[12].mxu1 }
 0x4f1   :  { %v8321_v63 = vpop.f32.mrb[42].mxu0  ;;  %v1681_v44 = vpop.f32.mrb[13].mxu1 }
 0x4f2   :  { %v10471_v49 = vpack.c.bf16 %v8321_v63, %v8320_v60  ;;  %v1791_v0 = vpop.f32.mrb[43].mxu0  ;;  %v1683_v4 = vpop.f32.mrb[14].mxu1 }
 0x4f3   :  { %v10473_v5 = vpack.c.bf16 %v1791_v0, %v1788_v8  ;;  %v10475_v57 = vpack.c.bf16 %v1683_v4, %v1679_v48  ;;  %v1685_v9 = vpop.f32.mrb[15].mxu1 }
 0x4f4   :  { %v10477_v3 = vpack.c.bf16 %v1685_v9, %v1681_v44 }
 0x4f6   :  { %9099 = vmatprep.subr.msk.bf16.mxu1 %vm1859_vm6, %v10477_v3  ;;  %v1879_v58 = vsel %vm1859_vm6, %v10477_v3, 0 }
 0x4f7   :  { %v8324_v52 = vpop.f32.mrb[44].mxu0  ;;  %8335 = vmatpush3.bf16.xpose.msra.mxu1 %v1879_v58 }
 0x4f8   :  { %v1804_v10 = vpop.f32.mrb[45].mxu0  ;;  %v1689_v11 = vpop.f32.mrb[16].mxu1 }
 0x4f9   :  { %v8325_v12 = vpop.f32.mrb[46].mxu0  ;;  %v1691_v61 = vpop.f32.mrb[17].mxu1 }
 0x4fa   :  { %v10483_v16 = vpack.c.bf16 %v8325_v12, %v8324_v52  ;;  %v1807_v13 = vpop.f32.mrb[47].mxu0  ;;  %v1693_v14 = vpop.f32.mrb[18].mxu1 }
 0x4fb   :  { %v10485_v21 = vpack.c.bf16 %v1807_v13, %v1804_v10  ;;  %v10487_v18 = vpack.c.bf16 %v1693_v14, %v1689_v11  ;;  %v1695_v22 = vpop.f32.mrb[19].mxu1 }
 0x4fc   :  { %v10489_v25 = vpack.c.bf16 %v1695_v22, %v1691_v61 }
 0x4fe   :  { %12494 = vst [vmem:[#allocation41_spill] sm:$0xff] %v10489_v25  ;;  %9100 = vmatprep.subr.msk.bf16.mxu1 %vm1859_vm6, %v10489_v25  ;;  %v1882_v35 = vsel %vm1859_vm6, %v10489_v25, 0 }
 0x4ff   :  { %v8328_v39 = vpop.f32.mrb[48].mxu0  ;;  %8337 = vmatpush3.bf16.xpose.msra.mxu1 %v1882_v35 }
 0x500   :  { %v1820_v15 = vpop.f32.mrb[49].mxu0  ;;  %v1699_v56 = vpop.f32.mrb[20].mxu1  ;;  %8362 = vmatprep.subr.bf16.mxu1 %v10461_v51 }
 0x501   :  { %v8329_v50 = vpop.f32.mrb[50].mxu0  ;;  %v1701_v32 = vpop.f32.mrb[21].mxu1 }
 0x502   :  { %v10496_v2 = vpack.c.bf16 %v8329_v50, %v8328_v39  ;;  %v1823_v40 = vpop.f32.mrb[51].mxu0  ;;  %v1703_v28 = vpop.f32.mrb[22].mxu1 }
 0x503   :  { %v10498_v45 = vpack.c.bf16 %v1823_v40, %v1820_v15  ;;  %v10500_v46 = vpack.c.bf16 %v1703_v28, %v1699_v56  ;;  %v1705_v47 = vpop.f32.mrb[23].mxu1 }
 0x504   :  { %v10502_v54 = vpack.c.bf16 %v1705_v47, %v1701_v32 }
 0x505   :  { %12495 = vst [vmem:[#allocation42_spill] sm:$0xff] %v10500_v46  ;;  %8354 = vmatprep.mubr.msk.bf16.mxu0 %vm1859_vm6, %v10500_v46 }
 0x506   :  { %12496 = vst [vmem:[#allocation43_spill] sm:$0xff] %v10502_v54  ;;  %8339 = vmatmul.mubr.msk.bf16.vlgmr.msra.gmra.mrb[36].mxu1 %vm1859_vm6, %v10463_v53  ;;  %9101 = vmatprep.subr.msk.bf16.mxu0 %vm1859_vm6, %v10502_v54  ;;  %v1962_v59 = vsel %vm1859_vm6, %v10502_v54, 0 }
 0x507   :  { %8342 = vmatprep.mubr.msk.bf16.mxu1 %vm1859_vm6, %v10475_v57  ;;  %8347 = vmatpush3.bf16.xpose.msra.mxu0 %v1962_v59 }
 0x508   :  { %8363 = vmatpush3.bf16.msra.mxu1 %v10461_v51  ;;  %v1709_v60 = vpop.f32.mrb[24].mxu1 }
 0x509   :  { %8364 = vmatprep.subr.bf16.mxu1 %v10459_v29  ;;  %v1711_v8 = vpop.f32.mrb[25].mxu1 }
 0x50a   :  { %v1713_v48 = vpop.f32.mrb[26].mxu1 }
 0x50b   :  { %v10516_v63 = vpack.c.bf16 %v1713_v48, %v1709_v60  ;;  %v1715_v44 = vpop.f32.mrb[27].mxu1 }
 0x50c   :  { %v10518_v0 = vpack.c.bf16 %v1715_v44, %v1711_v8  ;;  %8365 = vmatpush3.bf16.msra.mxu1 %v10459_v29 }
 0x50d   :  { %12497 = vst [vmem:[#allocation44_spill] sm:$0xff] %v10516_v63  ;;  %8366 = vmatprep.subr.bf16.mxu1 %v10473_v5 }
 0x50e   :  { %8343 = vmatmul.mubr.msk.bf16.gmra.mrb[40].mxu1 %vm1859_vm6, %v10487_v18  ;;  %9102 = vmatprep.subr.msk.bf16.mxu0 %vm1859_vm6, %v10518_v0  ;;  %v1965_v4 = vsel %vm1859_vm6, %v10518_v0, 0 }
 0x50f   :  { %8349 = vmatpush3.bf16.xpose.msra.mxu0 %v1965_v4 }
 0x510   :  { %8367 = vmatpush3.bf16.msra.mxu1 %v10473_v5  ;;  %v1719_v9 = vpop.f32.mrb[28].mxu1 }
 0x511   :  { %8368 = vmatprep.subr.bf16.mxu1 %v10471_v49  ;;  %v1721_v58 = vpop.f32.mrb[29].mxu1 }
 0x512   :  { %v1723_v52 = vpop.f32.mrb[30].mxu1 }
 0x513   :  { %v10530_v10 = vpack.c.bf16 %v1723_v52, %v1719_v9  ;;  %v1725_v11 = vpop.f32.mrb[31].mxu1 }
 0x514   :  { %v10532_v12 = vpack.c.bf16 %v1725_v11, %v1721_v58  ;;  %8369 = vmatpush3.bf16.msra.mxu1 %v10471_v49 }
 0x515   :  { %12498 = vst [vmem:[#allocation45_spill] sm:$0xff] %v10530_v10  ;;  %8378 = vmatprep.subr.bf16.mxu1 %v10485_v21 }
 0x516   :  { %9103 = vmatprep.subr.msk.bf16.mxu0 %vm1859_vm6, %v10532_v12  ;;  %v1968_v61 = vsel %vm1859_vm6, %v10532_v12, 0 }
 0x517   :  { %8351 = vmatpush3.bf16.xpose.msra.mxu0 %v1968_v61 }
 0x518   :  { %v1729_v13 = vpop.f32.mrb[32].mxu1 }
 0x519   :  { %v1731_v14 = vpop.f32.mrb[33].mxu1 }
 0x51a   :  { %v1733_v22 = vpop.f32.mrb[34].mxu1 }
 0x51b   :  { %v10540_v35 = vpack.c.bf16 %v1733_v22, %v1729_v13  ;;  %v1735_v39 = vpop.f32.mrb[35].mxu1 }
 0x51c   :  { %v10542_v15 = vpack.c.bf16 %v1735_v39, %v1731_v14 }
 0x51d   :  { %12499 = vst [vmem:[#allocation46_spill] sm:$0xff] %v10540_v35 }
 0x51e   :  { %12500 = vst [vmem:[#allocation47_spill] sm:$0xff] %v10542_v15  ;;  %9104 = vmatprep.subr.msk.bf16.mxu0 %vm1859_vm6, %v10542_v15  ;;  %v1971_v56 = vsel %vm1859_vm6, %v10542_v15, 0 }
 0x51f   :  { %8353 = vmatpush3.bf16.xpose.msra.mxu0 %v1971_v56 }
 0x526   :  { %8355 = vmatmul.mubr.msk.bf16.vlgmr.msra.gmra.mrb[52].mxu0 %vm1859_vm6, %v10516_v63 }
 0x527   :  { %8358 = vmatprep.mubr.msk.bf16.mxu0 %vm1859_vm6, %v10530_v10 }
 0x52e   :  { %8359 = vmatmul.mubr.msk.bf16.gmra.mrb[56].mxu0 %vm1859_vm6, %v10540_v35 }
 0x5d9   :  { %v8340_v50 = vpop.f32.mrb[36].mxu1 }
 0x5da   :  { %v1918_v32 = vpop.f32.mrb[37].mxu1  ;;  %v2045_v60 = vsel %vm2038_vm7, %v8340_v50, -inf }
 0x5db   :  { %v8341_v40 = vpop.f32.mrb[38].mxu1  ;;  %v2039_v28 = vsel %vm2038_vm7, %v1918_v32, -inf }
 0x5dc   :  { %2040 = vmax.xlane.f32.xlu1 %v2039_v28  ;;  %v1921_v47 = vpop.f32.mrb[39].mxu1  ;;  %v2048_v48 = vsel %vm2038_vm7, %v8341_v40, -inf }
 0x5dd   :  { %v2042_v59 = vsel %vm2038_vm7, %v1921_v47, -inf }
 0x5de   :  { %2043 = vmax.xlane.f32.xlu0 %v2042_v59 }
 0x5e0   :  { %2046 = vmax.xlane.f32.xlu1 %v2045_v60 }
 0x5e1   :  { %v8344_v8 = vpop.f32.mrb[40].mxu1 }
 0x5e2   :  { %2049 = vmax.xlane.f32.xlu0 %v2048_v48  ;;  %v1934_v44 = vpop.f32.mrb[41].mxu1  ;;  %v2057_v11 = vsel %vm2038_vm7, %v8344_v8, -inf }
 0x5e3   :  { %v10558_v4 = vpop.f32.mrb[42].mxu1  ;;  %v2051_v9 = vsel %vm2038_vm7, %v1934_v44, -inf }
 0x5e4   :  { %2052 = vmax.xlane.f32.xlu1 %v2051_v9  ;;  %v1937_v58 = vpop.f32.mrb[43].mxu1  ;;  %v2060_v61 = vsel %vm2038_vm7, %v10558_v4, -inf }
 0x5e5   :  { %v2054_v52 = vsel %vm2038_vm7, %v1937_v58, -inf }
 0x5e6   :  { %2055 = vmax.xlane.f32.xlu0 %v2054_v52 }
 0x5e8   :  { %2058 = vmax.xlane.f32.xlu1 %v2057_v11 }
 0x5ea   :  { %2061 = vmax.xlane.f32.xlu0 %v2060_v61 }
 0x5f9   :  { %v10565_v13 = vpop.f32.mrb[52].mxu0 }
 0x5fa   :  { %v10567_v14 = vpop.f32.mrb[53].mxu0  ;;  %v2069_v59 = vsel %vm2038_vm7, %v10565_v13, -inf }
 0x5fb   :  { %v10569_v22 = vpop.f32.mrb[54].mxu0  ;;  %v2063_v39 = vsel %vm2038_vm7, %v10567_v14, -inf }
 0x5fc   :  { %2064 = vmax.xlane.f32.xlu1 %v2063_v39  ;;  %v10573_v56 = vpop.f32.mrb[55].mxu0  ;;  %v2072_v48 = vsel %vm2038_vm7, %v10569_v22, -inf }
 0x5fd   :  { %v2066_v28 = vsel %vm2038_vm7, %v10573_v56, -inf }
 0x5fe   :  { %2067 = vmax.xlane.f32.xlu0 %v2066_v28 }
 0x600   :  { %2070 = vmax.xlane.f32.xlu1 %v2069_v59 }
 0x601   :  { %v10579_v60 = vpop.f32.mrb[56].mxu0 }
 0x602   :  { %2073 = vmax.xlane.f32.xlu0 %v2072_v48  ;;  %v10583_v9 = vpop.f32.mrb[57].mxu0  ;;  %v2081_v52 = vsel %vm2038_vm7, %v10579_v60, -inf }
 0x603   :  { %v10587_v11 = vpop.f32.mrb[58].mxu0  ;;  %v2075_v28 = vsel %vm2038_vm7, %v10583_v9, -inf }
 0x604   :  { %2082 = vmax.xlane.f32.xlu1 %v2081_v52  ;;  %v10589_v61 = vpop.f32.mrb[59].mxu0  ;;  %v2084_v59 = vsel %vm2038_vm7, %v10587_v11, -inf }
 0x605   :  { %v2078_v39 = vsel %vm2038_vm7, %v10589_v61, -inf }
 0x606   :  { %2079 = vmax.xlane.f32.xlu0 %v2078_v39 }
 0x608   :  { %2076 = vmax.xlane.f32.xlu1 %v2075_v28 }
 0x60a   :  { %2085 = vmax.xlane.f32.xlu0 %v2084_v59 }
 0x669   :  { %v2041_v48 = vpop.xlane.xlu1 %2040 }
 0x66a   :  { %v2087_v43 = vsub.f32 %v1918_v32, %v2041_v48 }
 0x66b   :  { %v2044_v34 = vpop.xlane.xlu0 %2043 }
 0x66c   :  { %v2088_v38 = vsub.f32 %v1921_v47, %v2044_v34  ;;  %v2103_v42 = vmul.f32 1.442695, %v2087_v43 }
 0x66d   :  { %v2047_v17 = vpop.xlane.xlu1 %2046 }
 0x66e   :  { %v2105_v52 = vmul.f32 1.442695, %v2088_v38  ;;  %v2089_v41 = vsub.f32 %v8340_v50, %v2047_v17 }
 0x66f   :  { %v2050_v37 = vpop.xlane.xlu0 %2049 }
 0x670   :  { %9387 = vpow2.f32 %v2105_v52  ;;  %v2107_v36 = vmul.f32 1.442695, %v2089_v41  ;;  %v2090_v39 = vsub.f32 %v8341_v40, %v2050_v37 }
 0x671   :  { %v2053_v33 = vpop.xlane.xlu1 %2052 }
 0x672   :  { %9389 = vpow2.f32 %v2107_v36  ;;  %v2109_v1 = vmul.f32 1.442695, %v2090_v39  ;;  %v2091_v28 = vsub.f32 %v1934_v44, %v2053_v33 }
 0x673   :  { %9391 = vpow2.f32 %v2103_v42  ;;  %v2056_v31 = vpop.xlane.xlu0 %2055 }
 0x674   :  { %9393 = vpow2.f32 %v2109_v1  ;;  %v2092_v26 = vsub.f32 %v1937_v58, %v2056_v31  ;;  %v2111_v48 = vmul.f32 1.442695, %v2091_v28 }
 0x675   :  { %v2059_v59 = vpop.xlane.xlu1 %2058 }
 0x676   :  { %v2093_v32 = vsub.f32 %v8344_v8, %v2059_v59  ;;  %v2113_v17 = vmul.f32 1.442695, %v2092_v26 }
 0x677   :  { %v2062_v34 = vpop.xlane.xlu0 %2061 }
 0x678   :  { %v2115_v47 = vmul.f32 1.442695, %v2093_v32  ;;  %v2094_v38 = vsub.f32 %v10558_v4, %v2062_v34 }
 0x67a   :  { %v10598_v43 = vpop.eup %9387  ;;  %9395 = vpow2.f32 %v2115_v47  ;;  %v2117_v37 = vmul.f32 1.442695, %v2094_v38 }
 0x67b   :  { %9397 = vpow2.f32 %v2111_v48  ;;  %v2138_v36 = vsel %vm2038_vm7, %v10598_v43, 0.0 }
 0x67c   :  { %v10602_v33 = vpop.eup %9389  ;;  %9399 = vpow2.f32 %v2117_v37  ;;  %2139 = vadd.xlane.f32.xlu0 %v2138_v36 }
 0x67d   :  { %v10604_v31 = vpop.eup %9391  ;;  %v2141_v1 = vsel %vm2038_vm7, %v10602_v33, 0.0  ;;  %9401 = vpow2.f32 %v2113_v17 }
 0x67e   :  { %v10608_v41 = vpop.eup %9393  ;;  %2142 = vadd.xlane.f32.xlu1 %v2141_v1  ;;  %v2135_v42 = vsel %vm2038_vm7, %v10604_v31, 0.0 }
 0x67f   :  { %v2144_v26 = vsel %vm2038_vm7, %v10608_v41, 0.0 }
 0x680   :  { %2145 = vadd.xlane.f32.xlu0 %v2144_v26 }
 0x682   :  { %2136 = vadd.xlane.f32.xlu1 %v2135_v42 }
 0x684   :  { %v10614_v50 = vpop.eup %9395 }
 0x685   :  { %v10616_v40 = vpop.eup %9397  ;;  %v2153_v8 = vsel %vm2038_vm7, %v10614_v50, 0.0 }
 0x686   :  { %v10620_v44 = vpop.eup %9399  ;;  %2154 = vadd.xlane.f32.xlu1 %v2153_v8  ;;  %v2147_v39 = vsel %vm2038_vm7, %v10616_v40, 0.0 }
 0x687   :  { %v2156_v4 = vsel %vm2038_vm7, %v10620_v44, 0.0  ;;  %v10624_v58 = vpop.eup %9401 }
 0x688   :  { %2157 = vadd.xlane.f32.xlu0 %v2156_v4  ;;  %v2150_v32 = vsel %vm2038_vm7, %v10624_v58, 0.0 }
 0x689   :  { %v2065_v52 = vpop.xlane.xlu1 %2064 }
 0x68a   :  { %2148 = vadd.xlane.f32.xlu1 %v2147_v39  ;;  %v2095_v28 = vsub.f32 %v10567_v14, %v2065_v52 }
 0x68b   :  { %v2068_v59 = vpop.xlane.xlu0 %2067 }
 0x68c   :  { %2151 = vadd.xlane.f32.xlu0 %v2150_v32  ;;  %v2096_v34 = vsub.f32 %v10573_v56, %v2068_v59  ;;  %v2119_v38 = vmul.f32 1.442695, %v2095_v28 }
 0x68d   :  { %v2071_v48 = vpop.xlane.xlu1 %2070 }
 0x68e   :  { %v2097_v47 = vsub.f32 %v10565_v13, %v2071_v48  ;;  %v2121_v1 = vmul.f32 1.442695, %v2096_v34 }
 0x68f   :  { %v2074_v17 = vpop.xlane.xlu0 %2073 }
 0x690   :  { %v2123_v37 = vmul.f32 1.442695, %v2097_v47  ;;  %v2098_v36 = vsub.f32 %v10569_v22, %v2074_v17 }
 0x691   :  { %v2083_v17 = vpop.xlane.xlu1 %2082 }
 0x692   :  { %9403 = vpow2.f32 %v2123_v37  ;;  %v2125_v26 = vmul.f32 1.442695, %v2098_v36  ;;  %v2101_v37 = vsub.f32 %v10579_v60, %v2083_v17 }
 0x693   :  { %9405 = vpow2.f32 %v2119_v38  ;;  %v2080_v14 = vpop.xlane.xlu0 %2079 }
 0x694   :  { %9407 = vpow2.f32 %v2125_v26  ;;  %v2100_v42 = vsub.f32 %v10589_v61, %v2080_v14 }
 0x695   :  { %9409 = vpow2.f32 %v2121_v1  ;;  %v2077_v36 = vpop.xlane.xlu1 %2076  ;;  %v2131_v1 = vmul.f32 1.442695, %v2101_v37 }
 0x696   :  { %v2129_v56 = vmul.f32 1.442695, %v2100_v42  ;;  %v2099_v26 = vsub.f32 %v10583_v9, %v2077_v36 }
 0x697   :  { %v2086_v8 = vpop.xlane.xlu0 %2085 }
 0x698   :  { %v2102_v4 = vsub.f32 %v10587_v11, %v2086_v8  ;;  %v2127_v14 = vmul.f32 1.442695, %v2099_v26 }
 0x69a   :  { %v2133_v52 = vmul.f32 1.442695, %v2102_v4 }
 0x69c   :  { %v10636_v13 = vpop.eup %9403  ;;  %9411 = vpow2.f32 %v2133_v52 }
 0x69d   :  { %v10638_v39 = vpop.eup %9405  ;;  %v2165_v22 = vsel %vm2038_vm7, %v10636_v13, 0.0  ;;  %9413 = vpow2.f32 %v2129_v56 }
 0x69e   :  { %v10642_v28 = vpop.eup %9407  ;;  %2166 = vadd.xlane.f32.xlu1 %v2165_v22  ;;  %v2159_v11 = vsel %vm2038_vm7, %v10638_v39, 0.0  ;;  %9415 = vpow2.f32 %v2131_v1 }
 0x69f   :  { %v2168_v61 = vsel %vm2038_vm7, %v10642_v28, 0.0  ;;  %v10646_v59 = vpop.eup %9409  ;;  %9417 = vpow2.f32 %v2127_v14 }
 0x6a0   :  { %2169 = vadd.xlane.f32.xlu0 %v2168_v61  ;;  %v2162_v32 = vsel %vm2038_vm7, %v10646_v59, 0.0 }
 0x6a2   :  { %2160 = vadd.xlane.f32.xlu1 %v2159_v11 }
 0x6a4   :  { %2163 = vadd.xlane.f32.xlu0 %v2162_v32 }
 0x6a6   :  { %v10652_v48 = vpop.eup %9411 }
 0x6a7   :  { %v2180_v34 = vsel %vm2038_vm7, %v10652_v48, 0.0  ;;  %v10656_v47 = vpop.eup %9413 }
 0x6a8   :  { %2181 = vadd.xlane.f32.xlu0 %v2180_v34  ;;  %v2174_v38 = vsel %vm2038_vm7, %v10656_v47, 0.0  ;;  %v10674_v60 = vpop.eup %9415 }
 0x6a9   :  { %v2177_v9 = vsel %vm2038_vm7, %v10674_v60, 0.0  ;;  %v10680_v42 = vpop.eup %9417 }
 0x6aa   :  { %v2171_v8 = vsel %vm2038_vm7, %v10680_v42, 0.0 }
 0x6ac   :  { %2175 = vadd.xlane.f32.xlu0 %v2174_v38 }
 0x6b3   :  { %2518 = vrot.lane.b32.xlu1 %v10502_v54, %s9807_s0 }
 0x6c2   :  { %2520 = vrot.lane.b32.xlu0 %v10518_v0, %s9807_s0 }
 0x6c6   :  { %2506 = vrot.lane.b32.xlu0 %v10500_v46, %s9807_s0 }
 0x6ca   :  { %2510 = vrot.lane.b32.xlu0 %v10530_v10, %s9807_s0 }
 0x6ce   :  { %2405 = vrot.lane.b32.xlu0 %v10451_v7, %s9807_s0 }
 0x6d2   :  { %2409 = vrot.lane.b32.xlu0 %v10477_v3, %s9807_s0 }
 0x6d6   :  { %2393 = vrot.lane.b32.xlu0 %v10449_v6, %s9807_s0 }
 0x6d7   :  { %2178 = vadd.xlane.f32.xlu1 %v2177_v9 }
 0x6da   :  { %2397 = vrot.lane.b32.xlu0 %v10475_v57, %s9807_s0 }
 0x6db   :  { %2172 = vadd.xlane.f32.xlu1 %v2171_v8 }
 0x6de   :  { %2898 = vrot.lane.b32.xlu0 %v10483_v16, %s9807_s0 }
 0x6e2   :  { %3273 = vrot.lane.b32.xlu0 %v10465_v55, %s9808_s5 }
 0x6ec   :  { %2522 = vrot.lane.b32.xlu1 %v10532_v12, %s9807_s0 }
 0x6f0   :  { %2524 = vrot.lane.b32.xlu1 %v10542_v15, %s9807_s0 }
 0x6f4   :  { %2508 = vrot.lane.b32.xlu1 %v10516_v63, %s9807_s0 }
 0x6f8   :  { %2512 = vrot.lane.b32.xlu1 %v10540_v35, %s9807_s0 }
 0x6fc   :  { %2407 = vrot.lane.b32.xlu1 %v10465_v55, %s9807_s0 }
 0x700   :  { %2411 = vrot.lane.b32.xlu1 %v10489_v25, %s9807_s0 }
 0x704   :  { %2395 = vrot.lane.b32.xlu1 %v10463_v53, %s9807_s0 }
 0x708   :  { %2399 = vrot.lane.b32.xlu1 %v10487_v18, %s9807_s0 }
 0x709   :  { %v2140_v4 = vpop.xlane.xlu0 %2139 }
 0x70a   :  { %9419 = vrcp.f32 %v2140_v4 }
 0x70b   :  { %v2143_v56 = vpop.xlane.xlu1 %2142 }
 0x70c   :  { %2896 = vrot.lane.b32.xlu1 %v10485_v21, %s9807_s0 }
 0x70d   :  { %v2146_v52 = vpop.xlane.xlu0 %2145 }
 0x70e   :  { %9421 = vrcp.f32 %v2146_v52 }
 0x70f   :  { %9423 = vrcp.f32 %v2143_v56  ;;  %v2137_v22 = vpop.xlane.xlu1 %2136 }
 0x710   :  { %9425 = vrcp.f32 %v2137_v22  ;;  %2900 = vrot.lane.b32.xlu1 %v10498_v45, %s9807_s0 }
 0x713   :  { %v2155_v61 = vpop.xlane.xlu1 %2154 }
 0x714   :  { %2902 = vrot.lane.b32.xlu1 %v10496_v2, %s9807_s0  ;;  %v9420_v32 = vpop.eup %9419 }
 0x715   :  { %v2158_v11 = vpop.xlane.xlu0 %2157  ;;  %v2200_v14 = vmul.f32 %v9420_v32, %v10598_v43 }
 0x716   :  { %9427 = vrcp.f32 %v2158_v11 }
 0x717   :  { %v2149_v34 = vpop.xlane.xlu1 %2148 }
 0x718   :  { %v9422_v38 = vpop.eup %9421  ;;  %9429 = vrcp.f32 %v2149_v34  ;;  %3271 = vrot.lane.b32.xlu1 %v10451_v7, %s9808_s5 }
 0x719   :  { %v9424_v17 = vpop.eup %9423  ;;  %9431 = vrcp.f32 %v2155_v61  ;;  %v2152_v37 = vpop.xlane.xlu0 %2151  ;;  %v2202_v1 = vmul.f32 %v9422_v38, %v10608_v41 }
 0x71a   :  { %v9426_v36 = vpop.eup %9425  ;;  %9433 = vrcp.f32 %v2152_v37  ;;  %v2201_v9 = vmul.f32 %v9424_v17, %v10602_v33 }
 0x71b   :  { %v2199_v26 = vmul.f32 %v9426_v36, %v10604_v31 }
 0x71c   :  { %3275 = vrot.lane.b32.xlu1 %v10477_v3, %s9808_s5  ;;  %v2216_v4 = vpack.c.bf16 %v2202_v1, %v2201_v9 }
 0x71d   :  { %v2215_v8 = vpack.c.bf16 %v2200_v14, %v2199_v26 }
 0x71f   :  { %8370 = vmatprep.mubr.msk.bf16.mxu1 %vm2038_vm7, %v2215_v8 }
 0x720   :  { %3277 = vrot.lane.b32.xlu1 %v10489_v25, %s9808_s5  ;;  %8371 = vmatmul.mubr.msk.bf16.vlgmr.msra.gmra.mrb[44].mxu1 %vm2038_vm7, %v2216_v4  ;;  %v9428_v41 = vpop.eup %9427 }
 0x721   :  { %8379 = vmatpush3.bf16.msra.mxu1 %v10485_v21  ;;  %v2206_v56 = vmul.f32 %v9428_v41, %v10620_v44 }
 0x722   :  { %v9430_v31 = vpop.eup %9429  ;;  %8380 = vmatprep.subr.bf16.mxu1 %v10483_v16 }
 0x723   :  { %v9432_v43 = vpop.eup %9431  ;;  %v2203_v52 = vmul.f32 %v9430_v31, %v10616_v40 }
 0x724   :  { %v9434_v33 = vpop.eup %9433  ;;  %v2205_v61 = vmul.f32 %v9432_v43, %v10614_v50 }
 0x725   :  { %8381 = vmatpush3.bf16.msra.mxu1 %v10483_v16  ;;  %v2204_v22 = vmul.f32 %v9434_v33, %v10624_v58 }
 0x726   :  { %8382 = vmatprep.subr.bf16.mxu1 %v10498_v45  ;;  %v2218_v32 = vpack.c.bf16 %v2206_v56, %v2205_v61 }
 0x727   :  { %v2217_v11 = vpack.c.bf16 %v2204_v22, %v2203_v52 }
 0x729   :  { %8383 = vmatpush3.bf16.msra.mxu1 %v10498_v45  ;;  %8374 = vmatprep.mubr.msk.bf16.mxu1 %vm2038_vm7, %v2217_v11 }
 0x72a   :  { %8384 = vmatprep.subr.bf16.mxu1 %v10496_v2  ;;  %8375 = vmatmul.mubr.msk.bf16.gmra.mrb[48].mxu1 %vm2038_vm7, %v2218_v32 }
 0x72b   :  { %v2167_v44 = vpop.xlane.xlu1 %2166 }
 0x72d   :  { %8385 = vmatpush3.bf16.msra.mxu1 %v10496_v2  ;;  %v2170_v40 = vpop.xlane.xlu0 %2169 }
 0x72e   :  { %9435 = vrcp.f32 %v2170_v40 }
 0x72f   :  { %v2161_v58 = vpop.xlane.xlu1 %2160 }
 0x730   :  { %9437 = vrcp.f32 %v2161_v58 }
 0x731   :  { %9439 = vrcp.f32 %v2167_v44  ;;  %v2164_v34 = vpop.xlane.xlu0 %2163 }
 0x732   :  { %9441 = vrcp.f32 %v2164_v34 }
 0x733   :  { %v2519_v50 = vpop.permute.xlu1 %2518 }
 0x734   :  { %9109 = vmatprep.subr.msk.bf16.mxu1 %vm1859_vm6, %v2519_v50  ;;  %v2539_v56 = vsel %vm1859_vm6, %v2519_v50, 0 }
 0x735   :  { %v2182_v38 = vpop.xlane.xlu0 %2181 }
 0x738   :  { %v9436_v17 = vpop.eup %9435 }
 0x739   :  { %v2176_v37 = vpop.xlane.xlu0 %2175  ;;  %v2210_v14 = vmul.f32 %v9436_v17, %v10642_v28 }
 0x73a   :  { %v9438_v36 = vpop.eup %9437 }
 0x73b   :  { %v9440_v1 = vpop.eup %9439  ;;  %v2207_v8 = vmul.f32 %v9438_v36, %v10638_v39 }
 0x73c   :  { %v9442_v26 = vpop.eup %9441  ;;  %v2209_v41 = vmul.f32 %v9440_v1, %v10636_v13 }
 0x73d   :  { %v2521_v9 = vpop.permute.xlu0 %2520  ;;  %v2208_v4 = vmul.f32 %v9442_v26, %v10646_v59 }
 0x73e   :  { %v2220_v43 = vpack.c.bf16 %v2210_v14, %v2209_v41  ;;  %v2542_v39 = vsel %vm1859_vm6, %v2521_v9, 0 }
 0x73f   :  { %v2219_v31 = vpack.c.bf16 %v2208_v4, %v2207_v8 }
 0x741   :  { %8386 = vmatprep.mubr.msk.bf16.mxu1 %vm2038_vm7, %v2219_v31  ;;  %v2507_v33 = vpop.permute.xlu0 %2506 }
 0x742   :  { %8387 = vmatmul.mubr.msk.bf16.vlgmr.msra.gmra.mrb[52].mxu1 %vm2038_vm7, %v2220_v43 }
 0x743   :  { %8411 = vmatpush3.bf16.xpose.msra.mxu1 %v2539_v56 }
 0x744   :  { %9110 = vmatprep.subr.msk.bf16.mxu1 %vm1859_vm6, %v2521_v9 }
 0x745   :  { %v2511_v28 = vpop.permute.xlu0 %2510 }
 0x749   :  { %v2406_v52 = vpop.permute.xlu0 %2405 }
 0x74a   :  { %9105 = vmatprep.subr.msk.bf16.mxu0 %vm1859_vm6, %v2406_v52  ;;  %v2426_v13 = vsel %vm1859_vm6, %v2406_v52, 0 }
 0x74b   :  { %8413 = vmatpush3.bf16.xpose.msra.mxu1 %v2542_v39  ;;  %8395 = vmatpush3.bf16.xpose.msra.mxu0 %v2426_v13 }
 0x74d   :  { %v2410_v59 = vpop.permute.xlu0 %2409 }
 0x74e   :  { %v2432_v41 = vsel %vm1859_vm6, %v2410_v59, 0 }
 0x751   :  { %v2394_v22 = vpop.permute.xlu0 %2393 }
 0x752   :  { %8402 = vmatprep.mubr.msk.bf16.mxu0 %vm1859_vm6, %v2394_v22 }
 0x755   :  { %v2398_v31 = vpop.permute.xlu0 %2397 }
 0x759   :  { %v2899_v52 = vpop.permute.xlu0 %2898 }
 0x75d   :  { %v10867_v19 = vpop.permute.xlu0 %3273 }
 0x764   :  { %v2179_v61 = vpop.xlane.xlu1 %2178 }
 0x765   :  { %9443 = vrcp.f32 %v2179_v61 }
 0x766   :  { %9445 = vrcp.f32 %v2176_v37 }
 0x767   :  { %9447 = vrcp.f32 %v2182_v38 }
 0x768   :  { %v2173_v11 = vpop.xlane.xlu1 %2172 }
 0x769   :  { %9449 = vrcp.f32 %v2173_v11 }
 0x76c   :  { %v2523_v32 = vpop.permute.xlu1 %2522 }
 0x76d   :  { %9111 = vmatprep.subr.msk.bf16.mxu1 %vm1859_vm6, %v2523_v32  ;;  %v2545_v44 = vsel %vm1859_vm6, %v2523_v32, 0 }
 0x76e   :  { %8415 = vmatpush3.bf16.xpose.msra.mxu1 %v2545_v44 }
 0x76f   :  { %v9444_v40 = vpop.eup %9443 }
 0x770   :  { %v2525_v58 = vpop.permute.xlu1 %2524  ;;  %v9446_v34 = vpop.eup %9445  ;;  %v2213_v36 = vmul.f32 %v9444_v40, %v10674_v60 }
 0x771   :  { %9112 = vmatprep.subr.msk.bf16.mxu1 %vm1859_vm6, %v2525_v58  ;;  %v9448_v50 = vpop.eup %9447  ;;  %v2212_v37 = vmul.f32 %v9446_v34, %v10656_v47  ;;  %v2548_v26 = vsel %vm1859_vm6, %v2525_v58, 0 }
 0x772   :  { %v2214_v14 = vmul.f32 %v9448_v50, %v10652_v48 }
 0x773   :  { %v9450_v17 = vpop.eup %9449 }
 0x774   :  { %v2509_v1 = vpop.permute.xlu1 %2508  ;;  %v2211_v38 = vmul.f32 %v9450_v17, %v10680_v42  ;;  %v2222_v8 = vpack.c.bf16 %v2214_v14, %v2213_v36 }
 0x776   :  { %8417 = vmatpush3.bf16.xpose.msra.mxu1 %v2548_v26  ;;  %v2221_v9 = vpack.c.bf16 %v2212_v37, %v2211_v38 }
 0x778   :  { %v2513_v4 = vpop.permute.xlu1 %2512  ;;  %8390 = vmatprep.mubr.msk.bf16.mxu1 %vm2038_vm7, %v2221_v9 }
 0x779   :  { %8391 = vmatmul.mubr.msk.bf16.gmra.mrb[56].mxu1 %vm2038_vm7, %v2222_v8 }
 0x77a   :  { %8418 = vmatprep.mubr.msk.bf16.mxu1 %vm1859_vm6, %v2507_v33 }
 0x77c   :  { %v2408_v60 = vpop.permute.xlu1 %2407 }
 0x77d   :  { %9106 = vmatprep.subr.msk.bf16.mxu0 %vm1859_vm6, %v2408_v60  ;;  %v2429_v42 = vsel %vm1859_vm6, %v2408_v60, 0 }
 0x77e   :  { %8397 = vmatpush3.bf16.xpose.msra.mxu0 %v2429_v42 }
 0x77f   :  { %9107 = vmatprep.subr.msk.bf16.mxu0 %vm1859_vm6, %v2410_v59 }
 0x780   :  { %v2412_v47 = vpop.permute.xlu1 %2411 }
 0x781   :  { %8419 = vmatmul.mubr.msk.bf16.vlgmr.msra.gmra.mrb[60].mxu1 %vm1859_vm6, %v2509_v1  ;;  %v2435_v56 = vsel %vm1859_vm6, %v2412_v47, 0 }
 0x782   :  { %8422 = vmatprep.mubr.msk.bf16.mxu1 %vm1859_vm6, %v2511_v28 }
 0x784   :  { %v2396_v48 = vpop.permute.xlu1 %2395 }
 0x786   :  { %8399 = vmatpush3.bf16.xpose.msra.mxu0 %v2432_v41 }
 0x787   :  { %9108 = vmatprep.subr.msk.bf16.mxu0 %vm1859_vm6, %v2412_v47 }
 0x788   :  { %v2400_v43 = vpop.permute.xlu1 %2399 }
 0x789   :  { %8423 = vmatmul.mubr.msk.bf16.gmra.mrb[64].mxu1 %vm1859_vm6, %v2513_v4 }
 0x78c   :  { %v2897_v33 = vpop.permute.xlu1 %2896 }
 0x78d   :  { %8442 = vmatprep.subr.bf16.mxu1 %v2897_v33 }
 0x78e   :  { %8401 = vmatpush3.bf16.xpose.msra.mxu0 %v2435_v56  ;;  %8443 = vmatpush3.bf16.msra.mxu1 %v2897_v33 }
 0x78f   :  { %8444 = vmatprep.subr.bf16.mxu1 %v2899_v52 }
 0x790   :  { %v2901_v39 = vpop.permute.xlu1 %2900 }
 0x792   :  { %8445 = vmatpush3.bf16.msra.mxu1 %v2899_v52 }
 0x793   :  { %8446 = vmatprep.subr.bf16.mxu1 %v2901_v39 }
 0x794   :  { %v2903_v28 = vpop.permute.xlu1 %2902 }
 0x795   :  { %8403 = vmatmul.mubr.msk.bf16.vlgmr.msra.gmra.mrb[60].mxu0 %vm1859_vm6, %v2396_v48 }
 0x796   :  { %8406 = vmatprep.mubr.msk.bf16.mxu0 %vm1859_vm6, %v2398_v31  ;;  %8447 = vmatpush3.bf16.msra.mxu1 %v2901_v39 }
 0x797   :  { %8448 = vmatprep.subr.bf16.mxu1 %v2903_v28 }
 0x798   :  { %v10772_v13 = vpop.permute.xlu1 %3271 }
 0x79a   :  { %8449 = vmatpush3.bf16.msra.mxu1 %v2903_v28 }
 0x79b   :  { %9113 = vmatprep.subr.msk.bf16.mxu1 %vm1859_vm6, %v10772_v13 }
 0x79c   :  { %v10865_v20 = vpop.permute.xlu1 %3275 }
 0x79d   :  { %8407 = vmatmul.mubr.msk.bf16.gmra.mrb[64].mxu0 %vm1859_vm6, %v2400_v43 }
 0x7f3   :  { %v10777_v59 = vpop.f32.mrb[44].mxu1 }
 0x7f4   :  { %v10779_v22 = vpop.f32.mrb[45].mxu1 }
 0x7f5   :  { %v10781_v61 = vpop.f32.mrb[46].mxu1 }
 0x7f6   :  { %v10785_v32 = vpop.f32.mrb[47].mxu1 }
 0x7fd   :  { %v10789_v40 = vpop.f32.mrb[48].mxu1 }
 0x7fe   :  { %v10791_v58 = vpop.f32.mrb[49].mxu1 }
 0x7ff   :  { %v10793_v34 = vpop.f32.mrb[50].mxu1 }
 0x800   :  { %v10797_v17 = vpop.f32.mrb[51].mxu1 }
 0x815   :  { %v10801_v1 = vpop.f32.mrb[52].mxu1 }
 0x816   :  { %12501 = vst [vmem:[#allocation48_spill] sm:$0xff] %v10801_v1  ;;  %v10803_v38 = vpop.f32.mrb[53].mxu1 }
 0x817   :  { %12502 = vst [vmem:[#allocation49_spill] sm:$0xff] %v10803_v38  ;;  %v10805_v37 = vpop.f32.mrb[54].mxu1 }
 0x818   :  { %12503 = vst [vmem:[#allocation50_spill] sm:$0xff] %v10805_v37  ;;  %v10809_v14 = vpop.f32.mrb[55].mxu1 }
 0x819   :  { %12504 = vst [vmem:[#allocation51_spill] sm:$0xff] %v10809_v14 }
 0x84c   :  { %v10813_v8 = vpop.f32.mrb[56].mxu1 }
 0x84d   :  { %12505 = vst [vmem:[#allocation52_spill] sm:$0xff] %v10813_v8  ;;  %v10815_v4 = vpop.f32.mrb[57].mxu1 }
 0x84e   :  { %12506 = vst [vmem:[#allocation53_spill] sm:$0xff] %v10815_v4  ;;  %v10817_v60 = vpop.f32.mrb[58].mxu1 }
 0x84f   :  { %12507 = vst [vmem:[#allocation54_spill] sm:$0xff] %v10817_v60  ;;  %v10821_v47 = vpop.f32.mrb[59].mxu1 }
 0x850   :  { %12508 = vst [vmem:[#allocation55_spill] sm:$0xff] %v10821_v47 }
 0x854   :  { %v8420_v41 = vpop.f32.mrb[60].mxu1 }
 0x855   :  { %v2584_v31 = vpop.f32.mrb[61].mxu1  ;;  %v2645_v43 = vsel %vm2038_vm7, %v8420_v41, -inf }
 0x856   :  { %2646 = vmax.xlane.f32.xlu0 %v2645_v43  ;;  %v8421_v33 = vpop.f32.mrb[62].mxu1  ;;  %v2639_v39 = vsel %vm2038_vm7, %v2584_v31, -inf }
 0x857   :  { %v2587_v56 = vpop.f32.mrb[63].mxu1  ;;  %v2648_v26 = vsel %vm2038_vm7, %v8421_v33, -inf }
 0x858   :  { %v2642_v52 = vsel %vm2038_vm7, %v2587_v56, -inf }
 0x859   :  { %2643 = vmax.xlane.f32.xlu1 %v2642_v52 }
 0x85a   :  { %2640 = vmax.xlane.f32.xlu0 %v2639_v39 }
 0x85c   :  { %v8424_v28 = vpop.f32.mrb[64].mxu1 }
 0x85d   :  { %v2600_v42 = vpop.f32.mrb[65].mxu1  ;;  %v2657_v9 = vsel %vm2038_vm7, %v8424_v28, -inf }
 0x85e   :  { %2649 = vmax.xlane.f32.xlu0 %v2648_v26  ;;  %2658 = vmax.xlane.f32.xlu1 %v2657_v9  ;;  %v10830_v48 = vpop.f32.mrb[66].mxu1  ;;  %v2651_v43 = vsel %vm2038_vm7, %v2600_v42, -inf }
 0x85f   :  { %v10832_v50 = vpop.f32.mrb[67].mxu1 }
 0x860   :  { %v2654_v24 = vsel %vm2038_vm7, %v10832_v50, -inf }
 0x862   :  { %2652 = vmax.xlane.f32.xlu1 %v2651_v43  ;;  %v2660_v43 = vsel %vm2038_vm7, %v10830_v48, -inf }
 0x868   :  { %v10835_v36 = vpop.f32.mrb[60].mxu0 }
 0x869   :  { %v10837_v52 = vpop.f32.mrb[61].mxu0 }
 0x86a   :  { %v10839_v39 = vpop.f32.mrb[62].mxu0  ;;  %v2615_v27 = vsel %vm2038_vm7, %v10837_v52, -inf }
 0x86b   :  { %v10841_v11 = vpop.f32.mrb[63].mxu0 }
 0x86c   :  { %v2618_v23 = vsel %vm2038_vm7, %v10841_v11, -inf }
 0x870   :  { %v10843_v44 = vpop.f32.mrb[64].mxu0 }
 0x871   :  { %v10845_v30 = vpop.f32.mrb[65].mxu0 }
 0x872   :  { %v10847_v26 = vpop.f32.mrb[66].mxu0 }
 0x873   :  { %3376 = vrot.lane.b32.xlu1 %v10502_v54, %s9808_s5  ;;  %v10851_v9 = vpop.f32.mrb[67].mxu0 }
 0x874   :  { %3263 = vrot.lane.b32.xlu0 %v10449_v6, %s9808_s5 }
 0x893   :  { %2661 = vmax.xlane.f32.xlu0 %v2660_v43  ;;  %v10869_v43 = vpop.permute.xlu1 %3277 }
 0x897   :  { %2655 = vmax.xlane.f32.xlu0 %v2654_v24  ;;  %2616 = vmax.xlane.f32.xlu1 %v2615_v27 }
 0x8ad   :  { %3265 = vrot.lane.b32.xlu0 %v10463_v53, %s9808_s5 }
 0x8cc   :  { %2619 = vmax.xlane.f32.xlu0 %v2618_v23 }
 0x8e3   :  { %v2647_v62 = vpop.xlane.xlu0 %2646 }
 0x8e4   :  { %v2673_v8 = vsub.f32 %v8420_v41, %v2647_v62  ;;  %v2627_v41 = vsel %vm2038_vm7, %v10845_v30, -inf }
 0x8e6   :  { %v2699_v60 = vmul.f32 1.442695, %v2673_v8  ;;  %v2644_v4 = vpop.xlane.xlu1 %2643 }
 0x8e7   :  { %v2641_v47 = vpop.xlane.xlu0 %2640  ;;  %v2672_v1 = vsub.f32 %v2587_v56, %v2644_v4  ;;  %v2630_v56 = vsel %vm2038_vm7, %v10851_v9, -inf }
 0x8e8   :  { %9451 = vpow2.f32 %v2699_v60  ;;  %v2671_v24 = vsub.f32 %v2584_v31, %v2641_v47 }
 0x8e9   :  { %v2697_v6 = vmul.f32 1.442695, %v2672_v1 }
 0x8ea   :  { %v2695_v27 = vmul.f32 1.442695, %v2671_v24 }
 0x8eb   :  { %v2659_v37 = vpop.xlane.xlu1 %2658  ;;  %v2650_v54 = vpop.xlane.xlu0 %2649 }
 0x8ec   :  { %9453 = vpow2.f32 %v2695_v27  ;;  %v2674_v53 = vsub.f32 %v8421_v33, %v2650_v54  ;;  %v2677_v38 = vsub.f32 %v8424_v28, %v2659_v37  ;;  %v2624_v37 = vsel %vm2038_vm7, %v10839_v39, -inf }
 0x8ee   :  { %v2701_v23 = vmul.f32 1.442695, %v2674_v53  ;;  %v2707_v62 = vmul.f32 1.442695, %v2677_v38 }
 0x8ef   :  { %v2653_v14 = vpop.xlane.xlu1 %2652  ;;  %v10903_v24 = vpop.permute.xlu0 %3263 }
 0x8f0   :  { %9455 = vpow2.f32 %v2701_v23  ;;  %v2675_v8 = vsub.f32 %v2600_v42, %v2653_v14 }
 0x8f1   :  { %9457 = vpow2.f32 %v2697_v6  ;;  %v2621_v6 = vsel %vm2038_vm7, %v10835_v36, -inf }
 0x8f2   :  { %v10871_v25 = vpop.eup %9451  ;;  %9459 = vpow2.f32 %v2707_v62  ;;  %v2703_v4 = vmul.f32 1.442695, %v2675_v8 }
 0x8f3   :  { %v2741_v60 = vsel %vm2038_vm7, %v10871_v25, 0.0 }
 0x8f4   :  { %2742 = vadd.xlane.f32.xlu1 %v2741_v60  ;;  %9461 = vpow2.f32 %v2703_v4 }
 0x8f6   :  { %v10875_v47 = vpop.eup %9453 }
 0x8f7   :  { %v2735_v53 = vsel %vm2038_vm7, %v10875_v47, 0.0 }
 0x8f8   :  { %2736 = vadd.xlane.f32.xlu1 %v2735_v53 }
 0x8fa   :  { %v10879_v54 = vpop.eup %9455 }
 0x8fb   :  { %v2744_v1 = vsel %vm2038_vm7, %v10879_v54, 0.0  ;;  %v10885_v38 = vpop.eup %9457 }
 0x8fc   :  { %2622 = vmax.xlane.f32.xlu1 %v2621_v6  ;;  %2745 = vadd.xlane.f32.xlu0 %v2744_v1  ;;  %v2738_v14 = vsel %vm2038_vm7, %v10885_v38, 0.0  ;;  %v10891_v42 = vpop.eup %9459 }
 0x8fd   :  { %v2753_v31 = vsel %vm2038_vm7, %v10891_v42, 0.0 }
 0x8fe   :  { %v10897_v33 = vpop.eup %9461 }
 0x8ff   :  { %v2747_v28 = vsel %vm2038_vm7, %v10897_v33, 0.0 }
 0x900   :  { %2625 = vmax.xlane.f32.xlu1 %v2624_v37  ;;  %2739 = vadd.xlane.f32.xlu0 %v2738_v14  ;;  %v10923_v14 = vpop.permute.xlu1 %3376 }
 0x904   :  { %2628 = vmax.xlane.f32.xlu1 %v2627_v41  ;;  %2754 = vadd.xlane.f32.xlu0 %v2753_v31 }
 0x908   :  { %2631 = vmax.xlane.f32.xlu1 %v2630_v56  ;;  %2748 = vadd.xlane.f32.xlu0 %v2747_v28 }
 0x920   :  { %v2662_v27 = vpop.xlane.xlu0 %2661 }
 0x921   :  { %v2678_v23 = vsub.f32 %v10830_v48, %v2662_v27  ;;  %v2636_v48 = vsel %vm2038_vm7, %v10847_v26, -inf }
 0x923   :  { %v2709_v62 = vmul.f32 1.442695, %v2678_v23 }
 0x924   :  { %v2656_v8 = vpop.xlane.xlu0 %2655  ;;  %v2617_v41 = vpop.xlane.xlu1 %2616 }
 0x925   :  { %9463 = vpow2.f32 %v2709_v62  ;;  %v2676_v60 = vsub.f32 %v10832_v50, %v2656_v8  ;;  %v2633_v50 = vsel %vm2038_vm7, %v10843_v44, -inf }
 0x927   :  { %v2705_v4 = vmul.f32 1.442695, %v2676_v60 }
 0x928   :  { %v10933_v56 = vpop.permute.xlu0 %3265 }
 0x929   :  { %9465 = vpow2.f32 %v2705_v4 }
 0x92f   :  { %v10907_v53 = vpop.eup %9463 }
 0x930   :  { %v2756_v6 = vsel %vm2038_vm7, %v10907_v53, 0.0 }
 0x931   :  { %2757 = vadd.xlane.f32.xlu0 %v2756_v6 }
 0x933   :  { %v10911_v1 = vpop.eup %9465 }
 0x934   :  { %v2750_v37 = vsel %vm2038_vm7, %v10911_v1, 0.0 }
 0x935   :  { %2751 = vadd.xlane.f32.xlu1 %v2750_v37 }
 0x946   :  { %3380 = vrot.lane.b32.xlu1 %v10532_v12, %s9808_s5 }
 0x947   :  { %3378 = vrot.lane.b32.xlu0 %v10518_v0, %s9808_s5 }
 0x959   :  { %v2620_v27 = vpop.xlane.xlu0 %2619 }
 0x95a   :  { %v2664_v60 = vsub.f32 %v10841_v11, %v2620_v27 }
 0x95c   :  { %v2681_v37 = vmul.f32 1.442695, %v2664_v60 }
 0x966   :  { %2634 = vmax.xlane.f32.xlu0 %v2633_v50 }
 0x96a   :  { %2637 = vmax.xlane.f32.xlu1 %v2636_v48  ;;  %v2663_v48 = vsub.f32 %v10837_v52, %v2617_v41 }
 0x97b   :  { %3269 = vrot.lane.b32.xlu1 %v10487_v18, %s9808_s5 }
 0x97c   :  { %3267 = vrot.lane.b32.xlu0 %v10475_v57, %s9808_s5 }
 0x97f   :  { %3374 = vrot.lane.b32.xlu1 %v10540_v35, %s9808_s5 }
 0x980   :  { %3382 = vrot.lane.b32.xlu0 %v10542_v15, %s9808_s5 }
 0x981   :  { %v2743_v31 = vpop.xlane.xlu1 %2742 }
 0x984   :  { %3368 = vrot.lane.b32.xlu0 %v10500_v46, %s9808_s5 }
 0x985   :  { %v2737_v28 = vpop.xlane.xlu1 %2736 }
 0x988   :  { %3370 = vrot.lane.b32.xlu0 %v10516_v63, %s9808_s5 }
 0x989   :  { %v2623_v23 = vpop.xlane.xlu1 %2622  ;;  %v2746_v62 = vpop.xlane.xlu0 %2745 }
 0x98a   :  { %9467 = vrcp.f32 %v2746_v62 }
 0x98b   :  { %9469 = vrcp.f32 %v2737_v28  ;;  %v2665_v28 = vsub.f32 %v10835_v36, %v2623_v23 }
 0x98c   :  { %3372 = vrot.lane.b32.xlu0 %v10530_v10, %s9808_s5  ;;  %9471 = vrcp.f32 %v2743_v31  ;;  %v2679_v10 = vmul.f32 1.442695, %v2663_v48 }
 0x98d   :  { %v2626_v8 = vpop.xlane.xlu1 %2625  ;;  %v2740_v4 = vpop.xlane.xlu0 %2739  ;;  %v2683_v52 = vmul.f32 1.442695, %v2665_v28 }
 0x98e   :  { %9473 = vrcp.f32 %v2740_v4  ;;  %v2666_v4 = vsub.f32 %v10839_v39, %v2626_v8 }
 0x98f   :  { %9475 = vpow2.f32 %v2681_v37 }
 0x991   :  { %v2629_v6 = vpop.xlane.xlu1 %2628 }
 0x992   :  { %v2667_v50 = vsub.f32 %v10845_v30, %v2629_v6 }
 0x994   :  { %v9468_v35 = vpop.eup %9467  ;;  %v2687_v63 = vmul.f32 1.442695, %v2667_v50  ;;  %v2755_v50 = vpop.xlane.xlu0 %2754 }
 0x995   :  { %v9470_v62 = vpop.eup %9469  ;;  %v2786_v11 = vmul.f32 %v9468_v35, %v10879_v54  ;;  %v2632_v6 = vpop.xlane.xlu1 %2631 }
 0x996   :  { %v9472_v46 = vpop.eup %9471  ;;  %9477 = vpow2.f32 %v2687_v63  ;;  %v2783_v31 = vmul.f32 %v9470_v62, %v10875_v47  ;;  %v3292_v63 = vsel %vm1859_vm6, %v10772_v13, 0  ;;  %v3295_v13 = vsel %vm1859_vm6, %v10867_v19, 0 }
 0x997   :  { %v2785_v30 = vmul.f32 %v9472_v46, %v10871_v25  ;;  %9479 = vpow2.f32 %v2679_v10  ;;  %v2668_v25 = vsub.f32 %v10851_v9, %v2632_v6  ;;  %v3301_v62 = vsel %vm1859_vm6, %v10869_v43, 0 }
 0x998   :  { %v9474_v15 = vpop.eup %9473  ;;  %9481 = vpow2.f32 %v2683_v52 }
 0x999   :  { %v2784_v27 = vmul.f32 %v9474_v15, %v10885_v38  ;;  %v2796_v41 = vpack.c.bf16 %v2786_v11, %v2785_v30  ;;  %v10954_v35 = vpop.eup %9475  ;;  %v2685_v15 = vmul.f32 1.442695, %v2666_v4  ;;  %v2689_v36 = vmul.f32 1.442695, %v2668_v25 }
 0x99a   :  { %v2714_v46 = vsel %vm2038_vm7, %v10954_v35, 0.0 }
 0x99b   :  { %v2795_v60 = vpack.c.bf16 %v2784_v27, %v2783_v31  ;;  %9483 = vpow2.f32 %v2685_v15 }
 0x99c   :  { %9485 = vpow2.f32 %v2689_v36 }
 0x99d   :  { %8450 = vmatprep.mubr.msk.bf16.mxu1 %vm2038_vm7, %v2795_v60 }
 0x99e   :  { %8451 = vmatmul.mubr.msk.bf16.vlgmr.msra.gmra.mrb[68].mxu1 %vm2038_vm7, %v2796_v41 }
 0x99f   :  { %8499 = vmatpush3.bf16.xpose.msra.mxu1 %v3292_v63 }
 0x9a0   :  { %9114 = vmatprep.subr.msk.bf16.mxu1 %vm1859_vm6, %v10867_v19  ;;  %v10961_v10 = vpop.eup %9477  ;;  %v3298_v19 = vsel %vm1859_vm6, %v10865_v20, 0 }
 0x9a1   :  { %v10963_v39 = vpop.eup %9479  ;;  %v2723_v47 = vsel %vm2038_vm7, %v10961_v10, 0.0 }
 0x9a2   :  { %v2711_v9 = vsel %vm2038_vm7, %v10963_v39, 0.0  ;;  %v10973_v54 = vpop.eup %9481 }
 0x9a3   :  { %2715 = vadd.xlane.f32.xlu1 %v2714_v46  ;;  %v2717_v38 = vsel %vm2038_vm7, %v10973_v54, 0.0 }
 0x9a5   :  { %v10977_v23 = vpop.eup %9483 }
 0x9a6   :  { %v2720_v8 = vsel %vm2038_vm7, %v10977_v23, 0.0  ;;  %v10985_v37 = vpop.eup %9485 }
 0x9a7   :  { %8501 = vmatpush3.bf16.xpose.msra.mxu1 %v3295_v13  ;;  %2724 = vadd.xlane.f32.xlu1 %v2723_v47  ;;  %v2726_v48 = vsel %vm2038_vm7, %v10985_v37, 0.0 }
 0x9a8   :  { %9115 = vmatprep.subr.msk.bf16.mxu1 %vm1859_vm6, %v10865_v20  ;;  %v2749_v20 = vpop.xlane.xlu0 %2748 }
 0x9ab   :  { %2712 = vadd.xlane.f32.xlu0 %v2711_v9 }
 0x9af   :  { %2718 = vadd.xlane.f32.xlu0 %v2717_v38  ;;  %8503 = vmatpush3.bf16.xpose.msra.mxu1 %v3298_v19 }
 0x9b0   :  { %9116 = vmatprep.subr.msk.bf16.mxu1 %vm1859_vm6, %v10869_v43 }
 0x9b3   :  { %2721 = vadd.xlane.f32.xlu0 %v2720_v8 }
 0x9b7   :  { %2727 = vadd.xlane.f32.xlu0 %v2726_v48  ;;  %8505 = vmatpush3.bf16.xpose.msra.mxu1 %v3301_v62 }
 0x9b8   :  { %9117 = vmatprep.subr.msk.bf16.mxu1 %vm1859_vm6, %v10923_v14 }
 0x9be   :  { %v2758_v28 = vpop.xlane.xlu0 %2757 }
 0x9bf   :  { %9487 = vrcp.f32 %v2758_v28 }
 0x9c0   :  { %9489 = vrcp.f32 %v2749_v20 }
 0x9c1   :  { %9491 = vrcp.f32 %v2755_v50 }
 0x9c2   :  { %v2752_v11 = vpop.xlane.xlu1 %2751 }
 0x9c3   :  { %9493 = vrcp.f32 %v2752_v11 }
 0x9c9   :  { %v9488_v31 = vpop.eup %9487 }
 0x9ca   :  { %v9490_v27 = vpop.eup %9489  ;;  %v2790_v52 = vmul.f32 %v9488_v31, %v10907_v53  ;;  %v3397_v53 = vsel %vm1859_vm6, %v10923_v14, 0 }
 0x9cb   :  { %v9492_v30 = vpop.eup %9491  ;;  %v2787_v43 = vmul.f32 %v9490_v27, %v10897_v33  ;;  %v3379_v33 = vpop.permute.xlu0 %3378 }
 0x9cc   :  { %v2789_v4 = vmul.f32 %v9492_v30, %v10891_v42  ;;  %v3400_v42 = vsel %vm1859_vm6, %v3379_v33, 0 }
 0x9cd   :  { %v9494_v60 = vpop.eup %9493 }
 0x9ce   :  { %v2788_v41 = vmul.f32 %v9494_v60, %v10911_v1  ;;  %v2798_v63 = vpack.c.bf16 %v2790_v52, %v2789_v4  ;;  %v3381_v1 = vpop.permute.xlu1 %3380 }
 0x9cf   :  { %v3403_v15 = vsel %vm1859_vm6, %v3381_v1, 0 }
 0x9d0   :  { %v2797_v6 = vpack.c.bf16 %v2788_v41, %v2787_v43 }
 0x9d2   :  { %8454 = vmatprep.mubr.msk.bf16.mxu1 %vm2038_vm7, %v2797_v6 }
 0x9d3   :  { %8455 = vmatmul.mubr.msk.bf16.gmra.mrb[72].mxu1 %vm2038_vm7, %v2798_v63 }
 0x9d4   :  { %8506 = vmatprep.mubr.msk.bf16.mxu1 %vm1859_vm6, %v10903_v24 }
 0x9db   :  { %8507 = vmatmul.mubr.msk.bf16.vlgmr.msra.gmra.mrb[76].mxu1 %vm1859_vm6, %v10933_v56 }
 0x9dc   :  { %8515 = vmatpush3.bf16.xpose.msra.mxu1 %v3397_v53 }
 0x9dd   :  { %9118 = vmatprep.subr.msk.bf16.mxu1 %vm1859_vm6, %v3379_v33 }
 0x9e4   :  { %8517 = vmatpush3.bf16.xpose.msra.mxu1 %v3400_v42 }
 0x9e5   :  { %9119 = vmatprep.subr.msk.bf16.mxu1 %vm1859_vm6, %v3381_v1 }
 0x9ec   :  { %8519 = vmatpush3.bf16.xpose.msra.mxu1 %v3403_v15 }
 0x9f3   :  { %v2635_v24 = vpop.xlane.xlu0 %2634 }
 0x9f4   :  { %v2669_v25 = vsub.f32 %v10843_v44, %v2635_v24 }
 0x9f6   :  { %v2691_v56 = vmul.f32 1.442695, %v2669_v25 }
 0x9f7   :  { %v3268_v46 = vpop.permute.xlu0 %3267  ;;  %v2638_v14 = vpop.xlane.xlu1 %2637 }
 0x9f8   :  { %9495 = vpow2.f32 %v2691_v56  ;;  %8510 = vmatprep.mubr.msk.bf16.mxu1 %vm1859_vm6, %v3268_v46  ;;  %v2670_v36 = vsub.f32 %v10847_v26, %v2638_v14 }
 0x9fa   :  { %v2693_v13 = vmul.f32 1.442695, %v2670_v36 }
 0x9fb   :  { %v3383_v47 = vpop.permute.xlu0 %3382  ;;  %v3270_v9 = vpop.permute.xlu1 %3269 }
 0x9fc   :  { %9120 = vmatprep.subr.msk.bf16.mxu1 %vm1859_vm6, %v3383_v47  ;;  %v3406_v38 = vsel %vm1859_vm6, %v3383_v47, 0  ;;  %9497 = vpow2.f32 %v2693_v13  ;;  %8511 = vmatmul.mubr.msk.bf16.gmra.mrb[80].mxu1 %vm1859_vm6, %v3270_v9 }
 0x9fd   :  { %8521 = vmatpush3.bf16.xpose.msra.mxu1 %v3406_v38 }
 0x9ff   :  { %v3369_v44 = vpop.permute.xlu0 %3368  ;;  %v3375_v20 = vpop.permute.xlu1 %3374 }
 0xa00   :  { %8522 = vmatprep.mubr.msk.bf16.mxu1 %vm1859_vm6, %v3369_v44 }
 0xa02   :  { %v11016_v19 = vpop.eup %9495 }
 0xa03   :  { %v3371_v8 = vpop.permute.xlu0 %3370  ;;  %v2729_v26 = vsel %vm2038_vm7, %v11016_v19, 0.0 }
 0xa04   :  { %2730 = vadd.xlane.f32.xlu1 %v2729_v26  ;;  %8523 = vmatmul.mubr.msk.bf16.vlgmr.msra.gmra.mrb[84].mxu1 %vm1859_vm6, %v3371_v8 }
 0xa06   :  { %v11021_v50 = vpop.eup %9497 }
 0xa07   :  { %v3373_v48 = vpop.permute.xlu0 %3372  ;;  %v2732_v62 = vsel %vm2038_vm7, %v11021_v50, 0.0 }
 0xa08   :  { %8526 = vmatprep.mubr.msk.bf16.mxu1 %vm1859_vm6, %v3373_v48  ;;  %2733 = vadd.xlane.f32.xlu0 %v2732_v62 }
 0xa0c   :  { %8527 = vmatmul.mubr.msk.bf16.gmra.mrb[88].mxu1 %vm1859_vm6, %v3375_v20 }
 0xa15   :  { %2803 = vrot.lane.b32.xlu1 %v10461_v51, %s9807_s0 }
 0xa19   :  { %2807 = vrot.lane.b32.xlu1 %v10473_v5, %s9807_s0 }
 0xa1d   :  { %2809 = vrot.lane.b32.xlu1 %v10471_v49, %s9807_s0 }
 0xa1e   :  { %2805 = vrot.lane.b32.xlu0 %v10459_v29, %s9807_s0 }
 0xa21   :  { %3657 = vrot.lane.b32.xlu1 %v10461_v51, %s9808_s5 }
 0xa25   :  { %3659 = vrot.lane.b32.xlu1 %v10459_v29, %s9808_s5 }
 0xa30   :  { %v2716_v28 = vpop.xlane.xlu1 %2715 }
 0xa31   :  { %9499 = vrcp.f32 %v2716_v28 }
 0xa38   :  { %v2713_v11 = vpop.xlane.xlu0 %2712 }
 0xa39   :  { %9501 = vrcp.f32 %v2713_v11 }
 0xa3b   :  { %v9500_v31 = vpop.eup %9499 }
 0xa3c   :  { %v2776_v60 = vmul.f32 %v9500_v31, %v10954_v35  ;;  %v2725_v35 = vpop.xlane.xlu1 %2724 }
 0xa43   :  { %v9502_v27 = vpop.eup %9501 }
 0xa44   :  { %v2775_v30 = vmul.f32 %v9502_v27, %v10963_v39  ;;  %v2719_v39 = vpop.xlane.xlu0 %2718 }
 0xa46   :  { %v2791_v52 = vpack.c.bf16 %v2776_v60, %v2775_v30 }
 0xa48   :  { %8434 = vmatprep.mubr.msk.bf16.mxu0 %vm2038_vm7, %v2791_v52  ;;  %v2722_v33 = vpop.xlane.xlu0 %2721 }
 0xa49   :  { %9503 = vrcp.f32 %v2722_v33 }
 0xa4c   :  { %v2728_v1 = vpop.xlane.xlu0 %2727 }
 0xa4d   :  { %9505 = vrcp.f32 %v2728_v1 }
 0xa4e   :  { %9507 = vrcp.f32 %v2719_v39 }
 0xa4f   :  { %9509 = vrcp.f32 %v2725_v35 }
 0xa53   :  { %v9504_v46 = vpop.eup %9503 }
 0xa54   :  { %v2778_v9 = vmul.f32 %v9504_v46, %v10977_v23 }
 0xa57   :  { %v9506_v14 = vpop.eup %9505 }
 0xa58   :  { %v9508_v36 = vpop.eup %9507  ;;  %v2780_v38 = vmul.f32 %v9506_v14, %v10985_v37 }
 0xa59   :  { %v9510_v47 = vpop.eup %9509  ;;  %v2777_v44 = vmul.f32 %v9508_v36, %v10973_v54 }
 0xa5a   :  { %v2779_v8 = vmul.f32 %v9510_v47, %v10961_v10 }
 0xa5b   :  { %v2792_v26 = vpack.c.bf16 %v2778_v9, %v2777_v44 }
 0xa5c   :  { %v2793_v62 = vpack.c.bf16 %v2780_v38, %v2779_v8 }
 0xa71   :  { %v11042_v43 = vpop.f32.mrb[68].mxu1 }
 0xa72   :  { %v11044_v41 = vpop.f32.mrb[69].mxu1 }
 0xa73   :  { %v11046_v4 = vpop.f32.mrb[70].mxu1 }
 0xa74   :  { %v11050_v63 = vpop.f32.mrb[71].mxu1 }
 0xa91   :  { %v2731_v42 = vpop.xlane.xlu1 %2730 }
 0xa95   :  { %v2804_v15 = vpop.permute.xlu1 %2803  ;;  %v2734_v24 = vpop.xlane.xlu0 %2733 }
 0xa96   :  { %8426 = vmatprep.subr.bf16.mxu0 %v2804_v15  ;;  %9511 = vrcp.f32 %v2734_v24 }
 0xa97   :  { %8427 = vmatpush3.bf16.msra.mxu0 %v2804_v15  ;;  %9513 = vrcp.f32 %v2731_v42 }
 0xa99   :  { %v2808_v25 = vpop.permute.xlu1 %2807  ;;  %v2806_v56 = vpop.permute.xlu0 %2805 }
 0xa9a   :  { %8428 = vmatprep.subr.bf16.mxu0 %v2806_v56 }
 0xa9b   :  { %8429 = vmatpush3.bf16.msra.mxu0 %v2806_v56 }
 0xa9c   :  { %8430 = vmatprep.subr.bf16.mxu0 %v2808_v25 }
 0xa9d   :  { %v2810_v13 = vpop.permute.xlu1 %2809 }
 0xa9f   :  { %8431 = vmatpush3.bf16.msra.mxu0 %v2808_v25 }
 0xaa0   :  { %8432 = vmatprep.subr.bf16.mxu0 %v2810_v13  ;;  %v9512_v48 = vpop.eup %9511 }
 0xaa1   :  { %v9514_v28 = vpop.eup %9513  ;;  %v2782_v37 = vmul.f32 %v9512_v48, %v11021_v50 }
 0xaa2   :  { %v2781_v27 = vmul.f32 %v9514_v28, %v11016_v19 }
 0xaa3   :  { %8433 = vmatpush3.bf16.msra.mxu0 %v2810_v13 }
 0xaa4   :  { %v2794_v30 = vpack.c.bf16 %v2782_v37, %v2781_v27 }
 0xaa6   :  { %8435 = vmatmul.mubr.msk.bf16.vlgmr.msra.gmra.mrb[68].mxu0 %vm2038_vm7, %v2792_v26  ;;  %v11059_v20 = vpop.f32.mrb[72].mxu1 }
 0xaa7   :  { %8438 = vmatprep.mubr.msk.bf16.mxu0 %vm2038_vm7, %v2793_v62  ;;  %v11062_v11 = vpop.f32.mrb[73].mxu1 }
 0xaa8   :  { %v11064_v23 = vpop.f32.mrb[74].mxu1 }
 0xaa9   :  { %v11069_v10 = vpop.f32.mrb[75].mxu1 }
 0xaae   :  { %8439 = vmatmul.mubr.msk.bf16.gmra.mrb[72].mxu0 %vm2038_vm7, %v2794_v30  ;;  %v8508_v60 = vpop.f32.mrb[76].mxu1 }
 0xaaf   :  { %v11075_v52 = vpop.f32.mrb[77].mxu1  ;;  %v3479_v39 = vsel %vm2038_vm7, %v8508_v60, -inf }
 0xab0   :  { %3480 = vmax.xlane.f32.xlu0 %v3479_v39  ;;  %v11078_v50 = vpop.f32.mrb[78].mxu1  ;;  %v3473_v19 = vsel %vm2038_vm7, %v11075_v52, -inf }
 0xab1   :  { %v11080_v33 = vpop.f32.mrb[79].mxu1  ;;  %v3482_v42 = vsel %vm2038_vm7, %v11078_v50, -inf }
 0xab2   :  { %v3476_v35 = vsel %vm2038_vm7, %v11080_v33, -inf }
 0xab3   :  { %3477 = vmax.xlane.f32.xlu1 %v3476_v35 }
 0xab4   :  { %3474 = vmax.xlane.f32.xlu0 %v3473_v19 }
 0xab8   :  { %3483 = vmax.xlane.f32.xlu0 %v3482_v42  ;;  %v9243_v42 = vld [vmem:[%s9888_s6 + $0x10] sm:$0xff]  }
 0xab9   :  { %8458 = vmatprep.subr.bf16.mxu0 %v9243_v42 }
 0xaba   :  { %8459 = vmatpush3.bf16.msra.mxu0 %v9243_v42 }
 0xacf   :  { %v11088_v1 = vpop.f32.mrb[80].mxu1 }
 0xad0   :  { %v11090_v15 = vpop.f32.mrb[81].mxu1  ;;  %v3491_v24 = vsel %vm2038_vm7, %v11088_v1, -inf }
 0xad1   :  { %3492 = vmax.xlane.f32.xlu1 %v3491_v24  ;;  %v11094_v25 = vpop.f32.mrb[82].mxu1  ;;  %v3485_v14 = vsel %vm2038_vm7, %v11090_v15, -inf  ;;  %v9244_v24 = vld [vmem:[%s9888_s6 + $0x18] sm:$0xff]  }
 0xad2   :  { %v11096_v56 = vpop.f32.mrb[83].mxu1  ;;  %v3494_v46 = vsel %vm2038_vm7, %v11094_v25, -inf  ;;  %8460 = vmatprep.subr.bf16.mxu0 %v9244_v24 }
 0xad3   :  { %3495 = vmax.xlane.f32.xlu0 %v3494_v46  ;;  %v3488_v36 = vsel %vm2038_vm7, %v11096_v56, -inf  ;;  %8461 = vmatpush3.bf16.msra.mxu0 %v9244_v24  ;;  %v11143_v46 = vld [vmem:[%s9888_s6] sm:$0xff]  }
 0xad4   :  { %8478 = vmatprep.subr.bf16.mxu0 %v11143_v46 }
 0xad5   :  { %3486 = vmax.xlane.f32.xlu1 %v3485_v14  ;;  %v11146_v14 = vpop.permute.xlu1 %3657 }
 0xad7   :  { %3489 = vmax.xlane.f32.xlu0 %v3488_v36  ;;  %v11104_v13 = vpop.f32.mrb[84].mxu1 }
 0xad8   :  { %v11106_v47 = vpop.f32.mrb[85].mxu1  ;;  %v3503_v9 = vsel %vm2038_vm7, %v11104_v13, -inf }
 0xad9   :  { %3504 = vmax.xlane.f32.xlu1 %v3503_v9  ;;  %v11110_v38 = vpop.f32.mrb[86].mxu1  ;;  %v3497_v26 = vsel %vm2038_vm7, %v11106_v47, -inf  ;;  %v11148_v36 = vpop.permute.xlu1 %3659 }
 0xada   :  { %v11112_v44 = vpop.f32.mrb[87].mxu1  ;;  %v3506_v8 = vsel %vm2038_vm7, %v11110_v38, -inf }
 0xadb   :  { %3507 = vmax.xlane.f32.xlu0 %v3506_v8  ;;  %v3500_v48 = vsel %vm2038_vm7, %v11112_v44, -inf }
 0xadd   :  { %3498 = vmax.xlane.f32.xlu1 %v3497_v26 }
 0xadf   :  { %3501 = vmax.xlane.f32.xlu0 %v3500_v48  ;;  %v11120_v62 = vpop.f32.mrb[88].mxu1 }
 0xae0   :  { %v11122_v28 = vpop.f32.mrb[89].mxu1  ;;  %v3515_v37 = vsel %vm2038_vm7, %v11120_v62, -inf }
 0xae1   :  { %3516 = vmax.xlane.f32.xlu1 %v3515_v37  ;;  %v11126_v27 = vpop.f32.mrb[90].mxu1  ;;  %v3509_v35 = vsel %vm2038_vm7, %v11122_v28, -inf }
 0xae2   :  { %v11128_v30 = vpop.f32.mrb[91].mxu1  ;;  %v3518_v39 = vsel %vm2038_vm7, %v11126_v27, -inf }
 0xae3   :  { %3519 = vmax.xlane.f32.xlu0 %v3518_v39  ;;  %v3512_v19 = vsel %vm2038_vm7, %v11128_v30, -inf }
 0xae5   :  { %3510 = vmax.xlane.f32.xlu1 %v3509_v35 }
 0xae7   :  { %3513 = vmax.xlane.f32.xlu0 %v3512_v19 }
 0xaf6   :  { %3663 = vrot.lane.b32.xlu1 %v10471_v49, %s9808_s5 }
 0xafd   :  { %3661 = vrot.lane.b32.xlu0 %v10473_v5, %s9808_s5 }
 0xb3d   :  { %v3481_v9 = vpop.xlane.xlu0 %3480 }
 0xb3e   :  { %v3523_v8 = vsub.f32 %v8508_v60, %v3481_v9 }
 0xb40   :  { %v3541_v26 = vmul.f32 1.442695, %v3523_v8  ;;  %v3478_v48 = vpop.xlane.xlu1 %3477 }
 0xb41   :  { %v3475_v37 = vpop.xlane.xlu0 %3474  ;;  %v3522_v35 = vsub.f32 %v11080_v33, %v3478_v48 }
 0xb42   :  { %9515 = vpow2.f32 %v3541_v26  ;;  %v3521_v39 = vsub.f32 %v11075_v52, %v3475_v37 }
 0xb43   :  { %v3539_v54 = vmul.f32 1.442695, %v3522_v35 }
 0xb44   :  { %v3537_v19 = vmul.f32 1.442695, %v3521_v39 }
 0xb45   :  { %v3484_v42 = vpop.xlane.xlu0 %3483 }
 0xb46   :  { %9517 = vpow2.f32 %v3537_v19  ;;  %v3524_v24 = vsub.f32 %v11078_v50, %v3484_v42 }
 0xb48   :  { %v3543_v31 = vmul.f32 1.442695, %v3524_v24 }
 0xb4a   :  { %9519 = vpow2.f32 %v3543_v31 }
 0xb4b   :  { %9521 = vpow2.f32 %v3539_v54 }
 0xb4c   :  { %v11153_v6 = vpop.eup %9515 }
 0xb4d   :  { %v3575_v60 = vsel %vm2038_vm7, %v11153_v6, 0.0 }
 0xb4e   :  { %3576 = vadd.xlane.f32.xlu1 %v3575_v60 }
 0xb50   :  { %v11157_v9 = vpop.eup %9517 }
 0xb51   :  { %v3569_v52 = vsel %vm2038_vm7, %v11157_v9, 0.0 }
 0xb52   :  { %3570 = vadd.xlane.f32.xlu1 %v3569_v52 }
 0xb54   :  { %v11161_v33 = vpop.eup %9519 }
 0xb55   :  { %v3578_v50 = vsel %vm2038_vm7, %v11161_v33, 0.0  ;;  %v11165_v8 = vpop.eup %9521 }
 0xb56   :  { %3579 = vadd.xlane.f32.xlu0 %v3578_v50  ;;  %v3572_v54 = vsel %vm2038_vm7, %v11165_v8, 0.0 }
 0xb5a   :  { %3573 = vadd.xlane.f32.xlu0 %v3572_v54 }
 0xb5e   :  { %v3493_v31 = vpop.xlane.xlu1 %3492 }
 0xb5f   :  { %v3527_v26 = vsub.f32 %v11088_v1, %v3493_v31 }
 0xb60   :  { %v3496_v48 = vpop.xlane.xlu0 %3495 }
 0xb61   :  { %v3549_v37 = vmul.f32 1.442695, %v3527_v26  ;;  %v3528_v39 = vsub.f32 %v11094_v25, %v3496_v48 }
 0xb62   :  { %v3487_v35 = vpop.xlane.xlu1 %3486 }
 0xb63   :  { %9523 = vpow2.f32 %v3549_v37  ;;  %v3551_v19 = vmul.f32 1.442695, %v3528_v39  ;;  %v3525_v42 = vsub.f32 %v11090_v15, %v3487_v35 }
 0xb64   :  { %v3490_v24 = vpop.xlane.xlu0 %3489 }
 0xb65   :  { %9525 = vpow2.f32 %v3551_v19  ;;  %v3545_v60 = vmul.f32 1.442695, %v3525_v42  ;;  %v3526_v52 = vsub.f32 %v11096_v56, %v3490_v24 }
 0xb66   :  { %v3505_v50 = vpop.xlane.xlu1 %3504 }
 0xb67   :  { %9527 = vpow2.f32 %v3545_v60  ;;  %v3547_v54 = vmul.f32 1.442695, %v3526_v52  ;;  %v3531_v53 = vsub.f32 %v11104_v13, %v3505_v50 }
 0xb68   :  { %v3508_v1 = vpop.xlane.xlu0 %3507 }
 0xb69   :  { %9529 = vpow2.f32 %v3547_v54  ;;  %v3557_v31 = vmul.f32 1.442695, %v3531_v53  ;;  %v3532_v25 = vsub.f32 %v11110_v38, %v3508_v1 }
 0xb6a   :  { %v3499_v26 = vpop.xlane.xlu1 %3498 }
 0xb6b   :  { %9531 = vpow2.f32 %v3557_v31  ;;  %v3529_v48 = vsub.f32 %v11106_v47, %v3499_v26  ;;  %v3559_v35 = vmul.f32 1.442695, %v3532_v25 }
 0xb6c   :  { %v3502_v15 = vpop.xlane.xlu0 %3501 }
 0xb6d   :  { %v11176_v37 = vpop.eup %9523  ;;  %v3553_v39 = vmul.f32 1.442695, %v3529_v48  ;;  %v3530_v56 = vsub.f32 %v11112_v44, %v3502_v15 }
 0xb6e   :  { %v3517_v19 = vpop.xlane.xlu1 %3516  ;;  %v3587_v13 = vsel %vm2038_vm7, %v11176_v37, 0.0 }
 0xb6f   :  { %v11181_v42 = vpop.eup %9525  ;;  %9533 = vpow2.f32 %v3553_v39  ;;  %v3535_v53 = vsub.f32 %v11120_v62, %v3517_v19  ;;  %3588 = vadd.xlane.f32.xlu1 %v3587_v13  ;;  %v3555_v44 = vmul.f32 1.442695, %v3530_v56 }
 0xb70   :  { %v3520_v38 = vpop.xlane.xlu0 %3519  ;;  %v3590_v47 = vsel %vm2038_vm7, %v11181_v42, 0.0  ;;  %9535 = vpow2.f32 %v3559_v35 }
 0xb71   :  { %v11186_v24 = vpop.eup %9527  ;;  %v3565_v60 = vmul.f32 1.442695, %v3535_v53  ;;  %v3536_v52 = vsub.f32 %v11126_v27, %v3520_v38  ;;  %3591 = vadd.xlane.f32.xlu0 %v3590_v47 }
 0xb72   :  { %v3511_v50 = vpop.xlane.xlu1 %3510  ;;  %v3581_v54 = vsel %vm2038_vm7, %v11186_v24, 0.0 }
 0xb73   :  { %v11191_v1 = vpop.eup %9529  ;;  %9537 = vpow2.f32 %v3565_v60  ;;  %v3533_v62 = vsub.f32 %v11122_v28, %v3511_v50  ;;  %3582 = vadd.xlane.f32.xlu1 %v3581_v54  ;;  %v3567_v27 = vmul.f32 1.442695, %v3536_v52  ;;  %v9246_v50 = vld [vmem:[%s9888_s6 + $0x8] sm:$0xff]  }
 0xb74   :  { %v3514_v31 = vpop.xlane.xlu0 %3513  ;;  %v3584_v25 = vsel %vm2038_vm7, %v11191_v1, 0.0  ;;  %9539 = vpow2.f32 %v3555_v44 }
 0xb75   :  { %v11196_v26 = vpop.eup %9531  ;;  %v3561_v48 = vmul.f32 1.442695, %v3533_v62  ;;  %v3534_v15 = vsub.f32 %v11128_v30, %v3514_v31  ;;  %3585 = vadd.xlane.f32.xlu0 %v3584_v25 }
 0xb76   :  { %v3599_v35 = vsel %vm2038_vm7, %v11196_v26, 0.0 }
 0xb77   :  { %9541 = vpow2.f32 %v3561_v48  ;;  %v3563_v39 = vmul.f32 1.442695, %v3534_v15 }
 0xb78   :  { %9543 = vpow2.f32 %v3567_v27 }
 0xb79   :  { %v11201_v28 = vpop.eup %9533  ;;  %v8436_v56 = vpop.f32.mrb[68].mxu0  ;;  %3600 = vadd.xlane.f32.xlu0 %v3599_v35  ;;  %9545 = vpow2.f32 %v3563_v39 }
 0xb7a   :  { %v2861_v19 = vpop.f32.mrb[69].mxu0  ;;  %v11203_v53 = vpop.eup %9535  ;;  %v3593_v47 = vsel %vm2038_vm7, %v11201_v28, 0.0 }
 0xb7b   :  { %v8437_v13 = vpop.f32.mrb[70].mxu0  ;;  %v3602_v62 = vsel %vm2038_vm7, %v11203_v53, 0.0 }
 0xb7c   :  { %v2986_v38 = vpack.c.bf16 %v8437_v13, %v8436_v56  ;;  %v2864_v30 = vpop.f32.mrb[71].mxu0 }
 0xb7d   :  { %v11207_v60 = vpop.eup %9537  ;;  %v2985_v52 = vpack.c.bf16 %v2864_v30, %v2861_v19  ;;  %3594 = vadd.xlane.f32.xlu0 %v3593_v47  ;;  %v12509_v47 = vpack.c.bf16 %v11050_v63, %v11044_v41  ;;  %v12513_v41 = vpack.c.bf16 %v10785_v32, %v10779_v22  ;;  %v12515_v22 = vpack.c.bf16 %v10797_v17, %v10791_v58  ;;  %v12517_v32 = vld [vmem:[#allocation41_spill] sm:$0xff]  ;;  %v3664_v58 = vpop.permute.xlu1 %3663  ;;  %v12521_v63 = vld [vmem:[#allocation39_spill] sm:$0xff] }
 0xb7e   :  { %v3611_v44 = vsel %vm2038_vm7, %v11207_v60, 0.0  ;;  %v11213_v54 = vpop.eup %9539  ;;  %v12519_v17 = vld [vmem:[#allocation49_spill] sm:$0xff] }
 0xb7f   :  { %8462 = vmatprep.mubr.msk.bf16.mxu0 %vm1859_vm6, %v2985_v52  ;;  %3612 = vadd.xlane.f32.xlu1 %v3611_v44  ;;  %v3596_v19 = vsel %vm2038_vm7, %v11213_v54, 0.0  ;;  %v12510_v52 = vpack.c.bf16 %v11046_v4, %v11042_v43  ;;  %v12511_v44 = vpack.c.bf16 %v11069_v10, %v11062_v11  ;;  %v12514_v43 = vpack.c.bf16 %v10781_v61, %v10777_v59  ;;  %v3662_v59 = vpop.permute.xlu0 %3661  ;;  %v9247_v4 = vld [vmem:[%s9888_s6 + $0x20] sm:$0xff]   ;;  %v12528_v10 = vld [vmem:[#allocation53_spill] sm:$0xff] }
 0xb80   :  { %8463 = vmatmul.mubr.msk.bf16.vlgmr.msra.gmra.mrb[76].mxu0 %vm1859_vm6, %v2986_v38  ;;  %v12516_v61 = vpack.c.bf16 %v10793_v34, %v10789_v40  ;;  %v12523_v40 = vld [vmem:[#allocation43_spill] sm:$0xff]  ;;  %v12524_v34 = vld [vmem:[#allocation50_spill] sm:$0xff] }
 0xb81   :  { %v11218_v31 = vpop.eup %9541  ;;  %8479 = vmatpush3.bf16.msra.mxu0 %v11143_v46  ;;  %v8440_v25 = vpop.f32.mrb[72].mxu0  ;;  %3603 = vadd.xlane.f32.xlu0 %v3602_v62  ;;  %v12531_v62 = vld [vmem:[#allocation52_spill] sm:$0xff] }
 0xb82   :  { %v2877_v27 = vpop.f32.mrb[73].mxu0  ;;  %8480 = vmatprep.subr.bf16.mxu0 %v9246_v50  ;;  %v3605_v48 = vsel %vm2038_vm7, %v11218_v31, 0.0  ;;  %v11223_v15 = vpop.eup %9543 }
 0xb83   :  { %v8441_v39 = vpop.f32.mrb[74].mxu0  ;;  %3606 = vadd.xlane.f32.xlu1 %v3605_v48  ;;  %v11227_v13 = vpop.eup %9545  ;;  %v3614_v46 = vsel %vm2038_vm7, %v11223_v15, 0.0  ;;  %v12535_v48 = vld [vmem:[#allocation44_spill] sm:$0xff] }
 0xb84   :  { %v2988_v35 = vpack.c.bf16 %v8441_v39, %v8440_v25  ;;  %v2880_v56 = vpop.f32.mrb[75].mxu0  ;;  %v3608_v30 = vsel %vm2038_vm7, %v11227_v13, 0.0 }
 0xb85   :  { %v2987_v38 = vpack.c.bf16 %v2880_v56, %v2877_v27  ;;  %8481 = vmatpush3.bf16.msra.mxu0 %v9246_v50  ;;  %3597 = vadd.xlane.f32.xlu0 %v3596_v19  ;;  %v12512_v50 = vpack.c.bf16 %v11064_v23, %v11059_v20  ;;  %v12525_v20 = vld [vmem:[#allocation48_spill] sm:$0xff]  ;;  %v12527_v23 = vld [vmem:[#allocation55_spill] sm:$0xff]  ;;  %v12534_v27 = vld [vmem:[#allocation42_spill] sm:$0xff] }
 0xb86   :  { %8530 = vmatprep.subr.bf16.mxu0 %v11146_v14  ;;  %v12526_v11 = vpack.c.bf16 %v12524_v34, %v12525_v20 }
 0xb87   :  { %8466 = vmatprep.mubr.msk.bf16.mxu0 %vm1859_vm6, %v2987_v38  ;;  %3615 = vadd.xlane.f32.xlu1 %v3614_v46 }
 0xb88   :  { %8467 = vmatmul.mubr.msk.bf16.gmra.mrb[80].mxu0 %vm1859_vm6, %v2988_v35 }
 0xb89   :  { %8470 = vmatprep.mubr.msk.bf16.mxu0 %vm1859_vm6, %v12509_v47  ;;  %3609 = vadd.xlane.f32.xlu0 %v3608_v30 }
 0xb90   :  { %8471 = vmatmul.mubr.msk.bf16.gmra.mrb[84].mxu0 %vm1859_vm6, %v12510_v52 }
 0xb91   :  { %8474 = vmatprep.mubr.msk.bf16.mxu0 %vm1859_vm6, %v12511_v44 }
 0xb98   :  { %8475 = vmatmul.mubr.msk.bf16.gmra.mrb[88].mxu0 %vm1859_vm6, %v12512_v50  ;;  %3748 = vrot.lane.b32.xlu1 %v10483_v16, %s9808_s5 }
 0xb99   :  { %8482 = vmatprep.mubr.msk.bf16.mxu0 %vm1859_vm6, %v12513_v41 }
 0xb9c   :  { %3750 = vrot.lane.b32.xlu1 %v10498_v45, %s9808_s5 }
 0xb9f   :  { %3746 = vrot.lane.b32.xlu0 %v10485_v21, %s9808_s5 }
 0xba0   :  { %8483 = vmatmul.mubr.msk.bf16.vlgmr.msra.gmra.mrb[76].mxu0 %vm1859_vm6, %v12514_v43  ;;  %3752 = vrot.lane.b32.xlu1 %v10496_v2, %s9808_s5  ;;  %v9248_v43 = vld [vmem:[%s9888_s6 + $0x28] sm:$0xff]  }
 0xba1   :  { %8531 = vmatpush3.bf16.msra.mxu0 %v11146_v14  ;;  %8486 = vmatprep.mubr.msk.bf16.mxu0 %vm1859_vm6, %v12515_v22  ;;  %v12529_v14 = vpack.c.bf16 %v12527_v23, %v12528_v10 }
 0xba2   :  { %8532 = vmatprep.subr.bf16.mxu0 %v11148_v36 }
 0xba3   :  { %4004 = vrot.lane.b32.xlu0 %v10451_v7, %s9809_s9  ;;  %v12518_v7 = vld [vmem:[#allocation51_spill] sm:$0xff] }
 0xba4   :  { %4006 = vrot.lane.b32.xlu1 %v10465_v55, %s9809_s9  ;;  %v12520_v55 = vpack.c.bf16 %v12518_v7, %v12519_v17 }
 0xba5   :  { %8533 = vmatpush3.bf16.msra.mxu0 %v11148_v36  ;;  %v12530_v36 = vld [vmem:[#allocation54_spill] sm:$0xff] }
 0xba6   :  { %8534 = vmatprep.subr.bf16.mxu0 %v3662_v59  ;;  %v12532_v25 = vpack.c.bf16 %v12530_v36, %v12531_v62 }
 0xba7   :  { %4008 = vrot.lane.b32.xlu0 %v10477_v3, %s9809_s9  ;;  %v12522_v3 = vld [vmem:[#allocation40_spill] sm:$0xff] }
 0xba8   :  { %8487 = vmatmul.mubr.msk.bf16.gmra.mrb[80].mxu0 %vm1859_vm6, %v12516_v61  ;;  %4010 = vrot.lane.b32.xlu1 %v12517_v32, %s9809_s9 }
 0xba9   :  { %8535 = vmatpush3.bf16.msra.mxu0 %v3662_v59  ;;  %8490 = vmatprep.mubr.msk.bf16.mxu0 %vm1859_vm6, %v12520_v55 }
 0xbaa   :  { %8536 = vmatprep.subr.bf16.mxu0 %v3664_v58 }
 0xbab   :  { %3996 = vrot.lane.b32.xlu0 %v12521_v63, %s9809_s9 }
 0xbac   :  { %3998 = vrot.lane.b32.xlu1 %v12522_v3, %s9809_s9 }
 0xbad   :  { %8537 = vmatpush3.bf16.msra.mxu0 %v3664_v58 }
 0xbae   :  { %8562 = vmatprep.subr.bf16.mxu0 %v9247_v4 }
 0xbaf   :  { %4109 = vrot.lane.b32.xlu0 %v12523_v40, %s9809_s9 }
 0xbb0   :  { %8491 = vmatmul.mubr.msk.bf16.gmra.mrb[84].mxu0 %vm1859_vm6, %v12526_v11  ;;  %4111 = vrot.lane.b32.xlu1 %v10518_v0, %s9809_s9  ;;  %v12533_v0 = vld [vmem:[#allocation47_spill] sm:$0xff] }
 0xbb1   :  { %8494 = vmatprep.mubr.msk.bf16.mxu0 %vm1859_vm6, %v12529_v14 }
 0xbb3   :  { %4000 = vrot.lane.b32.xlu0 %v10475_v57, %s9809_s9  ;;  %v12536_v57 = vld [vmem:[#allocation45_spill] sm:$0xff] }
 0xbb4   :  { %4002 = vrot.lane.b32.xlu1 %v10487_v18, %s9809_s9  ;;  %v12537_v18 = vld [vmem:[#allocation46_spill] sm:$0xff] }
 0xbb7   :  { %4113 = vrot.lane.b32.xlu0 %v10532_v12, %s9809_s9 }
 0xbb8   :  { %8495 = vmatmul.mubr.msk.bf16.gmra.mrb[88].mxu0 %vm1859_vm6, %v12532_v25  ;;  %4115 = vrot.lane.b32.xlu1 %v12533_v0, %s9809_s9 }
 0xbbb   :  { %4101 = vrot.lane.b32.xlu0 %v12534_v27, %s9809_s9 }
 0xbbc   :  { %4103 = vrot.lane.b32.xlu1 %v12535_v48, %s9809_s9 }
 0xbbf   :  { %4105 = vrot.lane.b32.xlu0 %v12536_v57, %s9809_s9 }
 0xbc0   :  { %4107 = vrot.lane.b32.xlu1 %v12537_v18, %s9809_s9 }
 0xbc4   :  { %4390 = vrot.lane.b32.xlu1 %v10461_v51, %s9809_s9 }
 0xbdb   :  { %v3577_v12 = vpop.xlane.xlu1 %3576 }
 0xbdf   :  { %v3571_v39 = vpop.xlane.xlu1 %3570 }
 0xbe3   :  { %v3580_v35 = vpop.xlane.xlu0 %3579 }
 0xbe4   :  { %9547 = vrcp.f32 %v3580_v35 }
 0xbe5   :  { %9549 = vrcp.f32 %v3571_v39 }
 0xbe6   :  { %9551 = vrcp.f32 %v3577_v12 }
 0xbe7   :  { %v3574_v56 = vpop.xlane.xlu0 %3573 }
 0xbe8   :  { %9553 = vrcp.f32 %v3574_v56 }
 0xbee   :  { %v9548_v19 = vpop.eup %9547 }
 0xbef   :  { %v9550_v38 = vpop.eup %9549  ;;  %v3636_v47 = vmul.f32 %v9548_v19, %v11161_v33 }
 0xbf0   :  { %v9552_v46 = vpop.eup %9551  ;;  %v3633_v52 = vmul.f32 %v9550_v38, %v11157_v9 }
 0xbf1   :  { %v3635_v51 = vmul.f32 %v9552_v46, %v11153_v6 }
 0xbf2   :  { %v9554_v30 = vpop.eup %9553 }
 0xbf3   :  { %v3634_v44 = vmul.f32 %v9554_v30, %v11165_v8  ;;  %v3650_v41 = vpack.c.bf16 %v3636_v47, %v3635_v51 }
 0xbf5   :  { %v3649_v50 = vpack.c.bf16 %v3634_v44, %v3633_v52 }
 0xbf7   :  { %8538 = vmatprep.mubr.msk.bf16.mxu0 %vm2038_vm7, %v3649_v50 }
 0xbf8   :  { %8539 = vmatmul.mubr.msk.bf16.vlgmr.msra.gmra.mrb[92].mxu0 %vm2038_vm7, %v3650_v41 }
 0xbf9   :  { %8563 = vmatpush3.bf16.msra.mxu0 %v9247_v4 }
 0xbfa   :  { %8564 = vmatprep.subr.bf16.mxu0 %v9248_v43 }
 0xbfc   :  { %v3589_v22 = vpop.xlane.xlu1 %3588 }
 0xbfd   :  { %8565 = vmatpush3.bf16.msra.mxu0 %v9248_v43 }
 0xbfe   :  { %v3592_v59 = vpop.xlane.xlu0 %3591 }
 0xbff   :  { %9555 = vrcp.f32 %v3592_v59 }
 0xc00   :  { %v3583_v33 = vpop.xlane.xlu1 %3582 }
 0xc01   :  { %9557 = vrcp.f32 %v3583_v33 }
 0xc02   :  { %9559 = vrcp.f32 %v3589_v22  ;;  %v3586_v9 = vpop.xlane.xlu0 %3585 }
 0xc03   :  { %9561 = vrcp.f32 %v3586_v9 }
 0xc06   :  { %v3601_v8 = vpop.xlane.xlu0 %3600 }
 0xc09   :  { %v9556_v6 = vpop.eup %9555 }
 0xc0a   :  { %v3595_v61 = vpop.xlane.xlu0 %3594  ;;  %v3640_v55 = vmul.f32 %v9556_v6, %v11181_v42 }
 0xc0b   :  { %v9558_v32 = vpop.eup %9557  ;;  %9563 = vrcp.f32 %v3595_v61 }
 0xc0c   :  { %v9560_v58 = vpop.eup %9559  ;;  %v3613_v7 = vpop.xlane.xlu1 %3612  ;;  %v3637_v63 = vmul.f32 %v9558_v32, %v11186_v24 }
 0xc0d   :  { %v9562_v17 = vpop.eup %9561  ;;  %v3639_v40 = vmul.f32 %v9560_v58, %v11176_v37 }
 0xc0e   :  { %v3604_v4 = vpop.xlane.xlu0 %3603  ;;  %v3638_v3 = vmul.f32 %v9562_v17, %v11191_v1 }
 0xc0f   :  { %v3652_v11 = vpack.c.bf16 %v3640_v55, %v3639_v40 }
 0xc10   :  { %v3607_v34 = vpop.xlane.xlu1 %3606  ;;  %v3651_v20 = vpack.c.bf16 %v3638_v3, %v3637_v63 }
 0xc12   :  { %8542 = vmatprep.mubr.msk.bf16.mxu0 %vm2038_vm7, %v3651_v20  ;;  %v3598_v23 = vpop.xlane.xlu0 %3597 }
 0xc13   :  { %9565 = vrcp.f32 %v3598_v23  ;;  %8543 = vmatmul.mubr.msk.bf16.gmra.mrb[96].mxu0 %vm2038_vm7, %v3652_v11 }
 0xc14   :  { %v3616_v10 = vpop.xlane.xlu1 %3615  ;;  %9567 = vrcp.f32 %v3604_v4 }
 0xc15   :  { %v9564_v1 = vpop.eup %9563 }
 0xc16   :  { %v3610_v14 = vpop.xlane.xlu0 %3609  ;;  %v3641_v25 = vmul.f32 %v9564_v1, %v11201_v28 }
 0xc17   :  { %9569 = vrcp.f32 %v3610_v14 }
 0xc18   :  { %v3749_v42 = vpop.permute.xlu1 %3748  ;;  %9571 = vrcp.f32 %v3601_v8 }
 0xc19   :  { %9573 = vrcp.f32 %v3607_v34 }
 0xc1a   :  { %v3747_v24 = vpop.permute.xlu0 %3746  ;;  %9575 = vrcp.f32 %v3616_v10 }
 0xc1b   :  { %8546 = vmatprep.subr.bf16.mxu1 %v3747_v24  ;;  %9577 = vrcp.f32 %v3613_v7 }
 0xc1c   :  { %v3751_v37 = vpop.permute.xlu1 %3750  ;;  %8547 = vmatpush3.bf16.msra.mxu1 %v3747_v24 }
 0xc1d   :  { %v9566_v36 = vpop.eup %9565  ;;  %8548 = vmatprep.subr.bf16.mxu1 %v3749_v42 }
 0xc1e   :  { %v4005_v62 = vpop.permute.xlu0 %4004  ;;  %v3642_v0 = vmul.f32 %v9566_v36, %v11213_v54  ;;  %v9568_v57 = vpop.eup %9567 }
 0xc1f   :  { %v3644_v19 = vmul.f32 %v9568_v57, %v11203_v53 }
 0xc20   :  { %v3753_v27 = vpop.permute.xlu1 %3752  ;;  %8549 = vmatpush3.bf16.msra.mxu1 %v3749_v42  ;;  %v3653_v48 = vpack.c.bf16 %v3642_v0, %v3641_v25 }
 0xc21   :  { %8550 = vmatprep.subr.bf16.mxu1 %v3751_v37  ;;  %v9570_v12 = vpop.eup %9569 }
 0xc22   :  { %8554 = vmatprep.mubr.msk.bf16.mxu1 %vm2038_vm7, %v3653_v48  ;;  %v4009_v18 = vpop.permute.xlu0 %4008  ;;  %v9572_v39 = vpop.eup %9571  ;;  %v3646_v54 = vmul.f32 %v9570_v12, %v11227_v13 }
 0xc23   :  { %v9574_v56 = vpop.eup %9573  ;;  %v3643_v38 = vmul.f32 %v9572_v39, %v11196_v26 }
 0xc24   :  { %v4007_v35 = vpop.permute.xlu1 %4006  ;;  %8551 = vmatpush3.bf16.msra.mxu1 %v3751_v37  ;;  %v3645_v30 = vmul.f32 %v9574_v56, %v11218_v31  ;;  %v9576_v52 = vpop.eup %9575  ;;  %v4025_v31 = vsel %vm1859_vm6, %v4005_v62, 0 }
 0xc25   :  { %8552 = vmatprep.subr.bf16.mxu1 %v3753_v27  ;;  %v3654_v47 = vpack.c.bf16 %v3644_v19, %v3643_v38  ;;  %v9578_v53 = vpop.eup %9577  ;;  %v3648_v26 = vmul.f32 %v9576_v52, %v11223_v15  ;;  %v4028_v33 = vsel %vm1859_vm6, %v4007_v35, 0 }
 0xc26   :  { %v3997_v28 = vpop.permute.xlu0 %3996  ;;  %v3655_v51 = vpack.c.bf16 %v3646_v54, %v3645_v30  ;;  %v3647_v13 = vmul.f32 %v9578_v53, %v11207_v60  ;;  %v4031_v60 = vsel %vm1859_vm6, %v4009_v18, 0 }
 0xc28   :  { %v4011_v46 = vpop.permute.xlu1 %4010  ;;  %8553 = vmatpush3.bf16.msra.mxu1 %v3753_v27  ;;  %v3656_v43 = vpack.c.bf16 %v3648_v26, %v3647_v13 }
 0xc29   :  { %9121 = vmatprep.subr.msk.bf16.mxu1 %vm1859_vm6, %v4005_v62  ;;  %v4034_v8 = vsel %vm1859_vm6, %v4011_v46, 0 }
 0xc2a   :  { %v4110_v44 = vpop.permute.xlu0 %4109 }
 0xc2b   :  { %8555 = vmatmul.mubr.msk.bf16.vlgmr.msra.gmra.mrb[92].mxu1 %vm2038_vm7, %v3654_v47  ;;  %9125 = vmatprep.subr.msk.bf16.mxu0 %vm1859_vm6, %v4110_v44  ;;  %v4130_v63 = vsel %vm1859_vm6, %v4110_v44, 0 }
 0xc2c   :  { %v3999_v50 = vpop.permute.xlu1 %3998  ;;  %8558 = vmatprep.mubr.msk.bf16.mxu1 %vm2038_vm7, %v3655_v51 }
 0xc2e   :  { %v4001_v61 = vpop.permute.xlu0 %4000 }
 0xc30   :  { %v4112_v41 = vpop.permute.xlu1 %4111 }
 0xc31   :  { %8583 = vmatpush3.bf16.xpose.msra.mxu1 %v4025_v31  ;;  %v4133_v3 = vsel %vm1859_vm6, %v4112_v41, 0 }
 0xc32   :  { %9122 = vmatprep.subr.msk.bf16.mxu1 %vm1859_vm6, %v4007_v35  ;;  %v4114_v40 = vpop.permute.xlu0 %4113 }
 0xc33   :  { %8559 = vmatmul.mubr.msk.bf16.gmra.mrb[96].mxu1 %vm2038_vm7, %v3656_v43  ;;  %v4136_v34 = vsel %vm1859_vm6, %v4114_v40, 0 }
 0xc34   :  { %v4003_v22 = vpop.permute.xlu1 %4002  ;;  %8590 = vmatprep.mubr.msk.bf16.mxu1 %vm1859_vm6, %v3997_v28 }
 0xc36   :  { %v4102_v35 = vpop.permute.xlu0 %4101 }
 0xc38   :  { %v4116_v59 = vpop.permute.xlu1 %4115 }
 0xc39   :  { %8585 = vmatpush3.bf16.xpose.msra.mxu1 %v4028_v33  ;;  %v4139_v24 = vsel %vm1859_vm6, %v4116_v59, 0 }
 0xc3a   :  { %9123 = vmatprep.subr.msk.bf16.mxu1 %vm1859_vm6, %v4009_v18  ;;  %v4106_v56 = vpop.permute.xlu0 %4105 }
 0xc3c   :  { %v4104_v15 = vpop.permute.xlu1 %4103 }
 0xc40   :  { %v4108_v9 = vpop.permute.xlu1 %4107 }
 0xc41   :  { %8587 = vmatpush3.bf16.xpose.msra.mxu1 %v4031_v60 }
 0xc42   :  { %9124 = vmatprep.subr.msk.bf16.mxu1 %vm1859_vm6, %v4011_v46 }
 0xc44   :  { %v4391_v6 = vpop.permute.xlu1 %4390 }
 0xc49   :  { %8589 = vmatpush3.bf16.xpose.msra.mxu1 %v4034_v8 }
 0xc4a   :  { %8614 = vmatprep.subr.bf16.mxu1 %v4391_v6 }
 0xc50   :  { %8591 = vmatmul.mubr.msk.bf16.vlgmr.msra.gmra.mrb[100].mxu1 %vm1859_vm6, %v3999_v50 }
 0xc51   :  { %8594 = vmatprep.mubr.msk.bf16.mxu1 %vm1859_vm6, %v4001_v61  ;;  %8615 = vmatpush3.bf16.msra.mxu1 %v4391_v6 }
 0xc58   :  { %8595 = vmatmul.mubr.msk.bf16.gmra.mrb[104].mxu1 %vm1859_vm6, %v4003_v22 }
 0xccb   :  { %v8540_v32 = vpop.f32.mrb[92].mxu0 }
 0xccc   :  { %v3715_v58 = vpop.f32.mrb[93].mxu0 }
 0xccd   :  { %v8541_v7 = vpop.f32.mrb[94].mxu0 }
 0xcce   :  { %v3836_v17 = vpack.c.bf16 %v8541_v7, %v8540_v32  ;;  %v3718_v55 = vpop.f32.mrb[95].mxu0 }
 0xccf   :  { %v3835_v4 = vpack.c.bf16 %v3718_v55, %v3715_v58 }
 0xcd1   :  { %8566 = vmatprep.mubr.msk.bf16.mxu0 %vm1859_vm6, %v3835_v4 }
 0xcd2   :  { %8567 = vmatmul.mubr.msk.bf16.vlgmr.msra.gmra.mrb[76].mxu0 %vm1859_vm6, %v3836_v17 }
 0xcd3   :  { %8599 = vmatpush3.bf16.xpose.msra.mxu0 %v4130_v63 }
 0xcd4   :  { %9126 = vmatprep.subr.msk.bf16.mxu0 %vm1859_vm6, %v4112_v41 }
 0xcdb   :  { %8601 = vmatpush3.bf16.xpose.msra.mxu0 %v4133_v3 }
 0xcdc   :  { %9127 = vmatprep.subr.msk.bf16.mxu0 %vm1859_vm6, %v4114_v40 }
 0xce3   :  { %8603 = vmatpush3.bf16.xpose.msra.mxu0 %v4136_v34 }
 0xce4   :  { %9128 = vmatprep.subr.msk.bf16.mxu0 %vm1859_vm6, %v4116_v59 }
 0xce6   :  { %v8544_v20 = vpop.f32.mrb[96].mxu0 }
 0xce7   :  { %v3731_v11 = vpop.f32.mrb[97].mxu0 }
 0xce8   :  { %v8545_v23 = vpop.f32.mrb[98].mxu0 }
 0xce9   :  { %v3838_v10 = vpack.c.bf16 %v8545_v23, %v8544_v20  ;;  %v3734_v14 = vpop.f32.mrb[99].mxu0 }
 0xcea   :  { %v3837_v42 = vpack.c.bf16 %v3734_v14, %v3731_v11 }
 0xceb   :  { %8605 = vmatpush3.bf16.xpose.msra.mxu0 %v4139_v24 }
 0xcec   :  { %8570 = vmatprep.mubr.msk.bf16.mxu0 %vm1859_vm6, %v3837_v42 }
 0xced   :  { %8571 = vmatmul.mubr.msk.bf16.gmra.mrb[80].mxu0 %vm1859_vm6, %v3838_v10 }
 0xcfe   :  { %v8556_v1 = vpop.f32.mrb[92].mxu1 }
 0xcff   :  { %v3804_v37 = vpop.f32.mrb[93].mxu1 }
 0xd00   :  { %v8557_v36 = vpop.f32.mrb[94].mxu1 }
 0xd01   :  { %v3840_v62 = vpack.c.bf16 %v8557_v36, %v8556_v1  ;;  %v3807_v25 = vpop.f32.mrb[95].mxu1 }
 0xd02   :  { %v3839_v0 = vpack.c.bf16 %v3807_v25, %v3804_v37 }
 0xd04   :  { %8574 = vmatprep.mubr.msk.bf16.mxu0 %vm1859_vm6, %v3839_v0 }
 0xd05   :  { %8575 = vmatmul.mubr.msk.bf16.gmra.mrb[84].mxu0 %vm1859_vm6, %v3840_v62 }
 0xd06   :  { %v8560_v27 = vpop.f32.mrb[96].mxu1 }
 0xd07   :  { %v3820_v48 = vpop.f32.mrb[97].mxu1 }
 0xd08   :  { %v8561_v57 = vpop.f32.mrb[98].mxu1 }
 0xd09   :  { %v3842_v18 = vpack.c.bf16 %v8561_v57, %v8560_v27  ;;  %v3823_v12 = vpop.f32.mrb[99].mxu1 }
 0xd0a   :  { %v3841_v39 = vpack.c.bf16 %v3823_v12, %v3820_v48 }
 0xd0c   :  { %8578 = vmatprep.mubr.msk.bf16.mxu0 %vm1859_vm6, %v3841_v39 }
 0xd0d   :  { %8579 = vmatmul.mubr.msk.bf16.gmra.mrb[88].mxu0 %vm1859_vm6, %v3842_v18 }
 0xd0e   :  { %8606 = vmatprep.mubr.msk.bf16.mxu0 %vm1859_vm6, %v4102_v35 }
 0xd15   :  { %8607 = vmatmul.mubr.msk.bf16.vlgmr.msra.gmra.mrb[100].mxu0 %vm1859_vm6, %v4104_v15 }
 0xd16   :  { %8610 = vmatprep.mubr.msk.bf16.mxu0 %vm1859_vm6, %v4106_v56 }
 0xd1d   :  { %8611 = vmatmul.mubr.msk.bf16.gmra.mrb[104].mxu0 %vm1859_vm6, %v4108_v9 }
 0xd23   :  { %v8592_v19 = vpop.f32.mrb[100].mxu1 }
 0xd24   :  { %v4070_v28 = vpop.f32.mrb[101].mxu1  ;;  %v4212_v54 = vsel %vm2038_vm7, %v8592_v19, -inf }
 0xd25   :  { %4213 = vmax.xlane.f32.xlu0 %v4212_v54  ;;  %v8593_v38 = vpop.f32.mrb[102].mxu1  ;;  %v4206_v47 = vsel %vm2038_vm7, %v4070_v28, -inf }
 0xd26   :  { %v4073_v46 = vpop.f32.mrb[103].mxu1  ;;  %v4215_v51 = vsel %vm2038_vm7, %v8593_v38, -inf }
 0xd27   :  { %v4209_v30 = vsel %vm2038_vm7, %v4073_v46, -inf }
 0xd28   :  { %4210 = vmax.xlane.f32.xlu1 %v4209_v30 }
 0xd29   :  { %4207 = vmax.xlane.f32.xlu0 %v4206_v47 }
 0xd2b   :  { %v8596_v52 = vpop.f32.mrb[104].mxu1 }
 0xd2c   :  { %v4086_v44 = vpop.f32.mrb[105].mxu1  ;;  %v4224_v53 = vsel %vm2038_vm7, %v8596_v52, -inf }
 0xd2d   :  { %4216 = vmax.xlane.f32.xlu0 %v4215_v51  ;;  %4225 = vmax.xlane.f32.xlu1 %v4224_v53  ;;  %v8597_v50 = vpop.f32.mrb[106].mxu1  ;;  %v4218_v13 = vsel %vm2038_vm7, %v4086_v44, -inf }
 0xd2e   :  { %v4089_v26 = vpop.f32.mrb[107].mxu1  ;;  %v4227_v41 = vsel %vm2038_vm7, %v8597_v50, -inf }
 0xd2f   :  { %v4221_v31 = vsel %vm2038_vm7, %v4089_v26, -inf }
 0xd31   :  { %4219 = vmax.xlane.f32.xlu1 %v4218_v13  ;;  %4228 = vmax.xlane.f32.xlu0 %v4227_v41 }
 0xd35   :  { %4222 = vmax.xlane.f32.xlu0 %v4221_v31 }
 0xdb2   :  { %v4214_v43 = vpop.xlane.xlu0 %4213 }
 0xdb3   :  { %v4256_v22 = vsub.f32 %v8592_v19, %v4214_v43 }
 0xdb5   :  { %v4274_v59 = vmul.f32 1.442695, %v4256_v22  ;;  %v4211_v33 = vpop.xlane.xlu1 %4210 }
 0xdb6   :  { %v4208_v15 = vpop.xlane.xlu0 %4207  ;;  %v4255_v8 = vsub.f32 %v4073_v46, %v4211_v33 }
 0xdb7   :  { %9579 = vpow2.f32 %v4274_v59  ;;  %v4254_v60 = vsub.f32 %v4070_v28, %v4208_v15 }
 0xdb8   :  { %v4272_v7 = vmul.f32 1.442695, %v4255_v8 }
 0xdb9   :  { %v4270_v9 = vmul.f32 1.442695, %v4254_v60 }
 0xdba   :  { %v4226_v6 = vpop.xlane.xlu1 %4225  ;;  %v4217_v61 = vpop.xlane.xlu0 %4216 }
 0xdbb   :  { %9581 = vpow2.f32 %v4270_v9  ;;  %v4257_v32 = vsub.f32 %v8593_v38, %v4217_v61  ;;  %v4260_v17 = vsub.f32 %v8596_v52, %v4226_v6 }
 0xdbd   :  { %v4276_v58 = vmul.f32 1.442695, %v4257_v32  ;;  %v4282_v3 = vmul.f32 1.442695, %v4260_v17 }
 0xdbe   :  { %v4229_v55 = vpop.xlane.xlu0 %4228  ;;  %v4220_v4 = vpop.xlane.xlu1 %4219 }
 0xdbf   :  { %9583 = vpow2.f32 %v4276_v58  ;;  %v4258_v40 = vsub.f32 %v4086_v44, %v4220_v4  ;;  %v4261_v18 = vsub.f32 %v8597_v50, %v4229_v55 }
 0xdc0   :  { %9585 = vpow2.f32 %v4272_v7 }
 0xdc1   :  { %v11395_v63 = vpop.eup %9579  ;;  %9587 = vpow2.f32 %v4282_v3  ;;  %v4278_v23 = vmul.f32 1.442695, %v4258_v40  ;;  %v4284_v12 = vmul.f32 1.442695, %v4261_v18 }
 0xdc2   :  { %v4308_v34 = vsel %vm2038_vm7, %v11395_v63, 0.0  ;;  %v4223_v20 = vpop.xlane.xlu0 %4222 }
 0xdc3   :  { %4309 = vadd.xlane.f32.xlu1 %v4308_v34  ;;  %v4259_v10 = vsub.f32 %v4089_v26, %v4223_v20  ;;  %9589 = vpow2.f32 %v4278_v23 }
 0xdc5   :  { %v11399_v11 = vpop.eup %9581  ;;  %v4280_v24 = vmul.f32 1.442695, %v4259_v10 }
 0xdc6   :  { %v4302_v14 = vsel %vm2038_vm7, %v11399_v11, 0.0 }
 0xdc7   :  { %4303 = vadd.xlane.f32.xlu1 %v4302_v14  ;;  %9591 = vpow2.f32 %v4280_v24 }
 0xdc8   :  { %9593 = vpow2.f32 %v4284_v12 }
 0xdc9   :  { %v11403_v42 = vpop.eup %9583 }
 0xdca   :  { %v4311_v1 = vsel %vm2038_vm7, %v11403_v42, 0.0  ;;  %v9586_v37 = vpop.eup %9585 }
 0xdcb   :  { %4312 = vadd.xlane.f32.xlu0 %v4311_v1  ;;  %v4305_v36 = vsel %vm2038_vm7, %v9586_v37, 0.0  ;;  %v11408_v62 = vpop.eup %9587 }
 0xdcc   :  { %v4320_v25 = vsel %vm2038_vm7, %v11408_v62, 0.0 }
 0xdcd   :  { %v11412_v0 = vpop.eup %9589 }
 0xdce   :  { %v4314_v27 = vsel %vm2038_vm7, %v11412_v0, 0.0 }
 0xdcf   :  { %4306 = vadd.xlane.f32.xlu0 %v4305_v36 }
 0xdd1   :  { %v11416_v48 = vpop.eup %9591 }
 0xdd2   :  { %v4317_v57 = vsel %vm2038_vm7, %v11416_v48, 0.0  ;;  %v11424_v30 = vpop.eup %9593 }
 0xdd3   :  { %4321 = vadd.xlane.f32.xlu0 %v4320_v25  ;;  %v4323_v53 = vsel %vm2038_vm7, %v11424_v30, 0.0 }
 0xdd7   :  { %4315 = vadd.xlane.f32.xlu0 %v4314_v27 }
 0xddb   :  { %4318 = vadd.xlane.f32.xlu0 %v4317_v57 }
 0xde8   :  { %v8608_v39 = vpop.f32.mrb[100].mxu0 }
 0xde9   :  { %v4175_v35 = vpop.f32.mrb[101].mxu0  ;;  %v4236_v56 = vsel %vm2038_vm7, %v8608_v39, -inf }
 0xdea   :  { %v8609_v19 = vpop.f32.mrb[102].mxu0  ;;  %4237 = vmax.xlane.f32.xlu1 %v4236_v56  ;;  %v4230_v38 = vsel %vm2038_vm7, %v4175_v35, -inf }
 0xdeb   :  { %v4178_v28 = vpop.f32.mrb[103].mxu0  ;;  %v4239_v54 = vsel %vm2038_vm7, %v8609_v19, -inf }
 0xdec   :  { %4240 = vmax.xlane.f32.xlu0 %v4239_v54  ;;  %v4233_v46 = vsel %vm2038_vm7, %v4178_v28, -inf }
 0xdee   :  { %4231 = vmax.xlane.f32.xlu1 %v4230_v38 }
 0xdf0   :  { %v11426_v47 = vpop.f32.mrb[104].mxu0  ;;  %4234 = vmax.xlane.f32.xlu0 %v4233_v46 }
 0xdf1   :  { %v11428_v52 = vpop.f32.mrb[105].mxu0  ;;  %v4248_v13 = vsel %vm2038_vm7, %v11426_v47, -inf }
 0xdf2   :  { %v11430_v44 = vpop.f32.mrb[106].mxu0  ;;  %v4242_v41 = vsel %vm2038_vm7, %v11428_v52, -inf }
 0xdf3   :  { %v11432_v51 = vpop.f32.mrb[107].mxu0  ;;  %v4251_v50 = vsel %vm2038_vm7, %v11430_v44, -inf }
 0xdf4   :  { %4324 = vadd.xlane.f32.xlu0 %v4323_v53  ;;  %v4245_v26 = vsel %vm2038_vm7, %v11432_v51, -inf }
 0xdf8   :  { %4252 = vmax.xlane.f32.xlu0 %v4251_v50 }
 0xdfc   :  { %4246 = vmax.xlane.f32.xlu0 %v4245_v26 }
 0xdff   :  { %4392 = vrot.lane.b32.xlu1 %v10459_v29, %s9809_s9 }
 0xe12   :  { %4394 = vrot.lane.b32.xlu0 %v10473_v5, %s9809_s9 }
 0xe23   :  { %4249 = vmax.xlane.f32.xlu1 %v4248_v13 }
 0xe27   :  { %4243 = vmax.xlane.f32.xlu1 %v4242_v41 }
 0xe38   :  { %4396 = vrot.lane.b32.xlu1 %v10471_v49, %s9809_s9 }
 0xe3c   :  { %4479 = vrot.lane.b32.xlu1 %v10485_v21, %s9809_s9 }
 0xe40   :  { %4481 = vrot.lane.b32.xlu1 %v10483_v16, %s9809_s9 }
 0xe50   :  { %v4310_v29 = vpop.xlane.xlu1 %4309 }
 0xe54   :  { %v4304_v31 = vpop.xlane.xlu1 %4303 }
 0xe55   :  { %9595 = vrcp.f32 %v4304_v31 }
 0xe58   :  { %v4313_v5 = vpop.xlane.xlu0 %4312 }
 0xe5c   :  { %v4307_v43 = vpop.xlane.xlu0 %4306 }
 0xe5d   :  { %9597 = vrcp.f32 %v4307_v43 }
 0xe5f   :  { %v9596_v22 = vpop.eup %9595 }
 0xe60   :  { %v4322_v33 = vpop.xlane.xlu0 %4321  ;;  %v4366_v15 = vmul.f32 %v9596_v22, %v11399_v11 }
 0xe64   :  { %v4316_v49 = vpop.xlane.xlu0 %4315 }
 0xe67   :  { %v9598_v59 = vpop.eup %9597 }
 0xe68   :  { %v4367_v60 = vmul.f32 %v9598_v59, %v9586_v37  ;;  %v4319_v21 = vpop.xlane.xlu0 %4318 }
 0xe6a   :  { %v4382_v9 = vpack.c.bf16 %v4367_v60, %v4366_v15 }
 0xe6c   :  { %8622 = vmatprep.mubr.msk.bf16.mxu1 %vm2038_vm7, %v4382_v9 }
 0xe77   :  { %v4238_v8 = vpop.xlane.xlu1 %4237 }
 0xe78   :  { %v4264_v6 = vsub.f32 %v8608_v39, %v4238_v8 }
 0xe79   :  { %v4241_v16 = vpop.xlane.xlu0 %4240 }
 0xe7a   :  { %v4290_v61 = vmul.f32 1.442695, %v4264_v6  ;;  %v4265_v32 = vsub.f32 %v8609_v19, %v4241_v16 }
 0xe7b   :  { %v4232_v58 = vpop.xlane.xlu1 %4231 }
 0xe7c   :  { %9599 = vpow2.f32 %v4290_v61  ;;  %v4262_v7 = vsub.f32 %v4175_v35, %v4232_v58  ;;  %v4292_v17 = vmul.f32 1.442695, %v4265_v32 }
 0xe7d   :  { %v4235_v55 = vpop.xlane.xlu0 %4234 }
 0xe7e   :  { %v4286_v4 = vmul.f32 1.442695, %v4262_v7  ;;  %v4263_v3 = vsub.f32 %v4178_v28, %v4235_v55 }
 0xe7f   :  { %v4393_v40 = vpop.permute.xlu1 %4392 }
 0xe80   :  { %9601 = vpow2.f32 %v4286_v4  ;;  %v4288_v34 = vmul.f32 1.442695, %v4263_v3  ;;  %8616 = vmatprep.subr.bf16.mxu1 %v4393_v40 }
 0xe81   :  { %9603 = vpow2.f32 %v4292_v17  ;;  %8617 = vmatpush3.bf16.msra.mxu1 %v4393_v40  ;;  %v4325_v20 = vpop.xlane.xlu0 %4324 }
 0xe82   :  { %9605 = vpow2.f32 %v4288_v34 }
 0xe83   :  { %9607 = vrcp.f32 %v4313_v5 }
 0xe84   :  { %9609 = vrcp.f32 %v4319_v21 }
 0xe85   :  { %v4253_v11 = vpop.xlane.xlu0 %4252  ;;  %9611 = vrcp.f32 %v4310_v29 }
 0xe86   :  { %v11456_v23 = vpop.eup %9599  ;;  %9613 = vrcp.f32 %v4316_v49  ;;  %v4269_v39 = vsub.f32 %v11430_v44, %v4253_v11 }
 0xe87   :  { %v4332_v10 = vsel %vm2038_vm7, %v11456_v23, 0.0  ;;  %9615 = vrcp.f32 %v4325_v20 }
 0xe88   :  { %4333 = vadd.xlane.f32.xlu1 %v4332_v10  ;;  %9617 = vrcp.f32 %v4322_v33  ;;  %v4300_v53 = vmul.f32 1.442695, %v4269_v39  ;;  %v9249_v10 = vld [vmem:[%s9888_s6 + $0x30] sm:$0xff]  }
 0xe89   :  { %v4247_v14 = vpop.xlane.xlu0 %4246 }
 0xe8a   :  { %v11460_v24 = vpop.eup %9601  ;;  %v4267_v50 = vsub.f32 %v11432_v51, %v4247_v14 }
 0xe8b   :  { %v11462_v1 = vpop.eup %9603  ;;  %v4326_v37 = vsel %vm2038_vm7, %v11460_v24, 0.0 }
 0xe8c   :  { %v11466_v36 = vpop.eup %9605  ;;  %4327 = vadd.xlane.f32.xlu1 %v4326_v37  ;;  %v4335_v57 = vsel %vm2038_vm7, %v11462_v1, 0.0 }
 0xe8d   :  { %v4395_v25 = vpop.permute.xlu0 %4394  ;;  %v4329_v27 = vsel %vm2038_vm7, %v11466_v36, 0.0  ;;  %v9608_v56 = vpop.eup %9607 }
 0xe8e   :  { %4330 = vadd.xlane.f32.xlu0 %v4329_v27  ;;  %8618 = vmatprep.subr.bf16.mxu1 %v4395_v25  ;;  %v9610_v28 = vpop.eup %9609  ;;  %v4369_v46 = vmul.f32 %v9608_v56, %v11403_v42 }
 0xe8f   :  { %8619 = vmatpush3.bf16.msra.mxu1 %v4395_v25  ;;  %v9612_v38 = vpop.eup %9611  ;;  %v4371_v13 = vmul.f32 %v9610_v28, %v11416_v48  ;;  %v9250_v25 = vld [vmem:[%s9888_s6 + $0x38] sm:$0xff]   ;;  %s12568_s6 = sld [smem:[#allocation12_spill]] }
 0xe90   :  { %4336 = vadd.xlane.f32.xlu1 %v4335_v57  ;;  %v4368_v44 = vmul.f32 %v9612_v38, %v11395_v63 }
 0xe92   :  { %v4383_v29 = vpack.c.bf16 %v4369_v46, %v4368_v44 }
 0xea1   :  { %4485 = vrot.lane.b32.xlu1 %v10496_v2, %s9809_s9  ;;  %v9614_v2 = vpop.eup %9613 }
 0xea2   :  { %v4370_v41 = vmul.f32 %v9614_v2, %v11412_v0  ;;  %v9616_v31 = vpop.eup %9615 }
 0xea3   :  { %v9618_v51 = vpop.eup %9617  ;;  %v4373_v63 = vmul.f32 %v9616_v31, %v11424_v30 }
 0xea4   :  { %v4384_v42 = vpack.c.bf16 %v4371_v13, %v4370_v41  ;;  %v4372_v22 = vmul.f32 %v9618_v51, %v11408_v62 }
 0xea6   :  { %v4385_v33 = vpack.c.bf16 %v4373_v63, %v4372_v22 }
 0xeb0   :  { %v4250_v18 = vpop.xlane.xlu1 %4249 }
 0xeb1   :  { %v4268_v12 = vsub.f32 %v11426_v47, %v4250_v18 }
 0xeb3   :  { %v4298_v35 = vmul.f32 1.442695, %v4268_v12 }
 0xeb4   :  { %v4244_v19 = vpop.xlane.xlu1 %4243 }
 0xeb5   :  { %9619 = vpow2.f32 %v4298_v35  ;;  %v4266_v54 = vsub.f32 %v11428_v52, %v4244_v19  ;;  %v4296_v52 = vmul.f32 1.442695, %v4267_v50 }
 0xeb7   :  { %v4294_v26 = vmul.f32 1.442695, %v4266_v54 }
 0xeb8   :  { %v4397_v47 = vpop.permute.xlu1 %4396 }
 0xeb9   :  { %9621 = vpow2.f32 %v4294_v26  ;;  %8620 = vmatprep.subr.bf16.mxu1 %v4397_v47 }
 0xeba   :  { %8621 = vmatpush3.bf16.msra.mxu1 %v4397_v47  ;;  %9623 = vpow2.f32 %v4300_v53 }
 0xebb   :  { %9625 = vpow2.f32 %v4296_v52 }
 0xebc   :  { %v4480_v5 = vpop.permute.xlu1 %4479 }
 0xebd   :  { %8623 = vmatmul.mubr.msk.bf16.vlgmr.msra.gmra.mrb[108].mxu1 %vm2038_vm7, %v4383_v29  ;;  %8630 = vmatprep.subr.bf16.mxu0 %v4480_v5 }
 0xebe   :  { %8626 = vmatprep.mubr.msk.bf16.mxu1 %vm2038_vm7, %v4384_v42  ;;  %8631 = vmatpush3.bf16.msra.mxu0 %v4480_v5 }
 0xebf   :  { %v11484_v48 = vpop.eup %9619 }
 0xec0   :  { %v4482_v43 = vpop.permute.xlu1 %4481  ;;  %v4344_v0 = vsel %vm2038_vm7, %v11484_v48, 0.0 }
 0xec1   :  { %8632 = vmatprep.subr.bf16.mxu0 %v4482_v43  ;;  %4345 = vadd.xlane.f32.xlu0 %v4344_v0 }
 0xec2   :  { %8633 = vmatpush3.bf16.msra.mxu0 %v4482_v43 }
 0xec3   :  { %v9622_v59 = vpop.eup %9621 }
 0xec4   :  { %v4338_v15 = vsel %vm2038_vm7, %v9622_v59, 0.0  ;;  %v9624_v60 = vpop.eup %9623 }
 0xec5   :  { %4339 = vadd.xlane.f32.xlu0 %v4338_v15  ;;  %8627 = vmatmul.mubr.msk.bf16.gmra.mrb[112].mxu1 %vm2038_vm7, %v4385_v33  ;;  %v4347_v9 = vsel %vm2038_vm7, %v9624_v60, 0.0  ;;  %v9626_v30 = vpop.eup %9625  ;;  %v12538_v33 = vld [vmem:[#allocation23_spill] sm:$0xff] }
 0xec6   :  { %v4341_v49 = vsel %vm2038_vm7, %v9626_v30, 0.0 }
 0xec9   :  { %4348 = vadd.xlane.f32.xlu0 %v4347_v9 }
 0xecd   :  { %4342 = vadd.xlane.f32.xlu0 %v4341_v49 }
 0xee3   :  { %4483 = vrot.lane.b32.xlu0 %v10498_v45, %s9809_s9 }
 0xf15   :  { %v4334_v62 = vpop.xlane.xlu1 %4333 }
 0xf19   :  { %v4328_v21 = vpop.xlane.xlu1 %4327 }
 0xf1a   :  { %9627 = vrcp.f32 %v4328_v21 }
 0xf1b   :  { %v4331_v8 = vpop.xlane.xlu0 %4330 }
 0xf1c   :  { %9629 = vrcp.f32 %v4331_v8 }
 0xf1d   :  { %v4337_v17 = vpop.xlane.xlu1 %4336 }
 0xf1e   :  { %9631 = vrcp.f32 %v4337_v17 }
 0xf1f   :  { %9633 = vrcp.f32 %v4334_v62  ;;  %v12540_v62 = vld [vmem:[#allocation25_spill] sm:$0xff] }
 0xf21   :  { %v4486_v20 = vpop.permute.xlu1 %4485 }
 0xf24   :  { %v9628_v6 = vpop.eup %9627 }
 0xf25   :  { %v4374_v61 = vmul.f32 %v9628_v6, %v11460_v24 }
 0xf26   :  { %v9630_v16 = vpop.eup %9629 }
 0xf27   :  { %v4375_v32 = vmul.f32 %v9630_v16, %v11466_v36  ;;  %v12541_v16 = vld [vmem:[#allocation26_spill] sm:$0xff] }
 0xf28   :  { %v9632_v3 = vpop.eup %9631 }
 0xf29   :  { %v4386_v58 = vpack.c.bf16 %v4375_v32, %v4374_v61  ;;  %v9634_v34 = vpop.eup %9633  ;;  %v4377_v11 = vmul.f32 %v9632_v3, %v11462_v1 }
 0xf2a   :  { %v4376_v24 = vmul.f32 %v9634_v34, %v11456_v23 }
 0xf2b   :  { %8638 = vmatprep.mubr.msk.bf16.mxu0 %vm2038_vm7, %v4386_v58 }
 0xf2c   :  { %v4387_v36 = vpack.c.bf16 %v4377_v11, %v4376_v24  ;;  %v12546_v24 = vld [vmem:[#allocation31_spill] sm:$0xff] }
 0xf4e   :  { %v4346_v7 = vpop.xlane.xlu0 %4345 }
 0xf52   :  { %v4340_v55 = vpop.xlane.xlu0 %4339 }
 0xf53   :  { %9635 = vrcp.f32 %v4340_v55  ;;  %v12543_v55 = vld [vmem:[#allocation27_spill] sm:$0xff] }
 0xf56   :  { %v4349_v45 = vpop.xlane.xlu0 %4348 }
 0xf5a   :  { %v4343_v4 = vpop.xlane.xlu0 %4342 }
 0xf5b   :  { %9637 = vrcp.f32 %v4343_v4  ;;  %v12544_v4 = vld [vmem:[#allocation30_spill] sm:$0xff] }
 0xf5c   :  { %9639 = vrcp.f32 %v4349_v45 }
 0xf5d   :  { %9641 = vrcp.f32 %v4346_v7  ;;  %v9636_v14 = vpop.eup %9635  ;;  %v12542_v7 = vld [vmem:[#allocation29_spill] sm:$0xff] }
 0xf5e   :  { %v4484_v40 = vpop.permute.xlu0 %4483  ;;  %v4378_v57 = vmul.f32 %v9636_v14, %v9622_v59 }
 0xf5f   :  { %8634 = vmatprep.subr.bf16.mxu0 %v4484_v40 }
 0xf60   :  { %8635 = vmatpush3.bf16.msra.mxu0 %v4484_v40  ;;  %v12545_v40 = vld [vmem:[#allocation28_spill] sm:$0xff] }
 0xf61   :  { %8636 = vmatprep.subr.bf16.mxu0 %v4486_v20 }
 0xf64   :  { %8637 = vmatpush3.bf16.msra.mxu0 %v4486_v20 }
 0xf65   :  { %v9638_v37 = vpop.eup %9637  ;;  %8646 = vmatprep.subr.bf16.mxu0 %v9249_v10 }
 0xf66   :  { %v9640_v27 = vpop.eup %9639  ;;  %v4379_v18 = vmul.f32 %v9638_v37, %v9626_v30  ;;  %v12539_v30 = vld [vmem:[#allocation24_spill] sm:$0xff] }
 0xf67   :  { %8639 = vmatmul.mubr.msk.bf16.vlgmr.msra.gmra.mrb[108].mxu0 %vm2038_vm7, %v4387_v36  ;;  %v9642_v12 = vpop.eup %9641  ;;  %v4381_v35 = vmul.f32 %v9640_v27, %v9624_v60  ;;  %v12547_v27 = vld [vmem:[#allocation33_spill] sm:$0xff] }
 0xf68   :  { %v4388_v39 = vpack.c.bf16 %v4379_v18, %v4378_v57  ;;  %8647 = vmatpush3.bf16.msra.mxu0 %v9249_v10  ;;  %v4380_v1 = vmul.f32 %v9642_v12, %v11484_v48  ;;  %v12548_v18 = vld [vmem:[#allocation32_spill] sm:$0xff] }
 0xf69   :  { %8648 = vmatprep.subr.bf16.mxu0 %v9250_v25 }
 0xf6a   :  { %8642 = vmatprep.mubr.msk.bf16.mxu0 %vm2038_vm7, %v4388_v39  ;;  %v4389_v23 = vpack.c.bf16 %v4381_v35, %v4380_v1  ;;  %v12549_v35 = vld [vmem:[#allocation34_spill] sm:$0xff] }
 0xf6c   :  { %8649 = vmatpush3.bf16.msra.mxu0 %v9250_v25 }
 0xf6f   :  { %8643 = vmatmul.mubr.msk.bf16.gmra.mrb[112].mxu0 %vm2038_vm7, %v4389_v23 }
 0xf90   :  { %v8624_v56 = vpop.f32.mrb[108].mxu1 }
 0xf91   :  { %v4448_v19 = vpop.f32.mrb[109].mxu1 }
 0xf92   :  { %v8625_v28 = vpop.f32.mrb[110].mxu1 }
 0xf93   :  { %v4569_v54 = vpack.c.bf16 %v8625_v28, %v8624_v56  ;;  %v4451_v38 = vpop.f32.mrb[111].mxu1 }
 0xf94   :  { %v4568_v2 = vpack.c.bf16 %v4451_v38, %v4448_v19 }
 0xf96   :  { %8650 = vmatprep.mubr.msk.bf16.mxu0 %vm1859_vm6, %v4568_v2 }
 0xf97   :  { %8651 = vmatmul.mubr.msk.bf16.vlgmr.msra.gmra.mrb[76].mxu0 %vm1859_vm6, %v4569_v54  ;;  %v12550_v54 = vld [vmem:[#allocation35_spill] sm:$0xff] }
 0xf98   :  { %v8628_v46 = vpop.f32.mrb[112].mxu1 }
 0xf99   :  { %v4464_v53 = vpop.f32.mrb[113].mxu1 }
 0xf9a   :  { %v8629_v50 = vpop.f32.mrb[114].mxu1 }
 0xf9b   :  { %v4571_v26 = vpack.c.bf16 %v8629_v50, %v8628_v46  ;;  %v4467_v47 = vpop.f32.mrb[115].mxu1  ;;  %v12551_v50 = vld [vmem:[#allocation37_spill] sm:$0xff] }
 0xf9c   :  { %v4570_v13 = vpack.c.bf16 %v4467_v47, %v4464_v53 }
 0xf9e   :  { %8654 = vmatprep.mubr.msk.bf16.mxu0 %vm1859_vm6, %v4570_v13 }
 0xf9f   :  { %8655 = vmatmul.mubr.msk.bf16.gmra.mrb[80].mxu0 %vm1859_vm6, %v4571_v26 }
0x103a   :  { %v8640_v44 = vpop.f32.mrb[108].mxu0 }
0x103b   :  { %v4537_v41 = vpop.f32.mrb[109].mxu0 }
0x103c   :  { %v8641_v29 = vpop.f32.mrb[110].mxu0 }
0x103d   :  { %v4573_v52 = vpack.c.bf16 %v8641_v29, %v8640_v44  ;;  %v4540_v31 = vpop.f32.mrb[111].mxu0 }
0x103e   :  { %v4572_v5 = vpack.c.bf16 %v4540_v31, %v4537_v41  ;;  %v12552_v41 = vld [vmem:[#allocation36_spill] sm:$0xff] }
0x1040   :  { %8658 = vmatprep.mubr.msk.bf16.mxu0 %vm1859_vm6, %v4572_v5 }
0x1041   :  { %8659 = vmatmul.mubr.msk.bf16.gmra.mrb[84].mxu0 %vm1859_vm6, %v4573_v52 }
0x1042   :  { %v8644_v42 = vpop.f32.mrb[112].mxu0 }
0x1043   :  { %v4553_v51 = vpop.f32.mrb[113].mxu0 }
0x1044   :  { %v8645_v48 = vpop.f32.mrb[114].mxu0 }
0x1045   :  { %v4575_v63 = vpack.c.bf16 %v8645_v48, %v8644_v42  ;;  %v4556_v43 = vpop.f32.mrb[115].mxu0  ;;  %v12553_v42 = vld [vmem:[#allocation38_spill] sm:$0xff] }
0x1046   :  { %v4574_v0 = vpack.c.bf16 %v4556_v43, %v4553_v51 }
0x1048   :  { %8662 = vmatprep.mubr.msk.bf16.mxu0 %vm1859_vm6, %v4574_v0 }
0x1049   :  { %8663 = vmatmul.mubr.msk.bf16.gmra.mrb[88].mxu0 %vm1859_vm6, %v4575_v63 }
0x106a   :  { %v8652_v22 = vpop.f32.mrb[76].mxu0 }
0x106b   :  { %v4650_v59 = vpop.f32.mrb[77].mxu0  ;;  %v11523_v21 = vadd.f32 %v12540_v62, %v8652_v22 }
0x106c   :  { %v11516_v15 = vadd.f32 %v12538_v33, %v4650_v59  ;;  %v8653_v60 = vpop.f32.mrb[78].mxu0 }
0x106d   :  { %v4653_v9 = vpop.f32.mrb[79].mxu0  ;;  %v11528_v61 = vadd.f32 %v12541_v16, %v8653_v60 }
0x106e   :  { %v11519_v49 = vadd.f32 %v12539_v30, %v4653_v9  ;;  %4747 = vadd.xlane.f32.xlu1 %v11516_v15 }
0x1070   :  { %4749 = vadd.xlane.f32.xlu0 %v11519_v49 }
0x1072   :  { %4751 = vadd.xlane.f32.xlu1 %v11523_v21  ;;  %v8656_v8 = vpop.f32.mrb[80].mxu0 }
0x1073   :  { %v4666_v6 = vpop.f32.mrb[81].mxu0  ;;  %v11543_v34 = vadd.f32 %v12545_v40, %v8656_v8  ;;  %v9251_v40 = vld [vmem:[%s12554_s13] sm:$0xff]  }
0x1074   :  { %v8657_v32 = vpop.f32.mrb[82].mxu0  ;;  %v11535_v45 = vadd.f32 %v12543_v55, %v4666_v6  ;;  %8666 = vmatprep.subr.bf16.mxu1 %v9251_v40 }
0x1075   :  { %v4669_v58 = vpop.f32.mrb[83].mxu0  ;;  %v11539_v3 = vadd.f32 %v12544_v4, %v8657_v32  ;;  %8667 = vmatpush3.bf16.msra.mxu1 %v9251_v40 }
0x1076   :  { %v11531_v17 = vadd.f32 %v12542_v7, %v4669_v58  ;;  %4753 = vadd.xlane.f32.xlu1 %v11528_v61 }
0x1078   :  { %4757 = vadd.xlane.f32.xlu0 %v11531_v17 }
0x107a   :  { %4755 = vadd.xlane.f32.xlu1 %v11535_v45 }
0x107c   :  { %4761 = vadd.xlane.f32.xlu0 %v11539_v3 }
0x107e   :  { %4759 = vadd.xlane.f32.xlu1 %v11543_v34 }
0x10fb   :  { %v4748_v20 = vpop.xlane.xlu1 %4747 }
0x10fc   :  { %v4779_v28 = vmul.f32 0.0078125, %v4748_v20 }
0x10fd   :  { %v4750_v56 = vpop.xlane.xlu0 %4749 }
0x10fe   :  { %v4780_v53 = vmul.f32 0.0078125, %v4750_v56  ;;  %v11571_v13 = vsub.f32 %v11516_v15, %v4779_v28 }
0x10ff   :  { %v4752_v10 = vpop.xlane.xlu1 %4751 }
0x1100   :  { %v4781_v44 = vmul.f32 0.0078125, %v4752_v10  ;;  %v11578_v31 = vsub.f32 %v11519_v49, %v4780_v53  ;;  %v4811_v43 = vmul.f32 %v11571_v13, %v11571_v13  ;;  %v9253_v10 = vld [vmem:[%s12554_s13 + $0x10] sm:$0xff]  }
0x1102   :  { %v11585_v48 = vsub.f32 %v11523_v21, %v4781_v44  ;;  %v4812_v33 = vmul.f32 %v11578_v31, %v11578_v31 }
0x1103   :  { %v4754_v39 = vpop.xlane.xlu1 %4753 }
0x1104   :  { %v4782_v5 = vmul.f32 0.0078125, %v4754_v39  ;;  %v4813_v62 = vmul.f32 %v11585_v48, %v11585_v48 }
0x1105   :  { %v4758_v52 = vpop.xlane.xlu0 %4757 }
0x1106   :  { %v11591_v22 = vsub.f32 %v11528_v61, %v4782_v5  ;;  %v4784_v59 = vmul.f32 0.0078125, %v4758_v52 }
0x1107   :  { %v4756_v47 = vpop.xlane.xlu1 %4755 }
0x1108   :  { %v4783_v63 = vmul.f32 0.0078125, %v4756_v47  ;;  %v11601_v8 = vsub.f32 %v11531_v17, %v4784_v59  ;;  %v4814_v16 = vmul.f32 %v11591_v22, %v11591_v22 }
0x1109   :  { %v4762_v60 = vpop.xlane.xlu0 %4761 }
0x110a   :  { %v11596_v9 = vsub.f32 %v11535_v45, %v4783_v63  ;;  %v4786_v6 = vmul.f32 0.0078125, %v4762_v60  ;;  %v4816_v55 = vmul.f32 %v11601_v8, %v11601_v8 }
0x110b   :  { %v4760_v0 = vpop.xlane.xlu1 %4759 }
0x110c   :  { %v4785_v30 = vmul.f32 0.0078125, %v4760_v0  ;;  %v4815_v58 = vmul.f32 %v11596_v9, %v11596_v9  ;;  %v11611_v7 = vsub.f32 %v11539_v3, %v4786_v6 }
0x110e   :  { %v11606_v32 = vsub.f32 %v11543_v34, %v4785_v30  ;;  %v4818_v20 = vmul.f32 %v11611_v7, %v11611_v7 }
0x1110   :  { %v4817_v4 = vmul.f32 %v11606_v32, %v11606_v32 }
0x1114   :  { %v8660_v11 = vpop.f32.mrb[84].mxu0 }
0x1115   :  { %v4682_v14 = vpop.f32.mrb[85].mxu0  ;;  %v11555_v12 = vadd.f32 %v12548_v18, %v8660_v11  ;;  %v9252_v11 = vld [vmem:[%s12554_s13 + $0x8] sm:$0xff]  }
0x1116   :  { %v11548_v37 = vadd.f32 %v12546_v24, %v4682_v14  ;;  %v8661_v36 = vpop.f32.mrb[86].mxu0  ;;  %8668 = vmatprep.subr.bf16.mxu1 %v9252_v11  ;;  %v9254_v14 = vld [vmem:[%s12554_s13 + $0x18] sm:$0xff]   ;;  %v9255_v24 = vld [vmem:[%s12554_s13 + $0x20] sm:$0xff]  }
0x1117   :  { %v4685_v25 = vpop.f32.mrb[87].mxu0  ;;  %v11559_v1 = vadd.f32 %v12549_v35, %v8661_v36  ;;  %8669 = vmatpush3.bf16.msra.mxu1 %v9252_v11  ;;  %v9256_v36 = vld [vmem:[%s12554_s13 + $0x28] sm:$0xff]  }
0x1118   :  { %v11551_v57 = vadd.f32 %v12547_v27, %v4685_v25  ;;  %4763 = vadd.xlane.f32.xlu1 %v11548_v37  ;;  %8670 = vmatprep.subr.bf16.mxu1 %v9253_v10  ;;  %v9257_v25 = vld [vmem:[%s12554_s13 + $0x30] sm:$0xff]   ;;  %v9258_v27 = vld [vmem:[%s12554_s13 + $0x38] sm:$0xff]  }
0x111a   :  { %4765 = vadd.xlane.f32.xlu0 %v11551_v57 }
0x111b   :  { %8671 = vmatpush3.bf16.msra.mxu1 %v9253_v10 }
0x111c   :  { %4767 = vadd.xlane.f32.xlu1 %v11555_v12  ;;  %v8664_v23 = vpop.f32.mrb[88].mxu0  ;;  %8672 = vmatprep.subr.bf16.mxu1 %v9254_v14 }
0x111d   :  { %v4698_v19 = vpop.f32.mrb[89].mxu0  ;;  %v11574_v29 = vadd.f32 %v12552_v41, %v8664_v23 }
0x111e   :  { %v11563_v38 = vadd.f32 %v12550_v54, %v4698_v19  ;;  %4769 = vadd.xlane.f32.xlu0 %v11559_v1  ;;  %v8665_v2 = vpop.f32.mrb[90].mxu0 }
0x111f   :  { %v4701_v46 = vpop.f32.mrb[91].mxu0  ;;  %v11581_v51 = vadd.f32 %v12553_v42, %v8665_v2  ;;  %8673 = vmatpush3.bf16.msra.mxu1 %v9254_v14 }
0x1120   :  { %v11567_v26 = vadd.f32 %v12551_v50, %v4701_v46  ;;  %4771 = vadd.xlane.f32.xlu1 %v11563_v38  ;;  %8674 = vmatprep.subr.bf16.mxu1 %v9255_v24 }
0x1122   :  { %4773 = vadd.xlane.f32.xlu0 %v11567_v26 }
0x1123   :  { %8675 = vmatpush3.bf16.msra.mxu1 %v9255_v24 }
0x1124   :  { %4775 = vadd.xlane.f32.xlu1 %v11574_v29  ;;  %8676 = vmatprep.subr.bf16.mxu1 %v9256_v36 }
0x1126   :  { %4777 = vadd.xlane.f32.xlu0 %v11581_v51 }
0x1127   :  { %8677 = vmatpush3.bf16.msra.mxu1 %v9256_v36 }
0x1128   :  { %4827 = vadd.xlane.f32.xlu1 %v4811_v43  ;;  %8678 = vmatprep.subr.bf16.mxu1 %v9257_v25 }
0x112a   :  { %4829 = vadd.xlane.f32.xlu0 %v4812_v33 }
0x112b   :  { %8679 = vmatpush3.bf16.msra.mxu1 %v9257_v25 }
0x112c   :  { %4831 = vadd.xlane.f32.xlu1 %v4813_v62  ;;  %8680 = vmatprep.subr.bf16.mxu1 %v9258_v27 }
0x112e   :  { %4833 = vadd.xlane.f32.xlu0 %v4814_v16 }
0x112f   :  { %8681 = vmatpush3.bf16.msra.mxu1 %v9258_v27 }
0x1130   :  { %4835 = vadd.xlane.f32.xlu1 %v4815_v58 }
0x1132   :  { %4837 = vadd.xlane.f32.xlu0 %v4816_v55 }
0x1134   :  { %4839 = vadd.xlane.f32.xlu1 %v4817_v4 }
0x1136   :  { %4841 = vadd.xlane.f32.xlu0 %v4818_v20 }
0x11a5   :  { %v4764_v18 = vpop.xlane.xlu1 %4763 }
0x11a6   :  { %v4787_v39 = vmul.f32 0.0078125, %v4764_v18 }
0x11a7   :  { %v4766_v35 = vpop.xlane.xlu0 %4765 }
0x11a8   :  { %v11628_v23 = vsub.f32 %v11548_v37, %v4787_v39  ;;  %v4788_v56 = vmul.f32 0.0078125, %v4766_v35 }
0x11a9   :  { %v4768_v19 = vpop.xlane.xlu1 %4767 }
0x11aa   :  { %v11631_v28 = vsub.f32 %v11551_v57, %v4788_v56  ;;  %v4789_v54 = vmul.f32 0.0078125, %v4768_v19  ;;  %v4819_v2 = vmul.f32 %v11628_v23, %v11628_v23 }
0x11ab   :  { %v4770_v46 = vpop.xlane.xlu0 %4769 }
0x11ac   :  { %v11636_v53 = vsub.f32 %v11555_v12, %v4789_v54  ;;  %v4790_v50 = vmul.f32 0.0078125, %v4770_v46  ;;  %4843 = vadd.xlane.f32.xlu1 %v4819_v2  ;;  %v4820_v47 = vmul.f32 %v11631_v28, %v11631_v28 }
0x11ad   :  { %v4772_v44 = vpop.xlane.xlu1 %4771 }
0x11ae   :  { %v11641_v41 = vsub.f32 %v11559_v1, %v4790_v50  ;;  %v4791_v52 = vmul.f32 0.0078125, %v4772_v44  ;;  %4845 = vadd.xlane.f32.xlu0 %v4820_v47  ;;  %v4821_v5 = vmul.f32 %v11636_v53, %v11636_v53 }
0x11af   :  { %v4774_v42 = vpop.xlane.xlu0 %4773 }
0x11b0   :  { %v11646_v63 = vsub.f32 %v11563_v38, %v4791_v52  ;;  %v4792_v43 = vmul.f32 0.0078125, %v4774_v42  ;;  %4847 = vadd.xlane.f32.xlu1 %v4821_v5  ;;  %v4822_v0 = vmul.f32 %v11641_v41, %v11641_v41 }
0x11b1   :  { %v4776_v59 = vpop.xlane.xlu1 %4775 }
0x11b2   :  { %v11651_v33 = vsub.f32 %v11567_v26, %v4792_v43  ;;  %v4793_v60 = vmul.f32 0.0078125, %v4776_v59  ;;  %4849 = vadd.xlane.f32.xlu0 %v4822_v0  ;;  %v4823_v30 = vmul.f32 %v11646_v63, %v11646_v63  ;;  %v11668_v43 = vld [vmem:[%s12555_s17] ss:$0 sm:$0xff] }
0x11b3   :  { %v4778_v62 = vpop.xlane.xlu0 %4777 }
0x11b4   :  { %v11656_v6 = vsub.f32 %v11574_v29, %v4793_v60  ;;  %v4794_v16 = vmul.f32 0.0078125, %v4778_v62  ;;  %4851 = vadd.xlane.f32.xlu1 %v4823_v30  ;;  %v4824_v58 = vmul.f32 %v11651_v33, %v11651_v33 }
0x11b5   :  { %v4828_v55 = vpop.xlane.xlu1 %4827 }
0x11b6   :  { %v11661_v4 = vsub.f32 %v11581_v51, %v4794_v16  ;;  %v4859_v40 = vmul.f32 0.0078125, %v4828_v55  ;;  %4853 = vadd.xlane.f32.xlu0 %v4824_v58  ;;  %v4825_v20 = vmul.f32 %v11656_v6, %v11656_v6 }
0x11b7   :  { %v4830_v11 = vpop.xlane.xlu0 %4829 }
0x11b8   :  { %v4875_v10 = vadd.f32 1e-05, %v4859_v40  ;;  %v4860_v14 = vmul.f32 0.0078125, %v4830_v11  ;;  %4855 = vadd.xlane.f32.xlu1 %v4825_v20  ;;  %v4826_v24 = vmul.f32 %v11661_v4, %v11661_v4  ;;  %v11674_v40 = vld [vmem:[%s12556_s21] ss:$0 sm:$0xff] }
0x11b9   :  { %v4832_v36 = vpop.xlane.xlu1 %4831 }
0x11ba   :  { %9643 = vrsqrt.f32 %v4875_v10  ;;  %v4876_v25 = vadd.f32 1e-05, %v4860_v14  ;;  %v4861_v27 = vmul.f32 0.0078125, %v4832_v36  ;;  %4857 = vadd.xlane.f32.xlu0 %v4826_v24 }
0x11bb   :  { %v4834_v18 = vpop.xlane.xlu0 %4833 }
0x11bc   :  { %9645 = vrsqrt.f32 %v4876_v25  ;;  %v4877_v39 = vadd.f32 1e-05, %v4861_v27  ;;  %v4862_v35 = vmul.f32 0.0078125, %v4834_v18 }
0x11bd   :  { %v4836_v56 = vpop.xlane.xlu1 %4835 }
0x11be   :  { %9647 = vrsqrt.f32 %v4877_v39  ;;  %v4878_v19 = vadd.f32 1e-05, %v4862_v35  ;;  %v4863_v54 = vmul.f32 0.0078125, %v4836_v56 }
0x11bf   :  { %v4838_v2 = vpop.xlane.xlu0 %4837 }
0x11c0   :  { %9649 = vrsqrt.f32 %v4878_v19  ;;  %v4879_v46 = vadd.f32 1e-05, %v4863_v54  ;;  %v4864_v50 = vmul.f32 0.0078125, %v4838_v2 }
0x11c1   :  { %v4840_v47 = vpop.xlane.xlu1 %4839 }
0x11c2   :  { %9651 = vrsqrt.f32 %v4879_v46  ;;  %v4880_v44 = vadd.f32 1e-05, %v4864_v50  ;;  %v4865_v52 = vmul.f32 0.0078125, %v4840_v47 }
0x11c3   :  { %v4842_v5 = vpop.xlane.xlu0 %4841 }
0x11c4   :  { %v9644_v42 = vpop.eup %9643  ;;  %9653 = vrsqrt.f32 %v4880_v44  ;;  %v4881_v0 = vadd.f32 1e-05, %v4865_v52  ;;  %v4866_v59 = vmul.f32 0.0078125, %v4842_v5 }
0x11c5   :  { %v4907_v60 = vmul.f32 %v9644_v42, %v11571_v13 }
0x11c6   :  { %v9646_v30 = vpop.eup %9645  ;;  %9655 = vrsqrt.f32 %v4881_v0  ;;  %v4882_v62 = vadd.f32 1e-05, %v4866_v59  ;;  %v9259_v59 = vld [vmem:[%s12557_s25] sm:$0xff]  }
0x11c7   :  { %v4908_v16 = vmul.f32 %v9646_v30, %v11578_v31  ;;  %v4929_v58 = vmul.f32 %v11668_v43, %v4907_v60  ;;  %v9260_v60 = vld [vmem:[%s12557_s25 + $0x8] sm:$0xff]   ;;  %8698 = vmatprep.subr.bf16.mxu0 %v9259_v59  ;;  %v9262_v30 = vld [vmem:[%s12557_s25 + $0x18] sm:$0xff]  }
0x11c8   :  { %v9648_v55 = vpop.eup %9647  ;;  %9657 = vrsqrt.f32 %v4882_v62  ;;  %8699 = vmatpush3.bf16.msra.mxu0 %v9259_v59  ;;  %v9263_v62 = vld [vmem:[%s12557_s25 + $0x20] sm:$0xff]  }
0x11c9   :  { %v4909_v20 = vmul.f32 %v9648_v55, %v11585_v48  ;;  %v4930_v11 = vmul.f32 %v11668_v43, %v4908_v16  ;;  %v4951_v24 = vadd.f32 %v11674_v40, %v4929_v58  ;;  %8700 = vmatprep.subr.bf16.mxu0 %v9260_v60  ;;  %v9264_v16 = vld [vmem:[%s12557_s25 + $0x28] sm:$0xff]   ;;  %v9265_v58 = vld [vmem:[%s12557_s25 + $0x30] sm:$0xff]   ;;  %v9266_v55 = vld [vmem:[%s12557_s25 + $0x38] sm:$0xff]  }
0x11ca   :  { %v9650_v10 = vpop.eup %9649 }
0x11cb   :  { %v4931_v14 = vmul.f32 %v11668_v43, %v4909_v20  ;;  %v4910_v13 = vmul.f32 %v9650_v10, %v11591_v22  ;;  %v4952_v36 = vadd.f32 %v11674_v40, %v4930_v11 }
0x11cc   :  { %v9652_v31 = vpop.eup %9651  ;;  %8701 = vmatpush3.bf16.msra.mxu0 %v9260_v60 }
0x11cd   :  { %v4932_v25 = vmul.f32 %v11668_v43, %v4910_v13  ;;  %v4967_v27 = vpack.c.bf16 %v4952_v36, %v4951_v24  ;;  %v4911_v18 = vmul.f32 %v9652_v31, %v11596_v9  ;;  %v4953_v48 = vadd.f32 %v11674_v40, %v4931_v14 }
0x11ce   :  { %v9654_v39 = vpop.eup %9653 }
0x11cf   :  { %8682 = vmatprep.mubr.bf16.mxu1 %v4967_v27  ;;  %v4954_v35 = vadd.f32 %v11674_v40, %v4932_v25  ;;  %v4912_v56 = vmul.f32 %v9654_v39, %v11601_v8  ;;  %v4933_v22 = vmul.f32 %v11668_v43, %v4911_v18 }
0x11d0   :  { %v9656_v19 = vpop.eup %9655 }
0x11d1   :  { %v4968_v54 = vpack.c.bf16 %v4954_v35, %v4953_v48  ;;  %v4934_v2 = vmul.f32 %v11668_v43, %v4912_v56  ;;  %v4913_v46 = vmul.f32 %v9656_v19, %v11606_v32  ;;  %v4955_v9 = vadd.f32 %v11674_v40, %v4933_v22 }
0x11d2   :  { %v9658_v50 = vpop.eup %9657 }
0x11d3   :  { %8683 = vmatmul.mubr.bf16.vlgmr.msra.gmra.mrb[116].mxu1 %v4968_v54  ;;  %v4956_v47 = vadd.f32 %v11674_v40, %v4934_v2  ;;  %v4914_v44 = vmul.f32 %v9658_v50, %v11611_v7  ;;  %v4935_v8 = vmul.f32 %v11668_v43, %v4913_v46  ;;  %v9261_v7 = vld [vmem:[%s12557_s25 + $0x10] sm:$0xff]  }
0x11d4   :  { %8702 = vmatprep.subr.bf16.mxu0 %v9261_v7 }
0x11d5   :  { %v4969_v52 = vpack.c.bf16 %v4956_v47, %v4955_v9  ;;  %v4936_v5 = vmul.f32 %v11668_v43, %v4914_v44  ;;  %v4957_v42 = vadd.f32 %v11674_v40, %v4935_v8  ;;  %8703 = vmatpush3.bf16.msra.mxu0 %v9261_v7 }
0x11d6   :  { %8704 = vmatprep.subr.bf16.mxu0 %v9262_v30 }
0x11d7   :  { %8686 = vmatprep.mubr.bf16.mxu1 %v4969_v52  ;;  %v4958_v32 = vadd.f32 %v11674_v40, %v4936_v5 }
0x11d9   :  { %v4970_v0 = vpack.c.bf16 %v4958_v32, %v4957_v42  ;;  %8705 = vmatpush3.bf16.msra.mxu0 %v9262_v30 }
0x11da   :  { %8706 = vmatprep.subr.bf16.mxu0 %v9263_v62 }
0x11db   :  { %8687 = vmatmul.mubr.bf16.gmra.mrb[120].mxu1 %v4970_v0 }
0x11dd   :  { %8707 = vmatpush3.bf16.msra.mxu0 %v9263_v62 }
0x11de   :  { %8708 = vmatprep.subr.bf16.mxu0 %v9264_v16 }
0x11e1   :  { %8709 = vmatpush3.bf16.msra.mxu0 %v9264_v16 }
0x11e2   :  { %8710 = vmatprep.subr.bf16.mxu0 %v9265_v58 }
0x11e5   :  { %8711 = vmatpush3.bf16.msra.mxu0 %v9265_v58 }
0x11e6   :  { %8712 = vmatprep.subr.bf16.mxu0 %v9266_v55 }
0x11e9   :  { %8713 = vmatpush3.bf16.msra.mxu0 %v9266_v55 }
0x1239   :  { %v4844_v20 = vpop.xlane.xlu1 %4843 }
0x123a   :  { %v4867_v11 = vmul.f32 0.0078125, %v4844_v20 }
0x123b   :  { %v4846_v10 = vpop.xlane.xlu0 %4845 }
0x123c   :  { %v4883_v14 = vadd.f32 1e-05, %v4867_v11  ;;  %v4868_v13 = vmul.f32 0.0078125, %v4846_v10 }
0x123d   :  { %v4848_v24 = vpop.xlane.xlu1 %4847 }
0x123e   :  { %9659 = vrsqrt.f32 %v4883_v14  ;;  %v4884_v36 = vadd.f32 1e-05, %v4868_v13  ;;  %v4869_v31 = vmul.f32 0.0078125, %v4848_v24 }
0x123f   :  { %v4850_v25 = vpop.xlane.xlu0 %4849 }
0x1240   :  { %9661 = vrsqrt.f32 %v4884_v36  ;;  %v4885_v27 = vadd.f32 1e-05, %v4869_v31  ;;  %v4870_v18 = vmul.f32 0.0078125, %v4850_v25 }
0x1241   :  { %v4852_v39 = vpop.xlane.xlu1 %4851 }
0x1242   :  { %9663 = vrsqrt.f32 %v4885_v27  ;;  %v4886_v48 = vadd.f32 1e-05, %v4870_v18  ;;  %v4871_v35 = vmul.f32 0.0078125, %v4852_v39 }
0x1243   :  { %v4854_v56 = vpop.xlane.xlu0 %4853 }
0x1244   :  { %9665 = vrsqrt.f32 %v4886_v48  ;;  %v4887_v22 = vadd.f32 1e-05, %v4871_v35  ;;  %v4872_v19 = vmul.f32 0.0078125, %v4854_v56 }
0x1245   :  { %v4856_v54 = vpop.xlane.xlu1 %4855 }
0x1246   :  { %9667 = vrsqrt.f32 %v4887_v22  ;;  %v4888_v2 = vadd.f32 1e-05, %v4872_v19  ;;  %v4873_v46 = vmul.f32 0.0078125, %v4856_v54 }
0x1247   :  { %v4858_v50 = vpop.xlane.xlu0 %4857 }
0x1248   :  { %v9660_v9 = vpop.eup %9659  ;;  %9669 = vrsqrt.f32 %v4888_v2  ;;  %v4889_v47 = vadd.f32 1e-05, %v4873_v46  ;;  %v4874_v44 = vmul.f32 0.0078125, %v4858_v50 }
0x1249   :  { %v4915_v8 = vmul.f32 %v9660_v9, %v11628_v23 }
0x124a   :  { %v9662_v52 = vpop.eup %9661  ;;  %9671 = vrsqrt.f32 %v4889_v47  ;;  %v4890_v5 = vadd.f32 1e-05, %v4874_v44 }
0x124b   :  { %v4916_v42 = vmul.f32 %v9662_v52, %v11631_v28  ;;  %v4937_v32 = vmul.f32 %v11668_v43, %v4915_v8 }
0x124c   :  { %v9664_v0 = vpop.eup %9663  ;;  %9673 = vrsqrt.f32 %v4890_v5 }
0x124d   :  { %v4938_v59 = vmul.f32 %v11668_v43, %v4916_v42  ;;  %v4917_v60 = vmul.f32 %v9664_v0, %v11636_v53  ;;  %v4959_v30 = vadd.f32 %v11674_v40, %v4937_v32 }
0x124e   :  { %v9666_v7 = vpop.eup %9665 }
0x124f   :  { %v4960_v62 = vadd.f32 %v11674_v40, %v4938_v59  ;;  %v4918_v23 = vmul.f32 %v9666_v7, %v11641_v41  ;;  %v4939_v16 = vmul.f32 %v11668_v43, %v4917_v60 }
0x1250   :  { %v9668_v58 = vpop.eup %9667 }
0x1251   :  { %v4971_v55 = vpack.c.bf16 %v4960_v62, %v4959_v30  ;;  %v4940_v28 = vmul.f32 %v11668_v43, %v4918_v23  ;;  %v4919_v20 = vmul.f32 %v9668_v58, %v11646_v63  ;;  %v4961_v10 = vadd.f32 %v11674_v40, %v4939_v16 }
0x1252   :  { %v9670_v11 = vpop.eup %9669 }
0x1253   :  { %8690 = vmatprep.mubr.bf16.mxu1 %v4971_v55  ;;  %v4962_v53 = vadd.f32 %v11674_v40, %v4940_v28  ;;  %v4920_v14 = vmul.f32 %v9670_v11, %v11651_v33  ;;  %v4941_v13 = vmul.f32 %v11668_v43, %v4919_v20 }
0x1254   :  { %v9672_v24 = vpop.eup %9671 }
0x1255   :  { %v4972_v41 = vpack.c.bf16 %v4962_v53, %v4961_v10  ;;  %v4942_v36 = vmul.f32 %v11668_v43, %v4920_v14  ;;  %v4921_v31 = vmul.f32 %v9672_v24, %v11656_v6  ;;  %v4963_v63 = vadd.f32 %v11674_v40, %v4941_v13  ;;  %v7725_v6 = vld [vmem:[%s12558_s29] ss:$0 sm:$0xff] }
0x1256   :  { %v9674_v25 = vpop.eup %9673 }
0x1257   :  { %8691 = vmatmul.mubr.bf16.gmra.mrb[124].mxu1 %v4972_v41  ;;  %v4964_v27 = vadd.f32 %v11674_v40, %v4942_v36  ;;  %v4922_v18 = vmul.f32 %v9674_v25, %v11661_v4  ;;  %v4943_v39 = vmul.f32 %v11668_v43, %v4921_v31 }
0x1259   :  { %v4973_v33 = vpack.c.bf16 %v4964_v27, %v4963_v63  ;;  %v4944_v48 = vmul.f32 %v11668_v43, %v4922_v18  ;;  %v4965_v35 = vadd.f32 %v11674_v40, %v4943_v39 }
0x125b   :  { %8694 = vmatprep.mubr.bf16.mxu1 %v4973_v33  ;;  %v4966_v56 = vadd.f32 %v11674_v40, %v4944_v48 }
0x125d   :  { %v4974_v22 = vpack.c.bf16 %v4966_v56, %v4965_v35 }
0x125f   :  { %8695 = vmatmul.mubr.bf16.gmra.mrb[128].mxu1 %v4974_v22 }
0x12a6   :  { %v8684_v19 = vpop.f32.mrb[116].mxu1 }
0x12a7   :  { %v5089_v54 = vadd.f32 %v8684_v19, %v7725_v6  ;;  %v5080_v2 = vpop.f32.mrb[117].mxu1 }
0x12a8   :  { %v5081_v46 = vadd.f32 %v7725_v6, %v5080_v2  ;;  %v8685_v50 = vpop.f32.mrb[118].mxu1 }
0x12a9   :  { %v5092_v9 = vadd.f32 %v8685_v50, %v7725_v6  ;;  %v5083_v4 = vpop.f32.mrb[119].mxu1  ;;  %v5145_v44 = vmax.f32 %v5089_v54, 0.0 }
0x12aa   :  { %v5084_v47 = vadd.f32 %v7725_v6, %v5083_v4  ;;  %v5143_v52 = vmax.f32 %v5081_v46, 0.0 }
0x12ab   :  { %v5146_v8 = vmax.f32 %v5092_v9, 0.0 }
0x12ac   :  { %v5144_v43 = vmax.f32 %v5084_v47, 0.0 }
0x12ad   :  { %v5160_v5 = vpack.c.bf16 %v5146_v8, %v5145_v44  ;;  %v12560_v8 = vmov 0  }
0x12ae   :  { %v5159_v42 = vpack.c.bf16 %v5144_v43, %v5143_v52  ;;  %v8688_v32 = vpop.f32.mrb[120].mxu1  ;;  %v7734_v52 = vld [vmem:[%s12559_s3] ss:$0 sm:$0xff] }
0x12af   :  { %v5105_v0 = vadd.f32 %v8688_v32, %v7725_v6  ;;  %v5096_v40 = vpop.f32.mrb[121].mxu1 }
0x12b0   :  { %v5097_v59 = vadd.f32 %v7725_v6, %v5096_v40  ;;  %v8689_v60 = vpop.f32.mrb[122].mxu1  ;;  %8714 = vmatprep.mubr.bf16.mxu0 %v5159_v42 }
0x12b1   :  { %v5108_v7 = vadd.f32 %v8689_v60, %v7725_v6  ;;  %v5099_v30 = vpop.f32.mrb[123].mxu1  ;;  %8715 = vmatmul.mubr.bf16.vlgmr.msra.gmra.mrb[116].mxu0 %v5160_v5  ;;  %v5149_v23 = vmax.f32 %v5105_v0, 0.0 }
0x12b2   :  { %v5100_v62 = vadd.f32 %v7725_v6, %v5099_v30  ;;  %v5147_v58 = vmax.f32 %v5097_v59, 0.0 }
0x12b3   :  { %v5150_v16 = vmax.f32 %v5108_v7, 0.0 }
0x12b4   :  { %v5148_v55 = vmax.f32 %v5100_v62, 0.0 }
0x12b5   :  { %v5162_v28 = vpack.c.bf16 %v5150_v16, %v5149_v23 }
0x12b6   :  { %v5161_v20 = vpack.c.bf16 %v5148_v55, %v5147_v58 }
0x12b8   :  { %8718 = vmatprep.mubr.bf16.mxu0 %v5161_v20 }
0x12b9   :  { %8719 = vmatmul.mubr.bf16.gmra.mrb[120].mxu0 %v5162_v28 }
0x132a   :  { %v8692_v11 = vpop.f32.mrb[124].mxu1 }
0x132b   :  { %v5121_v10 = vadd.f32 %v8692_v11, %v7725_v6  ;;  %v5112_v53 = vpop.f32.mrb[125].mxu1 }
0x132c   :  { %v5113_v14 = vadd.f32 %v7725_v6, %v5112_v53  ;;  %v8693_v13 = vpop.f32.mrb[126].mxu1 }
0x132d   :  { %v5124_v24 = vadd.f32 %v8693_v13, %v7725_v6  ;;  %v5115_v41 = vpop.f32.mrb[127].mxu1  ;;  %v5153_v31 = vmax.f32 %v5121_v10, 0.0 }
0x132e   :  { %v5116_v36 = vadd.f32 %v7725_v6, %v5115_v41  ;;  %v5151_v63 = vmax.f32 %v5113_v14, 0.0 }
0x132f   :  { %v5154_v25 = vmax.f32 %v5124_v24, 0.0 }
0x1330   :  { %v5152_v27 = vmax.f32 %v5116_v36, 0.0 }
0x1331   :  { %v5164_v18 = vpack.c.bf16 %v5154_v25, %v5153_v31 }
0x1332   :  { %v5163_v39 = vpack.c.bf16 %v5152_v27, %v5151_v63  ;;  %v8696_v33 = vpop.f32.mrb[128].mxu1  ;;  %v12561_v63 = vld [vmem:[#allocation22_spill] sm:$0xff] }
0x1333   :  { %v5137_v48 = vadd.f32 %v8696_v33, %v7725_v6  ;;  %v5128_v35 = vpop.f32.mrb[129].mxu1  ;;  %v12562_v33 = vld [vmem:[#allocation21_spill] sm:$0xff] }
0x1334   :  { %v5129_v56 = vadd.f32 %v7725_v6, %v5128_v35  ;;  %v8697_v22 = vpop.f32.mrb[130].mxu1  ;;  %8722 = vmatprep.mubr.bf16.mxu0 %v5163_v39 }
0x1335   :  { %v5140_v19 = vadd.f32 %v8697_v22, %v7725_v6  ;;  %v5131_v54 = vpop.f32.mrb[131].mxu1  ;;  %8723 = vmatmul.mubr.bf16.gmra.mrb[124].mxu0 %v5164_v18  ;;  %v5157_v46 = vmax.f32 %v5137_v48, 0.0 }
0x1336   :  { %v5132_v2 = vadd.f32 %v7725_v6, %v5131_v54  ;;  %v5155_v9 = vmax.f32 %v5129_v56, 0.0 }
0x1337   :  { %v5158_v50 = vmax.f32 %v5140_v19, 0.0 }
0x1338   :  { %v5156_v4 = vmax.f32 %v5132_v2, 0.0 }
0x1339   :  { %v5166_v47 = vpack.c.bf16 %v5158_v50, %v5157_v46 }
0x133a   :  { %v5165_v44 = vpack.c.bf16 %v5156_v4, %v5155_v9 }
0x133c   :  { %8726 = vmatprep.mubr.bf16.mxu0 %v5165_v44 }
0x133d   :  { %8727 = vmatmul.mubr.bf16.gmra.mrb[128].mxu0 %v5166_v47 }
0x133e   :  { %5855 = vmatprep.mubr.bf16.mxu0 %v12560_v8 }
0x1384   :  { %v8716_v43 = vpop.f32.mrb[116].mxu0 }
0x1385   :  { %v5272_v5 = vpop.f32.mrb[117].mxu0  ;;  %v5281_v40 = vadd.f32 %v8716_v43, %v7734_v52 }
0x1386   :  { %v5273_v42 = vadd.f32 %v7734_v52, %v5272_v5  ;;  %v8717_v32 = vpop.f32.mrb[118].mxu0 }
0x1387   :  { %v5275_v0 = vpop.f32.mrb[119].mxu0  ;;  %v5284_v60 = vadd.f32 %v8717_v32, %v7734_v52  ;;  %v11737_v30 = vadd.f32 %v5281_v40, %v11523_v21 }
0x1388   :  { %v5335_v59 = vadd.f32 %v5273_v42, %v11516_v15  ;;  %v5276_v6 = vadd.f32 %v7734_v52, %v5275_v0 }
0x1389   :  { %v11741_v16 = vadd.f32 %v5284_v60, %v11528_v61 }
0x138a   :  { %v11734_v7 = vadd.f32 %v5276_v6, %v11519_v49  ;;  %5393 = vadd.xlane.f32.xlu1 %v5335_v59 }
0x138c   :  { %5395 = vadd.xlane.f32.xlu0 %v11734_v7  ;;  %v8720_v62 = vpop.f32.mrb[120].mxu0 }
0x138d   :  { %v5288_v23 = vpop.f32.mrb[121].mxu0  ;;  %v5297_v28 = vadd.f32 %v8720_v62, %v7734_v52 }
0x138e   :  { %v5289_v58 = vadd.f32 %v7734_v52, %v5288_v23  ;;  %5397 = vadd.xlane.f32.xlu1 %v11737_v30  ;;  %v8721_v15 = vpop.f32.mrb[122].mxu0 }
0x138f   :  { %v5291_v55 = vpop.f32.mrb[123].mxu0  ;;  %v5300_v21 = vadd.f32 %v8721_v15, %v7734_v52  ;;  %v11753_v61 = vadd.f32 %v5297_v28, %v11543_v34  ;;  %v9269_v15 = vld [vmem:[%s12563_s8 + $0x4] ss:$8 sps:$4 sm:$0xff]  }
0x1390   :  { %v11745_v49 = vadd.f32 %v5289_v58, %v11535_v45  ;;  %v5292_v20 = vadd.f32 %v7734_v52, %v5291_v55  ;;  %5399 = vadd.xlane.f32.xlu0 %v11741_v16  ;;  %v9267_v55 = vld [vmem:[%s12563_s8] ss:$8 sps:$4 sm:$0xff]   ;;  %5823 = vmatprep.subr.bf16.mxu0 %v9269_v15 }
0x1391   :  { %v11757_v10 = vadd.f32 %v5300_v21, %v11539_v3  ;;  %5824 = vmatpush1.bf16.msra.mxu0 %v9267_v55  ;;  %v9272_v21 = vld [vmem:[%s12563_s8 + $0x14] ss:$8 sps:$4 sm:$0xff]  }
0x1392   :  { %v11749_v11 = vadd.f32 %v5292_v20, %v11531_v17  ;;  %5401 = vadd.xlane.f32.xlu1 %v11745_v49  ;;  %5825 = vmatprep.subr.bf16.mxu0 %v9272_v21 }
0x1394   :  { %5403 = vadd.xlane.f32.xlu0 %v11749_v11 }
0x1396   :  { %5405 = vadd.xlane.f32.xlu1 %v11753_v61 }
0x1398   :  { %5407 = vadd.xlane.f32.xlu0 %v11757_v10 }
0x1408   :  { %v8724_v45 = vpop.f32.mrb[124].mxu0 }
0x1409   :  { %v5304_v53 = vpop.f32.mrb[125].mxu0  ;;  %v5313_v3 = vadd.f32 %v8724_v45, %v7734_v52  ;;  %v9273_v45 = vld [vmem:[%s12563_s8 + $0x20] ss:$8 sps:$4 sm:$0xff]  }
0x140a   :  { %v5305_v14 = vadd.f32 %v7734_v52, %v5304_v53  ;;  %v8725_v13 = vpop.f32.mrb[126].mxu0  ;;  %v9278_v53 = vld [vmem:[%s12563_s8 + $0x34] ss:$8 sps:$4 sm:$0xff]  }
0x140b   :  { %v5307_v17 = vpop.f32.mrb[127].mxu0  ;;  %v5316_v25 = vadd.f32 %v8725_v13, %v7734_v52  ;;  %v11771_v39 = vadd.f32 %v5313_v3, %v11555_v12  ;;  %v9281_v13 = vld [vmem:[%s12563_s8 + $0x44] ss:$8 sps:$4 sm:$0xff]   ;;  %v9282_v3 = vld [vmem:[%s12563_s8 + $0x50] ss:$8 sps:$4 sm:$0xff]  }
0x140c   :  { %v11762_v24 = vadd.f32 %v5305_v14, %v11548_v37  ;;  %v5308_v41 = vadd.f32 %v7734_v52, %v5307_v17  ;;  %v9276_v14 = vld [vmem:[%s12563_s8 + $0x30] ss:$8 sps:$4 sm:$0xff]   ;;  %v9279_v17 = vld [vmem:[%s12563_s8 + $0x40] ss:$8 sps:$4 sm:$0xff]  }
0x140e   :  { %v11765_v34 = vadd.f32 %v5308_v41, %v11551_v57  ;;  %5409 = vadd.xlane.f32.xlu1 %v11762_v24  ;;  %v11775_v57 = vadd.f32 %v5316_v25, %v11559_v1  ;;  %v9284_v41 = vld [vmem:[%s12563_s8 + $0x54] ss:$8 sps:$4 sm:$0xff]   ;;  %v9288_v25 = vld [vmem:[%s12563_s8 + $0x70] ss:$8 sps:$4 sm:$0xff]  }
0x1410   :  { %5411 = vadd.xlane.f32.xlu0 %v11765_v34  ;;  %v8728_v36 = vpop.f32.mrb[128].mxu0 }
0x1411   :  { %v5320_v31 = vpop.f32.mrb[129].mxu0  ;;  %v5329_v56 = vadd.f32 %v8728_v36, %v7734_v52  ;;  %v9287_v36 = vld [vmem:[%s12563_s8 + $0x64] ss:$8 sps:$4 sm:$0xff]  }
0x1412   :  { %5353 = vadd.xlane.f32.xlu1 %v12561_v63  ;;  %v8729_v27 = vpop.f32.mrb[130].mxu0  ;;  %v5321_v37 = vadd.f32 %v7734_v52, %v5320_v31  ;;  %v9285_v31 = vld [vmem:[%s12563_s8 + $0x60] ss:$8 sps:$4 sm:$0xff]  }
0x1413   :  { %v5323_v18 = vpop.f32.mrb[131].mxu0  ;;  %v5332_v12 = vadd.f32 %v8729_v27, %v7734_v52  ;;  %v11787_v50 = vadd.f32 %v5329_v56, %v11574_v29  ;;  %v9290_v27 = vld [vmem:[%s12563_s8 + $0x74] ss:$8 sps:$4 sm:$0xff]  }
0x1414   :  { %5355 = vadd.xlane.f32.xlu0 %v12562_v33  ;;  %v5324_v48 = vadd.f32 %v7734_v52, %v5323_v18  ;;  %v11779_v22 = vadd.f32 %v5321_v37, %v11563_v38  ;;  %v9291_v18 = vld [vmem:[%s12564_s14] sm:$0xff]   ;;  %v9810_v37 = vmov 0.0  }
0x1415   :  { %v11793_v47 = vadd.f32 %v5332_v12, %v11581_v51  ;;  %8730 = vmatprep.subr.bf16.mxu1 %v9810_v37  ;;  %8746 = vmatprep.mubr.msk.bf16.mxu1 %vm9811_vm8, %v9810_v37 }
0x1416   :  { %5413 = vadd.xlane.f32.xlu1 %v11771_v39  ;;  %v11783_v2 = vadd.f32 %v5324_v48, %v11567_v26  ;;  %8731 = vmatpush3.bf16.msra.mxu1 %v9291_v18 }
0x1417   :  { %v5394_v35 = vpop.xlane.xlu1 %5393  ;;  %8732 = vmatprep.subr.bf16.mxu1 %v9810_v37 }
0x1418   :  { %v5425_v19 = vmul.f32 0.0078125, %v5394_v35  ;;  %5415 = vadd.xlane.f32.xlu0 %v11775_v57 }
0x1419   :  { %v5396_v54 = vpop.xlane.xlu0 %5395 }
0x141a   :  { %v5426_v46 = vmul.f32 0.0078125, %v5396_v54  ;;  %5417 = vadd.xlane.f32.xlu1 %v11779_v22  ;;  %v11789_v9 = vsub.f32 %v5335_v59, %v5425_v19 }
0x141b   :  { %v5398_v1 = vpop.xlane.xlu1 %5397 }
0x141c   :  { %v5427_v4 = vmul.f32 0.0078125, %v5398_v1  ;;  %5419 = vadd.xlane.f32.xlu0 %v11783_v2  ;;  %v11796_v44 = vsub.f32 %v11734_v7, %v5426_v46  ;;  %v5457_v5 = vmul.f32 %v11789_v9, %v11789_v9 }
0x141d   :  { %v5400_v38 = vpop.xlane.xlu0 %5399 }
0x141e   :  { %v5428_v26 = vmul.f32 0.0078125, %v5400_v38  ;;  %5421 = vadd.xlane.f32.xlu1 %v11787_v50  ;;  %v11800_v43 = vsub.f32 %v11737_v30, %v5427_v4  ;;  %v5458_v0 = vmul.f32 %v11796_v44, %v11796_v44 }
0x141f   :  { %v5402_v52 = vpop.xlane.xlu1 %5401 }
0x1420   :  { %v5429_v29 = vmul.f32 0.0078125, %v5402_v52  ;;  %5423 = vadd.xlane.f32.xlu0 %v11793_v47  ;;  %v11806_v51 = vsub.f32 %v11741_v16, %v5428_v26  ;;  %v5459_v60 = vmul.f32 %v11800_v43, %v11800_v43 }
0x1421   :  { %v5404_v42 = vpop.xlane.xlu0 %5403 }
0x1422   :  { %v5430_v32 = vmul.f32 0.0078125, %v5404_v42  ;;  %5473 = vadd.xlane.f32.xlu1 %v5457_v5  ;;  %v11811_v59 = vsub.f32 %v11745_v49, %v5429_v29  ;;  %v5460_v23 = vmul.f32 %v11806_v51, %v11806_v51 }
0x1423   :  { %v5406_v40 = vpop.xlane.xlu1 %5405 }
0x1424   :  { %v5431_v6 = vmul.f32 0.0078125, %v5406_v40  ;;  %5475 = vadd.xlane.f32.xlu0 %v5458_v0  ;;  %v11816_v30 = vsub.f32 %v11749_v11, %v5430_v32  ;;  %v5461_v58 = vmul.f32 %v11811_v59, %v11811_v59  ;;  %v9270_v11 = vld [vmem:[%s12563_s8 + $0x10] ss:$8 sps:$4 sm:$0xff]  }
0x1425   :  { %v5408_v7 = vpop.xlane.xlu0 %5407  ;;  %5826 = vmatpush1.bf16.msra.mxu0 %v9270_v11 }
0x1426   :  { %v5432_v62 = vmul.f32 0.0078125, %v5408_v7  ;;  %5477 = vadd.xlane.f32.xlu1 %v5459_v60  ;;  %v11821_v16 = vsub.f32 %v11753_v61, %v5431_v6  ;;  %v5462_v49 = vmul.f32 %v11816_v30, %v11816_v30 }
0x1428   :  { %5479 = vadd.xlane.f32.xlu0 %v5460_v23  ;;  %v11828_v28 = vsub.f32 %v11757_v10, %v5432_v62  ;;  %v5463_v20 = vmul.f32 %v11821_v16, %v11821_v16  ;;  %v9275_v10 = vld [vmem:[%s12563_s8 + $0x24] ss:$8 sps:$4 sm:$0xff]  }
0x1429   :  { %5827 = vmatprep.subr.bf16.mxu0 %v9275_v10 }
0x142a   :  { %5481 = vadd.xlane.f32.xlu1 %v5461_v58  ;;  %v5464_v61 = vmul.f32 %v11828_v28, %v11828_v28  ;;  %5828 = vmatpush1.bf16.msra.mxu0 %v9273_v45 }
0x142b   :  { %5829 = vmatprep.subr.bf16.mxu0 %v9278_v53 }
0x142c   :  { %5483 = vadd.xlane.f32.xlu0 %v5462_v49 }
0x142e   :  { %5485 = vadd.xlane.f32.xlu1 %v5463_v20  ;;  %5830 = vmatpush1.bf16.msra.mxu0 %v9276_v14 }
0x142f   :  { %5831 = vmatprep.subr.bf16.mxu0 %v9281_v13 }
0x1430   :  { %5487 = vadd.xlane.f32.xlu0 %v5464_v61 }
0x1432   :  { %5832 = vmatpush1.bf16.msra.mxu0 %v9279_v17  ;;  %v9292_v17 = vld [vmem:[%s12564_s14 + $0x8] sm:$0xff]  }
0x1433   :  { %5833 = vmatprep.subr.bf16.mxu0 %v9284_v41  ;;  %8733 = vmatpush3.bf16.msra.mxu1 %v9292_v17 }
0x1434   :  { %8734 = vmatprep.subr.bf16.mxu1 %v9810_v37 }
0x1436   :  { %5834 = vmatpush1.bf16.msra.mxu0 %v9282_v3 }
0x1437   :  { %5835 = vmatprep.subr.bf16.mxu0 %v9287_v36 }
0x143a   :  { %5836 = vmatpush1.bf16.msra.mxu0 %v9285_v31 }
0x143b   :  { %5837 = vmatprep.subr.bf16.mxu0 %v9290_v27  ;;  %v9293_v27 = vld [vmem:[%s12564_s14 + $0x10] sm:$0xff]  }
0x143c   :  { %8735 = vmatpush3.bf16.msra.mxu1 %v9293_v27 }
0x143d   :  { %8736 = vmatprep.subr.bf16.mxu1 %v9810_v37 }
0x143e   :  { %5838 = vmatpush1.bf16.msra.mxu0 %v9288_v25 }
0x143f   :  { %8786 = vmatprep.subr.bf16.mxu0 %v9810_v37 }
0x149b   :  { %v5410_v48 = vpop.xlane.xlu1 %5409 }
0x149c   :  { %v5433_v35 = vmul.f32 0.0078125, %v5410_v48 }
0x149d   :  { %v5412_v56 = vpop.xlane.xlu0 %5411 }
0x149e   :  { %v11855_v19 = vsub.f32 %v11762_v24, %v5433_v35  ;;  %v5434_v54 = vmul.f32 0.0078125, %v5412_v56 }
0x149f   :  { %v5354_v12 = vpop.xlane.xlu1 %5353 }
0x14a0   :  { %v11858_v46 = vsub.f32 %v11765_v34, %v5434_v54  ;;  %v5357_v1 = vmul.f32 0.0078125, %v5354_v12  ;;  %v5465_v4 = vmul.f32 %v11855_v19, %v11855_v19 }
0x14a1   :  { %v5356_v38 = vpop.xlane.xlu0 %5355 }
0x14a2   :  { %v11863_v26 = vsub.f32 %v12561_v63, %v5357_v1  ;;  %v5358_v52 = vmul.f32 0.0078125, %v5356_v38  ;;  %5489 = vadd.xlane.f32.xlu1 %v5465_v4  ;;  %v5466_v29 = vmul.f32 %v11858_v46, %v11858_v46  ;;  %v9294_v1 = vld [vmem:[%s12564_s14 + $0x18] sm:$0xff]  }
0x14a3   :  { %v5414_v24 = vpop.xlane.xlu1 %5413  ;;  %8737 = vmatpush3.bf16.msra.mxu1 %v9294_v1 }
0x14a4   :  { %v11868_v5 = vsub.f32 %v12562_v33, %v5358_v52  ;;  %v5435_v42 = vmul.f32 0.0078125, %v5414_v24  ;;  %5491 = vadd.xlane.f32.xlu0 %v5466_v29  ;;  %v5361_v34 = vmul.f32 %v11863_v26, %v11863_v26  ;;  %8738 = vmatprep.subr.bf16.mxu1 %v9810_v37 }
0x14a5   :  { %v5416_v32 = vpop.xlane.xlu0 %5415 }
0x14a6   :  { %v11873_v0 = vsub.f32 %v11771_v39, %v5435_v42  ;;  %v5436_v40 = vmul.f32 0.0078125, %v5416_v32  ;;  %5363 = vadd.xlane.f32.xlu1 %v5361_v34  ;;  %v5362_v6 = vmul.f32 %v11868_v5, %v11868_v5  ;;  %v9295_v42 = vld [vmem:[%s12564_s14 + $0x20] sm:$0xff]  }
0x14a7   :  { %v5418_v60 = vpop.xlane.xlu1 %5417  ;;  %v11912_v32 = vld [vmem:[%s12565_s19] ss:$0 sm:$0xff]  ;;  %8739 = vmatpush3.bf16.msra.mxu1 %v9295_v42 }
0x14a8   :  { %v11878_v7 = vsub.f32 %v11775_v57, %v5436_v40  ;;  %v5437_v62 = vmul.f32 0.0078125, %v5418_v60  ;;  %5365 = vadd.xlane.f32.xlu0 %v5362_v6  ;;  %v5467_v23 = vmul.f32 %v11873_v0, %v11873_v0  ;;  %8740 = vmatprep.subr.bf16.mxu1 %v9810_v37 }
0x14a9   :  { %v5420_v58 = vpop.xlane.xlu0 %5419 }
0x14aa   :  { %v11883_v15 = vsub.f32 %v11779_v22, %v5437_v62  ;;  %v5438_v39 = vmul.f32 0.0078125, %v5420_v58  ;;  %5493 = vadd.xlane.f32.xlu1 %v5467_v23  ;;  %v5468_v55 = vmul.f32 %v11878_v7, %v11878_v7 }
0x14ab   :  { %v5422_v49 = vpop.xlane.xlu1 %5421 }
0x14ac   :  { %v11888_v20 = vsub.f32 %v11783_v2, %v5438_v39  ;;  %v5439_v57 = vmul.f32 0.0078125, %v5422_v49  ;;  %5495 = vadd.xlane.f32.xlu0 %v5468_v55  ;;  %v5469_v21 = vmul.f32 %v11883_v15, %v11883_v15  ;;  %v9296_v39 = vld [vmem:[%s12564_s14 + $0x28] sm:$0xff]  }
0x14ad   :  { %v5424_v11 = vpop.xlane.xlu0 %5423  ;;  %8741 = vmatpush3.bf16.msra.mxu1 %v9296_v39 }
0x14ae   :  { %v11893_v61 = vsub.f32 %v11787_v50, %v5439_v57  ;;  %v5440_v22 = vmul.f32 0.0078125, %v5424_v11  ;;  %5497 = vadd.xlane.f32.xlu1 %v5469_v21  ;;  %v5470_v10 = vmul.f32 %v11888_v20, %v11888_v20  ;;  %v11920_v57 = vld [vmem:[%s12566_s24] ss:$0 sm:$0xff]  ;;  %8742 = vmatprep.subr.bf16.mxu1 %v9810_v37 }
0x14af   :  { %v5474_v45 = vpop.xlane.xlu1 %5473 }
0x14b0   :  { %v11898_v53 = vsub.f32 %v11793_v47, %v5440_v22  ;;  %v5505_v2 = vmul.f32 0.0078125, %v5474_v45  ;;  %5499 = vadd.xlane.f32.xlu0 %v5470_v10  ;;  %v5471_v14 = vmul.f32 %v11893_v61, %v11893_v61 }
0x14b1   :  { %v5476_v13 = vpop.xlane.xlu0 %5475 }
0x14b2   :  { %v5521_v41 = vadd.f32 1e-05, %v5505_v2  ;;  %v5506_v50 = vmul.f32 0.0078125, %v5476_v13  ;;  %5501 = vadd.xlane.f32.xlu1 %v5471_v14  ;;  %v5472_v3 = vmul.f32 %v11898_v53, %v11898_v53  ;;  %v9297_v2 = vld [vmem:[%s12564_s14 + $0x30] sm:$0xff]  }
0x14b3   :  { %v5478_v36 = vpop.xlane.xlu1 %5477  ;;  %8743 = vmatpush3.bf16.msra.mxu1 %v9297_v2 }
0x14b4   :  { %9675 = vrsqrt.f32 %v5521_v41  ;;  %v5522_v31 = vadd.f32 1e-05, %v5506_v50  ;;  %v5507_v47 = vmul.f32 0.0078125, %v5478_v36  ;;  %5503 = vadd.xlane.f32.xlu0 %v5472_v3  ;;  %8744 = vmatprep.subr.bf16.mxu1 %v9810_v37  ;;  %v9298_v50 = vld [vmem:[%s12564_s14 + $0x38] sm:$0xff]  }
0x14b5   :  { %v5480_v25 = vpop.xlane.xlu0 %5479 }
0x14b6   :  { %9677 = vrsqrt.f32 %v5522_v31  ;;  %v5523_v18 = vadd.f32 1e-05, %v5507_v47  ;;  %v5508_v48 = vmul.f32 0.0078125, %v5480_v25 }
0x14b7   :  { %v5482_v35 = vpop.xlane.xlu1 %5481  ;;  %8745 = vmatpush3.bf16.msra.mxu1 %v9298_v50 }
0x14b8   :  { %9679 = vrsqrt.f32 %v5523_v18  ;;  %v5524_v56 = vadd.f32 1e-05, %v5508_v48  ;;  %v5509_v54 = vmul.f32 0.0078125, %v5482_v35  ;;  %8750 = vmatprep.subr.bf16.mxu1 %v9810_v37 }
0x14b9   :  { %v5484_v12 = vpop.xlane.xlu0 %5483 }
0x14ba   :  { %9681 = vrsqrt.f32 %v5524_v56  ;;  %v5510_v4 = vmul.f32 0.0078125, %v5484_v12  ;;  %v5525_v38 = vadd.f32 1e-05, %v5509_v54 }
0x14bb   :  { %v5486_v29 = vpop.xlane.xlu1 %5485 }
0x14bc   :  { %v5526_v52 = vadd.f32 1e-05, %v5510_v4  ;;  %v5511_v62 = vmul.f32 0.0078125, %v5486_v29 }
0x14bd   :  { %v5488_v24 = vpop.xlane.xlu0 %5487 }
0x14be   :  { %v9676_v34 = vpop.eup %9675  ;;  %9683 = vrsqrt.f32 %v5526_v52  ;;  %v5512_v40 = vmul.f32 0.0078125, %v5488_v24  ;;  %v5527_v11 = vadd.f32 1e-05, %v5511_v62 }
0x14bf   :  { %v5553_v6 = vmul.f32 %v9676_v34, %v11789_v9  ;;  %9685 = vrsqrt.f32 %v5525_v38 }
0x14c0   :  { %v9678_v60 = vpop.eup %9677  ;;  %v5528_v49 = vadd.f32 1e-05, %v5512_v40 }
0x14c1   :  { %v5575_v23 = vmul.f32 %v11912_v32, %v5553_v6  ;;  %v5554_v58 = vmul.f32 %v9678_v60, %v11796_v44 }
0x14c2   :  { %v9680_v55 = vpop.eup %9679  ;;  %9687 = vrsqrt.f32 %v5528_v49 }
0x14c3   :  { %v5576_v21 = vmul.f32 %v11912_v32, %v5554_v58  ;;  %v5597_v22 = vadd.f32 %v11920_v57, %v5575_v23  ;;  %v5555_v45 = vmul.f32 %v9680_v55, %v11800_v43  ;;  %9689 = vrsqrt.f32 %v5527_v11 }
0x14c4   :  { %v9682_v9 = vpop.eup %9681 }
0x14c5   :  { %v5598_v10 = vadd.f32 %v11920_v57, %v5576_v21  ;;  %v5556_v44 = vmul.f32 %v9682_v9, %v11806_v51  ;;  %v5577_v41 = vmul.f32 %v11912_v32, %v5555_v45 }
0x14c7   :  { %v5719_v14 = vpack.c.bf16 %v5598_v10, %v5597_v22  ;;  %v5578_v13 = vmul.f32 %v11912_v32, %v5556_v44  ;;  %v5599_v36 = vadd.f32 %v11920_v57, %v5577_v41 }
0x14c8   :  { %v9684_v17 = vpop.eup %9683 }
0x14c9   :  { %5856 = vmatmul.mubr.bf16.vlgmr.msra.gmra.mrb[132].mxu0 %v5719_v14  ;;  %v9686_v3 = vpop.eup %9685  ;;  %v5600_v43 = vadd.f32 %v11920_v57, %v5578_v13  ;;  %v5558_v51 = vmul.f32 %v9684_v17, %v11816_v30 }
0x14ca   :  { %5865 = vmatprep.mubr.bf16.mxu0 %v12560_v8  ;;  %v5557_v31 = vmul.f32 %v9686_v3, %v11811_v59 }
0x14cb   :  { %v5720_v47 = vpack.c.bf16 %v5600_v43, %v5599_v36  ;;  %v5580_v25 = vmul.f32 %v11912_v32, %v5558_v51 }
0x14cc   :  { %v9688_v27 = vpop.eup %9687  ;;  %v5579_v18 = vmul.f32 %v11912_v32, %v5557_v31 }
0x14cd   :  { %v9690_v48 = vpop.eup %9689  ;;  %v5602_v35 = vadd.f32 %v11920_v57, %v5580_v25  ;;  %v5560_v30 = vmul.f32 %v9688_v27, %v11828_v28 }
0x14ce   :  { %v5601_v56 = vadd.f32 %v11920_v57, %v5579_v18  ;;  %v5559_v54 = vmul.f32 %v9690_v48, %v11821_v16 }
0x14cf   :  { %v5582_v59 = vmul.f32 %v11912_v32, %v5560_v30 }
0x14d0   :  { %v5721_v12 = vpack.c.bf16 %v5602_v35, %v5601_v56  ;;  %v5581_v1 = vmul.f32 %v11912_v32, %v5559_v54 }
0x14d1   :  { %5866 = vmatmul.mubr.bf16.gmra.mrb[136].mxu0 %v5720_v47  ;;  %v5604_v4 = vadd.f32 %v11920_v57, %v5582_v59  ;;  %v7743_v47 = vld [vmem:[%s12567_s30] ss:$0 sm:$0xff] }
0x14d2   :  { %5875 = vmatprep.mubr.bf16.mxu0 %v12560_v8  ;;  %v5603_v38 = vadd.f32 %v11920_v57, %v5581_v1  ;;  %v7744_v59 = vld [vmem:[%s12568_s6] ss:$0 sm:$0xff] }
0x14d4   :  { %v5722_v52 = vpack.c.bf16 %v5604_v4, %v5603_v38 }
0x14d9   :  { %5876 = vmatmul.mubr.bf16.gmra.mrb[140].mxu0 %v5721_v12 }
0x14da   :  { %5885 = vmatprep.mubr.bf16.mxu0 %v12560_v8 }
0x14e1   :  { %5886 = vmatmul.mubr.bf16.gmra.mrb[144].mxu0 %v5722_v52 }
0x14e2   :  { %5895 = vmatprep.mubr.bf16.mxu0 %v12560_v8 }
0x152f   :  { %v5490_v28 = vpop.xlane.xlu1 %5489 }
0x1530   :  { %v5513_v29 = vmul.f32 0.0078125, %v5490_v28 }
0x1531   :  { %v5492_v24 = vpop.xlane.xlu0 %5491 }
0x1532   :  { %v5529_v16 = vadd.f32 1e-05, %v5513_v29  ;;  %v5514_v42 = vmul.f32 0.0078125, %v5492_v24 }
0x1533   :  { %v5364_v34 = vpop.xlane.xlu1 %5363 }
0x1534   :  { %9691 = vrsqrt.f32 %v5529_v16  ;;  %v5530_v40 = vadd.f32 1e-05, %v5514_v42  ;;  %v5367_v6 = vmul.f32 0.0078125, %v5364_v34 }
0x1535   :  { %v5366_v60 = vpop.xlane.xlu0 %5365 }
0x1536   :  { %9693 = vrsqrt.f32 %v5530_v40  ;;  %v5369_v62 = vadd.f32 1e-05, %v5367_v6  ;;  %v5368_v23 = vmul.f32 0.0078125, %v5366_v60 }
0x1537   :  { %v5494_v58 = vpop.xlane.xlu1 %5493 }
0x1538   :  { %9695 = vrsqrt.f32 %v5369_v62  ;;  %v5370_v39 = vadd.f32 1e-05, %v5368_v23  ;;  %v5515_v55 = vmul.f32 0.0078125, %v5494_v58 }
0x1539   :  { %v5496_v49 = vpop.xlane.xlu0 %5495 }
0x153a   :  { %9697 = vrsqrt.f32 %v5370_v39  ;;  %v5531_v21 = vadd.f32 1e-05, %v5515_v55  ;;  %v5516_v9 = vmul.f32 0.0078125, %v5496_v49 }
0x153b   :  { %v5498_v11 = vpop.xlane.xlu1 %5497 }
0x153c   :  { %9699 = vrsqrt.f32 %v5531_v21  ;;  %v5532_v22 = vadd.f32 1e-05, %v5516_v9  ;;  %v5517_v10 = vmul.f32 0.0078125, %v5498_v11 }
0x153d   :  { %v5500_v45 = vpop.xlane.xlu0 %5499 }
0x153e   :  { %v9692_v44 = vpop.eup %9691  ;;  %9701 = vrsqrt.f32 %v5532_v22  ;;  %v5533_v2 = vadd.f32 1e-05, %v5517_v10  ;;  %v5518_v14 = vmul.f32 0.0078125, %v5500_v45 }
0x153f   :  { %v5502_v13 = vpop.xlane.xlu1 %5501  ;;  %v5561_v17 = vmul.f32 %v9692_v44, %v11855_v19 }
0x1540   :  { %v9694_v41 = vpop.eup %9693  ;;  %9703 = vrsqrt.f32 %v5533_v2  ;;  %v5534_v50 = vadd.f32 1e-05, %v5518_v14  ;;  %v5519_v3 = vmul.f32 0.0078125, %v5502_v13 }
0x1541   :  { %v5504_v43 = vpop.xlane.xlu0 %5503  ;;  %v5562_v51 = vmul.f32 %v9694_v41, %v11858_v46  ;;  %v5583_v36 = vmul.f32 %v11912_v32, %v5561_v17 }
0x1542   :  { %v9696_v31 = vpop.eup %9695  ;;  %9705 = vrsqrt.f32 %v5534_v50  ;;  %v5520_v25 = vmul.f32 0.0078125, %v5504_v43  ;;  %v5535_v19 = vadd.f32 1e-05, %v5519_v3 }
0x1543   :  { %v5373_v27 = vmul.f32 %v9696_v31, %v11863_v26  ;;  %v5584_v18 = vmul.f32 %v11912_v32, %v5562_v51  ;;  %v5605_v54 = vadd.f32 %v11920_v57, %v5583_v36 }
0x1544   :  { %v9698_v48 = vpop.eup %9697  ;;  %v5536_v35 = vadd.f32 1e-05, %v5520_v25 }
0x1545   :  { %v5381_v30 = vmul.f32 %v7743_v47, %v5373_v27  ;;  %v5374_v56 = vmul.f32 %v9698_v48, %v11868_v5  ;;  %v5606_v46 = vadd.f32 %v11920_v57, %v5584_v18 }
0x1546   :  { %v9700_v12 = vpop.eup %9699  ;;  %9707 = vrsqrt.f32 %v5536_v35 }
0x1547   :  { %v5382_v1 = vmul.f32 %v7743_v47, %v5374_v56  ;;  %v5723_v4 = vpack.c.bf16 %v5606_v46, %v5605_v54  ;;  %v5563_v38 = vmul.f32 %v9700_v12, %v11873_v0  ;;  %9709 = vrsqrt.f32 %v5535_v19 }
0x1548   :  { %v9702_v26 = vpop.eup %9701  ;;  %v5389_v52 = vadd.f32 %v7744_v59, %v5381_v30 }
0x1549   :  { %5896 = vmatmul.mubr.bf16.gmra.mrb[148].mxu0 %v5723_v4  ;;  %v5390_v28 = vadd.f32 %v7744_v59, %v5382_v1  ;;  %v5564_v29 = vmul.f32 %v9702_v26, %v11878_v7  ;;  %v5585_v5 = vmul.f32 %v11912_v32, %v5563_v38 }
0x154a   :  { %v9704_v24 = vpop.eup %9703  ;;  %5905 = vmatprep.mubr.bf16.mxu0 %v12560_v8 }
0x154b   :  { %v5613_v16 = vpack.c.bf16 %v5390_v28, %v5389_v52  ;;  %v5586_v42 = vmul.f32 %v11912_v32, %v5564_v29  ;;  %v5607_v40 = vadd.f32 %v11920_v57, %v5585_v5  ;;  %v5565_v6 = vmul.f32 %v9704_v24, %v11883_v15 }
0x154c   :  { %v9706_v34 = vpop.eup %9705 }
0x154d   :  { %8747 = vmatmul.mubr.bf16.vlgmr.msra.gmra.mrb[132].mxu1 %v5613_v16  ;;  %v5608_v0 = vadd.f32 %v11920_v57, %v5586_v42  ;;  %v5566_v60 = vmul.f32 %v9706_v34, %v11888_v20  ;;  %v5587_v58 = vmul.f32 %v11912_v32, %v5565_v6 }
0x154e   :  { %8758 = vmatprep.mubr.msk.bf16.mxu1 %vm9811_vm8, %v9810_v37 }
0x154f   :  { %v5724_v7 = vpack.c.bf16 %v5608_v0, %v5607_v40  ;;  %v5588_v62 = vmul.f32 %v11912_v32, %v5566_v60  ;;  %v5609_v15 = vadd.f32 %v11920_v57, %v5587_v58 }
0x1550   :  { %v9708_v23 = vpop.eup %9707 }
0x1551   :  { %5906 = vmatmul.mubr.bf16.gmra.mrb[152].mxu0 %v5724_v7  ;;  %v9710_v39 = vpop.eup %9709  ;;  %v5610_v55 = vadd.f32 %v11920_v57, %v5588_v62  ;;  %v5568_v49 = vmul.f32 %v9708_v23, %v11898_v53 }
0x1552   :  { %5915 = vmatprep.mubr.bf16.mxu0 %v12560_v8  ;;  %v5567_v20 = vmul.f32 %v9710_v39, %v11893_v61 }
0x1553   :  { %v5725_v21 = vpack.c.bf16 %v5610_v55, %v5609_v15  ;;  %v5590_v9 = vmul.f32 %v11912_v32, %v5568_v49 }
0x1554   :  { %v5589_v11 = vmul.f32 %v11912_v32, %v5567_v20 }
0x1555   :  { %v5612_v22 = vadd.f32 %v11920_v57, %v5590_v9 }
0x1556   :  { %v5611_v10 = vadd.f32 %v11920_v57, %v5589_v11 }
0x1558   :  { %v5726_v45 = vpack.c.bf16 %v5612_v22, %v5611_v10 }
0x1559   :  { %5916 = vmatmul.mubr.bf16.gmra.mrb[156].mxu0 %v5725_v21 }
0x155a   :  { %5925 = vmatprep.mubr.bf16.mxu0 %v12560_v8 }
0x1561   :  { %5926 = vmatmul.mubr.bf16.gmra.mrb[160].mxu0 %v5726_v45 }
0x1562   :  { %8794 = vmatprep.mubr.msk.bf16.mxu0 %vm9811_vm8, %v9810_v37 }
0x159c   :  { %v5857_v53 = vpop.f32.mrb[132].mxu0 }
0x159d   :  { %v5859_v44 = vpop.f32.mrb[133].mxu0 }
0x159e   :  { %v5861_v61 = vpop.f32.mrb[134].mxu0 }
0x159f   :  { %v11989_v2 = vpack.c.bf16 %v5861_v61, %v5857_v53  ;;  %v5863_v14 = vpop.f32.mrb[135].mxu0 }
0x15a0   :  { %v11991_v13 = vpack.c.bf16 %v5863_v14, %v5859_v44 }
0x15a1   :  { %v5958_v8 = vsel %vm1859_vm6, %v11989_v2, 0 }
0x15a2   :  { %8751 = vmatpush3.bf16.xpose.msra.mxu1 %v5958_v8 }
0x15a3   :  { %8752 = vmatprep.subr.bf16.mxu1 %v9810_v37 }
0x15a4   :  { %v5867_v32 = vpop.f32.mrb[136].mxu0 }
0x15a5   :  { %v5869_v57 = vpop.f32.mrb[137].mxu0 }
0x15a6   :  { %v5871_v17 = vpop.f32.mrb[138].mxu0 }
0x15a7   :  { %v11996_v41 = vpack.c.bf16 %v5871_v17, %v5867_v32  ;;  %v5873_v50 = vpop.f32.mrb[139].mxu0 }
0x15a8   :  { %v11998_v3 = vpack.c.bf16 %v5873_v50, %v5869_v57 }
0x15a9   :  { %v5961_v43 = vsel %vm1859_vm6, %v11996_v41, 0 }
0x15aa   :  { %8753 = vmatpush3.bf16.xpose.msra.mxu1 %v5961_v43 }
0x15ab   :  { %8754 = vmatprep.subr.bf16.mxu1 %v9810_v37 }
0x15ac   :  { %v5877_v51 = vpop.f32.mrb[140].mxu0 }
0x15ad   :  { %v5879_v36 = vpop.f32.mrb[141].mxu0 }
0x15ae   :  { %v5881_v31 = vpop.f32.mrb[142].mxu0 }
0x15af   :  { %v12003_v47 = vpack.c.bf16 %v5881_v31, %v5877_v51  ;;  %v5883_v25 = vpop.f32.mrb[143].mxu0 }
0x15b0   :  { %v12005_v27 = vpack.c.bf16 %v5883_v25, %v5879_v36 }
0x15b1   :  { %v5964_v18 = vsel %vm1859_vm6, %v12003_v47, 0 }
0x15b2   :  { %8755 = vmatpush3.bf16.xpose.msra.mxu1 %v5964_v18 }
0x15b3   :  { %8756 = vmatprep.subr.bf16.mxu1 %v9810_v37 }
0x15b4   :  { %v5887_v48 = vpop.f32.mrb[144].mxu0 }
0x15b5   :  { %v5889_v19 = vpop.f32.mrb[145].mxu0 }
0x15b6   :  { %v5891_v35 = vpop.f32.mrb[146].mxu0 }
0x15b7   :  { %v12010_v30 = vpack.c.bf16 %v5891_v35, %v5887_v48  ;;  %v5893_v56 = vpop.f32.mrb[147].mxu0 }
0x15b8   :  { %v12012_v54 = vpack.c.bf16 %v5893_v56, %v5889_v19 }
0x15b9   :  { %v5967_v46 = vsel %vm1859_vm6, %v12010_v30, 0 }
0x15ba   :  { %8757 = vmatpush3.bf16.xpose.msra.mxu1 %v5967_v46 }
0x15bb   :  { %8762 = vmatprep.subr.bf16.mxu1 %v9810_v37 }
0x161c   :  { %v5897_v12 = vpop.f32.mrb[148].mxu0 }
0x161d   :  { %v5899_v59 = vpop.f32.mrb[149].mxu0 }
0x161e   :  { %v5901_v1 = vpop.f32.mrb[150].mxu0 }
0x161f   :  { %v12017_v4 = vpack.c.bf16 %v5901_v1, %v5897_v12  ;;  %v5903_v38 = vpop.f32.mrb[151].mxu0 }
0x1620   :  { %v12019_v26 = vpack.c.bf16 %v5903_v38, %v5899_v59  ;;  %v5712_v52 = vpop.f32.mrb[132].mxu1 }
0x1621   :  { %v12021_v28 = vpack.c.bf16 %v5712_v52, %v5712_v52  ;;  %v8748_v29 = vpop.f32.mrb[133].mxu1  ;;  %v6013_v5 = vsel %vm1859_vm6, %v12017_v4, 0 }
0x1622   :  { %v5715_v24 = vpop.f32.mrb[134].mxu1  ;;  %8787 = vmatpush3.bf16.msra.mxu0 %v12019_v26 }
0x1623   :  { %v8749_v16 = vpop.f32.mrb[135].mxu1  ;;  %8759 = vmatmul.mubr.msk.bf16.vlgmr.msra.gmra.mrb[136].mxu1 %vm1859_vm6, %v12021_v28  ;;  %8788 = vmatprep.subr.bf16.mxu0 %v9810_v37  ;;  %v12059_v53 = vpack.c.bf16 %v5715_v24, %v5715_v24 }
0x1624   :  { %8763 = vmatpush3.bf16.xpose.msra.mxu1 %v6013_v5  ;;  %v5907_v42 = vpop.f32.mrb[152].mxu0  ;;  %8770 = vmatprep.mubr.msk.bf16.mxu1 %vm9811_vm8, %v9810_v37 }
0x1625   :  { %v5909_v34 = vpop.f32.mrb[153].mxu0  ;;  %8764 = vmatprep.subr.bf16.mxu1 %v9810_v37 }
0x1626   :  { %v5911_v40 = vpop.f32.mrb[154].mxu0 }
0x1627   :  { %v12032_v0 = vpack.c.bf16 %v5911_v40, %v5907_v42  ;;  %v5913_v6 = vpop.f32.mrb[155].mxu0 }
0x1628   :  { %v12034_v60 = vpack.c.bf16 %v5913_v6, %v5909_v34 }
0x1629   :  { %v6016_v7 = vsel %vm1859_vm6, %v12032_v0, 0 }
0x162a   :  { %8789 = vmatpush3.bf16.msra.mxu0 %v12034_v60 }
0x162b   :  { %8790 = vmatprep.subr.bf16.mxu0 %v9810_v37 }
0x162c   :  { %8765 = vmatpush3.bf16.xpose.msra.mxu1 %v6016_v7  ;;  %v5917_v62 = vpop.f32.mrb[156].mxu0 }
0x162d   :  { %v5919_v23 = vpop.f32.mrb[157].mxu0  ;;  %8766 = vmatprep.subr.bf16.mxu1 %v9810_v37 }
0x162e   :  { %v5921_v58 = vpop.f32.mrb[158].mxu0 }
0x162f   :  { %v12041_v39 = vpack.c.bf16 %v5921_v58, %v5917_v62  ;;  %v5923_v55 = vpop.f32.mrb[159].mxu0 }
0x1630   :  { %v12043_v49 = vpack.c.bf16 %v5923_v55, %v5919_v23 }
0x1631   :  { %v6019_v15 = vsel %vm1859_vm6, %v12041_v39, 0 }
0x1632   :  { %8791 = vmatpush3.bf16.msra.mxu0 %v12043_v49 }
0x1633   :  { %8792 = vmatprep.subr.bf16.mxu0 %v9810_v37 }
0x1634   :  { %8767 = vmatpush3.bf16.xpose.msra.mxu1 %v6019_v15  ;;  %v5927_v20 = vpop.f32.mrb[160].mxu0 }
0x1635   :  { %v5929_v21 = vpop.f32.mrb[161].mxu0  ;;  %8768 = vmatprep.subr.bf16.mxu1 %v9810_v37 }
0x1636   :  { %v5931_v9 = vpop.f32.mrb[162].mxu0 }
0x1637   :  { %v12050_v11 = vpack.c.bf16 %v5931_v9, %v5927_v20  ;;  %v5933_v22 = vpop.f32.mrb[163].mxu0 }
0x1638   :  { %v12052_v10 = vpack.c.bf16 %v5933_v22, %v5929_v21 }
0x1639   :  { %v6022_v45 = vsel %vm1859_vm6, %v12050_v11, 0 }
0x163a   :  { %8793 = vmatpush3.bf16.msra.mxu0 %v12052_v10 }
0x163b   :  { %8810 = vmatprep.subr.bf16.mxu0 %v9810_v37 }
0x163c   :  { %8769 = vmatpush3.bf16.xpose.msra.mxu1 %v6022_v45 }
0x163d   :  { %8774 = vmatprep.subr.bf16.mxu1 %v9810_v37 }
0x1643   :  { %8771 = vmatmul.mubr.msk.bf16.vlgmr.msra.gmra.mrb[140].mxu1 %vm1859_vm6, %v12059_v53 }
0x1644   :  { %8775 = vmatpush3.bf16.msra.mxu1 %v11991_v13  ;;  %8782 = vmatprep.mubr.msk.bf16.mxu1 %vm9811_vm8, %v9810_v37 }
0x1645   :  { %8776 = vmatprep.subr.bf16.mxu1 %v9810_v37 }
0x1648   :  { %8777 = vmatpush3.bf16.msra.mxu1 %v11998_v3 }
0x1649   :  { %8778 = vmatprep.subr.bf16.mxu1 %v9810_v37 }
0x164c   :  { %8779 = vmatpush3.bf16.msra.mxu1 %v12005_v27 }
0x164d   :  { %8780 = vmatprep.subr.bf16.mxu1 %v9810_v37 }
0x1650   :  { %8781 = vmatpush3.bf16.msra.mxu1 %v12012_v54 }
0x1651   :  { %8798 = vmatprep.subr.bf16.mxu1 %v9810_v37 }
0x16f6   :  { %v6003_v44 = vpop.f32.mrb[136].mxu1 }
0x16f7   :  { %v8760_v61 = vpop.f32.mrb[137].mxu1  ;;  %v6064_v14 = vsel %vm2038_vm7, %v6003_v44, -inf }
0x16f8   :  { %6065 = vmax.xlane.f32.xlu1 %v6064_v14  ;;  %v6006_v8 = vpop.f32.mrb[138].mxu1 }
0x16f9   :  { %v8761_v32 = vpop.f32.mrb[139].mxu1 }
0x1716   :  { %v6058_v57 = vpop.f32.mrb[140].mxu1 }
0x1717   :  { %v8772_v17 = vpop.f32.mrb[141].mxu1  ;;  %v6067_v50 = vsel %vm2038_vm7, %v6058_v57, -inf }
0x1718   :  { %6068 = vmax.xlane.f32.xlu0 %v6067_v50  ;;  %v6061_v43 = vpop.f32.mrb[142].mxu1 }
0x1719   :  { %v8773_v51 = vpop.f32.mrb[143].mxu1 }
0x1785   :  { %v6066_v36 = vpop.xlane.xlu1 %6065 }
0x1786   :  { %v6070_v31 = vsub.f32 %v6003_v44, %v6066_v36 }
0x1788   :  { %v6072_v25 = vmul.f32 1.442695, %v6070_v31 }
0x178a   :  { %9711 = vpow2.f32 %v6072_v25 }
0x1794   :  { %v9712_v18 = vpop.eup %9711 }
0x1795   :  { %v6076_v48 = vsel %vm2038_vm7, %v9712_v18, 0.0 }
0x1796   :  { %6077 = vadd.xlane.f32.xlu1 %v6076_v48 }
0x17a5   :  { %v6069_v19 = vpop.xlane.xlu0 %6068 }
0x17a6   :  { %v6071_v35 = vsub.f32 %v6058_v57, %v6069_v19 }
0x17a7   :  { %6186 = vrot.lane.b32.xlu1 %v11989_v2, %s9807_s0 }
0x17a8   :  { %v6074_v56 = vmul.f32 1.442695, %v6071_v35 }
0x17aa   :  { %9713 = vpow2.f32 %v6074_v56 }
0x17ab   :  { %6188 = vrot.lane.b32.xlu1 %v11996_v41, %s9807_s0 }
0x17af   :  { %6258 = vrot.lane.b32.xlu1 %v12032_v0, %s9807_s0 }
0x17b3   :  { %6260 = vrot.lane.b32.xlu1 %v12041_v39, %s9807_s0 }
0x17b4   :  { %v9714_v46 = vpop.eup %9713 }
0x17b5   :  { %v6079_v12 = vsel %vm2038_vm7, %v9714_v46, 0.0 }
0x17b6   :  { %6080 = vadd.xlane.f32.xlu0 %v6079_v12 }
0x17b7   :  { %6262 = vrot.lane.b32.xlu1 %v12050_v11, %s9807_s0 }
0x17bb   :  { %6250 = vrot.lane.b32.xlu1 %v12059_v53, %s9807_s0 }
0x17cc   :  { %6256 = vrot.lane.b32.xlu0 %v12017_v4, %s9807_s0 }
0x17d0   :  { %6190 = vrot.lane.b32.xlu0 %v12003_v47, %s9807_s0 }
0x17d4   :  { %6192 = vrot.lane.b32.xlu0 %v12010_v30, %s9807_s0 }
0x17d8   :  { %6180 = vrot.lane.b32.xlu0 %v12021_v28, %s9807_s0 }
0x1823   :  { %v6078_v59 = vpop.xlane.xlu1 %6077 }
0x1824   :  { %9715 = vrcp.f32 %v6078_v59 }
0x1827   :  { %v6187_v52 = vpop.permute.xlu1 %6186 }
0x1828   :  { %v6198_v5 = vsel %vm1859_vm6, %v6187_v52, 0 }
0x182b   :  { %v6189_v24 = vpop.permute.xlu1 %6188 }
0x182c   :  { %v6201_v16 = vsel %vm1859_vm6, %v6189_v24, 0 }
0x182e   :  { %v9716_v1 = vpop.eup %9715 }
0x182f   :  { %v6084_v38 = vmul.f32 %v9716_v1, %v9712_v18  ;;  %v6259_v20 = vpop.permute.xlu1 %6258 }
0x1830   :  { %v6271_v21 = vsel %vm1859_vm6, %v6259_v20, 0 }
0x1831   :  { %v6086_v29 = vpack.c.bf16 %v6084_v38, %v6084_v38 }
0x1833   :  { %8783 = vmatmul.mubr.msk.bf16.vlgmr.msra.gmra.mrb[144].mxu1 %vm2038_vm7, %v6086_v29  ;;  %v6261_v22 = vpop.permute.xlu1 %6260 }
0x1834   :  { %8799 = vmatpush3.bf16.xpose.msra.mxu1 %v6198_v5  ;;  %8806 = vmatprep.mubr.msk.bf16.mxu1 %vm9811_vm8, %v9810_v37  ;;  %v6274_v45 = vsel %vm1859_vm6, %v6261_v22, 0 }
0x1835   :  { %8800 = vmatprep.subr.bf16.mxu1 %v9810_v37 }
0x1837   :  { %v6263_v44 = vpop.permute.xlu1 %6262 }
0x1838   :  { %v6277_v61 = vsel %vm1859_vm6, %v6263_v44, 0 }
0x183b   :  { %v6251_v14 = vpop.permute.xlu1 %6250 }
0x183c   :  { %8801 = vmatpush3.bf16.xpose.msra.mxu1 %v6201_v16 }
0x183d   :  { %8802 = vmatprep.subr.bf16.mxu1 %v9810_v37 }
0x1843   :  { %v6081_v42 = vpop.xlane.xlu0 %6080 }
0x1844   :  { %9717 = vrcp.f32 %v6081_v42 }
0x1847   :  { %v6257_v34 = vpop.permute.xlu0 %6256 }
0x1848   :  { %v6268_v55 = vsel %vm1859_vm6, %v6257_v34, 0 }
0x184b   :  { %v6191_v40 = vpop.permute.xlu0 %6190 }
0x184c   :  { %v6204_v6 = vsel %vm1859_vm6, %v6191_v40, 0 }
0x184d   :  { %8803 = vmatpush3.bf16.xpose.msra.mxu1 %v6204_v6 }
0x184e   :  { %v9718_v7 = vpop.eup %9717  ;;  %8804 = vmatprep.subr.bf16.mxu1 %v9810_v37 }
0x184f   :  { %v6085_v62 = vmul.f32 %v9718_v7, %v9714_v46  ;;  %v6193_v58 = vpop.permute.xlu0 %6192 }
0x1850   :  { %v6207_v15 = vsel %vm1859_vm6, %v6193_v58, 0 }
0x1851   :  { %v6087_v23 = vpack.c.bf16 %v6085_v62, %v6085_v62 }
0x1853   :  { %8795 = vmatmul.mubr.msk.bf16.vlgmr.msra.gmra.mrb[164].mxu0 %vm2038_vm7, %v6087_v23  ;;  %v6181_v9 = vpop.permute.xlu0 %6180 }
0x1854   :  { %8811 = vmatpush3.bf16.xpose.msra.mxu0 %v6268_v55  ;;  %8818 = vmatprep.mubr.msk.bf16.mxu0 %vm9811_vm8, %v9810_v37 }
0x1855   :  { %8805 = vmatpush3.bf16.xpose.msra.mxu1 %v6207_v15  ;;  %8812 = vmatprep.subr.bf16.mxu0 %v9810_v37 }
0x1856   :  { %8822 = vmatprep.subr.bf16.mxu1 %v9810_v37 }
0x185c   :  { %8813 = vmatpush3.bf16.xpose.msra.mxu0 %v6271_v21  ;;  %8807 = vmatmul.mubr.msk.bf16.vlgmr.msra.gmra.mrb[148].mxu1 %vm1859_vm6, %v6181_v9 }
0x185d   :  { %8814 = vmatprep.subr.bf16.mxu0 %v9810_v37  ;;  %8830 = vmatprep.mubr.msk.bf16.mxu1 %vm9811_vm8, %v9810_v37 }
0x1864   :  { %8815 = vmatpush3.bf16.xpose.msra.mxu0 %v6274_v45 }
0x1865   :  { %8816 = vmatprep.subr.bf16.mxu0 %v9810_v37 }
0x186c   :  { %8817 = vmatpush3.bf16.xpose.msra.mxu0 %v6277_v61 }
0x186d   :  { %8834 = vmatprep.subr.bf16.mxu0 %v9810_v37 }
0x1873   :  { %8819 = vmatmul.mubr.msk.bf16.vlgmr.msra.gmra.mrb[168].mxu0 %vm1859_vm6, %v6251_v14 }
0x1874   :  { %8842 = vmatprep.mubr.msk.bf16.mxu0 %vm9811_vm8, %v9810_v37 }
0x1906   :  { %v12125_v8 = vpop.f32.mrb[144].mxu1 }
0x1907   :  { %v8784_v32 = vpop.f32.mrb[145].mxu1 }
0x1908   :  { %v6128_v57 = vpop.f32.mrb[146].mxu1 }
0x1909   :  { %v8785_v17 = vpop.f32.mrb[147].mxu1 }
0x1926   :  { %v12127_v50 = vpop.f32.mrb[164].mxu0 }
0x1927   :  { %v6174_v43 = vpack.c.bf16 %v12127_v50, %v12125_v8  ;;  %v8796_v51 = vpop.f32.mrb[165].mxu0 }
0x1928   :  { %v6171_v36 = vpop.f32.mrb[166].mxu0 }
0x1929   :  { %v8797_v31 = vpop.f32.mrb[167].mxu0 }
0x192f   :  { %v6243_v25 = vpop.f32.mrb[148].mxu1 }
0x1930   :  { %v8808_v18 = vpop.f32.mrb[149].mxu1  ;;  %v6319_v48 = vsel %vm2038_vm7, %v6243_v25, -inf }
0x1931   :  { %6320 = vmax.xlane.f32.xlu0 %v6319_v48  ;;  %v6246_v19 = vpop.f32.mrb[150].mxu1 }
0x1932   :  { %v8809_v35 = vpop.f32.mrb[151].mxu1 }
0x1946   :  { %v6313_v56 = vpop.f32.mrb[168].mxu0 }
0x1947   :  { %v8820_v46 = vpop.f32.mrb[169].mxu0  ;;  %v6322_v12 = vsel %vm2038_vm7, %v6313_v56, -inf }
0x1948   :  { %6323 = vmax.xlane.f32.xlu1 %v6322_v12  ;;  %v6316_v59 = vpop.f32.mrb[170].mxu0  ;;  %v9300_v46 = vld [vmem:[%s12569_s7 + $0x18] sm:$0xff]  }
0x1949   :  { %v8821_v1 = vpop.f32.mrb[171].mxu0 }
0x1959   :  { %6347 = vrot.lane.b32.xlu1 %v11991_v13, %s9807_s0 }
0x195d   :  { %6349 = vrot.lane.b32.xlu1 %v11998_v3, %s9807_s0 }
0x1961   :  { %6408 = vrot.lane.b32.xlu1 %v12034_v60, %s9807_s0 }
0x1965   :  { %6410 = vrot.lane.b32.xlu1 %v12043_v49, %s9807_s0 }
0x1969   :  { %6412 = vrot.lane.b32.xlu1 %v12052_v10, %s9807_s0 }
0x196d   :  { %6645 = vrot.lane.b32.xlu1 %v12017_v4, %s9808_s5 }
0x1971   :  { %6647 = vrot.lane.b32.xlu1 %v12032_v0, %s9808_s5 }
0x1975   :  { %6649 = vrot.lane.b32.xlu1 %v12041_v39, %s9808_s5 }
0x1979   :  { %6651 = vrot.lane.b32.xlu1 %v12050_v11, %s9808_s5 }
0x197d   :  { %6643 = vrot.lane.b32.xlu1 %v12059_v53, %s9808_s5 }
0x19be   :  { %v6321_v38 = vpop.xlane.xlu0 %6320 }
0x19bf   :  { %v6325_v52 = vsub.f32 %v6243_v25, %v6321_v38 }
0x19c1   :  { %v6327_v29 = vmul.f32 1.442695, %v6325_v52 }
0x19c3   :  { %9719 = vpow2.f32 %v6327_v29  ;;  %v9301_v29 = vld [vmem:[%s12569_s7] sm:$0xff]  }
0x19cd   :  { %v9720_v5 = vpop.eup %9719 }
0x19ce   :  { %v6331_v24 = vsel %vm2038_vm7, %v9720_v5, 0.0 }
0x19cf   :  { %6332 = vadd.xlane.f32.xlu0 %v6331_v24 }
0x19d5   :  { %v6324_v16 = vpop.xlane.xlu1 %6323 }
0x19d6   :  { %v6326_v40 = vsub.f32 %v6313_v56, %v6324_v16  ;;  %v9299_v56 = vld [vmem:[%s12569_s7 + $0x10] sm:$0xff]  }
0x19d8   :  { %v6329_v6 = vmul.f32 1.442695, %v6326_v40 }
0x19d9   :  { %v6348_v42 = vpop.permute.xlu1 %6347 }
0x19da   :  { %8823 = vmatpush3.bf16.msra.mxu1 %v6348_v42  ;;  %9721 = vpow2.f32 %v6329_v6 }
0x19db   :  { %8824 = vmatprep.subr.bf16.mxu1 %v9810_v37 }
0x19dd   :  { %v6350_v34 = vpop.permute.xlu1 %6349 }
0x19de   :  { %8825 = vmatpush3.bf16.msra.mxu1 %v6350_v34  ;;  %v9302_v34 = vld [vmem:[%s12569_s7 + $0x8] sm:$0xff]  }
0x19df   :  { %8826 = vmatprep.subr.bf16.mxu1 %v9810_v37 }
0x19e1   :  { %v6409_v58 = vpop.permute.xlu1 %6408 }
0x19e4   :  { %v9722_v7 = vpop.eup %9721 }
0x19e5   :  { %6406 = vrot.lane.b32.xlu0 %v12019_v26, %s9807_s0  ;;  %v6334_v62 = vsel %vm2038_vm7, %v9722_v7, 0.0  ;;  %v6411_v20 = vpop.permute.xlu1 %6410 }
0x19e9   :  { %6351 = vrot.lane.b32.xlu0 %v12005_v27, %s9807_s0  ;;  %v6413_v21 = vpop.permute.xlu1 %6412 }
0x19ed   :  { %v6646_v40 = vpop.permute.xlu1 %6645 }
0x19ee   :  { %v6657_v6 = vsel %vm1859_vm6, %v6646_v40, 0 }
0x1a08   :  { %6335 = vadd.xlane.f32.xlu0 %v6334_v62 }
0x1a1e   :  { %6353 = vrot.lane.b32.xlu0 %v12012_v54, %s9807_s0 }
0x1a22   :  { %6580 = vrot.lane.b32.xlu0 %v11989_v2, %s9808_s5 }
0x1a26   :  { %6582 = vrot.lane.b32.xlu0 %v11996_v41, %s9808_s5 }
0x1a2a   :  { %6584 = vrot.lane.b32.xlu0 %v12003_v47, %s9808_s5 }
0x1a2e   :  { %6586 = vrot.lane.b32.xlu0 %v12010_v30, %s9808_s5 }
0x1a32   :  { %6578 = vrot.lane.b32.xlu0 %v12021_v28, %s9808_s5 }
0x1a5c   :  { %v6333_v23 = vpop.xlane.xlu0 %6332 }
0x1a5d   :  { %9723 = vrcp.f32 %v6333_v23 }
0x1a60   :  { %v6407_v55 = vpop.permute.xlu0 %6406 }
0x1a61   :  { %8835 = vmatpush3.bf16.msra.mxu0 %v6407_v55 }
0x1a62   :  { %8836 = vmatprep.subr.bf16.mxu0 %v9810_v37 }
0x1a64   :  { %v6352_v15 = vpop.permute.xlu0 %6351 }
0x1a65   :  { %8827 = vmatpush3.bf16.msra.mxu1 %v6352_v15  ;;  %8837 = vmatpush3.bf16.msra.mxu0 %v6409_v58 }
0x1a66   :  { %8838 = vmatprep.subr.bf16.mxu0 %v9810_v37  ;;  %8828 = vmatprep.subr.bf16.mxu1 %v9810_v37 }
0x1a67   :  { %v9724_v9 = vpop.eup %9723 }
0x1a68   :  { %v6339_v45 = vmul.f32 %v9724_v9, %v9720_v5 }
0x1a69   :  { %8839 = vmatpush3.bf16.msra.mxu0 %v6411_v20 }
0x1a6a   :  { %8840 = vmatprep.subr.bf16.mxu0 %v9810_v37  ;;  %v6341_v61 = vpack.c.bf16 %v6339_v45, %v6339_v45 }
0x1a6d   :  { %8841 = vmatpush3.bf16.msra.mxu0 %v6413_v21 }
0x1a6e   :  { %8862 = vmatprep.subr.bf16.mxu0 %v9810_v37 }
0x1a95   :  { %v6336_v22 = vpop.xlane.xlu0 %6335 }
0x1a96   :  { %9725 = vrcp.f32 %v6336_v22 }
0x1a99   :  { %v6354_v44 = vpop.permute.xlu0 %6353 }
0x1a9a   :  { %8829 = vmatpush3.bf16.msra.mxu1 %v6354_v44 }
0x1a9b   :  { %8846 = vmatprep.subr.bf16.mxu1 %v9810_v37 }
0x1a9d   :  { %8831 = vmatmul.mubr.msk.bf16.vlgmr.msra.gmra.mrb[152].mxu1 %vm2038_vm7, %v6341_v61  ;;  %v6581_v57 = vpop.permute.xlu0 %6580 }
0x1a9e   :  { %8850 = vmatprep.mubr.msk.bf16.mxu1 %vm9811_vm8, %v9810_v37  ;;  %v6592_v51 = vsel %vm1859_vm6, %v6581_v57, 0  ;;  %8847 = vmatpush3.bf16.msra.mxu1 %v9299_v56 }
0x1a9f   :  { %8848 = vmatprep.subr.bf16.mxu1 %v9810_v37 }
0x1aa0   :  { %v9726_v14 = vpop.eup %9725 }
0x1aa1   :  { %v6340_v32 = vmul.f32 %v9726_v14, %v9722_v7  ;;  %v6583_v36 = vpop.permute.xlu0 %6582  ;;  %v6648_v7 = vpop.permute.xlu1 %6647 }
0x1aa2   :  { %v6595_v31 = vsel %vm1859_vm6, %v6583_v36, 0  ;;  %8849 = vmatpush3.bf16.msra.mxu1 %v9300_v46  ;;  %v6660_v62 = vsel %vm1859_vm6, %v6648_v7, 0 }
0x1aa3   :  { %v6342_v17 = vpack.c.bf16 %v6340_v32, %v6340_v32  ;;  %8854 = vmatprep.subr.bf16.mxu1 %v9810_v37 }
0x1aa5   :  { %8843 = vmatmul.mubr.msk.bf16.vlgmr.msra.gmra.mrb[172].mxu0 %vm2038_vm7, %v6342_v17  ;;  %v6585_v25 = vpop.permute.xlu0 %6584  ;;  %v6650_v23 = vpop.permute.xlu1 %6649 }
0x1aa6   :  { %8863 = vmatpush3.bf16.xpose.msra.mxu0 %v6592_v51  ;;  %8870 = vmatprep.mubr.msk.bf16.mxu0 %vm9811_vm8, %v9810_v37  ;;  %v6598_v18 = vsel %vm1859_vm6, %v6585_v25, 0  ;;  %v6663_v8 = vsel %vm1859_vm6, %v6650_v23, 0 }
0x1aa7   :  { %8864 = vmatprep.subr.bf16.mxu0 %v9810_v37 }
0x1aa9   :  { %v6587_v48 = vpop.permute.xlu0 %6586  ;;  %v6652_v20 = vpop.permute.xlu1 %6651 }
0x1aaa   :  { %v6601_v19 = vsel %vm1859_vm6, %v6587_v48, 0  ;;  %v6666_v21 = vsel %vm1859_vm6, %v6652_v20, 0 }
0x1aad   :  { %v6579_v35 = vpop.permute.xlu0 %6578  ;;  %v6644_v9 = vpop.permute.xlu1 %6643 }
0x1aae   :  { %8865 = vmatpush3.bf16.xpose.msra.mxu0 %v6595_v31 }
0x1aaf   :  { %8866 = vmatprep.subr.bf16.mxu0 %v9810_v37 }
0x1ab6   :  { %8867 = vmatpush3.bf16.xpose.msra.mxu0 %v6598_v18 }
0x1ab7   :  { %8868 = vmatprep.subr.bf16.mxu0 %v9810_v37 }
0x1abe   :  { %8869 = vmatpush3.bf16.xpose.msra.mxu0 %v6601_v19 }
0x1abf   :  { %8886 = vmatprep.subr.bf16.mxu0 %v9810_v37 }
0x1ac5   :  { %8871 = vmatmul.mubr.msk.bf16.vlgmr.msra.gmra.mrb[176].mxu0 %vm1859_vm6, %v6579_v35 }
0x1ac6   :  { %8894 = vmatprep.mubr.msk.bf16.mxu0 %vm9811_vm8, %v9810_v37 }
0x1b70   :  { %v6396_v12 = vpop.f32.mrb[152].mxu1 }
0x1b71   :  { %v8832_v59 = vpop.f32.mrb[153].mxu1 }
0x1b72   :  { %v6399_v1 = vpop.f32.mrb[154].mxu1 }
0x1b73   :  { %v8833_v38 = vpop.f32.mrb[155].mxu1 }
0x1b78   :  { %v6455_v52 = vpop.f32.mrb[172].mxu0 }
0x1b79   :  { %v6461_v5 = vpack.c.bf16 %v6455_v52, %v6396_v12  ;;  %v8844_v24 = vpop.f32.mrb[173].mxu0 }
0x1b7a   :  { %v6458_v16 = vpop.f32.mrb[174].mxu0 }
0x1b7b   :  { %v8845_v42 = vpop.f32.mrb[175].mxu0  ;;  %8851 = vmatmul.mubr.msk.bf16.vlgmr.msra.gmra.mrb[156].mxu1 %vm1859_vm6, %v6461_v5 }
0x1b7c   :  { %8855 = vmatpush3.bf16.msra.mxu1 %v9301_v29  ;;  %8858 = vmatprep.mubr.msk.bf16.mxu1 %vm9811_vm8, %v9810_v37 }
0x1b7d   :  { %8856 = vmatprep.subr.bf16.mxu1 %v9810_v37 }
0x1b80   :  { %8857 = vmatpush3.bf16.msra.mxu1 %v9302_v34 }
0x1b81   :  { %8874 = vmatprep.subr.bf16.mxu1 %v9810_v37 }
0x1b83   :  { %8859 = vmatmul.mubr.msk.bf16.vlgmr.msra.gmra.mrb[160].mxu1 %vm1859_vm6, %v6174_v43 }
0x1b84   :  { %8882 = vmatprep.mubr.msk.bf16.mxu1 %vm9811_vm8, %v9810_v37 }
0x1b89   :  { %8875 = vmatpush3.bf16.xpose.msra.mxu1 %v6657_v6 }
0x1b8a   :  { %8876 = vmatprep.subr.bf16.mxu1 %v9810_v37 }
0x1b91   :  { %8877 = vmatpush3.bf16.xpose.msra.mxu1 %v6660_v62 }
0x1b92   :  { %8878 = vmatprep.subr.bf16.mxu1 %v9810_v37 }
0x1b98   :  { %v6637_v50 = vpop.f32.mrb[176].mxu0 }
0x1b99   :  { %v8872_v43 = vpop.f32.mrb[177].mxu0  ;;  %8879 = vmatpush3.bf16.xpose.msra.mxu1 %v6663_v8  ;;  %v6708_v58 = vsel %vm2038_vm7, %v6637_v50, -inf }
0x1b9a   :  { %6709 = vmax.xlane.f32.xlu0 %v6708_v58  ;;  %v6640_v55 = vpop.f32.mrb[178].mxu0  ;;  %8880 = vmatprep.subr.bf16.mxu1 %v9810_v37 }
0x1b9b   :  { %v8873_v15 = vpop.f32.mrb[179].mxu0 }
0x1ba1   :  { %8881 = vmatpush3.bf16.xpose.msra.mxu1 %v6666_v21  ;;  %v9304_v21 = vld [vmem:[%s12569_s7 + $0x28] sm:$0xff]  }
0x1ba2   :  { %8898 = vmatprep.subr.bf16.mxu1 %v9810_v37 }
0x1ba8   :  { %8883 = vmatmul.mubr.msk.bf16.vlgmr.msra.gmra.mrb[164].mxu1 %vm1859_vm6, %v6644_v9 }
0x1ba9   :  { %8906 = vmatprep.mubr.msk.bf16.mxu1 %vm9811_vm8, %v9810_v37 }
0x1c27   :  { %v6710_v22 = vpop.xlane.xlu0 %6709 }
0x1c28   :  { %v6714_v45 = vsub.f32 %v6637_v50, %v6710_v22 }
0x1c2a   :  { %v6716_v44 = vmul.f32 1.442695, %v6714_v45 }
0x1c2c   :  { %9727 = vpow2.f32 %v6716_v44 }
0x1c36   :  { %v12225_v61 = vpop.eup %9727 }
0x1c37   :  { %v6720_v14 = vsel %vm2038_vm7, %v12225_v61, 0.0 }
0x1c38   :  { %6721 = vadd.xlane.f32.xlu0 %v6720_v14 }
0x1c4e   :  { %6787 = vrot.lane.b32.xlu0 %v12019_v26, %s9808_s5  ;;  %v6515_v32 = vpop.f32.mrb[156].mxu1 }
0x1c4f   :  { %v8852_v57 = vpop.f32.mrb[157].mxu1 }
0x1c50   :  { %v6518_v17 = vpop.f32.mrb[158].mxu1 }
0x1c51   :  { %v8853_v51 = vpop.f32.mrb[159].mxu1 }
0x1c52   :  { %6736 = vrot.lane.b32.xlu0 %v12005_v27, %s9808_s5 }
0x1c56   :  { %v6571_v36 = vpop.f32.mrb[160].mxu1 }
0x1c57   :  { %v12233_v31 = vadd.f32 %v6571_v36, %v6515_v32  ;;  %v8860_v25 = vpop.f32.mrb[161].mxu1 }
0x1c58   :  { %v6574_v18 = vpop.f32.mrb[162].mxu1 }
0x1c59   :  { %v12235_v48 = vadd.f32 %v6574_v18, %v6518_v17  ;;  %v8861_v19 = vpop.f32.mrb[163].mxu1 }
0x1c7b   :  { %v6702_v35 = vpop.f32.mrb[164].mxu1 }
0x1c7c   :  { %v8884_v56 = vpop.f32.mrb[165].mxu1  ;;  %v6711_v46 = vsel %vm2038_vm7, %v6702_v35, -inf }
0x1c7d   :  { %6712 = vmax.xlane.f32.xlu1 %v6711_v46  ;;  %v6705_v12 = vpop.f32.mrb[166].mxu1 }
0x1c7e   :  { %v8885_v59 = vpop.f32.mrb[167].mxu1 }
0x1c8e   :  { %6732 = vrot.lane.b32.xlu1 %v11991_v13, %s9808_s5 }
0x1c92   :  { %6734 = vrot.lane.b32.xlu1 %v11998_v3, %s9808_s5 }
0x1c96   :  { %6789 = vrot.lane.b32.xlu1 %v12034_v60, %s9808_s5 }
0x1c9a   :  { %6791 = vrot.lane.b32.xlu1 %v12043_v49, %s9808_s5 }
0x1c9e   :  { %6793 = vrot.lane.b32.xlu1 %v12052_v10, %s9808_s5 }
0x1ca2   :  { %6972 = vrot.lane.b32.xlu1 %v12017_v4, %s9809_s9 }
0x1ca6   :  { %6974 = vrot.lane.b32.xlu1 %v12032_v0, %s9809_s9 }
0x1caa   :  { %6976 = vrot.lane.b32.xlu1 %v12041_v39, %s9809_s9 }
0x1cae   :  { %6978 = vrot.lane.b32.xlu1 %v12050_v11, %s9809_s9 }
0x1cb2   :  { %6970 = vrot.lane.b32.xlu1 %v12059_v53, %s9809_s9 }
0x1cc5   :  { %v6722_v1 = vpop.xlane.xlu0 %6721 }
0x1cc9   :  { %v6788_v38 = vpop.permute.xlu0 %6787 }
0x1cca   :  { %8899 = vmatpush3.bf16.msra.mxu1 %v6788_v38 }
0x1ccb   :  { %8900 = vmatprep.subr.bf16.mxu1 %v9810_v37 }
0x1ccd   :  { %v6737_v39 = vpop.permute.xlu0 %6736 }
0x1d0a   :  { %v6713_v52 = vpop.xlane.xlu1 %6712 }
0x1d0b   :  { %v6715_v29 = vsub.f32 %v6702_v35, %v6713_v52 }
0x1d0d   :  { %v6718_v4 = vmul.f32 1.442695, %v6715_v29 }
0x1d0e   :  { %v6733_v5 = vpop.permute.xlu1 %6732 }
0x1d0f   :  { %9729 = vpow2.f32 %v6718_v4  ;;  %8887 = vmatpush3.bf16.msra.mxu0 %v6733_v5 }
0x1d10   :  { %8888 = vmatprep.subr.bf16.mxu0 %v9810_v37  ;;  %9731 = vrcp.f32 %v6722_v1 }
0x1d12   :  { %v6735_v0 = vpop.permute.xlu1 %6734 }
0x1d13   :  { %8889 = vmatpush3.bf16.msra.mxu0 %v6735_v0 }
0x1d14   :  { %8890 = vmatprep.subr.bf16.mxu0 %v9810_v37 }
0x1d16   :  { %v6790_v11 = vpop.permute.xlu1 %6789 }
0x1d17   :  { %8891 = vmatpush3.bf16.msra.mxu0 %v6737_v39  ;;  %8901 = vmatpush3.bf16.msra.mxu1 %v6790_v11 }
0x1d18   :  { %8902 = vmatprep.subr.bf16.mxu1 %v9810_v37  ;;  %8892 = vmatprep.subr.bf16.mxu0 %v9810_v37 }
0x1d19   :  { %v9730_v53 = vpop.eup %9729 }
0x1d1a   :  { %v6792_v24 = vpop.permute.xlu1 %6791  ;;  %v6723_v16 = vsel %vm2038_vm7, %v9730_v53, 0.0  ;;  %v9732_v34 = vpop.eup %9731 }
0x1d1b   :  { %6724 = vadd.xlane.f32.xlu0 %v6723_v16  ;;  %8903 = vmatpush3.bf16.msra.mxu1 %v6792_v24  ;;  %v6728_v6 = vmul.f32 %v9732_v34, %v12225_v61 }
0x1d1c   :  { %8904 = vmatprep.subr.bf16.mxu1 %v9810_v37 }
0x1d1d   :  { %v6730_v62 = vpack.c.bf16 %v6728_v6, %v6728_v6 }
0x1d1e   :  { %v6794_v42 = vpop.permute.xlu1 %6793 }
0x1d1f   :  { %8905 = vmatpush3.bf16.msra.mxu1 %v6794_v42 }
0x1d20   :  { %8918 = vmatprep.subr.bf16.mxu1 %v9810_v37 }
0x1d22   :  { %v6973_v61 = vpop.permute.xlu1 %6972 }
0x1d23   :  { %v6984_v51 = vsel %vm1859_vm6, %v6973_v61, 0 }
0x1d26   :  { %v6975_v25 = vpop.permute.xlu1 %6974 }
0x1d27   :  { %v6987_v18 = vsel %vm1859_vm6, %v6975_v25, 0 }
0x1d2a   :  { %v6977_v19 = vpop.permute.xlu1 %6976 }
0x1d2b   :  { %v6990_v35 = vsel %vm1859_vm6, %v6977_v19, 0 }
0x1d2e   :  { %v6979_v56 = vpop.permute.xlu1 %6978 }
0x1d2f   :  { %v6993_v46 = vsel %vm1859_vm6, %v6979_v56, 0 }
0x1d31   :  { %6738 = vrot.lane.b32.xlu0 %v12012_v54, %s9808_s5 }
0x1d32   :  { %v6971_v38 = vpop.permute.xlu1 %6970 }
0x1d35   :  { %6907 = vrot.lane.b32.xlu0 %v11989_v2, %s9809_s9  ;;  %v9303_v2 = vld [vmem:[%s12569_s7 + $0x20] sm:$0xff]  }
0x1d39   :  { %6909 = vrot.lane.b32.xlu0 %v11996_v41, %s9809_s9 }
0x1d3d   :  { %6911 = vrot.lane.b32.xlu0 %v12003_v47, %s9809_s9 }
0x1d41   :  { %6913 = vrot.lane.b32.xlu0 %v12010_v30, %s9809_s9 }
0x1d45   :  { %6905 = vrot.lane.b32.xlu0 %v12021_v28, %s9809_s9 }
0x1da8   :  { %v6725_v40 = vpop.xlane.xlu0 %6724 }
0x1da9   :  { %9733 = vrcp.f32 %v6725_v40 }
0x1dac   :  { %v6739_v7 = vpop.permute.xlu0 %6738 }
0x1dad   :  { %8893 = vmatpush3.bf16.msra.mxu0 %v6739_v7 }
0x1dae   :  { %8910 = vmatprep.subr.bf16.mxu0 %v9810_v37 }
0x1db0   :  { %8895 = vmatmul.mubr.msk.bf16.vlgmr.msra.gmra.mrb[180].mxu0 %vm2038_vm7, %v6730_v62  ;;  %v6908_v30 = vpop.permute.xlu0 %6907 }
0x1db1   :  { %8911 = vmatpush3.bf16.msra.mxu0 %v9303_v2  ;;  %8914 = vmatprep.mubr.msk.bf16.mxu0 %vm9811_vm8, %v9810_v37  ;;  %v6919_v23 = vsel %vm1859_vm6, %v6908_v30, 0 }
0x1db2   :  { %8912 = vmatprep.subr.bf16.mxu0 %v9810_v37 }
0x1db3   :  { %v9734_v41 = vpop.eup %9733 }
0x1db4   :  { %v6729_v47 = vmul.f32 %v9734_v41, %v9730_v53  ;;  %v6910_v8 = vpop.permute.xlu0 %6909 }
0x1db5   :  { %v6922_v50 = vsel %vm1859_vm6, %v6910_v8, 0  ;;  %8913 = vmatpush3.bf16.msra.mxu0 %v9304_v21  ;;  %v9305_v21 = vld [vmem:[%s12569_s7 + $0x30] sm:$0xff]  }
0x1db6   :  { %v6731_v28 = vpack.c.bf16 %v6729_v47, %v6729_v47  ;;  %8930 = vmatprep.subr.bf16.mxu0 %v9810_v37 }
0x1db8   :  { %8907 = vmatmul.mubr.msk.bf16.vlgmr.msra.gmra.mrb[168].mxu1 %vm2038_vm7, %v6731_v28  ;;  %v6912_v43 = vpop.permute.xlu0 %6911 }
0x1db9   :  { %8919 = vmatpush3.bf16.xpose.msra.mxu1 %v6919_v23  ;;  %8926 = vmatprep.mubr.msk.bf16.mxu1 %vm9811_vm8, %v9810_v37  ;;  %v6925_v58 = vsel %vm1859_vm6, %v6912_v43, 0 }
0x1dba   :  { %8920 = vmatprep.subr.bf16.mxu1 %v9810_v37 }
0x1dbc   :  { %v6914_v55 = vpop.permute.xlu0 %6913 }
0x1dbd   :  { %v6928_v15 = vsel %vm1859_vm6, %v6914_v55, 0 }
0x1dc0   :  { %v6906_v20 = vpop.permute.xlu0 %6905 }
0x1dc1   :  { %8921 = vmatpush3.bf16.xpose.msra.mxu1 %v6922_v50 }
0x1dc2   :  { %8922 = vmatprep.subr.bf16.mxu1 %v9810_v37 }
0x1dc9   :  { %8923 = vmatpush3.bf16.xpose.msra.mxu1 %v6925_v58 }
0x1dca   :  { %8924 = vmatprep.subr.bf16.mxu1 %v9810_v37 }
0x1dd1   :  { %8925 = vmatpush3.bf16.xpose.msra.mxu1 %v6928_v15 }
0x1dd2   :  { %8942 = vmatprep.subr.bf16.mxu1 %v9810_v37 }
0x1dd8   :  { %8927 = vmatmul.mubr.msk.bf16.vlgmr.msra.gmra.mrb[172].mxu1 %vm1859_vm6, %v6906_v20 }
0x1dd9   :  { %8950 = vmatprep.mubr.msk.bf16.mxu1 %vm9811_vm8, %v9810_v37 }
0x1e83   :  { %v6781_v9 = vpop.f32.mrb[180].mxu0 }
0x1e84   :  { %v8896_v22 = vpop.f32.mrb[181].mxu0 }
0x1e85   :  { %v6784_v45 = vpop.f32.mrb[182].mxu0 }
0x1e86   :  { %v8897_v44 = vpop.f32.mrb[183].mxu0 }
0x1e8b   :  { %v6836_v14 = vpop.f32.mrb[168].mxu1 }
0x1e8c   :  { %v6842_v32 = vpack.c.bf16 %v6836_v14, %v6781_v9  ;;  %v8908_v57 = vpop.f32.mrb[169].mxu1  ;;  %v9306_v9 = vld [vmem:[%s12569_s7 + $0x38] sm:$0xff]  }
0x1e8d   :  { %v6839_v17 = vpop.f32.mrb[170].mxu1 }
0x1e8e   :  { %v8909_v36 = vpop.f32.mrb[171].mxu1  ;;  %8915 = vmatmul.mubr.msk.bf16.vlgmr.msra.gmra.mrb[184].mxu0 %vm1859_vm6, %v6842_v32 }
0x1e8f   :  { %8931 = vmatpush3.bf16.xpose.msra.mxu0 %v6984_v51  ;;  %8938 = vmatprep.mubr.msk.bf16.mxu0 %vm9811_vm8, %v9810_v37 }
0x1e90   :  { %8932 = vmatprep.subr.bf16.mxu0 %v9810_v37 }
0x1e97   :  { %8933 = vmatpush3.bf16.xpose.msra.mxu0 %v6987_v18 }
0x1e98   :  { %8934 = vmatprep.subr.bf16.mxu0 %v9810_v37 }
0x1e9f   :  { %8935 = vmatpush3.bf16.xpose.msra.mxu0 %v6990_v35 }
0x1ea0   :  { %8936 = vmatprep.subr.bf16.mxu0 %v9810_v37 }
0x1ea7   :  { %8937 = vmatpush3.bf16.xpose.msra.mxu0 %v6993_v46 }
0x1ea8   :  { %8954 = vmatprep.subr.bf16.mxu0 %v9810_v37 }
0x1eab   :  { %v6964_v12 = vpop.f32.mrb[172].mxu1 }
0x1eac   :  { %v8928_v59 = vpop.f32.mrb[173].mxu1  ;;  %v7035_v1 = vsel %vm2038_vm7, %v6964_v12, -inf }
0x1ead   :  { %7036 = vmax.xlane.f32.xlu0 %v7035_v1  ;;  %v6967_v52 = vpop.f32.mrb[174].mxu1  ;;  %v9307_v59 = vld [vmem:[%s12570_s10] sm:$0xff]  }
0x1eae   :  { %v8929_v29 = vpop.f32.mrb[175].mxu1  ;;  %8939 = vmatmul.mubr.msk.bf16.vlgmr.msra.gmra.mrb[188].mxu0 %vm1859_vm6, %v6971_v38 }
0x1eaf   :  { %8962 = vmatprep.mubr.msk.bf16.mxu0 %vm9811_vm8, %v9810_v37 }
0x1f3a   :  { %v7037_v4 = vpop.xlane.xlu0 %7036 }
0x1f3b   :  { %v7041_v5 = vsub.f32 %v6964_v12, %v7037_v4 }
0x1f3d   :  { %v7043_v0 = vmul.f32 1.442695, %v7041_v5 }
0x1f3f   :  { %9735 = vpow2.f32 %v7043_v0  ;;  %v9308_v0 = vld [vmem:[%s12570_s10 + $0x8] sm:$0xff]  }
0x1f49   :  { %v9736_v39 = vpop.eup %9735 }
0x1f4a   :  { %v7047_v11 = vsel %vm2038_vm7, %v9736_v39, 0.0 }
0x1f4b   :  { %7048 = vadd.xlane.f32.xlu0 %v7047_v11  ;;  %v9310_v11 = vld [vmem:[%s12570_s10 + $0x18] sm:$0xff]  }
0x1f61   :  { %7114 = vrot.lane.b32.xlu0 %v12019_v26, %s9809_s9  ;;  %v6896_v53 = vpop.f32.mrb[184].mxu0 }
0x1f62   :  { %v12320_v24 = vadd.f32 %v6896_v53, %v12233_v31  ;;  %v8916_v16 = vpop.f32.mrb[185].mxu0  ;;  %v9311_v53 = vld [vmem:[%s12570_s10 + $0x20] sm:$0xff]  }
0x1f63   :  { %v6899_v42 = vpop.f32.mrb[186].mxu0  ;;  %v9313_v16 = vld [vmem:[%s12570_s10 + $0x30] sm:$0xff]  }
0x1f64   :  { %v12323_v34 = vadd.f32 %v6899_v42, %v12235_v48  ;;  %v8917_v40 = vpop.f32.mrb[187].mxu0  ;;  %v9314_v42 = vld [vmem:[%s12570_s10 + $0x38] sm:$0xff]  }
0x1f65   :  { %7063 = vrot.lane.b32.xlu0 %v12005_v27, %s9809_s9  ;;  %v9316_v40 = vld [vmem:[%s9978_s20 + $0x8] sm:$0xff]  }
0x1f81   :  { %v7029_v6 = vpop.f32.mrb[188].mxu0 }
0x1f82   :  { %v8940_v7 = vpop.f32.mrb[189].mxu0  ;;  %v7038_v2 = vsel %vm2038_vm7, %v7029_v6, -inf }
0x1f83   :  { %7039 = vmax.xlane.f32.xlu1 %v7038_v2  ;;  %v7032_v62 = vpop.f32.mrb[190].mxu0  ;;  %v9318_v7 = vld [vmem:[%s9978_s20 + $0x18] sm:$0xff]   ;;  %v9319_v2 = vld [vmem:[%s9978_s20 + $0x20] sm:$0xff]  }
0x1f84   :  { %v8941_v26 = vpop.f32.mrb[191].mxu0  ;;  %v9320_v62 = vld [vmem:[%s9978_s20 + $0x28] sm:$0xff]  }
0x1f94   :  { %7059 = vrot.lane.b32.xlu1 %v11991_v13, %s9809_s9 }
0x1f98   :  { %7061 = vrot.lane.b32.xlu1 %v11998_v3, %s9809_s9 }
0x1f9c   :  { %7116 = vrot.lane.b32.xlu1 %v12034_v60, %s9809_s9 }
0x1fa0   :  { %7118 = vrot.lane.b32.xlu1 %v12043_v49, %s9809_s9 }
0x1fa4   :  { %7120 = vrot.lane.b32.xlu1 %v12052_v10, %s9809_s9 }
0x1fd8   :  { %v7049_v27 = vpop.xlane.xlu0 %7048 }
0x1fdc   :  { %v7115_v31 = vpop.permute.xlu0 %7114 }
0x1fdd   :  { %8955 = vmatpush3.bf16.msra.mxu0 %v7115_v31 }
0x1fde   :  { %8956 = vmatprep.subr.bf16.mxu0 %v9810_v37 }
0x1fe0   :  { %v7064_v60 = vpop.permute.xlu0 %7063 }
0x2010   :  { %v7040_v48 = vpop.xlane.xlu1 %7039 }
0x2011   :  { %v7042_v41 = vsub.f32 %v7029_v6, %v7040_v48  ;;  %v9317_v6 = vld [vmem:[%s9978_s20 + $0x10] sm:$0xff]  }
0x2013   :  { %v7045_v13 = vmul.f32 1.442695, %v7042_v41 }
0x2014   :  { %v7060_v47 = vpop.permute.xlu1 %7059 }
0x2015   :  { %9737 = vpow2.f32 %v7045_v13  ;;  %8943 = vmatpush3.bf16.msra.mxu1 %v7060_v47 }
0x2016   :  { %8944 = vmatprep.subr.bf16.mxu1 %v9810_v37  ;;  %9739 = vrcp.f32 %v7049_v27 }
0x2018   :  { %v7062_v3 = vpop.permute.xlu1 %7061 }
0x2019   :  { %8945 = vmatpush3.bf16.msra.mxu1 %v7062_v3 }
0x201a   :  { %8946 = vmatprep.subr.bf16.mxu1 %v9810_v37 }
0x201c   :  { %v7117_v49 = vpop.permute.xlu1 %7116 }
0x201d   :  { %8947 = vmatpush3.bf16.msra.mxu1 %v7064_v60  ;;  %8957 = vmatpush3.bf16.msra.mxu0 %v7117_v49  ;;  %v7799_v60 = vld [vmem:[%s12571_s11] ss:$0 sm:$0xff] }
0x201e   :  { %8958 = vmatprep.subr.bf16.mxu0 %v9810_v37  ;;  %8948 = vmatprep.subr.bf16.mxu1 %v9810_v37 }
0x201f   :  { %v9738_v10 = vpop.eup %9737 }
0x2020   :  { %v7119_v30 = vpop.permute.xlu1 %7118  ;;  %v7050_v28 = vsel %vm2038_vm7, %v9738_v10, 0.0  ;;  %v9740_v8 = vpop.eup %9739 }
0x2021   :  { %7051 = vadd.xlane.f32.xlu0 %v7050_v28  ;;  %8959 = vmatpush3.bf16.msra.mxu0 %v7119_v30  ;;  %v7055_v43 = vmul.f32 %v9740_v8, %v9736_v39  ;;  %v9309_v39 = vld [vmem:[%s12570_s10 + $0x10] sm:$0xff]   ;;  %v7800_v28 = vld [vmem:[%s12572_s15] ss:$0 sm:$0xff] }
0x2022   :  { %8960 = vmatprep.subr.bf16.mxu0 %v9810_v37 }
0x2023   :  { %v7057_v55 = vpack.c.bf16 %v7055_v43, %v7055_v43 }
0x2024   :  { %v7121_v23 = vpop.permute.xlu1 %7120 }
0x2025   :  { %8961 = vmatpush3.bf16.msra.mxu0 %v7121_v23 }
0x2026   :  { %8974 = vmatprep.subr.bf16.mxu0 %v9810_v37 }
0x2037   :  { %7065 = vrot.lane.b32.xlu0 %v12012_v54, %s9809_s9 }
0x20ae   :  { %v7052_v50 = vpop.xlane.xlu0 %7051 }
0x20af   :  { %9741 = vrcp.f32 %v7052_v50 }
0x20b2   :  { %v7066_v58 = vpop.permute.xlu0 %7065 }
0x20b3   :  { %8949 = vmatpush3.bf16.msra.mxu1 %v7066_v58  ;;  %v9321_v58 = vld [vmem:[%s9978_s20 + $0x30] sm:$0xff]  }
0x20b4   :  { %8966 = vmatprep.subr.bf16.mxu1 %v9810_v37 }
0x20b6   :  { %8951 = vmatmul.mubr.msk.bf16.vlgmr.msra.gmra.mrb[176].mxu1 %vm2038_vm7, %v7057_v55  ;;  %v9322_v55 = vld [vmem:[%s9978_s20 + $0x38] sm:$0xff]  }
0x20b7   :  { %8970 = vmatprep.mubr.msk.bf16.mxu1 %vm9811_vm8, %v9810_v37  ;;  %8967 = vmatpush3.bf16.msra.mxu1 %v9305_v21 }
0x20b8   :  { %8968 = vmatprep.subr.bf16.mxu1 %v9810_v37 }
0x20b9   :  { %v9742_v15 = vpop.eup %9741 }
0x20ba   :  { %v7056_v20 = vmul.f32 %v9742_v15, %v9738_v10  ;;  %v7801_v15 = vld [vmem:[%s9973_s12] ss:$0 sm:$0xff]  ;;  %s9747_s12 = scalar_lea.vmem %s7512_s18, 256 }
0x20bb   :  { %8969 = vmatpush3.bf16.msra.mxu1 %v9306_v9  ;;  %p9748_p0 = scmp.ne.s32.totalorder %s7512_s18, %s9747_s12  ;;  %p9753_p2 = scmp.lt.s32.totalorder %s9747_s12, %s9747_s12 }
0x20bc   :  { %v7058_v54 = vpack.c.bf16 %v7056_v20, %v7056_v20  ;;  %8994 = vmatprep.subr.bf16.mxu1 %v9810_v37 }
0x20bd   :  { %p9754_p3 = por %p9753_p2, %p9752_p1 }
0x20be   :  { %8963 = vmatmul.mubr.msk.bf16.vlgmr.msra.gmra.mrb[192].mxu0 %vm2038_vm7, %v7058_v54 }
0x20bf   :  { %8990 = vmatprep.mubr.msk.bf16.mxu0 %vm9811_vm8, %v9810_v37  ;;  %8975 = vmatpush3.bf16.msra.mxu0 %v9307_v59  ;;  %p9755_p4 = pnand %p9754_p3, %p9748_p0 }
0x20c0   :  { %8976 = vmatprep.subr.bf16.mxu0 %v9810_v37 }
0x20c3   :  { %8977 = vmatpush3.bf16.msra.mxu0 %v9308_v0 }
0x20c4   :  { %8978 = vmatprep.subr.bf16.mxu0 %v9810_v37 }
0x20c7   :  { %8979 = vmatpush3.bf16.msra.mxu0 %v9309_v39 }
0x20c8   :  { %8980 = vmatprep.subr.bf16.mxu0 %v9810_v37 }
0x20cb   :  { %8981 = vmatpush3.bf16.msra.mxu0 %v9310_v11 }
0x20cc   :  { %8982 = vmatprep.subr.bf16.mxu0 %v9810_v37 }
0x20cf   :  { %8983 = vmatpush3.bf16.msra.mxu0 %v9311_v53 }
0x20d0   :  { %8984 = vmatprep.subr.bf16.mxu0 %v9810_v37 }
0x2189   :  { %v7108_v22 = vpop.f32.mrb[176].mxu1 }
0x218a   :  { %v8952_v45 = vpop.f32.mrb[177].mxu1 }
0x218b   :  { %v7111_v44 = vpop.f32.mrb[178].mxu1 }
0x218c   :  { %v8953_v61 = vpop.f32.mrb[179].mxu1 }
0x2191   :  { %v7163_v14 = vpop.f32.mrb[192].mxu0 }
0x2192   :  { %v7169_v32 = vpack.c.bf16 %v7163_v14, %v7108_v22  ;;  %v8964_v57 = vpop.f32.mrb[193].mxu0 }
0x2193   :  { %v7166_v17 = vpop.f32.mrb[194].mxu0 }
0x2194   :  { %v8965_v51 = vpop.f32.mrb[195].mxu0  ;;  %8971 = vmatmul.mubr.msk.bf16.vlgmr.msra.gmra.mrb[180].mxu1 %vm1859_vm6, %v7169_v32  ;;  %v7810_v32 = vld [vmem:[%s9983_s27] ss:$0 sm:$0xff] }
0x2195   :  { %9010 = vmatprep.mubr.msk.bf16.mxu1 %vm9811_vm8, %v9810_v37 }
0x2267   :  { %v7223_v36 = vpop.f32.mrb[180].mxu1 }
0x2268   :  { %v7230_v25 = vadd.f32 %v7223_v36, %v12320_v24  ;;  %v8972_v18 = vpop.f32.mrb[181].mxu1  ;;  %v9312_v24 = vld [vmem:[%s12570_s10 + $0x28] sm:$0xff]  }
0x2269   :  { %v7226_v19 = vpop.f32.mrb[182].mxu1  ;;  %8985 = vmatpush3.bf16.msra.mxu0 %v9312_v24 }
0x226a   :  { %v12364_v35 = vadd.f32 %v7230_v25, %v12561_v63  ;;  %v7231_v56 = vadd.f32 %v7226_v19, %v12323_v34  ;;  %v8973_v46 = vpop.f32.mrb[183].mxu1  ;;  %8986 = vmatprep.subr.bf16.mxu0 %v9810_v37  ;;  %v9315_v34 = vld [vmem:[%s9978_s20] sm:$0xff]  }
0x226b   :  { %8995 = vmatpush3.bf16.msra.mxu1 %v9315_v34 }
0x226c   :  { %v12368_v12 = vadd.f32 %v7231_v56, %v12562_v33  ;;  %7236 = vadd.xlane.f32.xlu0 %v12364_v35  ;;  %8996 = vmatprep.subr.bf16.mxu1 %v9810_v37 }
0x226d   :  { %8987 = vmatpush3.bf16.msra.mxu0 %v9313_v16 }
0x226e   :  { %7238 = vadd.xlane.f32.xlu1 %v12368_v12  ;;  %8988 = vmatprep.subr.bf16.mxu0 %v9810_v37 }
0x226f   :  { %8997 = vmatpush3.bf16.msra.mxu1 %v9316_v40 }
0x2270   :  { %8998 = vmatprep.subr.bf16.mxu1 %v9810_v37 }
0x2271   :  { %8989 = vmatpush3.bf16.msra.mxu0 %v9314_v42 }
0x2273   :  { %8999 = vmatpush3.bf16.msra.mxu1 %v9317_v6 }
0x2274   :  { %9000 = vmatprep.subr.bf16.mxu1 %v9810_v37 }
0x2277   :  { %9001 = vmatpush3.bf16.msra.mxu1 %v9318_v7 }
0x2278   :  { %9002 = vmatprep.subr.bf16.mxu1 %v9810_v37 }
0x227b   :  { %9003 = vmatpush3.bf16.msra.mxu1 %v9319_v2 }
0x227c   :  { %9004 = vmatprep.subr.bf16.mxu1 %v9810_v37 }
0x227f   :  { %9005 = vmatpush3.bf16.msra.mxu1 %v9320_v62 }
0x2280   :  { %9006 = vmatprep.subr.bf16.mxu1 %v9810_v37 }
0x2283   :  { %9007 = vmatpush3.bf16.msra.mxu1 %v9321_v58 }
0x2284   :  { %9008 = vmatprep.subr.bf16.mxu1 %v9810_v37 }
0x2287   :  { %9009 = vmatpush3.bf16.msra.mxu1 %v9322_v55 }
0x22f9   :  { %v7237_v1 = vpop.xlane.xlu0 %7236 }
0x22fa   :  { %v7240_v63 = vmul.f32 0.0078125, %v7237_v1 }
0x22fb   :  { %v7239_v38 = vpop.xlane.xlu1 %7238 }
0x22fc   :  { %v7242_v52 = vsub.f32 %v12364_v35, %v7240_v63  ;;  %v7241_v29 = vmul.f32 0.0078125, %v7239_v38 }
0x22fe   :  { %v7243_v33 = vsub.f32 %v12368_v12, %v7241_v29  ;;  %v7244_v4 = vmul.f32 %v7242_v52, %v7242_v52 }
0x2300   :  { %7246 = vadd.xlane.f32.xlu0 %v7244_v4  ;;  %v7245_v5 = vmul.f32 %v7243_v33, %v7243_v33 }
0x2304   :  { %7248 = vadd.xlane.f32.xlu0 %v7245_v5 }
0x238d   :  { %v7247_v26 = vpop.xlane.xlu0 %7246 }
0x238e   :  { %v7250_v27 = vmul.f32 0.0078125, %v7247_v26 }
0x2390   :  { %v7252_v31 = vadd.f32 1e-05, %v7250_v27 }
0x2391   :  { %v7249_v48 = vpop.xlane.xlu0 %7248 }
0x2392   :  { %9743 = vrsqrt.f32 %v7252_v31  ;;  %v7251_v41 = vmul.f32 0.0078125, %v7249_v48 }
0x2394   :  { %v7253_v13 = vadd.f32 1e-05, %v7251_v41 }
0x2396   :  { %9745 = vrsqrt.f32 %v7253_v13 }
0x239c   :  { %v9744_v47 = vpop.eup %9743 }
0x239d   :  { %v7256_v3 = vmul.f32 %v9744_v47, %v7242_v52 }
0x239f   :  { %v7264_v30 = vmul.f32 %v7799_v60, %v7256_v3 }
0x23a0   :  { %v9746_v49 = vpop.eup %9745 }
0x23a1   :  { %v7257_v10 = vmul.f32 %v9746_v49, %v7243_v33  ;;  %v7272_v8 = vadd.f32 %v7800_v28, %v7264_v30 }
0x23a3   :  { %v7265_v23 = vmul.f32 %v7799_v60, %v7257_v10 }
0x23a5   :  { %v7273_v50 = vadd.f32 %v7800_v28, %v7265_v23 }
0x23a7   :  { %v7274_v43 = vpack.c.bf16 %v7273_v50, %v7272_v8 }
0x23a9   :  { %8991 = vmatmul.mubr.bf16.vlgmr.msra.gmra.mrb[196].mxu0 %v7274_v43 }
0x247c   :  { %v7380_v20 = vpop.f32.mrb[196].mxu0 }
0x247d   :  { %v7381_v54 = vadd.f32 %v7801_v15, %v7380_v20  ;;  %v8992_v21 = vpop.f32.mrb[197].mxu0 }
0x247e   :  { %v7383_v9 = vpop.f32.mrb[198].mxu0 }
0x247f   :  { %v7384_v22 = vadd.f32 %v7801_v15, %v7383_v9  ;;  %v8993_v45 = vpop.f32.mrb[199].mxu0  ;;  %v7387_v44 = vmax.f32 %v7381_v54, 0.0 }
0x2481   :  { %v7388_v61 = vmax.f32 %v7384_v22, 0.0 }
0x2483   :  { %v7389_v14 = vpack.c.bf16 %v7388_v61, %v7387_v44 }
0x2485   :  { %9011 = vmatmul.mubr.bf16.vlgmr.msra.gmra.mrb[184].mxu1 %v7389_v14 }
0x2558   :  { %v7495_v57 = vpop.f32.mrb[184].mxu1 }
0x2559   :  { %v7496_v17 = vadd.f32 %v7810_v32, %v7495_v57  ;;  %v9012_v51 = vpop.f32.mrb[185].mxu1 }
0x255a   :  { %v7498_v37 = vpop.f32.mrb[186].mxu1 }
0x255b   :  { %v7502_v36 = vadd.f32 %v7496_v17, %v12364_v35  ;;  %v7499_v25 = vadd.f32 %v7810_v32, %v7498_v37  ;;  %v9013_v18 = vpop.f32.mrb[187].mxu1 }
0x255d   :  { %7504 = vst [vmem:[#allocation2] sm:$0xff] %v7502_v36  ;;  %v7503_v19 = vadd.f32 %v7499_v25, %v12368_v12 }
0x255f   :  { %7505 = vst [vmem:[#allocation2 + $0x8] sm:$0xff] %v7503_v19 }
0x2560   :  { %9758 = shalt.err (!%p9755_p4)
}
0x2561   :  { %s9759_s20 = scalar_lea.hbm %s9988_s4, 256 }
0x2562   :  { %p9760_p5 = scmp.ne.s32.totalorder %s9988_s4, %s9759_s20  ;;  %p9763_p6 = scmp.lt.u32.totalorder %s9759_s20, %s9988_s4 }
0x2564   :  { %p9765_p7 = pnand %p9763_p6, %p9760_p5 }
0x2566   :  { %9768 = shalt.err (!%p9765_p7)
}
0x2567   :  { %s9813_s27 = smov 128   ;;  %s9814_s22 = smov 8  }
0x2568   :  { %7517 = dma.vmem_to_hbm [thread:$0]  %s7512_s18, 256, %s9988_s4, [#allocation3], %s9813_s27, %s9813_s27, %s9814_s22  }
0x2569   :  { %9769 = dma.done.wait [#allocation3], 256  }
0x256a   :  { %9770 = vsyncadd [#allocation3], 4294967040 }
0x256b   :  { %7521 = vsyncpa [#allocation3], 1 }

</bundles_post_ra>
